<compile_context>
chip_gen: v5e
topology: v5e:2x2
jax: 0.10.0
libtpu: 0.0.40
codegen_flags: <defaults>
</compile_context>

<pallas_src>
import math
import jax
import jax.numpy as jnp
from jax import lax
from jax.experimental import pallas as pl
from jax.experimental.pallas import tpu as pltpu


# ----------------------------------------------------------------------------
# Helpers
# ----------------------------------------------------------------------------
def _pick_tile(n, max_tile, multiple):
    """Largest tile <= max_tile that divides n and is a multiple of `multiple`.

    NOTE: falls back to the full extent n when no divisor exists (awkward n);
    fine for the shapes used here, re-derive for odd resolutions.
    """
    t = (min(max_tile, n) // multiple) * multiple
    while t >= multiple:
        if n % t == 0:
            return t
        t -= multiple
    return n


def _round_up(x, m):
    return ((x + m - 1) // m) * m


# ----------------------------------------------------------------------------
# Pallas kernels
# ----------------------------------------------------------------------------
def _eifusion_kernel(x1b_ref, x2b_ref, mask_ref, w1_ref, w2_ref,
                     b1_ref, b2_ref, wo1_ref, wo2_ref, bo_ref,
                     res_ref, out_ref, c1_ref, c2_ref):
    """Fused EIFusion on one (TH+2)-row halo'd band of one image.

      c1 = relu(x1 @ W1 + b1) ; c2 = relu(x2 @ W2 + b2)       (1x1 convs)
      out = relu(conv3x3([c1|c2]) + bo) + x1                   (residual)

    x1b/x2b : (1, 1, TH+2, Wp, C)  bf16, zero-padded band (Wp = roundup(W+2,8))
    mask    : (1, TH+2, Wp, 1)     f32, 1 at valid pixels, 0 where the 3x3 conv
                                   would see zero padding of `cat`
    w1/w2   : (C, Cm) bf16,  b1/b2: (1, Cm) f32
    wo1/wo2 : (9, Cm, C) bf16 (tap = dy*3+dx; the two halves of the 3x3 weight)
    bo      : (1, C) f32
    res/out : (1, TH, W, C) f32
    c1/c2   : VMEM scratch ((TH+2)*Wp + 8, Cm) bf16
    """
    THp2 = x1b_ref.shape[2]
    Wp = x1b_ref.shape[3]
    C = x1b_ref.shape[4]
    TH = out_ref.shape[1]
    W = out_ref.shape[2]
    Cout = out_ref.shape[3]
    Cm = w1_ref.shape[1]
    M = THp2 * Wp          # flattened padded-band rows
    Mo = TH * Wp           # flattened output rows (padded cols dropped at end)

    x1f = x1b_ref[...].reshape(M, C)
    x2f = x2b_ref[...].reshape(M, C)
    m = mask_ref[...].reshape(M, 1)

    # Stage 1: the two 1x1 convs (bf16 MXU, f32 accumulation).  The mask zeroes
    # positions corresponding to conv3x3 zero padding of `cat` (otherwise
    # relu(bias) would leak into the halo).
    c1 = jnp.maximum(
        jnp.dot(x1f, w1_ref[...], preferred_element_type=jnp.float32)
        + b1_ref[...], 0.0) * m
    c2 = jnp.maximum(
        jnp.dot(x2f, w2_ref[...], preferred_element_type=jnp.float32)
        + b2_ref[...], 0.0) * m

    # Park the band in VMEM so each 3x3 tap feeds the MXU through a static ref
    # view (no per-tap full-band relayout copies).  The 8 tail rows are only
    # ever read for output columns >= W, which are dropped before the store.
    c1_ref[:M, :] = c1.astype(c1_ref.dtype)
    c2_ref[:M, :] = c2.astype(c2_ref.dtype)
    c1_ref[M:M + 8, :] = jnp.zeros((8, Cm), c1_ref.dtype)
    c2_ref[M:M + 8, :] = jnp.zeros((8, Cm), c2_ref.dtype)

    # Stage 2: 3x3 conv as 18 (Mo, Cm) x (Cm, Cout) MXU matmuls (9 taps x two
    # cat halves -> no lane concat at offset 192, no zero-padded weights).
    acc = None
    for dy in range(3):
        for dx in range(3):
            tap = dy * 3 + dx
            off = dy * Wp + dx
            p = jnp.dot(c1_ref[off:off + Mo, :], wo1_ref[tap],
                        preferred_element_type=jnp.float32)
            p = p + jnp.dot(c2_ref[off:off + Mo, :], wo2_ref[tap],
                            preferred_element_type=jnp.float32)
            acc = p if acc is None else acc + p

    o = jnp.maximum(acc + bo_ref[...], 0.0).reshape(TH, Wp, Cout)[:, :W, :]
    out_ref[...] = o.reshape(1, TH, W, Cout) + res_ref[...]


def _corr_kernel(f1_ref, f2t_ref, out_ref):
    """CorrBlock base volume tile: corr[i, j] = <f1[i], f2[j]> / sqrt(D).

    f2 arrives pre-transposed to (D, HW) so this is a plain (TI,D)x(D,TJ)
    MXU contraction (no per-step RHS transpose through the XLU).
    """
    d = f1_ref.shape[-1]
    out_ref[0] = (jnp.dot(f1_ref[0], f2t_ref[0],
                          preferred_element_type=jnp.float32)
                  * (1.0 / math.sqrt(float(d)))).astype(out_ref.dtype)


# ----------------------------------------------------------------------------
# Wrappers
# ----------------------------------------------------------------------------
def prepare_eifusion_params(params):
    """One-time weight prep (hoisted out of the forward hot path)."""
    bf = jnp.bfloat16
    Cm = params["w1"].shape[1]
    return dict(
        w1=params["w1"].astype(bf),
        w2=params["w2"].astype(bf),
        b1=params["b1"].astype(jnp.float32),
        b2=params["b2"].astype(jnp.float32),
        wo1=params["wo"][:, :Cm, :].astype(bf),   # half acting on c1
        wo2=params["wo"][:, Cm:, :].astype(bf),   # half acting on c2
        bo=params["bo"].astype(jnp.float32),
    )


def eifusion_pallas(x1_nhwc, x2_nhwc, prep, *, max_row_tile=16):
    """EIFusion.forward(x1, x2) with NHWC f32 tensors -> NHWC f32."""
    N, H, W, C = x1_nhwc.shape
    Cm = prep["w1"].shape[1]
    bf = jnp.bfloat16

    TH = _pick_tile(H, max_row_tile, 1)     # output rows per grid step
    R = H // TH
    THp2 = TH + 2
    Wp = _round_up(W + 2, 8)                # padded width, multiple of 8
    M = THp2 * Wp

    # Spatial zero pad: 1-px halo for the 3x3 conv + extra right columns so
    # in-kernel reshapes stay layout-free (those columns are masked / dropped).
    x1p = jnp.pad(x1_nhwc.astype(bf), ((0, 0), (1, 1), (1, Wp - W - 1), (0, 0)))
    x2p = jnp.pad(x2_nhwc.astype(bf), ((0, 0), (1, 1), (1, Wp - W - 1), (0, 0)))

    # Overlapping row bands (TH rows + 1-row halo top/bottom), gathered once in
    # HBM so every grid step gets its halo'd window through a plain Blocked
    # BlockSpec (auto double-buffered).  Duplication overhead ~ (TH+2)/TH.
    rows = jnp.arange(R)[:, None] * TH + jnp.arange(THp2)[None, :]   # (R, TH+2)
    x1b = x1p[:, rows.reshape(-1)].reshape(N, R, THp2, Wp, C)
    x2b = x2p[:, rows.reshape(-1)].reshape(N, R, THp2, Wp, C)

    # Valid-pixel mask: the reference 3x3 conv zero-pads `cat`, so positions of
    # the band corresponding to spatial padding must contribute 0 after the 1x1
    # stage (not relu(bias)).
    col_ok = (jnp.arange(Wp) >= 1) & (jnp.arange(Wp) <= W)            # (Wp,)
    row_ok = (rows >= 1) & (rows <= H)                                 # (R, TH+2)
    mask = (row_ok[:, :, None] & col_ok[None, None, :])
    mask = mask.astype(jnp.float32)[..., None]                         # (R, TH+2, Wp, 1)

    return pl.pallas_call(
        _eifusion_kernel,
        out_shape=jax.ShapeDtypeStruct((N, H, W, C), jnp.float32),
        grid=(N, R),
        in_specs=[
            pl.BlockSpec((1, 1, THp2, Wp, C), lambda n, r: (n, r, 0, 0, 0)),
            pl.BlockSpec((1, 1, THp2, Wp, C), lambda n, r: (n, r, 0, 0, 0)),
            pl.BlockSpec((1, THp2, Wp, 1), lambda n, r: (r, 0, 0, 0)),
            pl.BlockSpec((C, Cm), lambda n, r: (0, 0)),
            pl.BlockSpec((C, Cm), lambda n, r: (0, 0)),
            pl.BlockSpec((1, Cm), lambda n, r: (0, 0)),
            pl.BlockSpec((1, Cm), lambda n, r: (0, 0)),
            pl.BlockSpec((9, Cm, C), lambda n, r: (0, 0, 0)),
            pl.BlockSpec((9, Cm, C), lambda n, r: (0, 0, 0)),
            pl.BlockSpec((1, C), lambda n, r: (0, 0)),
            pl.BlockSpec((1, TH, W, C), lambda n, r: (n, r, 0, 0)),
        ],
        out_specs=pl.BlockSpec((1, TH, W, C), lambda n, r: (n, r, 0, 0)),
        scratch_shapes=[pltpu.VMEM((M + 8, Cm), bf),
                        pltpu.VMEM((M + 8, Cm), bf)],
        compiler_params=pltpu.CompilerParams(
            dimension_semantics=("parallel", "parallel")),
    )(x1b, x2b, mask, prep["w1"], prep["w2"], prep["b1"], prep["b2"],
      prep["wo1"], prep["wo2"], prep["bo"], x1_nhwc)


def corr_volume_pallas(f1_nhwc, f2_nhwc, *, out_dtype=jnp.float32):
    """CorrBlock base correlation volume: (N, HW, HW), tiled over (n, i, j).

    out_dtype can be flipped to bf16 to halve the HBM write traffic (v5e/v6e
    are write-bound here) if the downstream pyramid lookup tolerates it.
    """
    N, H, W, D = f1_nhwc.shape
    HW = H * W
    bf = jnp.bfloat16
    f1 = f1_nhwc.astype(bf).reshape(N, HW, D)
    # One-time transpose so the kernel contraction is transpose-free per step.
    f2t = jnp.transpose(f2_nhwc.astype(bf).reshape(N, HW, D), (0, 2, 1))
    TI = _pick_tile(HW, 1024, 16)     # bf16 sublane tile
    TJ = _pick_tile(HW, 1024, 128)    # lane-dense output stores
    return pl.pallas_call(
        _corr_kernel,
        out_shape=jax.ShapeDtypeStruct((N, HW, HW), out_dtype),
        grid=(N, HW // TI, HW // TJ),
        in_specs=[
            pl.BlockSpec((1, TI, D), lambda n, i, j: (n, i, 0)),
            pl.BlockSpec((1, D, TJ), lambda n, i, j: (n, 0, j)),
        ],
        out_specs=pl.BlockSpec((1, TI, TJ), lambda n, i, j: (n, i, j)),
        compiler_params=pltpu.CompilerParams(
            dimension_semantics=("parallel", "parallel", "parallel")),
    )(f1, f2t)


def coords_grid(batch, ht, wd):
    """RAFT-style coords grid: (N, 2, H, W) with channel order (x, y)."""
    y, x = jnp.meshgrid(jnp.arange(ht, dtype=jnp.float32),
                        jnp.arange(wd, dtype=jnp.float32), indexing="ij")
    coords = jnp.stack([x, y], axis=0)
    return jnp.broadcast_to(coords[None], (batch, 2, ht, wd))


# ----------------------------------------------------------------------------
# Pure-JAX references (mirror the bf16 quantization the kernels apply, so the
# comparison measures kernel math, not casting).
# ----------------------------------------------------------------------------
def _q(x):
    return x.astype(jnp.bfloat16).astype(jnp.float32)


def eifusion_ref(x1_nhwc, x2_nhwc, params):
    c1 = jax.nn.relu(
        jnp.einsum("nhwc,cd->nhwd", _q(x1_nhwc), _q(params["w1"]),
                   precision=lax.Precision.HIGHEST)
        + params["b1"].reshape(1, 1, 1, -1))
    c2 = jax.nn.relu(
        jnp.einsum("nhwc,cd->nhwd", _q(x2_nhwc), _q(params["w2"]),
                   precision=lax.Precision.HIGHEST)
        + params["b2"].reshape(1, 1, 1, -1))
    cat = _q(jnp.concatenate([c1, c2], axis=-1))       # kernel feeds bf16 cat
    Ccat = cat.shape[-1]
    C = x1_nhwc.shape[-1]
    woq = _q(params["wo"]).reshape(3, 3, Ccat, C)      # tap = dy*3 + dx -> HWIO
    o = jax.nn.relu(
        lax.conv_general_dilated(cat, woq, (1, 1), "SAME",
                                 dimension_numbers=("NHWC", "HWIO", "NHWC"),
                                 precision=lax.Precision.HIGHEST)
        + params["bo"].reshape(1, 1, 1, C))
    return o + x1_nhwc


def corr_ref(f1_nhwc, f2_nhwc):
    N, H, W, D = f1_nhwc.shape
    f1 = _q(f1_nhwc).reshape(N, H * W, D)
    f2 = _q(f2_nhwc).reshape(N, H * W, D)
    return jnp.einsum("bid,bjd->bij", f1, f2,
                      precision=lax.Precision.HIGHEST) / math.sqrt(float(D))


# ----------------------------------------------------------------------------
# Main
# ----------------------------------------------------------------------------
if __name__ == "__main__":
    key = jax.random.PRNGKey(0)
    ks = jax.random.split(key, 10)

    # Small but shape-consistent configuration (BasicEncoder path, ds=8).
    N = 2
    num_bins = 5
    H_img, W_img = 64, 64          # divisible by 32 -> ImagePadder is a no-op
    ds = 8
    H8, W8 = H_img // ds, W_img // ds
    C_feat = 256                   # fnet/enet output dim (non-small branch)
    C_mid = 192                    # EIFusion hidden dim

    # Full-resolution module inputs (NCHW, PyTorch convention).
    image1 = jax.random.uniform(ks[0], (N, 1, H_img, W_img), jnp.float32)
    event_voxel = jax.random.uniform(ks[1], (N, num_bins, H_img, W_img),
                                     jnp.float32)
    image1 = 2.0 * image1 - 1.0    # same normalization as DCEIFlow.forward
    # TODO(synk): ImagePadder.pad is identity here (dims already multiples of 32).

    # TODO(synk): fnet/enet (BasicEncoder) sources not provided; deterministic
    # stand-in feature maps at 1/8 resolution are used instead.
    fmap1_nchw = jax.random.normal(ks[2], (N, C_feat, H8, W8), jnp.float32)
    emap_nchw = jax.random.normal(ks[3], (N, C_feat, H8, W8), jnp.float32)

    # EIFusion parameters, deterministically initialized (fan-in scaling).
    def init_w(k, shape, fan_in):
        return jax.random.normal(k, shape, jnp.float32) / math.sqrt(fan_in)

    params = {
        "w1": init_w(ks[4], (C_feat, C_mid), C_feat),                # conv1: 1x1
        "b1": init_w(ks[5], (1, C_mid), C_feat),
        "w2": init_w(ks[6], (C_feat, C_mid), C_feat),                # conv2: 1x1
        "b2": init_w(ks[7], (1, C_mid), C_feat),
        "wo": init_w(ks[8], (9, 2 * C_mid, C_feat), 9 * 2 * C_mid),  # convo 3x3
        "bo": init_w(ks[9], (1, C_feat), 9 * 2 * C_mid),
    }
    prep = prepare_eifusion_params(params)   # hoisted out of the hot path

    # NCHW -> NHWC for the kernels.
    fmap1 = jnp.transpose(fmap1_nchw, (0, 2, 3, 1))
    emap = jnp.transpose(emap_nchw, (0, 2, 3, 1))

    @jax.jit
    def hot_path(f1, em, pr):
        pseudo_fmap2 = eifusion_pallas(f1, em, pr)        # fusion(fmap1, emap)
        corr = corr_volume_pallas(f1, pseudo_fmap2)        # CorrBlock base volume
        return pseudo_fmap2, corr

    pseudo_fmap2, corr = hot_path(fmap1, emap, prep)
    jax.block_until_ready((pseudo_fmap2, corr))

    # Flow initialization (coords1 - coords0 == 0), as in initialize_flow.
    coords0 = coords_grid(N, H8, W8)
    coords1 = coords_grid(N, H8, W8)
    flow_init = coords1 - coords0

    # TODO(synk): cnet / BasicUpdateBlockNoMask / GRU iterations /
    # CorrBlock pyramid lookup / upsample_flow not provided -> not implemented.
    batch = dict(
        flow_init=flow_init,                                 # (N,2,H/8,W/8)
        fmap1_gt=jnp.transpose(fmap1, (0, 3, 1, 2)),         # back to NCHW
        fmap2_pseudo=jnp.transpose(pseudo_fmap2, (0, 3, 1, 2)),
        corr_volume=corr,
    )
    jax.block_until_ready(batch)

    # Correctness checks against pure-JAX references.
    ref_fusion = eifusion_ref(fmap1, emap, params)
    assert jnp.allclose(pseudo_fmap2, ref_fusion, rtol=2e-2, atol=2e-2), (
        "EIFusion mismatch")

    ref_corr = corr_ref(fmap1, pseudo_fmap2)
    assert jnp.allclose(corr, ref_corr, rtol=2e-2, atol=2e-2), (
        "correlation mismatch")

    print("KERNEL_OK")
</pallas_src>

<mosaic_0001>
module attributes {stable_mosaic.version = 11 : i64} {
  func.func @_eifusion_kernel(%arg0: i32, %arg1: i32, %arg2: memref<1x1x10x16x256xbf16, #tpu.memory_space<vmem>>, %arg3: memref<1x1x10x16x256xbf16, #tpu.memory_space<vmem>>, %arg4: memref<1x10x16x1xf32, #tpu.memory_space<vmem>>, %arg5: memref<256x192xbf16, #tpu.memory_space<vmem>>, %arg6: memref<256x192xbf16, #tpu.memory_space<vmem>>, %arg7: memref<1x192xf32, #tpu.memory_space<vmem>>, %arg8: memref<1x192xf32, #tpu.memory_space<vmem>>, %arg9: memref<9x192x256xbf16, #tpu.memory_space<vmem>>, %arg10: memref<9x192x256xbf16, #tpu.memory_space<vmem>>, %arg11: memref<1x256xf32, #tpu.memory_space<vmem>>, %arg12: memref<1x8x8x256xf32, #tpu.memory_space<vmem>>, %arg13: memref<1x8x8x256xf32, #tpu.memory_space<vmem>>, %arg14: memref<168x192xbf16, #tpu.memory_space<vmem>>, %arg15: memref<168x192xbf16, #tpu.memory_space<vmem>>) attributes {dimension_semantics = [#tpu.dimension_semantics<parallel>, #tpu.dimension_semantics<parallel>], iteration_bounds = array<i64: 2, 1>, scalar_prefetch = 0 : i64, scratch_operands = 2 : i64, tpu.core_type = #tpu.core_type<tc>, window_params = [{transform_indices = @transform_0, window_bounds = array<i64: 1, 1, 10, 16, 256>}, {transform_indices = @transform_1, window_bounds = array<i64: 1, 1, 10, 16, 256>}, {transform_indices = @transform_2, window_bounds = array<i64: 1, 10, 16, 1>}, {pipeline_mode = #tpu.pipeline_mode<synchronous>, transform_indices = @transform_3, window_bounds = array<i64: 256, 192>}, {pipeline_mode = #tpu.pipeline_mode<synchronous>, transform_indices = @transform_4, window_bounds = array<i64: 256, 192>}, {pipeline_mode = #tpu.pipeline_mode<synchronous>, transform_indices = @transform_5, window_bounds = array<i64: 1, 192>}, {pipeline_mode = #tpu.pipeline_mode<synchronous>, transform_indices = @transform_6, window_bounds = array<i64: 1, 192>}, {pipeline_mode = #tpu.pipeline_mode<synchronous>, transform_indices = @transform_7, window_bounds = array<i64: 9, 192, 256>}, {pipeline_mode = #tpu.pipeline_mode<synchronous>, transform_indices = @transform_8, window_bounds = array<i64: 9, 192, 256>}, {pipeline_mode = #tpu.pipeline_mode<synchronous>, transform_indices = @transform_9, window_bounds = array<i64: 1, 256>}, {transform_indices = @transform_10, window_bounds = array<i64: 1, 8, 8, 256>}, {transform_indices = @transform_11, window_bounds = array<i64: 1, 8, 8, 256>}]} {
    %c0 = arith.constant 0 : index
    %c0_0 = arith.constant 0 : index
    %c0_1 = arith.constant 0 : index
    %c0_2 = arith.constant 0 : index
    %c0_3 = arith.constant 0 : index
    %0 = vector.load %arg2[%c0, %c0_0, %c0_1, %c0_2, %c0_3] : memref<1x1x10x16x256xbf16, #tpu.memory_space<vmem>>, vector<1x1x10x16x256xbf16>
    %1 = vector.shape_cast %0 : vector<1x1x10x16x256xbf16> to vector<160x256xbf16>
    %c0_4 = arith.constant 0 : index
    %c0_5 = arith.constant 0 : index
    %c0_6 = arith.constant 0 : index
    %c0_7 = arith.constant 0 : index
    %c0_8 = arith.constant 0 : index
    %2 = vector.load %arg3[%c0_4, %c0_5, %c0_6, %c0_7, %c0_8] : memref<1x1x10x16x256xbf16, #tpu.memory_space<vmem>>, vector<1x1x10x16x256xbf16>
    %3 = vector.shape_cast %2 : vector<1x1x10x16x256xbf16> to vector<160x256xbf16>
    %c0_9 = arith.constant 0 : index
    %c0_10 = arith.constant 0 : index
    %c0_11 = arith.constant 0 : index
    %c0_12 = arith.constant 0 : index
    %4 = vector.load %arg4[%c0_9, %c0_10, %c0_11, %c0_12] : memref<1x10x16x1xf32, #tpu.memory_space<vmem>>, vector<1x10x16x1xf32>
    %5 = vector.shape_cast %4 : vector<1x10x16x1xf32> to vector<160x1xf32>
    %c0_13 = arith.constant 0 : index
    %c0_14 = arith.constant 0 : index
    %6 = vector.load %arg5[%c0_13, %c0_14] : memref<256x192xbf16, #tpu.memory_space<vmem>>, vector<256x192xbf16>
    %cst = arith.constant dense<0.000000e+00> : vector<160x192xf32>
    %7 = tpu.matmul %1, %6, %cst {dimension_numbers = #tpu.dot_dimension_numbers<[1], [0], [0], [1], [0, 0, 1, 1], [], []>} : vector<160x256xbf16>, vector<256x192xbf16>, vector<160x192xf32> -> vector<160x192xf32>
    %c0_15 = arith.constant 0 : index
    %c0_16 = arith.constant 0 : index
    %8 = vector.load %arg7[%c0_15, %c0_16] : memref<1x192xf32, #tpu.memory_space<vmem>>, vector<1x192xf32>
    %9 = vector.broadcast %8 : vector<1x192xf32> to vector<160x192xf32>
    %10 = arith.addf %7, %9 : vector<160x192xf32>
    %cst_17 = arith.constant 0.000000e+00 : f32
    %11 = vector.broadcast %cst_17 : f32 to vector<160x192xf32>
    %12 = arith.maximumf %10, %11 : vector<160x192xf32>
    %13 = vector.broadcast %5 : vector<160x1xf32> to vector<160x192xf32>
    %14 = arith.mulf %12, %13 : vector<160x192xf32>
    %c0_18 = arith.constant 0 : index
    %c0_19 = arith.constant 0 : index
    %15 = vector.load %arg6[%c0_18, %c0_19] : memref<256x192xbf16, #tpu.memory_space<vmem>>, vector<256x192xbf16>
    %cst_20 = arith.constant dense<0.000000e+00> : vector<160x192xf32>
    %16 = tpu.matmul %3, %15, %cst_20 {dimension_numbers = #tpu.dot_dimension_numbers<[1], [0], [0], [1], [0, 0, 1, 1], [], []>} : vector<160x256xbf16>, vector<256x192xbf16>, vector<160x192xf32> -> vector<160x192xf32>
    %c0_21 = arith.constant 0 : index
    %c0_22 = arith.constant 0 : index
    %17 = vector.load %arg8[%c0_21, %c0_22] : memref<1x192xf32, #tpu.memory_space<vmem>>, vector<1x192xf32>
    %18 = vector.broadcast %17 : vector<1x192xf32> to vector<160x192xf32>
    %19 = arith.addf %16, %18 : vector<160x192xf32>
    %cst_23 = arith.constant 0.000000e+00 : f32
    %20 = vector.broadcast %cst_23 : f32 to vector<160x192xf32>
    %21 = arith.maximumf %19, %20 : vector<160x192xf32>
    %22 = vector.broadcast %5 : vector<160x1xf32> to vector<160x192xf32>
    %23 = arith.mulf %21, %22 : vector<160x192xf32>
    %24 = arith.truncf %14 : vector<160x192xf32> to vector<160x192xbf16>
    %c0_24 = arith.constant 0 : index
    %c0_25 = arith.constant 0 : index
    %25 = vector.load %arg14[%c0_24, %c0_25] : memref<168x192xbf16, #tpu.memory_space<vmem>>, vector<160x192xbf16>
    tpu.vector_store %arg14[%c0_24, %c0_25], %24 {strides = array<i32>} : memref<168x192xbf16, #tpu.memory_space<vmem>>, vector<160x192xbf16>,
    %26 = arith.truncf %23 : vector<160x192xf32> to vector<160x192xbf16>
    %c0_26 = arith.constant 0 : index
    %c0_27 = arith.constant 0 : index
    %27 = vector.load %arg15[%c0_26, %c0_27] : memref<168x192xbf16, #tpu.memory_space<vmem>>, vector<160x192xbf16>
    tpu.vector_store %arg15[%c0_26, %c0_27], %26 {strides = array<i32>} : memref<168x192xbf16, #tpu.memory_space<vmem>>, vector<160x192xbf16>,
    %cst_28 = arith.constant 0.000000e+00 : bf16
    %28 = vector.broadcast %cst_28 : bf16 to vector<8x192xbf16>
    %c160 = arith.constant 160 : index
    %c0_29 = arith.constant 0 : index
    %29 = vector.load %arg14[%c160, %c0_29] : memref<168x192xbf16, #tpu.memory_space<vmem>>, vector<8x192xbf16>
    tpu.vector_store %arg14[%c160, %c0_29], %28 {strides = array<i32>} : memref<168x192xbf16, #tpu.memory_space<vmem>>, vector<8x192xbf16>,
    %cst_30 = arith.constant 0.000000e+00 : bf16
    %30 = vector.broadcast %cst_30 : bf16 to vector<8x192xbf16>
    %c160_31 = arith.constant 160 : index
    %c0_32 = arith.constant 0 : index
    %31 = vector.load %arg15[%c160_31, %c0_32] : memref<168x192xbf16, #tpu.memory_space<vmem>>, vector<8x192xbf16>
    tpu.vector_store %arg15[%c160_31, %c0_32], %30 {strides = array<i32>} : memref<168x192xbf16, #tpu.memory_space<vmem>>, vector<8x192xbf16>,
    %c0_33 = arith.constant 0 : index
    %c0_34 = arith.constant 0 : index
    %32 = vector.load %arg14[%c0_33, %c0_34] : memref<168x192xbf16, #tpu.memory_space<vmem>>, vector<128x192xbf16>
    %c0_35 = arith.constant 0 : index
    %c0_36 = arith.constant 0 : index
    %c0_37 = arith.constant 0 : index
    %33 = vector.load %arg9[%c0_35, %c0_36, %c0_37] : memref<9x192x256xbf16, #tpu.memory_space<vmem>>, vector<1x192x256xbf16>
    %34 = vector.shape_cast %33 : vector<1x192x256xbf16> to vector<192x256xbf16>
    %cst_38 = arith.constant dense<0.000000e+00> : vector<128x256xf32>
    %35 = tpu.matmul %32, %34, %cst_38 {dimension_numbers = #tpu.dot_dimension_numbers<[1], [0], [0], [1], [0, 0, 1, 1], [], []>} : vector<128x192xbf16>, vector<192x256xbf16>, vector<128x256xf32> -> vector<128x256xf32>
    %c0_39 = arith.constant 0 : index
    %c0_40 = arith.constant 0 : index
    %36 = vector.load %arg15[%c0_39, %c0_40] : memref<168x192xbf16, #tpu.memory_space<vmem>>, vector<128x192xbf16>
    %c0_41 = arith.constant 0 : index
    %c0_42 = arith.constant 0 : index
    %c0_43 = arith.constant 0 : index
    %37 = vector.load %arg10[%c0_41, %c0_42, %c0_43] : memref<9x192x256xbf16, #tpu.memory_space<vmem>>, vector<1x192x256xbf16>
    %38 = vector.shape_cast %37 : vector<1x192x256xbf16> to vector<192x256xbf16>
    %cst_44 = arith.constant dense<0.000000e+00> : vector<128x256xf32>
    %39 = tpu.matmul %36, %38, %cst_44 {dimension_numbers = #tpu.dot_dimension_numbers<[1], [0], [0], [1], [0, 0, 1, 1], [], []>} : vector<128x192xbf16>, vector<192x256xbf16>, vector<128x256xf32> -> vector<128x256xf32>
    %40 = arith.addf %35, %39 : vector<128x256xf32>
    %c1 = arith.constant 1 : index
    %c0_45 = arith.constant 0 : index
    %41 = vector.load %arg14[%c1, %c0_45] : memref<168x192xbf16, #tpu.memory_space<vmem>>, vector<128x192xbf16>
    %c1_46 = arith.constant 1 : index
    %c0_47 = arith.constant 0 : index
    %c0_48 = arith.constant 0 : index
    %42 = vector.load %arg9[%c1_46, %c0_47, %c0_48] : memref<9x192x256xbf16, #tpu.memory_space<vmem>>, vector<1x192x256xbf16>
    %43 = vector.shape_cast %42 : vector<1x192x256xbf16> to vector<192x256xbf16>
    %cst_49 = arith.constant dense<0.000000e+00> : vector<128x256xf32>
    %44 = tpu.matmul %41, %43, %cst_49 {dimension_numbers = #tpu.dot_dimension_numbers<[1], [0], [0], [1], [0, 0, 1, 1], [], []>} : vector<128x192xbf16>, vector<192x256xbf16>, vector<128x256xf32> -> vector<128x256xf32>
    %c1_50 = arith.constant 1 : index
    %c0_51 = arith.constant 0 : index
    %45 = vector.load %arg15[%c1_50, %c0_51] : memref<168x192xbf16, #tpu.memory_space<vmem>>, vector<128x192xbf16>
    %c1_52 = arith.constant 1 : index
    %c0_53 = arith.constant 0 : index
    %c0_54 = arith.constant 0 : index
    %46 = vector.load %arg10[%c1_52, %c0_53, %c0_54] : memref<9x192x256xbf16, #tpu.memory_space<vmem>>, vector<1x192x256xbf16>
    %47 = vector.shape_cast %46 : vector<1x192x256xbf16> to vector<192x256xbf16>
    %cst_55 = arith.constant dense<0.000000e+00> : vector<128x256xf32>
    %48 = tpu.matmul %45, %47, %cst_55 {dimension_numbers = #tpu.dot_dimension_numbers<[1], [0], [0], [1], [0, 0, 1, 1], [], []>} : vector<128x192xbf16>, vector<192x256xbf16>, vector<128x256xf32> -> vector<128x256xf32>
    %49 = arith.addf %44, %48 : vector<128x256xf32>
    %50 = arith.addf %40, %49 : vector<128x256xf32>
    %c2 = arith.constant 2 : index
    %c0_56 = arith.constant 0 : index
    %51 = vector.load %arg14[%c2, %c0_56] : memref<168x192xbf16, #tpu.memory_space<vmem>>, vector<128x192xbf16>
    %c2_57 = arith.constant 2 : index
    %c0_58 = arith.constant 0 : index
    %c0_59 = arith.constant 0 : index
    %52 = vector.load %arg9[%c2_57, %c0_58, %c0_59] : memref<9x192x256xbf16, #tpu.memory_space<vmem>>, vector<1x192x256xbf16>
    %53 = vector.shape_cast %52 : vector<1x192x256xbf16> to vector<192x256xbf16>
    %cst_60 = arith.constant dense<0.000000e+00> : vector<128x256xf32>
    %54 = tpu.matmul %51, %53, %cst_60 {dimension_numbers = #tpu.dot_dimension_numbers<[1], [0], [0], [1], [0, 0, 1, 1], [], []>} : vector<128x192xbf16>, vector<192x256xbf16>, vector<128x256xf32> -> vector<128x256xf32>
    %c2_61 = arith.constant 2 : index
    %c0_62 = arith.constant 0 : index
    %55 = vector.load %arg15[%c2_61, %c0_62] : memref<168x192xbf16, #tpu.memory_space<vmem>>, vector<128x192xbf16>
    %c2_63 = arith.constant 2 : index
    %c0_64 = arith.constant 0 : index
    %c0_65 = arith.constant 0 : index
    %56 = vector.load %arg10[%c2_63, %c0_64, %c0_65] : memref<9x192x256xbf16, #tpu.memory_space<vmem>>, vector<1x192x256xbf16>
    %57 = vector.shape_cast %56 : vector<1x192x256xbf16> to vector<192x256xbf16>
    %cst_66 = arith.constant dense<0.000000e+00> : vector<128x256xf32>
    %58 = tpu.matmul %55, %57, %cst_66 {dimension_numbers = #tpu.dot_dimension_numbers<[1], [0], [0], [1], [0, 0, 1, 1], [], []>} : vector<128x192xbf16>, vector<192x256xbf16>, vector<128x256xf32> -> vector<128x256xf32>
    %59 = arith.addf %54, %58 : vector<128x256xf32>
    %60 = arith.addf %50, %59 : vector<128x256xf32>
    %c16 = arith.constant 16 : index
    %c0_67 = arith.constant 0 : index
    %61 = vector.load %arg14[%c16, %c0_67] : memref<168x192xbf16, #tpu.memory_space<vmem>>, vector<128x192xbf16>
    %c3 = arith.constant 3 : index
    %c0_68 = arith.constant 0 : index
    %c0_69 = arith.constant 0 : index
    %62 = vector.load %arg9[%c3, %c0_68, %c0_69] : memref<9x192x256xbf16, #tpu.memory_space<vmem>>, vector<1x192x256xbf16>
    %63 = vector.shape_cast %62 : vector<1x192x256xbf16> to vector<192x256xbf16>
    %cst_70 = arith.constant dense<0.000000e+00> : vector<128x256xf32>
    %64 = tpu.matmul %61, %63, %cst_70 {dimension_numbers = #tpu.dot_dimension_numbers<[1], [0], [0], [1], [0, 0, 1, 1], [], []>} : vector<128x192xbf16>, vector<192x256xbf16>, vector<128x256xf32> -> vector<128x256xf32>
    %c16_71 = arith.constant 16 : index
    %c0_72 = arith.constant 0 : index
    %65 = vector.load %arg15[%c16_71, %c0_72] : memref<168x192xbf16, #tpu.memory_space<vmem>>, vector<128x192xbf16>
    %c3_73 = arith.constant 3 : index
    %c0_74 = arith.constant 0 : index
    %c0_75 = arith.constant 0 : index
    %66 = vector.load %arg10[%c3_73, %c0_74, %c0_75] : memref<9x192x256xbf16, #tpu.memory_space<vmem>>, vector<1x192x256xbf16>
    %67 = vector.shape_cast %66 : vector<1x192x256xbf16> to vector<192x256xbf16>
    %cst_76 = arith.constant dense<0.000000e+00> : vector<128x256xf32>
    %68 = tpu.matmul %65, %67, %cst_76 {dimension_numbers = #tpu.dot_dimension_numbers<[1], [0], [0], [1], [0, 0, 1, 1], [], []>} : vector<128x192xbf16>, vector<192x256xbf16>, vector<128x256xf32> -> vector<128x256xf32>
    %69 = arith.addf %64, %68 : vector<128x256xf32>
    %70 = arith.addf %60, %69 : vector<128x256xf32>
    %c17 = arith.constant 17 : index
    %c0_77 = arith.constant 0 : index
    %71 = vector.load %arg14[%c17, %c0_77] : memref<168x192xbf16, #tpu.memory_space<vmem>>, vector<128x192xbf16>
    %c4 = arith.constant 4 : index
    %c0_78 = arith.constant 0 : index
    %c0_79 = arith.constant 0 : index
    %72 = vector.load %arg9[%c4, %c0_78, %c0_79] : memref<9x192x256xbf16, #tpu.memory_space<vmem>>, vector<1x192x256xbf16>
    %73 = vector.shape_cast %72 : vector<1x192x256xbf16> to vector<192x256xbf16>
    %cst_80 = arith.constant dense<0.000000e+00> : vector<128x256xf32>
    %74 = tpu.matmul %71, %73, %cst_80 {dimension_numbers = #tpu.dot_dimension_numbers<[1], [0], [0], [1], [0, 0, 1, 1], [], []>} : vector<128x192xbf16>, vector<192x256xbf16>, vector<128x256xf32> -> vector<128x256xf32>
    %c17_81 = arith.constant 17 : index
    %c0_82 = arith.constant 0 : index
    %75 = vector.load %arg15[%c17_81, %c0_82] : memref<168x192xbf16, #tpu.memory_space<vmem>>, vector<128x192xbf16>
    %c4_83 = arith.constant 4 : index
    %c0_84 = arith.constant 0 : index
    %c0_85 = arith.constant 0 : index
    %76 = vector.load %arg10[%c4_83, %c0_84, %c0_85] : memref<9x192x256xbf16, #tpu.memory_space<vmem>>, vector<1x192x256xbf16>
    %77 = vector.shape_cast %76 : vector<1x192x256xbf16> to vector<192x256xbf16>
    %cst_86 = arith.constant dense<0.000000e+00> : vector<128x256xf32>
    %78 = tpu.matmul %75, %77, %cst_86 {dimension_numbers = #tpu.dot_dimension_numbers<[1], [0], [0], [1], [0, 0, 1, 1], [], []>} : vector<128x192xbf16>, vector<192x256xbf16>, vector<128x256xf32> -> vector<128x256xf32>
    %79 = arith.addf %74, %78 : vector<128x256xf32>
    %80 = arith.addf %70, %79 : vector<128x256xf32>
    %c18 = arith.constant 18 : index
    %c0_87 = arith.constant 0 : index
    %81 = vector.load %arg14[%c18, %c0_87] : memref<168x192xbf16, #tpu.memory_space<vmem>>, vector<128x192xbf16>
    %c5 = arith.constant 5 : index
    %c0_88 = arith.constant 0 : index
    %c0_89 = arith.constant 0 : index
    %82 = vector.load %arg9[%c5, %c0_88, %c0_89] : memref<9x192x256xbf16, #tpu.memory_space<vmem>>, vector<1x192x256xbf16>
    %83 = vector.shape_cast %82 : vector<1x192x256xbf16> to vector<192x256xbf16>
    %cst_90 = arith.constant dense<0.000000e+00> : vector<128x256xf32>
    %84 = tpu.matmul %81, %83, %cst_90 {dimension_numbers = #tpu.dot_dimension_numbers<[1], [0], [0], [1], [0, 0, 1, 1], [], []>} : vector<128x192xbf16>, vector<192x256xbf16>, vector<128x256xf32> -> vector<128x256xf32>
    %c18_91 = arith.constant 18 : index
    %c0_92 = arith.constant 0 : index
    %85 = vector.load %arg15[%c18_91, %c0_92] : memref<168x192xbf16, #tpu.memory_space<vmem>>, vector<128x192xbf16>
    %c5_93 = arith.constant 5 : index
    %c0_94 = arith.constant 0 : index
    %c0_95 = arith.constant 0 : index
    %86 = vector.load %arg10[%c5_93, %c0_94, %c0_95] : memref<9x192x256xbf16, #tpu.memory_space<vmem>>, vector<1x192x256xbf16>
    %87 = vector.shape_cast %86 : vector<1x192x256xbf16> to vector<192x256xbf16>
    %cst_96 = arith.constant dense<0.000000e+00> : vector<128x256xf32>
    %88 = tpu.matmul %85, %87, %cst_96 {dimension_numbers = #tpu.dot_dimension_numbers<[1], [0], [0], [1], [0, 0, 1, 1], [], []>} : vector<128x192xbf16>, vector<192x256xbf16>, vector<128x256xf32> -> vector<128x256xf32>
    %89 = arith.addf %84, %88 : vector<128x256xf32>
    %90 = arith.addf %80, %89 : vector<128x256xf32>
    %c32 = arith.constant 32 : index
    %c0_97 = arith.constant 0 : index
    %91 = vector.load %arg14[%c32, %c0_97] : memref<168x192xbf16, #tpu.memory_space<vmem>>, vector<128x192xbf16>
    %c6 = arith.constant 6 : index
    %c0_98 = arith.constant 0 : index
    %c0_99 = arith.constant 0 : index
    %92 = vector.load %arg9[%c6, %c0_98, %c0_99] : memref<9x192x256xbf16, #tpu.memory_space<vmem>>, vector<1x192x256xbf16>
    %93 = vector.shape_cast %92 : vector<1x192x256xbf16> to vector<192x256xbf16>
    %cst_100 = arith.constant dense<0.000000e+00> : vector<128x256xf32>
    %94 = tpu.matmul %91, %93, %cst_100 {dimension_numbers = #tpu.dot_dimension_numbers<[1], [0], [0], [1], [0, 0, 1, 1], [], []>} : vector<128x192xbf16>, vector<192x256xbf16>, vector<128x256xf32> -> vector<128x256xf32>
    %c32_101 = arith.constant 32 : index
    %c0_102 = arith.constant 0 : index
    %95 = vector.load %arg15[%c32_101, %c0_102] : memref<168x192xbf16, #tpu.memory_space<vmem>>, vector<128x192xbf16>
    %c6_103 = arith.constant 6 : index
    %c0_104 = arith.constant 0 : index
    %c0_105 = arith.constant 0 : index
    %96 = vector.load %arg10[%c6_103, %c0_104, %c0_105] : memref<9x192x256xbf16, #tpu.memory_space<vmem>>, vector<1x192x256xbf16>
    %97 = vector.shape_cast %96 : vector<1x192x256xbf16> to vector<192x256xbf16>
    %cst_106 = arith.constant dense<0.000000e+00> : vector<128x256xf32>
    %98 = tpu.matmul %95, %97, %cst_106 {dimension_numbers = #tpu.dot_dimension_numbers<[1], [0], [0], [1], [0, 0, 1, 1], [], []>} : vector<128x192xbf16>, vector<192x256xbf16>, vector<128x256xf32> -> vector<128x256xf32>
    %99 = arith.addf %94, %98 : vector<128x256xf32>
    %100 = arith.addf %90, %99 : vector<128x256xf32>
    %c33 = arith.constant 33 : index
    %c0_107 = arith.constant 0 : index
    %101 = vector.load %arg14[%c33, %c0_107] : memref<168x192xbf16, #tpu.memory_space<vmem>>, vector<128x192xbf16>
    %c7 = arith.constant 7 : index
    %c0_108 = arith.constant 0 : index
    %c0_109 = arith.constant 0 : index
    %102 = vector.load %arg9[%c7, %c0_108, %c0_109] : memref<9x192x256xbf16, #tpu.memory_space<vmem>>, vector<1x192x256xbf16>
    %103 = vector.shape_cast %102 : vector<1x192x256xbf16> to vector<192x256xbf16>
    %cst_110 = arith.constant dense<0.000000e+00> : vector<128x256xf32>
    %104 = tpu.matmul %101, %103, %cst_110 {dimension_numbers = #tpu.dot_dimension_numbers<[1], [0], [0], [1], [0, 0, 1, 1], [], []>} : vector<128x192xbf16>, vector<192x256xbf16>, vector<128x256xf32> -> vector<128x256xf32>
    %c33_111 = arith.constant 33 : index
    %c0_112 = arith.constant 0 : index
    %105 = vector.load %arg15[%c33_111, %c0_112] : memref<168x192xbf16, #tpu.memory_space<vmem>>, vector<128x192xbf16>
    %c7_113 = arith.constant 7 : index
    %c0_114 = arith.constant 0 : index
    %c0_115 = arith.constant 0 : index
    %106 = vector.load %arg10[%c7_113, %c0_114, %c0_115] : memref<9x192x256xbf16, #tpu.memory_space<vmem>>, vector<1x192x256xbf16>
    %107 = vector.shape_cast %106 : vector<1x192x256xbf16> to vector<192x256xbf16>
    %cst_116 = arith.constant dense<0.000000e+00> : vector<128x256xf32>
    %108 = tpu.matmul %105, %107, %cst_116 {dimension_numbers = #tpu.dot_dimension_numbers<[1], [0], [0], [1], [0, 0, 1, 1], [], []>} : vector<128x192xbf16>, vector<192x256xbf16>, vector<128x256xf32> -> vector<128x256xf32>
    %109 = arith.addf %104, %108 : vector<128x256xf32>
    %110 = arith.addf %100, %109 : vector<128x256xf32>
    %c34 = arith.constant 34 : index
    %c0_117 = arith.constant 0 : index
    %111 = vector.load %arg14[%c34, %c0_117] : memref<168x192xbf16, #tpu.memory_space<vmem>>, vector<128x192xbf16>
    %c8 = arith.constant 8 : index
    %c0_118 = arith.constant 0 : index
    %c0_119 = arith.constant 0 : index
    %112 = vector.load %arg9[%c8, %c0_118, %c0_119] : memref<9x192x256xbf16, #tpu.memory_space<vmem>>, vector<1x192x256xbf16>
    %113 = vector.shape_cast %112 : vector<1x192x256xbf16> to vector<192x256xbf16>
    %cst_120 = arith.constant dense<0.000000e+00> : vector<128x256xf32>
    %114 = tpu.matmul %111, %113, %cst_120 {dimension_numbers = #tpu.dot_dimension_numbers<[1], [0], [0], [1], [0, 0, 1, 1], [], []>} : vector<128x192xbf16>, vector<192x256xbf16>, vector<128x256xf32> -> vector<128x256xf32>
    %c34_121 = arith.constant 34 : index
    %c0_122 = arith.constant 0 : index
    %115 = vector.load %arg15[%c34_121, %c0_122] : memref<168x192xbf16, #tpu.memory_space<vmem>>, vector<128x192xbf16>
    %c8_123 = arith.constant 8 : index
    %c0_124 = arith.constant 0 : index
    %c0_125 = arith.constant 0 : index
    %116 = vector.load %arg10[%c8_123, %c0_124, %c0_125] : memref<9x192x256xbf16, #tpu.memory_space<vmem>>, vector<1x192x256xbf16>
    %117 = vector.shape_cast %116 : vector<1x192x256xbf16> to vector<192x256xbf16>
    %cst_126 = arith.constant dense<0.000000e+00> : vector<128x256xf32>
    %118 = tpu.matmul %115, %117, %cst_126 {dimension_numbers = #tpu.dot_dimension_numbers<[1], [0], [0], [1], [0, 0, 1, 1], [], []>} : vector<128x192xbf16>, vector<192x256xbf16>, vector<128x256xf32> -> vector<128x256xf32>
    %119 = arith.addf %114, %118 : vector<128x256xf32>
    %120 = arith.addf %110, %119 : vector<128x256xf32>
    %c0_127 = arith.constant 0 : index
    %c0_128 = arith.constant 0 : index
    %121 = vector.load %arg11[%c0_127, %c0_128] : memref<1x256xf32, #tpu.memory_space<vmem>>, vector<1x256xf32>
    %122 = vector.broadcast %121 : vector<1x256xf32> to vector<128x256xf32>
    %123 = arith.addf %120, %122 : vector<128x256xf32>
    %cst_129 = arith.constant 0.000000e+00 : f32
    %124 = vector.broadcast %cst_129 : f32 to vector<128x256xf32>
    %125 = arith.maximumf %123, %124 : vector<128x256xf32>
    %126 = vector.shape_cast %125 : vector<128x256xf32> to vector<8x16x256xf32>
    %127 = vector.extract_strided_slice %126 {offsets = [0, 0, 0], sizes = [8, 8, 256], strides = [1, 1, 1]} : vector<8x16x256xf32> to vector<8x8x256xf32>
    %128 = vector.shape_cast %127 : vector<8x8x256xf32> to vector<1x8x8x256xf32>
    %c0_130 = arith.constant 0 : index
    %c0_131 = arith.constant 0 : index
    %c0_132 = arith.constant 0 : index
    %c0_133 = arith.constant 0 : index
    %129 = vector.load %arg12[%c0_130, %c0_131, %c0_132, %c0_133] : memref<1x8x8x256xf32, #tpu.memory_space<vmem>>, vector<1x8x8x256xf32>
    %130 = arith.addf %128, %129 : vector<1x8x8x256xf32>
    %c0_134 = arith.constant 0 : index
    %c0_135 = arith.constant 0 : index
    %c0_136 = arith.constant 0 : index
    %c0_137 = arith.constant 0 : index
    %131 = vector.load %arg13[%c0_134, %c0_135, %c0_136, %c0_137] : memref<1x8x8x256xf32, #tpu.memory_space<vmem>>, vector<1x8x8x256xf32>
    tpu.vector_store %arg13[%c0_134, %c0_135, %c0_136, %c0_137], %130 {strides = array<i32>} : memref<1x8x8x256xf32, #tpu.memory_space<vmem>>, vector<1x8x8x256xf32>,
    return
  }
  func.func @transform_0(%arg0: i32, %arg1: i32) -> (i32, i32, i32, i32, i32) {
    %c0_i32 = arith.constant 0 : i32
    %c0_i32_0 = arith.constant 0 : i32
    %c0_i32_1 = arith.constant 0 : i32
    %c0_i32_2 = arith.constant 0 : i32
    return %arg0, %arg1, %c0_i32, %c0_i32_0, %c0_i32_1 : i32, i32, i32, i32, i32
  }
  func.func @transform_1(%arg0: i32, %arg1: i32) -> (i32, i32, i32, i32, i32) {
    %c0_i32 = arith.constant 0 : i32
    %c0_i32_0 = arith.constant 0 : i32
    %c0_i32_1 = arith.constant 0 : i32
    %c0_i32_2 = arith.constant 0 : i32
    return %arg0, %arg1, %c0_i32, %c0_i32_0, %c0_i32_1 : i32, i32, i32, i32, i32
  }
  func.func @transform_2(%arg0: i32, %arg1: i32) -> (i32, i32, i32, i32) {
    %c0_i32 = arith.constant 0 : i32
    %c0_i32_0 = arith.constant 0 : i32
    %c0_i32_1 = arith.constant 0 : i32
    %c0_i32_2 = arith.constant 0 : i32
    return %arg1, %c0_i32, %c0_i32_0, %c0_i32_1 : i32, i32, i32, i32
  }
  func.func @transform_3(%arg0: i32, %arg1: i32) -> (i32, i32) {
    %c0_i32 = arith.constant 0 : i32
    %c0_i32_0 = arith.constant 0 : i32
    %c0_i32_1 = arith.constant 0 : i32
    return %c0_i32, %c0_i32_0 : i32, i32
  }
  func.func @transform_4(%arg0: i32, %arg1: i32) -> (i32, i32) {
    %c0_i32 = arith.constant 0 : i32
    %c0_i32_0 = arith.constant 0 : i32
    %c0_i32_1 = arith.constant 0 : i32
    return %c0_i32, %c0_i32_0 : i32, i32
  }
  func.func @transform_5(%arg0: i32, %arg1: i32) -> (i32, i32) {
    %c0_i32 = arith.constant 0 : i32
    %c0_i32_0 = arith.constant 0 : i32
    %c0_i32_1 = arith.constant 0 : i32
    return %c0_i32, %c0_i32_0 : i32, i32
  }
  func.func @transform_6(%arg0: i32, %arg1: i32) -> (i32, i32) {
    %c0_i32 = arith.constant 0 : i32
    %c0_i32_0 = arith.constant 0 : i32
    %c0_i32_1 = arith.constant 0 : i32
    return %c0_i32, %c0_i32_0 : i32, i32
  }
  func.func @transform_7(%arg0: i32, %arg1: i32) -> (i32, i32, i32) {
    %c0_i32 = arith.constant 0 : i32
    %c0_i32_0 = arith.constant 0 : i32
    %c0_i32_1 = arith.constant 0 : i32
    %c0_i32_2 = arith.constant 0 : i32
    return %c0_i32, %c0_i32_0, %c0_i32_1 : i32, i32, i32
  }
  func.func @transform_8(%arg0: i32, %arg1: i32) -> (i32, i32, i32) {
    %c0_i32 = arith.constant 0 : i32
    %c0_i32_0 = arith.constant 0 : i32
    %c0_i32_1 = arith.constant 0 : i32
    %c0_i32_2 = arith.constant 0 : i32
    return %c0_i32, %c0_i32_0, %c0_i32_1 : i32, i32, i32
  }
  func.func @transform_9(%arg0: i32, %arg1: i32) -> (i32, i32) {
    %c0_i32 = arith.constant 0 : i32
    %c0_i32_0 = arith.constant 0 : i32
    %c0_i32_1 = arith.constant 0 : i32
    return %c0_i32, %c0_i32_0 : i32, i32
  }
  func.func @transform_10(%arg0: i32, %arg1: i32) -> (i32, i32, i32, i32) {
    %c0_i32 = arith.constant 0 : i32
    %c0_i32_0 = arith.constant 0 : i32
    %c0_i32_1 = arith.constant 0 : i32
    return %arg0, %arg1, %c0_i32, %c0_i32_0 : i32, i32, i32, i32
  }
  func.func @transform_11(%arg0: i32, %arg1: i32) -> (i32, i32, i32, i32) {
    %c0_i32 = arith.constant 0 : i32
    %c0_i32_0 = arith.constant 0 : i32
    %c0_i32_1 = arith.constant 0 : i32
    return %arg0, %arg1, %c0_i32, %c0_i32_0 : i32, i32, i32, i32
  }
}

module attributes {stable_mosaic.version = 11 : i64} {
  func.func @_corr_kernel(%arg0: i32, %arg1: i32, %arg2: i32, %arg3: memref<1x64x256xbf16, #tpu.memory_space<vmem>>, %arg4: memref<1x256x64xbf16, #tpu.memory_space<vmem>>, %arg5: memref<1x64x64xf32, #tpu.memory_space<vmem>>) attributes {dimension_semantics = [#tpu.dimension_semantics<parallel>, #tpu.dimension_semantics<parallel>, #tpu.dimension_semantics<parallel>], iteration_bounds = array<i64: 2, 1, 1>, scalar_prefetch = 0 : i64, scratch_operands = 0 : i64, tpu.core_type = #tpu.core_type<tc>, window_params = [{transform_indices = @transform_0, window_bounds = array<i64: 1, 64, 256>}, {transform_indices = @transform_1, window_bounds = array<i64: 1, 256, 64>}, {transform_indices = @transform_2, window_bounds = array<i64: 1, 64, 64>}]} {
    %c0 = arith.constant 0 : index
    %c0_0 = arith.constant 0 : index
    %c0_1 = arith.constant 0 : index
    %0 = vector.load %arg3[%c0, %c0_0, %c0_1] : memref<1x64x256xbf16, #tpu.memory_space<vmem>>, vector<1x64x256xbf16>
    %1 = vector.shape_cast %0 : vector<1x64x256xbf16> to vector<64x256xbf16>
    %c0_2 = arith.constant 0 : index
    %c0_3 = arith.constant 0 : index
    %c0_4 = arith.constant 0 : index
    %2 = vector.load %arg4[%c0_2, %c0_3, %c0_4] : memref<1x256x64xbf16, #tpu.memory_space<vmem>>, vector<1x256x64xbf16>
    %3 = vector.shape_cast %2 : vector<1x256x64xbf16> to vector<256x64xbf16>
    %cst = arith.constant dense<0.000000e+00> : vector<64x64xf32>
    %4 = tpu.matmul %1, %3, %cst {dimension_numbers = #tpu.dot_dimension_numbers<[1], [0], [0], [1], [0, 0, 1, 1], [], []>} : vector<64x256xbf16>, vector<256x64xbf16>, vector<64x64xf32> -> vector<64x64xf32>
    %cst_5 = arith.constant 6.250000e-02 : f32
    %5 = vector.broadcast %cst_5 : f32 to vector<64x64xf32>
    %6 = arith.mulf %4, %5 : vector<64x64xf32>
    %c0_6 = arith.constant 0 : index
    %c0_7 = arith.constant 0 : index
    %c0_8 = arith.constant 0 : index
    %7 = vector.load %arg5[%c0_6, %c0_7, %c0_8] : memref<1x64x64xf32, #tpu.memory_space<vmem>>, vector<1x64x64xf32>
    %8 = vector.shape_cast %7 : vector<1x64x64xf32> to vector<64x64xf32>
    %9 = vector.shape_cast %6 : vector<64x64xf32> to vector<1x64x64xf32>
    tpu.vector_store %arg5[%c0_6, %c0_7, %c0_8], %9 {strides = array<i32>} : memref<1x64x64xf32, #tpu.memory_space<vmem>>, vector<1x64x64xf32>,
    return
  }
  func.func @transform_0(%arg0: i32, %arg1: i32, %arg2: i32) -> (i32, i32, i32) {
    %c0_i32 = arith.constant 0 : i32
    %c0_i32_0 = arith.constant 0 : i32
    return %arg0, %arg1, %c0_i32 : i32, i32, i32
  }
  func.func @transform_1(%arg0: i32, %arg1: i32, %arg2: i32) -> (i32, i32, i32) {
    %c0_i32 = arith.constant 0 : i32
    %c0_i32_0 = arith.constant 0 : i32
    return %arg0, %c0_i32, %arg2 : i32, i32, i32
  }
  func.func @transform_2(%arg0: i32, %arg1: i32, %arg2: i32) -> (i32, i32, i32) {
    %c0_i32 = arith.constant 0 : i32
    return %arg0, %arg1, %arg2 : i32, i32, i32
  }
}

</mosaic_0001>

<bundles_post_ra>
// kernel: hot_path.3
= control target key start
LH: loop header
LB: loop body
LE: loop exit
PB: predicated region body
PF: predicated region fallthrough
CT: control target
= control target key end

     0   :  { %7 = vsyncpa [#allocation3], 0  ;;  %s1061_s0 = inlined_call_operand.vmem [shape: bf16[2,64,256], index: 0, kind: input, shape index: {}]   ;;  %s1062_s1 = inlined_call_operand.vmem [shape: bf16[2,256,64], index: 1, kind: input, shape index: {}]   ;;  %s1063_s2 = inlined_call_operand.hbm [shape: f32[2,64,64], index: 2, kind: output, shape index: {}]  }
   0x1   :  { %9 = vsyncpa [#allocation3 + $0x1], 0  ;;  %s898_s9 = smov 0   ;;  %s900_s10 = smov 0  }
   0x2   :  { %s902_s11 = smov 0   ;;  %s904_s12 = smov 0  }
   0x3   :  { %s906_s13 = smov 0   ;;  %s908_s14 = smov 0  }
   0x4 LB: > { %s590_s15 = sadd.s32 4294967295, %s879_s14   ;;  %s591_s16 = sadd.s32 4294967294, %s879_s14   ;;  %s879_s14 = sphi %s908_s14, %s15_s14   ;;  %s875_s13 = sphi %s906_s13, %s1070_s13   ;;  %s871_s12 = sphi %s904_s12, %s1069_s12   ;;  %s867_s11 = sphi %s902_s11, %s1068_s11   ;;  %s863_s10 = sphi %s900_s10, %s1067_s10   ;;  %s859_s9 = sphi %s898_s9, %s1066_s9  }
   0x5   : > { %s34_s17 = sadd.s32 1, %s875_s13  ;;  %s101_s18 = sadd.s32 1, %s867_s11 }
   0x6   : > { %p36_p0 = scmp.ge.s32.totalorder %s34_s17, 2  ;;  %p111_p1 = scmp.ne.s32.totalorder %s867_s11, %s863_s10 }
   0x7   : > { %p112_p2 = scmp.eq.s32.totalorder %s590_s15, 1  ;;  %p117_p3 = scmp.ne.s32.totalorder %s863_s10, %s859_s9 }
   0x8   : > { %s1072_s17 = smov (%p36_p0, %s34_s17), 0  ;;  %p118_p5 = scmp.eq.s32.totalorder %s591_s16, 1 }
   0x9   : > { %p938_p4 = por %p112_p2, %p111_p1  ;;  %s94_s20 = ssub.s32 %s875_s13, %s1072_s17 }
   0xa   : > { %p594_p6 = scmp.ge.s32.totalorder %s879_s14, 1  ;;  %p99_p7 = scmp.eq.s32.totalorder %s94_s20, 0 }
   0xb   : > { %p945_p8 = por %p118_p5, %p117_p3  ;;  %p161_p9 = scmp.lt.s32.totalorder %s879_s14, 3 }
   0xc   : > { %s951_s22 = scalar_select %p99_p7, %s867_s11, %s101_s18  }
   0xd   : > { %p162_p10 = pnand %p594_p6, %p161_p9 }
   0xe   : > { %p197_p11 = scmp.lt.s32.totalorder (!%p162_p10), %s871_s12, 1  ;;  %s193_s4 = sand.u32 (!%p162_p10), 1, %s863_s10  }
   0xf   : > { %165 = sbr.rel (%p162_p10) target bundleno = 221 (0xdd), region = 28  ;;  %s595_s5 = sshll.u32 (!%p162_p10), %s193_s4, 6 }
  0x10   : > { %s1004_s6 = scalar_lea.vmem (!%p162_p10), [#allocation2], %s595_s5  ;;  %s727_s7 = sshll.u32 (!%p162_p10), %s871_s12, 6 }
  0x11   : > { %s482_s16 = scalar_lea.hbm (!%p162_p10), %s1063_s2, %s727_s7  ;;  %s483_s18 = sshll.u32 (!%p162_p10), %s1004_s6, 4  ;;  %s484_s18 = int_to_ptr.vmem [resolvable:$true] %s483_s18 }
  0x12   : > { %s485_s20 = sshll.u32 (!%p162_p10), %s482_s16, 4  ;;  %s486_s20 = int_to_ptr.hbm [resolvable:$true] %s485_s20 }
  0x14   : > { %s955_s23 = scalar_select %p197_p11, %s871_s12, 1  ;;  %vm458_vm0 = vcmask 523264  }
  0x15   : > { %s468_s12 = scalar_lea.sflag [#allocation3], %s193_s4 }
  0x16   : > { %s702_s24 = sshll.u32 %s955_s23, 7  ;;  %s701_s28 = sshll.u32 %s955_s23, 6 }
  0x17   : > { %s961_s27 = scalar_lea.vmem %s1062_s1, %s702_s24  ;;  %s980_s3 = scalar_lea.vmem %s1061_s0, %s701_s28 }
  0x18   : > { %v718_v0 = vld [vmem:[%s961_s27 + $0x38] sm:$0xff]  ;;  %v717_v2 = vld [vmem:[%s961_s27 + $0x30] sm:$0xff]  ;;  %v716_v4 = vld [vmem:[%s961_s27 + $0x28] sm:$0xff]  ;;  %s815_s23 = sshra.s32 %s486_s20, 4  ;;  %s816_s23 = int_to_ptr.hbm [resolvable:$true] %s815_s23 }
  0x19   : > { %v726_v1 = vld [vmem:[%s961_s27 + $0x78] sm:$0xff]  ;;  %392 = vmatpush.bf16.msra.mxu0 %v718_v0  ;;  %728 = vmatpush.bf16.msra.mxu2 %v718_v0  ;;  %v725_v3 = vld [vmem:[%s961_s27 + $0x70] sm:$0xff]  ;;  %v724_v5 = vld [vmem:[%s961_s27 + $0x68] sm:$0xff]  ;;  %s817_s24 = scalar_lea.hbm %s816_s23, 64  ;;  %p822_p1 = scmp.lt.s32.totalorder %s816_s23, %s1063_s2 }
  0x1a   : > { %421 = vmatpush.bf16.msra.mxu1 %v726_v1  ;;  %736 = vmatpush.bf16.msra.mxu3 %v726_v1  ;;  %v715_v6 = vld [vmem:[%s961_s27 + $0x20] sm:$0xff]  ;;  %v714_v8 = vld [vmem:[%s961_s27 + $0x18] sm:$0xff]  ;;  %v713_v10 = vld [vmem:[%s961_s27 + $0x10] sm:$0xff]  ;;  %p818_p12 = scmp.ne.s32.totalorder %s816_s23, %s817_s24 }
  0x1b   : > { %v723_v7 = vld [vmem:[%s961_s27 + $0x60] sm:$0xff]  ;;  %v722_v9 = vld [vmem:[%s961_s27 + $0x58] sm:$0xff]  ;;  %v721_v11 = vld [vmem:[%s961_s27 + $0x50] sm:$0xff] }
  0x1c   : > { %v712_v12 = vld [vmem:[%s961_s27 + $0x8] sm:$0xff]  ;;  %v711_v14 = vld [vmem:[%s961_s27] sm:$0xff]  ;;  %v610_v28 = vld [vmem:[%s980_s3 + $0x10] sm:$0xf]  ;;  %p819_p13 = pnand %p818_p12, %p938_p4 }
  0x1d   : > { %393 = vmatpush.bf16.msra.mxu0 %v717_v2  ;;  %729 = vmatpush.bf16.msra.mxu2 %v717_v2  ;;  %v720_v13 = vld [vmem:[%s961_s27 + $0x48] sm:$0xff]  ;;  %v719_v15 = vld [vmem:[%s961_s27 + $0x40] sm:$0xff]  ;;  %v706_v29 = vld [vmem:[%s980_s3 + $0x14] sm:$0xf0]  ;;  %s821_s27 = scalar_lea.hbm %s1063_s2, 128 }
  0x1e   : > { %422 = vmatpush.bf16.msra.mxu1 %v725_v3  ;;  %737 = vmatpush.bf16.msra.mxu3 %v725_v3  ;;  %v602_v16 = vld [vmem:[%s980_s3] sm:$0xf]  ;;  %v704_v17 = vld [vmem:[%s980_s3 + $0x4] sm:$0xf0]  ;;  %v703_v20 = vld [vmem:[%s980_s3 + $0x4] sm:$0xf]  ;;  %v611_v36 = vor.u32 %v706_v29, %v610_v28  ;;  %p820_p0 = pneg %p819_p13  ;;  %p823_p2 = scmp.lt.s32.totalorder %s821_s27, %s817_s24 }
  0x1f   : > { %v618_v18 = vld [vmem:[%s980_s3 + $0x20] sm:$0xf]  ;;  %v708_v19 = vld [vmem:[%s980_s3 + $0x24] sm:$0xf0]  ;;  %v604_v21 = vld [vmem:[%s980_s3 + $0x8] sm:$0xf0]  ;;  %v603_v24 = vor.u32 %v704_v17, %v602_v16 }
  0x20   : > { %v707_v22 = vld [vmem:[%s980_s3 + $0x24] sm:$0xf]  ;;  %v620_v23 = vld [vmem:[%s980_s3 + $0x28] sm:$0xf0]  ;;  %v619_v25 = vor.u32 %v708_v19, %v618_v18  ;;  %v607_v26 = vor.u32 %v703_v20, %v604_v21  ;;  %v626_v30 = vld [vmem:[%s980_s3 + $0x30] sm:$0xf]  ;;  %p824_p3 = por %p823_p2, %p822_p1 }
  0x21   : > { %394 = vmatpush.bf16.msra.mxu0 %v716_v4  ;;  %730 = vmatpush.bf16.msra.mxu2 %v716_v4  ;;  %v623_v27 = vor.u32 %v707_v22, %v620_v23  ;;  %v710_v31 = vld [vmem:[%s980_s3 + $0x34] sm:$0xf0]  ;;  %v705_v32 = vld [vmem:[%s980_s3 + $0x14] sm:$0xf]  ;;  %v612_v33 = vld [vmem:[%s980_s3 + $0x18] sm:$0xf0] }
  0x22   : > { %423 = vmatpush.bf16.msra.mxu1 %v724_v5  ;;  %738 = vmatpush.bf16.msra.mxu3 %v724_v5  ;;  %v709_v34 = vld [vmem:[%s980_s3 + $0x34] sm:$0xf]  ;;  %v628_v35 = vld [vmem:[%s980_s3 + $0x38] sm:$0xf0]  ;;  %v627_v37 = vor.u32 %v710_v31, %v626_v30  ;;  %v615_v38 = vor.u32 %v705_v32, %v612_v33  ;;  %p825_p5 = pnand %p824_p3, %p820_p0 }
  0x23   : > { %v631_v39 = vor.u32 %v709_v34, %v628_v35 }
  0x25   : > { %395 = vmatpush.bf16.msra.mxu0 %v715_v6  ;;  %731 = vmatpush.bf16.msra.mxu2 %v715_v6 }
  0x26   : > { %424 = vmatpush.bf16.msra.mxu1 %v723_v7  ;;  %739 = vmatpush.bf16.msra.mxu3 %v723_v7 }
  0x29   : > { %396 = vmatpush.bf16.msra.mxu0 %v714_v8  ;;  %732 = vmatpush.bf16.msra.mxu2 %v714_v8 }
  0x2a   : > { %425 = vmatpush.bf16.msra.mxu1 %v722_v9  ;;  %740 = vmatpush.bf16.msra.mxu3 %v722_v9 }
  0x2d   : > { %397 = vmatpush.bf16.msra.mxu0 %v713_v10  ;;  %733 = vmatpush.bf16.msra.mxu2 %v713_v10 }
  0x2e   : > { %426 = vmatpush.bf16.msra.mxu1 %v721_v11  ;;  %741 = vmatpush.bf16.msra.mxu3 %v721_v11 }
  0x31   : > { %398 = vmatpush.bf16.msra.mxu0 %v712_v12  ;;  %734 = vmatpush.bf16.msra.mxu2 %v712_v12 }
  0x32   : > { %427 = vmatpush.bf16.msra.mxu1 %v720_v13  ;;  %742 = vmatpush.bf16.msra.mxu3 %v720_v13 }
  0x35   : > { %399 = vmatpush.bf16.msra.mxu0 %v711_v14  ;;  %735 = vmatpush.bf16.msra.mxu2 %v711_v14 }
  0x36   : > { %428 = vmatpush.bf16.msra.mxu1 %v719_v15  ;;  %743 = vmatpush.bf16.msra.mxu3 %v719_v15 }
  0x38   : > { %400 = vmatmul.bf16.vlgmr.msra.gmra.mxu0 %v603_v24  ;;  %410 = vmatmul.bf16.vlgmr.msra.gmra.mxu2 %v619_v25 }
  0x39   : > { %429 = vmatmul.bf16.vlgmr.msra.gmra.mxu1 %v607_v26  ;;  %439 = vmatmul.bf16.vlgmr.msra.gmra.mxu3 %v623_v27 }
  0x48   : > { %405 = vmatmul.bf16.gmra.mxu0 %v611_v36  ;;  %415 = vmatmul.bf16.gmra.mxu2 %v627_v37 }
  0x49   : > { %434 = vmatmul.bf16.gmra.mxu1 %v615_v38  ;;  %444 = vmatmul.bf16.gmra.mxu3 %v631_v39 }
  0xb5   : > { %v401_v40 = vpop.f32.mrf.mxu0 }
  0xb6   : > { %v430_v41 = vpop.f32.mrf.mxu1 }
  0xb7   : > { %v431_v42 = vadd.f32 %v430_v41, %v401_v40 }
  0xb9   : > { %v450_v43 = vmul.f32 0.0625, %v431_v42 }
  0xbb   : > { %459 = vst.msk [vmem:[%s1004_s6] sm:$0xff] %vm458_vm0, %v450_v43  ;;  %v411_v44 = vpop.f32.mrf.mxu2 }
  0xbc   : > { %v440_v45 = vpop.f32.mrf.mxu3 }
  0xbd   : > { %v441_v46 = vadd.f32 %v440_v45, %v411_v44  ;;  %v403_v47 = vpop.f32.mrf.mxu0 }
  0xbe   : > { %v432_v48 = vpop.f32.mrf.mxu1 }
  0xbf   : > { %v454_v49 = vmul.f32 0.0625, %v441_v46  ;;  %v433_v50 = vadd.f32 %v432_v48, %v403_v47 }
  0xc1   : > { %463 = vst.msk [vmem:[%s1004_s6 + $0x20] sm:$0xff] %vm458_vm0, %v454_v49  ;;  %v451_v51 = vmul.f32 0.0625, %v433_v50 }
  0xc3   : > { %460 = vst.msk [vmem:[%s1004_s6 + $0x8] sm:$0xff] %vm458_vm0, %v451_v51  ;;  %v413_v52 = vpop.f32.mrf.mxu2 }
  0xc4   : > { %v442_v53 = vpop.f32.mrf.mxu3 }
  0xc5   : > { %v443_v54 = vadd.f32 %v442_v53, %v413_v52  ;;  %v406_v55 = vpop.f32.mrf.mxu0 }
  0xc6   : > { %v435_v56 = vpop.f32.mrf.mxu1 }
  0xc7   : > { %v455_v57 = vmul.f32 0.0625, %v443_v54  ;;  %v436_v58 = vadd.f32 %v435_v56, %v406_v55 }
  0xc9   : > { %464 = vst.msk [vmem:[%s1004_s6 + $0x28] sm:$0xff] %vm458_vm0, %v455_v57  ;;  %v452_v59 = vmul.f32 0.0625, %v436_v58 }
  0xcb   : > { %461 = vst.msk [vmem:[%s1004_s6 + $0x10] sm:$0xff] %vm458_vm0, %v452_v59  ;;  %v416_v60 = vpop.f32.mrf.mxu2 }
  0xcc   : > { %v445_v61 = vpop.f32.mrf.mxu3 }
  0xcd   : > { %v446_v62 = vadd.f32 %v445_v61, %v416_v60  ;;  %v408_v63 = vpop.f32.mrf.mxu0 }
  0xce   : > { %v437_v0 = vpop.f32.mrf.mxu1 }
  0xcf   : > { %v456_v1 = vmul.f32 0.0625, %v446_v62  ;;  %v438_v2 = vadd.f32 %v437_v0, %v408_v63 }
  0xd1   : > { %465 = vst.msk [vmem:[%s1004_s6 + $0x30] sm:$0xff] %vm458_vm0, %v456_v1  ;;  %v453_v3 = vmul.f32 0.0625, %v438_v2 }
  0xd3   : > { %462 = vst.msk [vmem:[%s1004_s6 + $0x18] sm:$0xff] %vm458_vm0, %v453_v3  ;;  %v418_v4 = vpop.f32.mrf.mxu2 }
  0xd4   : > { %v447_v5 = vpop.f32.mrf.mxu3 }
  0xd5   : > { %v448_v6 = vadd.f32 %v447_v5, %v418_v4 }
  0xd7   : > { %v457_v7 = vmul.f32 0.0625, %v448_v6 }
  0xd9   : > { %466 = vst.msk [vmem:[%s1004_s6 + $0x38] sm:$0xff] %vm458_vm0, %v457_v7 }
  0xda   : > { %828 = shalt.err (!%p825_p5)
}
  0xdb   : > { %s881_s30 = smov 128   ;;  %s882_s3 = smov 8  }
  0xdc   : > { %744 = dma.vmem_to_hbm [thread:$0]  (%p938_p4), %s484_s18, 1024, %s486_s20, %s468_s12, %s881_s30, %s881_s30, %s882_s3  }
  0xdd PF: > { %p750_p6 = scmp.ge.s32.totalorder %s879_s14, 2  ;;  %s500_s4 = sand.u32 1, %s859_s9  }
  0xde   : > { %s501_s5 = scalar_lea.sflag [#allocation3], %s500_s4 }
  0xdf   : > { %p747_p7 = pnand %p750_p6, %p945_p8 }
  0xe1   : > { %p748_p9 = pneg %p747_p7 }
  0xe3   : > { %854 = dma.done.wait (%p748_p9), %s501_s5, 1024  }
  0xe4   : > { %856 = vsyncadd (%p748_p9), %s501_s5, 4294966272  ;;  %s15_s14 = sadd.s32 1, %s879_s14   ;;  %s1066_s9 = smov %s863_s10 }
  0xe5   : > { %p12_p10 = scmp.ge.s32.totalorder %s15_s14, 4   ;;  %s1067_s10 = smov %s867_s11 }
  0xe6   : > { %s1068_s11 = smov %s951_s22  ;;  %s1069_s12 = smov %s875_s13 }
  0xe7   : > { %s1070_s13 = smov %s1072_s17  ;;  %14 = sbr.rel (!%p12_p10) target bundleno = 4 (0x4), region = 66 }
  0xec   :  { %507 = vsyncpa [#allocation3], 1 }
  0xed   :  { %509 = vsyncpa [#allocation3 + $0x1], 1 }

// kernel: hot_path.2
= control target key start
LH: loop header
LB: loop body
LE: loop exit
PB: predicated region body
PF: predicated region fallthrough
CT: control target
= control target key end

     0   :  { %s14933_s17 = smov 0   ;;  %s14935_s18 = smov 0   ;;  %s20774_s0 = inlined_call_operand.vmem [shape: bf16[2,1,10,16,256], index: 0, kind: input, shape index: {}]   ;;  %s20775_s1 = inlined_call_operand.vmem [shape: bf16[2,1,10,16,256], index: 1, kind: input, shape index: {}]   ;;  %s20776_s2 = inlined_call_operand.vmem [shape: f32[1,10,16,1], index: 2, kind: input, shape index: {}]   ;;  %s20777_s3 = inlined_call_operand.vmem [shape: bf16[256,192], index: 3, kind: input, shape index: {}]   ;;  %s20778_s4 = inlined_call_operand.vmem [shape: bf16[256,192], index: 4, kind: input, shape index: {}]   ;;  %s20779_s5 = inlined_call_operand.vmem [shape: f32[1,192], index: 5, kind: input, shape index: {}]   ;;  %s20780_s6 = inlined_call_operand.vmem [shape: f32[1,192], index: 6, kind: input, shape index: {}]   ;;  %s20781_s7 = inlined_call_operand.vmem [shape: bf16[9,192,256], index: 7, kind: input, shape index: {}]   ;;  %s20782_s8 = inlined_call_operand.vmem [shape: bf16[9,192,256], index: 8, kind: input, shape index: {}]   ;;  %s20783_s9 = inlined_call_operand.vmem [shape: f32[1,256], index: 9, kind: input, shape index: {}]   ;;  %s20784_s10 = inlined_call_operand.vmem [shape: f32[2,8,8,256], index: 10, kind: input, shape index: {}]   ;;  %s20785_s11 = inlined_call_operand.vmem [shape: f32[2,8,8,256], index: 11, kind: output, shape index: {}]  }
   0x1   :  { %s14937_s19 = smov 0  }
   0x2 LB: > { %s33_s20 = sadd.s32 1, %s14866_s18  ;;  %p10556_p0 = scmp.ge.s32.totalorder %s14870_s19, 1  ;;  %s14870_s19 = sphi %s14937_s19, %s21_s19   ;;  %s14866_s18 = sphi %s14935_s18, %s21347_s18   ;;  %s14862_s17 = sphi %s14933_s17, %s21346_s17  }
   0x3   : > { %p35_p1 = scmp.ge.s32.totalorder %s33_s20, 2  ;;  %p401_p2 = scmp.lt.s32.totalorder %s14870_s19, 3 }
   0x5   : > { %s21349_s20 = smov (%p35_p1, %s33_s20), 0  ;;  %p402_p3 = pnand %p10556_p0, %p401_p2 }
   0x7   : > { %405 = sbr.rel (%p402_p3) target bundleno = 2804 (0xaf4), region = 64 }
   0xc   : > { %v10701_v0 = vld [vmem:[%s20777_s3 + $0x70] sm:$0xf]  ;;  %v14158_v1 = vld [vmem:[%s20777_s3 + $0x74] sm:$0xf0]  ;;  %v14157_v5 = vld [vmem:[%s20777_s3 + $0x74] sm:$0xf] }
   0xd   : > { %v10765_v2 = vld [vmem:[%s20777_s3 + $0xf0] sm:$0xf]  ;;  %v10702_v3 = vor.u32 %v14158_v1, %v10701_v0  ;;  %v14174_v4 = vld [vmem:[%s20777_s3 + $0xf4] sm:$0xf0]  ;;  %v10703_v6 = vld [vmem:[%s20777_s3 + $0x78] sm:$0xf0] }
   0xe   : > { %v10766_v7 = vor.u32 %v14174_v4, %v10765_v2  ;;  %v10706_v8 = vor.u32 %v14157_v5, %v10703_v6  ;;  %v14173_v9 = vld [vmem:[%s20777_s3 + $0xf4] sm:$0xf]  ;;  %v10767_v10 = vld [vmem:[%s20777_s3 + $0xf8] sm:$0xf0]  ;;  %v10693_v11 = vld [vmem:[%s20777_s3 + $0x60] sm:$0xf] }
   0xf   : > { %878 = vmatpush.bf16.msra.mxu0 %v10702_v3  ;;  %v10770_v12 = vor.u32 %v14173_v9, %v10767_v10  ;;  %v14156_v13 = vld [vmem:[%s20777_s3 + $0x64] sm:$0xf0]  ;;  %v10757_v14 = vld [vmem:[%s20777_s3 + $0xe0] sm:$0xf]  ;;  %v14155_v18 = vld [vmem:[%s20777_s3 + $0x64] sm:$0xf] }
  0x10   : > { %v14172_v15 = vld [vmem:[%s20777_s3 + $0xe4] sm:$0xf0]  ;;  %937 = vmatpush.bf16.msra.mxu1 %v10766_v7  ;;  %996 = vmatpush.bf16.msra.mxu2 %v10706_v8  ;;  %v10694_v16 = vor.u32 %v14156_v13, %v10693_v11  ;;  %v10695_v19 = vld [vmem:[%s20777_s3 + $0x68] sm:$0xf0]  ;;  %v14171_v20 = vld [vmem:[%s20777_s3 + $0xe4] sm:$0xf] }
  0x11   : > { %v10758_v17 = vor.u32 %v14172_v15, %v10757_v14  ;;  %1055 = vmatpush.bf16.msra.mxu3 %v10770_v12  ;;  %v10698_v21 = vor.u32 %v14155_v18, %v10695_v19  ;;  %v10759_v22 = vld [vmem:[%s20777_s3 + $0xe8] sm:$0xf0]  ;;  %v10685_v23 = vld [vmem:[%s20777_s3 + $0x50] sm:$0xf]  ;;  %v14154_v24 = vld [vmem:[%s20777_s3 + $0x54] sm:$0xf0] }
  0x12   : > { %v10762_v25 = vor.u32 %v14171_v20, %v10759_v22  ;;  %v10749_v26 = vld [vmem:[%s20777_s3 + $0xd0] sm:$0xf]  ;;  %v14170_v27 = vld [vmem:[%s20777_s3 + $0xd4] sm:$0xf0]  ;;  %v14153_v28 = vld [vmem:[%s20777_s3 + $0x54] sm:$0xf]  ;;  %v10686_v29 = vor.u32 %v14154_v24, %v10685_v23 }
  0x13   : > { %879 = vmatpush.bf16.msra.mxu0 %v10694_v16  ;;  %v10687_v30 = vld [vmem:[%s20777_s3 + $0x58] sm:$0xf0]  ;;  %v14169_v31 = vld [vmem:[%s20777_s3 + $0xd4] sm:$0xf]  ;;  %v10750_v33 = vor.u32 %v14170_v27, %v10749_v26  ;;  %v10677_v35 = vld [vmem:[%s20777_s3 + $0x40] sm:$0xf] }
  0x14   : > { %v10751_v32 = vld [vmem:[%s20777_s3 + $0xd8] sm:$0xf0]  ;;  %938 = vmatpush.bf16.msra.mxu1 %v10758_v17  ;;  %997 = vmatpush.bf16.msra.mxu2 %v10698_v21  ;;  %v10690_v34 = vor.u32 %v14153_v28, %v10687_v30  ;;  %v14152_v36 = vld [vmem:[%s20777_s3 + $0x44] sm:$0xf0]  ;;  %v10741_v37 = vld [vmem:[%s20777_s3 + $0xc0] sm:$0xf] }
  0x15   : > { %1056 = vmatpush.bf16.msra.mxu3 %v10762_v25  ;;  %v10754_v38 = vor.u32 %v14169_v31, %v10751_v32  ;;  %v14168_v39 = vld [vmem:[%s20777_s3 + $0xc4] sm:$0xf0]  ;;  %v14151_v40 = vld [vmem:[%s20777_s3 + $0x44] sm:$0xf]  ;;  %v10679_v41 = vld [vmem:[%s20777_s3 + $0x48] sm:$0xf0]  ;;  %v10678_v44 = vor.u32 %v14152_v36, %v10677_v35 }
  0x16   : > { %v14167_v42 = vld [vmem:[%s20777_s3 + $0xc4] sm:$0xf]  ;;  %v10743_v43 = vld [vmem:[%s20777_s3 + $0xc8] sm:$0xf0]  ;;  %v10742_v45 = vor.u32 %v14168_v39, %v10741_v37  ;;  %v10682_v46 = vor.u32 %v14151_v40, %v10679_v41  ;;  %v10669_v47 = vld [vmem:[%s20777_s3 + $0x30] sm:$0xf] }
  0x17   : > { %880 = vmatpush.bf16.msra.mxu0 %v10686_v29  ;;  %v14150_v48 = vld [vmem:[%s20777_s3 + $0x34] sm:$0xf0]  ;;  %v10733_v49 = vld [vmem:[%s20777_s3 + $0xb0] sm:$0xf]  ;;  %v10746_v50 = vor.u32 %v14167_v42, %v10743_v43  ;;  %v14149_v52 = vld [vmem:[%s20777_s3 + $0x34] sm:$0xf] }
  0x18   : > { %939 = vmatpush.bf16.msra.mxu1 %v10750_v33  ;;  %998 = vmatpush.bf16.msra.mxu2 %v10690_v34  ;;  %v14166_v51 = vld [vmem:[%s20777_s3 + $0xb4] sm:$0xf0]  ;;  %v10671_v53 = vld [vmem:[%s20777_s3 + $0x38] sm:$0xf0]  ;;  %v14165_v54 = vld [vmem:[%s20777_s3 + $0xb4] sm:$0xf]  ;;  %v10670_v56 = vor.u32 %v14150_v48, %v10669_v47 }
  0x19   : > { %1057 = vmatpush.bf16.msra.mxu3 %v10754_v38  ;;  %v10735_v55 = vld [vmem:[%s20777_s3 + $0xb8] sm:$0xf0]  ;;  %v10734_v57 = vor.u32 %v14166_v51, %v10733_v49  ;;  %v10674_v58 = vor.u32 %v14149_v52, %v10671_v53  ;;  %v10661_v59 = vld [vmem:[%s20777_s3 + $0x20] sm:$0xf]  ;;  %v14148_v60 = vld [vmem:[%s20777_s3 + $0x24] sm:$0xf0] }
  0x1a   : > { %v10725_v61 = vld [vmem:[%s20777_s3 + $0xa0] sm:$0xf]  ;;  %v10738_v62 = vor.u32 %v14165_v54, %v10735_v55  ;;  %v14164_v63 = vld [vmem:[%s20777_s3 + $0xa4] sm:$0xf0]  ;;  %v14147_v0 = vld [vmem:[%s20777_s3 + $0x24] sm:$0xf]  ;;  %v10662_v4 = vor.u32 %v14148_v60, %v10661_v59 }
  0x1b   : > { %881 = vmatpush.bf16.msra.mxu0 %v10678_v44  ;;  %v10663_v1 = vld [vmem:[%s20777_s3 + $0x28] sm:$0xf0]  ;;  %v14163_v2 = vld [vmem:[%s20777_s3 + $0xa4] sm:$0xf]  ;;  %v10653_v5 = vld [vmem:[%s20777_s3 + $0x10] sm:$0xf]  ;;  %v10726_v7 = vor.u32 %v14164_v63, %v10725_v61 }
  0x1c   : > { %940 = vmatpush.bf16.msra.mxu1 %v10742_v45  ;;  %999 = vmatpush.bf16.msra.mxu2 %v10682_v46  ;;  %v10727_v3 = vld [vmem:[%s20777_s3 + $0xa8] sm:$0xf0]  ;;  %v14146_v6 = vld [vmem:[%s20777_s3 + $0x14] sm:$0xf0]  ;;  %v10666_v8 = vor.u32 %v14147_v0, %v10663_v1  ;;  %v10717_v9 = vld [vmem:[%s20777_s3 + $0x90] sm:$0xf] }
  0x1d   : > { %1058 = vmatpush.bf16.msra.mxu3 %v10746_v50  ;;  %v14162_v10 = vld [vmem:[%s20777_s3 + $0x94] sm:$0xf0]  ;;  %v14145_v11 = vld [vmem:[%s20777_s3 + $0x14] sm:$0xf]  ;;  %v10730_v12 = vor.u32 %v14163_v2, %v10727_v3  ;;  %v10655_v13 = vld [vmem:[%s20777_s3 + $0x18] sm:$0xf0]  ;;  %v10654_v19 = vor.u32 %v14146_v6, %v10653_v5 }
  0x1e   : > { %v14161_v14 = vld [vmem:[%s20777_s3 + $0x94] sm:$0xf]  ;;  %p474_p4 = scmp.lt.s32.totalorder %s14862_s17, 1  ;;  %v10719_v15 = vld [vmem:[%s20777_s3 + $0x98] sm:$0xf0]  ;;  %v14872_v18 = vmov 0   ;;  %v10718_v23 = vor.u32 %v14162_v10, %v10717_v9  ;;  %v10658_v24 = vor.u32 %v14145_v11, %v10655_v13 }
  0x1f   : > { %882 = vmatpush.bf16.msra.mxu0 %v10670_v56  ;;  %v10645_v16 = vld [vmem:[%s20777_s3] sm:$0xf]  ;;  %v14144_v17 = vld [vmem:[%s20777_s3 + $0x4] sm:$0xf0]  ;;  %14845 = vset.pattern.permute.xlu0 %v14872_v18  ;;  %v14143_v22 = vld [vmem:[%s20777_s3 + $0x4] sm:$0xf]  ;;  %v10722_v28 = vor.u32 %v14161_v14, %v10719_v15 }
  0x20   : > { %941 = vmatpush.bf16.msra.mxu1 %v10734_v57  ;;  %1000 = vmatpush.bf16.msra.mxu2 %v10674_v58  ;;  %v10709_v20 = vld [vmem:[%s20777_s3 + $0x80] sm:$0xf]  ;;  %v14160_v21 = vld [vmem:[%s20777_s3 + $0x84] sm:$0xf0]  ;;  %s21351_s17 = smov (!%p474_p4, %s14862_s17), 1  ;;  %vm1928_vm0 = vcmask 1043456   ;;  %v10646_v34 = vor.u32 %v14144_v17, %v10645_v16 }
  0x21   : > { %1059 = vmatpush.bf16.msra.mxu3 %v10738_v62  ;;  %14846 = vset.pattern.permute.xlu1 %v14872_v18  ;;  %v10647_v25 = vld [vmem:[%s20777_s3 + $0x8] sm:$0xf0]  ;;  %v14159_v26 = vld [vmem:[%s20777_s3 + $0x84] sm:$0xf]  ;;  %vm1929_vm1 = vcmask 523268   ;;  %s14819_s12 = smul.u32 160, %s21351_s17  ;;  %v10710_v37 = vor.u32 %v14160_v21, %v10709_v20 }
  0x22   : > { %14847 = vset.pattern.permute.xlu2 %v14872_v18  ;;  %v560_v27 = vld [vmem:[%s20776_s2] sm:$0xff]  ;;  %v10711_v29 = vld [vmem:[%s20777_s3 + $0x88] sm:$0xf0]  ;;  %v14189_v30 = vld [vmem:[%s20778_s4 + $0x74] sm:$0xf]  ;;  %v10650_v38 = vor.u32 %v14143_v22, %v10647_v25  ;;  %vm4034_vm3 = vcmask 1046528  }
  0x23   : > { %883 = vmatpush.bf16.msra.mxu0 %v10662_v4  ;;  %vm15157_vm2 = vmor %vm1929_vm1, %vm1928_vm0  ;;  %1156 = vperm.xlu0 %14845, %v560_v27   ;;  %v10911_v32 = vld [vmem:[%s20778_s4 + $0x78] sm:$0xf0]  ;;  %v14205_v33 = vld [vmem:[%s20778_s4 + $0xf4] sm:$0xf]  ;;  %s15174_s25 = scalar_lea.vmem %s20774_s0, %s14819_s12  ;;  %v10714_v42 = vor.u32 %v14159_v26, %v10711_v29  ;;  %s15510_s22 = scalar_lea.vmem %s20775_s1, %s14819_s12  ;;  %vm2265_vm4 = vcmask 523264  }
  0x24   : > { %942 = vmatpush.bf16.msra.mxu1 %v10726_v7  ;;  %1001 = vmatpush.bf16.msra.mxu2 %v10666_v8  ;;  %1991 = vst.msk [vmem:[#allocation2 + $0xa0] sm:$0xff] %vm15157_vm2, %v14872_v18  ;;  %v10975_v35 = vld [vmem:[%s20778_s4 + $0xf8] sm:$0xf0]  ;;  %v10909_v36 = vld [vmem:[%s20778_s4 + $0x70] sm:$0xf]  ;;  %v10914_v44 = vor.u32 %v14189_v30, %v10911_v32  ;;  %v561_v63 = vld [vmem:[%s20776_s2 + $0x8] sm:$0xff] }
  0x25   : > { %1060 = vmatpush.bf16.msra.mxu3 %v10730_v12  ;;  %1992 = vst.msk [vmem:[#allocation3 + $0xa0] sm:$0xff] %vm15157_vm2, %v14872_v18  ;;  %v10565_v39 = vld [vmem:[%s15174_s25] sm:$0xf]  ;;  %v14104_v40 = vld [vmem:[%s15174_s25 + $0x4] sm:$0xf0]  ;;  %v10978_v48 = vor.u32 %v14205_v33, %v10975_v35  ;;  %v562_v1 = vld [vmem:[%s20776_s2 + $0x10] sm:$0xff] }
  0x26   : > { %v14103_v41 = vld [vmem:[%s15174_s25 + $0x4] sm:$0xf]  ;;  %v10567_v43 = vld [vmem:[%s15174_s25 + $0x8] sm:$0xf0]  ;;  %v14190_v45 = vld [vmem:[%s20778_s4 + $0x74] sm:$0xf0]  ;;  %v10566_v47 = vor.u32 %v14104_v40, %v10565_v39  ;;  %1166 = vperm.xlu1 %14846, %v562_v1  }
  0x27   : > { %884 = vmatpush.bf16.msra.mxu0 %v10654_v19  ;;  %v10973_v46 = vld [vmem:[%s20778_s4 + $0xf0] sm:$0xf]  ;;  %v14206_v49 = vld [vmem:[%s20778_s4 + $0xf4] sm:$0xf0]  ;;  %v14187_v50 = vld [vmem:[%s20778_s4 + $0x64] sm:$0xf]  ;;  %v10570_v52 = vor.u32 %v14103_v41, %v10567_v43  ;;  %v10910_v55 = vor.u32 %v14190_v45, %v10909_v36 }
  0x28   : > { %943 = vmatpush.bf16.msra.mxu1 %v10718_v23  ;;  %1002 = vmatpush.bf16.msra.mxu2 %v10658_v24  ;;  %v10903_v51 = vld [vmem:[%s20778_s4 + $0x68] sm:$0xf0]  ;;  %v14203_v53 = vld [vmem:[%s20778_s4 + $0xe4] sm:$0xf]  ;;  %v10974_v56 = vor.u32 %v14206_v49, %v10973_v46  ;;  %v10901_v58 = vld [vmem:[%s20778_s4 + $0x60] sm:$0xf] }
  0x29   : > { %1061 = vmatpush.bf16.msra.mxu3 %v10722_v28  ;;  %v10967_v54 = vld [vmem:[%s20778_s4 + $0xe8] sm:$0xf0]  ;;  %v10906_v57 = vor.u32 %v14187_v50, %v10903_v51  ;;  %v14188_v59 = vld [vmem:[%s20778_s4 + $0x64] sm:$0xf0]  ;;  %v10965_v61 = vld [vmem:[%s20778_s4 + $0xe0] sm:$0xf] }
  0x2a   : > { %v10970_v60 = vor.u32 %v14203_v53, %v10967_v54  ;;  %v14204_v62 = vld [vmem:[%s20778_s4 + $0xe4] sm:$0xf0]  ;;  %v10902_v0 = vor.u32 %v14188_v59, %v10901_v58  ;;  %v14185_v2 = vld [vmem:[%s20778_s4 + $0x54] sm:$0xf]  ;;  %v10895_v3 = vld [vmem:[%s20778_s4 + $0x58] sm:$0xf0] }
  0x2b   : > { %885 = vmatpush.bf16.msra.mxu0 %v10646_v34  ;;  %v10966_v4 = vor.u32 %v14204_v62, %v10965_v61  ;;  %v10898_v5 = vor.u32 %v14185_v2, %v10895_v3  ;;  %v14201_v6 = vld [vmem:[%s20778_s4 + $0xd4] sm:$0xf]  ;;  %v10959_v7 = vld [vmem:[%s20778_s4 + $0xd8] sm:$0xf0]  ;;  %1161 = vperm.xlu0 %14845, %v561_v63   ;;  %v10893_v9 = vld [vmem:[%s20778_s4 + $0x50] sm:$0xf] }
  0x2c   : > { %944 = vmatpush.bf16.msra.mxu1 %v10710_v37  ;;  %1003 = vmatpush.bf16.msra.mxu2 %v10650_v38  ;;  %v10962_v8 = vor.u32 %v14201_v6, %v10959_v7  ;;  %v14186_v10 = vld [vmem:[%s20778_s4 + $0x54] sm:$0xf0]  ;;  %v10573_v12 = vld [vmem:[%s15174_s25 + $0x10] sm:$0xf]  ;;  %v14105_v14 = vld [vmem:[%s15174_s25 + $0x14] sm:$0xf] }
  0x2d   : > { %1062 = vmatpush.bf16.msra.mxu3 %v10714_v42  ;;  %v10894_v11 = vor.u32 %v14186_v10, %v10893_v9  ;;  %v14106_v13 = vld [vmem:[%s15174_s25 + $0x14] sm:$0xf0]  ;;  %v10575_v15 = vld [vmem:[%s15174_s25 + $0x18] sm:$0xf0]  ;;  %v10957_v19 = vld [vmem:[%s20778_s4 + $0xd0] sm:$0xf] }
  0x2e   : > { %886 = vmatmul.bf16.vlgmr.msra.gmra.mxu0 %v10566_v47  ;;  %v563_v16 = vld [vmem:[%s20776_s2 + $0x18] sm:$0xff]  ;;  %v10574_v17 = vor.u32 %v14106_v13, %v10573_v12  ;;  %v10578_v18 = vor.u32 %v14105_v14, %v10575_v15  ;;  %v14183_v21 = vld [vmem:[%s20778_s4 + $0x44] sm:$0xf]  ;;  %v10887_v23 = vld [vmem:[%s20778_s4 + $0x48] sm:$0xf0]  ;;  %s14101_s15 = sshll.u32 %s21351_s17, 7 }
  0x2f   : > { %945 = vmatmul.bf16.vlgmr.msra.gmra.mxu1 %v10570_v52  ;;  %1004 = vmatmul.bf16.vlgmr.msra.gmra.mxu2 %v10566_v47  ;;  %v14202_v20 = vld [vmem:[%s20778_s4 + $0xd4] sm:$0xf0]  ;;  %v14199_v24 = vld [vmem:[%s20778_s4 + $0xc4] sm:$0xf]  ;;  %v10951_v25 = vld [vmem:[%s20778_s4 + $0xc8] sm:$0xf0]  ;;  %v10890_v26 = vor.u32 %v14183_v21, %v10887_v23  ;;  %s20677_s12 = scalar_lea.vmem %s20784_s10, %s14101_s15 }
  0x30   : > { %1710 = vmatpush.bf16.msrb.mxu2 %v10914_v44  ;;  %1063 = vmatmul.bf16.vlgmr.msra.gmra.mxu3 %v10570_v52  ;;  %v10958_v22 = vor.u32 %v14202_v20, %v10957_v19  ;;  %v10954_v27 = vor.u32 %v14199_v24, %v10951_v25  ;;  %v10581_v28 = vld [vmem:[%s15174_s25 + $0x20] sm:$0xf]  ;;  %v14108_v29 = vld [vmem:[%s15174_s25 + $0x24] sm:$0xf0]  ;;  %v14107_v30 = vld [vmem:[%s15174_s25 + $0x24] sm:$0xf] }
  0x31   : > { %1769 = vmatpush.bf16.msrb.mxu3 %v10978_v48  ;;  %1592 = vmatpush.bf16.msrb.mxu0 %v10910_v55  ;;  %v10583_v32 = vld [vmem:[%s15174_s25 + $0x28] sm:$0xf0]  ;;  %v10582_v33 = vor.u32 %v14108_v29, %v10581_v28  ;;  %v10885_v35 = vld [vmem:[%s20778_s4 + $0x40] sm:$0xf]  ;;  %v14184_v36 = vld [vmem:[%s20778_s4 + $0x44] sm:$0xf0] }
  0x32   : > { %1651 = vmatpush.bf16.msrb.mxu1 %v10974_v56  ;;  %1171 = vperm.xlu1 %14846, %v563_v16   ;;  %v10586_v34 = vor.u32 %v14107_v30, %v10583_v32  ;;  %v10949_v37 = vld [vmem:[%s20778_s4 + $0xc0] sm:$0xf]  ;;  %v10886_v38 = vor.u32 %v14184_v36, %v10885_v35  ;;  %v14200_v39 = vld [vmem:[%s20778_s4 + $0xc4] sm:$0xf0]  ;;  %v566_v40 = vld [vmem:[%s20776_s2 + $0x30] sm:$0xff] }
  0x33   : > { %v564_v41 = vld [vmem:[%s20776_s2 + $0x20] sm:$0xff]  ;;  %v10950_v42 = vor.u32 %v14200_v39, %v10949_v37  ;;  %1186 = vperm.xlu0 %14845, %v566_v40   ;;  %v567_v43 = vld [vmem:[%s20776_s2 + $0x38] sm:$0xff]  ;;  %v10589_v44 = vld [vmem:[%s15174_s25 + $0x30] sm:$0xf]  ;;  %vm2987_vm5 = vsmask.f32 7424 }
  0x34   : > { %1711 = vmatpush.bf16.msrb.mxu2 %v10906_v57  ;;  %1176 = vperm.xlu2 %14847, %v564_v41   ;;  %v14110_v45 = vld [vmem:[%s15174_s25 + $0x34] sm:$0xf0]  ;;  %v14109_v46 = vld [vmem:[%s15174_s25 + $0x34] sm:$0xf]  ;;  %v10591_v47 = vld [vmem:[%s15174_s25 + $0x38] sm:$0xf0] }
  0x35   : > { %1770 = vmatpush.bf16.msrb.mxu3 %v10970_v60  ;;  %1593 = vmatpush.bf16.msrb.mxu0 %v10902_v0  ;;  %v10590_v48 = vor.u32 %v14110_v45, %v10589_v44  ;;  %v10594_v49 = vor.u32 %v14109_v46, %v10591_v47  ;;  %v14181_v50 = vld [vmem:[%s20778_s4 + $0x34] sm:$0xf]  ;;  %v10879_v51 = vld [vmem:[%s20778_s4 + $0x38] sm:$0xf0]  ;;  %v565_v52 = vld [vmem:[%s20776_s2 + $0x28] sm:$0xff] }
  0x36   : > { %1652 = vmatpush.bf16.msrb.mxu1 %v10966_v4  ;;  %v10882_v53 = vor.u32 %v14181_v50, %v10879_v51  ;;  %v14197_v54 = vld [vmem:[%s20778_s4 + $0xb4] sm:$0xf]  ;;  %v10943_v55 = vld [vmem:[%s20778_s4 + $0xb8] sm:$0xf0]  ;;  %v10877_v56 = vld [vmem:[%s20778_s4 + $0x30] sm:$0xf] }
  0x37   : > { %v10946_v57 = vor.u32 %v14197_v54, %v10943_v55  ;;  %v14182_v58 = vld [vmem:[%s20778_s4 + $0x34] sm:$0xf0]  ;;  %v10941_v59 = vld [vmem:[%s20778_s4 + $0xb0] sm:$0xf]  ;;  %v569_v63 = vld [vmem:[%s20776_s2 + $0x48] sm:$0xff] }
  0x38   : > { %1712 = vmatpush.bf16.msrb.mxu2 %v10898_v5  ;;  %v14198_v60 = vld [vmem:[%s20778_s4 + $0xb4] sm:$0xf0]  ;;  %v10878_v61 = vor.u32 %v14182_v58, %v10877_v56  ;;  %v10597_v0 = vld [vmem:[%s15174_s25 + $0x40] sm:$0xf]  ;;  %v14112_v1 = vld [vmem:[%s15174_s25 + $0x44] sm:$0xf0] }
  0x39   : > { %1771 = vmatpush.bf16.msrb.mxu3 %v10962_v8  ;;  %1594 = vmatpush.bf16.msrb.mxu0 %v10894_v11  ;;  %v10942_v62 = vor.u32 %v14198_v60, %v10941_v59  ;;  %v14111_v2 = vld [vmem:[%s15174_s25 + $0x44] sm:$0xf]  ;;  %v10599_v3 = vld [vmem:[%s15174_s25 + $0x48] sm:$0xf0]  ;;  %v10598_v4 = vor.u32 %v14112_v1, %v10597_v0  ;;  %v570_v11 = vld [vmem:[%s20776_s2 + $0x50] sm:$0xff] }
  0x3a   : > { %1653 = vmatpush.bf16.msrb.mxu1 %v10958_v22  ;;  %1191 = vperm.xlu1 %14846, %v567_v43   ;;  %v10602_v5 = vor.u32 %v14111_v2, %v10599_v3  ;;  %v14179_v6 = vld [vmem:[%s20778_s4 + $0x24] sm:$0xf]  ;;  %v10871_v7 = vld [vmem:[%s20778_s4 + $0x28] sm:$0xf0]  ;;  %v10869_v12 = vld [vmem:[%s20778_s4 + $0x20] sm:$0xf] }
  0x3b   : > { %1201 = vperm.xlu0 %14845, %v569_v63   ;;  %v14195_v8 = vld [vmem:[%s20778_s4 + $0xa4] sm:$0xf]  ;;  %v10874_v9 = vor.u32 %v14179_v6, %v10871_v7  ;;  %v10935_v10 = vld [vmem:[%s20778_s4 + $0xa8] sm:$0xf0]  ;;  %v14180_v14 = vld [vmem:[%s20778_s4 + $0x24] sm:$0xf0] }
  0x3c   : > { %1713 = vmatpush.bf16.msrb.mxu2 %v10890_v26  ;;  %1181 = vperm.xlu2 %14847, %v565_v52   ;;  %v10938_v13 = vor.u32 %v14195_v8, %v10935_v10  ;;  %v10933_v15 = vld [vmem:[%s20778_s4 + $0xa0] sm:$0xf]  ;;  %v14196_v16 = vld [vmem:[%s20778_s4 + $0xa4] sm:$0xf0]  ;;  %v10605_v20 = vld [vmem:[%s15174_s25 + $0x50] sm:$0xf] }
  0x3d   : > { %1772 = vmatpush.bf16.msrb.mxu3 %v10954_v27  ;;  %1595 = vmatpush.bf16.msrb.mxu0 %v10886_v38  ;;  %v568_v19 = vld [vmem:[%s20776_s2 + $0x40] sm:$0xff]  ;;  %v14114_v21 = vld [vmem:[%s15174_s25 + $0x54] sm:$0xf0]  ;;  %v14113_v22 = vld [vmem:[%s15174_s25 + $0x54] sm:$0xf] }
  0x3e   : > { %891 = vmatmul.bf16.gmra.mxu0 %v10574_v17  ;;  %1654 = vmatpush.bf16.msrb.mxu1 %v10950_v42  ;;  %v10607_v23 = vld [vmem:[%s15174_s25 + $0x58] sm:$0xf0]  ;;  %v10606_v24 = vor.u32 %v14114_v21, %v10605_v20  ;;  %v572_v26 = vld [vmem:[%s20776_s2 + $0x60] sm:$0xff]  ;;  %v14177_v27 = vld [vmem:[%s20778_s4 + $0x14] sm:$0xf] }
  0x3f   : > { %950 = vmatmul.bf16.gmra.mxu1 %v10578_v18  ;;  %1009 = vmatmul.bf16.gmra.mxu2 %v10574_v17  ;;  %v10870_v17 = vor.u32 %v14180_v14, %v10869_v12  ;;  %v10610_v25 = vor.u32 %v14113_v22, %v10607_v23  ;;  %v10863_v28 = vld [vmem:[%s20778_s4 + $0x18] sm:$0xf0]  ;;  %v573_v30 = vld [vmem:[%s20776_s2 + $0x68] sm:$0xff]  ;;  %v14193_v32 = vld [vmem:[%s20778_s4 + $0x94] sm:$0xf] }
  0x40   : > { %1068 = vmatmul.bf16.gmra.mxu3 %v10578_v18  ;;  %1714 = vmatpush.bf16.msrb.mxu2 %v10882_v53  ;;  %v10934_v18 = vor.u32 %v14196_v16, %v10933_v15  ;;  %v10866_v29 = vor.u32 %v14177_v27, %v10863_v28  ;;  %v10613_v35 = vld [vmem:[%s15174_s25 + $0x60] sm:$0xf]  ;;  %v14116_v36 = vld [vmem:[%s15174_s25 + $0x64] sm:$0xf0]  ;;  %v14115_v37 = vld [vmem:[%s15174_s25 + $0x64] sm:$0xf] }
  0x41   : > { %1773 = vmatpush.bf16.msrb.mxu3 %v10946_v57  ;;  %1596 = vmatpush.bf16.msrb.mxu0 %v10878_v61  ;;  %v10615_v38 = vld [vmem:[%s15174_s25 + $0x68] sm:$0xf0]  ;;  %v10614_v39 = vor.u32 %v14116_v36, %v10613_v35  ;;  %v10861_v41 = vld [vmem:[%s20778_s4 + $0x10] sm:$0xf]  ;;  %v14178_v42 = vld [vmem:[%s20778_s4 + $0x14] sm:$0xf0] }
  0x42   : > { %1655 = vmatpush.bf16.msrb.mxu1 %v10942_v62  ;;  %1206 = vperm.xlu1 %14846, %v570_v11   ;;  %v10618_v40 = vor.u32 %v14115_v37, %v10615_v38  ;;  %v10925_v43 = vld [vmem:[%s20778_s4 + $0x90] sm:$0xf]  ;;  %v10862_v44 = vor.u32 %v14178_v42, %v10861_v41  ;;  %v14194_v45 = vld [vmem:[%s20778_s4 + $0x94] sm:$0xf0]  ;;  %v14117_v50 = vld [vmem:[%s15174_s25 + $0x74] sm:$0xf] }
  0x43   : > { %1216 = vperm.xlu0 %14845, %v572_v26   ;;  %v571_v46 = vld [vmem:[%s20776_s2 + $0x58] sm:$0xff]  ;;  %v10926_v47 = vor.u32 %v14194_v45, %v10925_v43  ;;  %v612_v55 = vld [vmem:[%s20779_s5] sm:$0x3]  ;;  %v14175_v56 = vld [vmem:[%s20778_s4 + $0x4] sm:$0xf] }
  0x44   : > { %1715 = vmatpush.bf16.msrb.mxu2 %v10874_v9  ;;  %1196 = vperm.xlu2 %14847, %v568_v19   ;;  %v10623_v51 = vld [vmem:[%s15174_s25 + $0x78] sm:$0xf0]  ;;  %v10855_v57 = vld [vmem:[%s20778_s4 + $0x8] sm:$0xf0]  ;;  %v14191_v58 = vld [vmem:[%s20778_s4 + $0x84] sm:$0xf] }
  0x45   : > { %1774 = vmatpush.bf16.msrb.mxu3 %v10938_v13  ;;  %1597 = vmatpush.bf16.msrb.mxu0 %v10870_v17  ;;  %v575_v52 = vld [vmem:[%s20776_s2 + $0x78] sm:$0xff]  ;;  %v10626_v54 = vor.u32 %v14117_v50, %v10623_v51  ;;  %v10858_v59 = vor.u32 %v14175_v56, %v10855_v57  ;;  %v10919_v60 = vld [vmem:[%s20778_s4 + $0x88] sm:$0xf0]  ;;  %v10853_v61 = vld [vmem:[%s20778_s4] sm:$0xf]  ;;  %v15451_v17 = vperm.slane %v612_v55, 1 }
  0x46   : > { %1656 = vmatpush.bf16.msrb.mxu1 %v10934_v18  ;;  %v14176_v62 = vld [vmem:[%s20778_s4 + $0x4] sm:$0xf0]  ;;  %v10629_v63 = vld [vmem:[%s15174_s25 + $0x80] sm:$0xf]  ;;  %v10922_v1 = vor.u32 %v14191_v58, %v10919_v60  ;;  %v10631_v6 = vld [vmem:[%s15174_s25 + $0x88] sm:$0xf0] }
  0x47   : > { %v14120_v0 = vld [vmem:[%s15174_s25 + $0x84] sm:$0xf0]  ;;  %v10854_v2 = vor.u32 %v14176_v62, %v10853_v61  ;;  %v576_v3 = vld [vmem:[%s20776_s2 + $0x80] sm:$0xff]  ;;  %v574_v15 = vld [vmem:[%s20776_s2 + $0x70] sm:$0xff] }
  0x48   : > { %1716 = vmatpush.bf16.msrb.mxu2 %v10866_v29  ;;  %v10630_v7 = vor.u32 %v14120_v0, %v10629_v63  ;;  %v10917_v8 = vld [vmem:[%s20778_s4 + $0x80] sm:$0xf]  ;;  %v14192_v9 = vld [vmem:[%s20778_s4 + $0x84] sm:$0xf0]  ;;  %v14277_v27 = vld [vmem:[%s20782_s8 + $0x74] sm:$0xf] }
  0x49   : > { %1598 = vmatpush.bf16.msrb.mxu0 %v10862_v44  ;;  %v10918_v12 = vor.u32 %v14192_v9, %v10917_v8  ;;  %v11103_v28 = vld [vmem:[%s20782_s8 + $0x78] sm:$0xf0]  ;;  %v14285_v29 = vld [vmem:[%s20782_s8 + $0xb4] sm:$0xf]  ;;  %v10637_v36 = vld [vmem:[%s15174_s25 + $0x90] sm:$0xf] }
  0x4a   : > { %1221 = vperm.xlu1 %14846, %v573_v30   ;;  %1657 = vmatpush.bf16.msrb.mxu1 %v10926_v47  ;;  %v11106_v30 = vor.u32 %v14277_v27, %v11103_v28  ;;  %v14122_v37 = vld [vmem:[%s15174_s25 + $0x94] sm:$0xf0]  ;;  %v577_v0 = vld [vmem:[%s20776_s2 + $0x88] sm:$0xff] }
  0x4b   : > { %1231 = vperm.xlu0 %14845, %v575_v52   ;;  %v579_v41 = vld [vmem:[%s20776_s2 + $0x98] sm:$0xff]  ;;  %v10638_v45 = vor.u32 %v14122_v37, %v10637_v36 }
  0x4c   : > { %1211 = vperm.xlu2 %14847, %v571_v46   ;;  %1717 = vmatpush.bf16.msrb.mxu2 %v10858_v59  ;;  %v14278_v56 = vld [vmem:[%s20782_s8 + $0x74] sm:$0xf0]  ;;  %v11133_v59 = vld [vmem:[%s20782_s8 + $0xb0] sm:$0xf] }
  0x4d   : > { %1599 = vmatpush.bf16.msrb.mxu0 %v10854_v2  ;;  %v14286_v60 = vld [vmem:[%s20782_s8 + $0xb4] sm:$0xf0] }
  0x4e   : > { %896 = vmatmul.bf16.gmra.mxu0 %v10582_v33  ;;  %1658 = vmatpush.bf16.msrb.mxu1 %v10918_v12  ;;  %v11134_v63 = vor.u32 %v14286_v60, %v11133_v59 }
  0x4f   : > { %955 = vmatmul.bf16.gmra.mxu1 %v10586_v34  ;;  %1014 = vmatmul.bf16.gmra.mxu2 %v10582_v33  ;;  %v10927_v33 = vld [vmem:[%s20778_s4 + $0x98] sm:$0xf0] }
  0x50   : > { %1073 = vmatmul.bf16.gmra.mxu3 %v10586_v34  ;;  %v10930_v34 = vor.u32 %v14193_v32, %v10927_v33  ;;  %v11135_v32 = vld [vmem:[%s20782_s8 + $0xb8] sm:$0xf0]  ;;  %v578_v33 = vld [vmem:[%s20776_s2 + $0x90] sm:$0xff]  ;;  %2372 = vmatpush.bf16.msra.mxu2 %v11106_v30 }
  0x51   : > { %v11138_v38 = vor.u32 %v14285_v29, %v11135_v32 }
  0x52   : > { %1775 = vmatpush.bf16.msrb.mxu3 %v10930_v34  ;;  %1236 = vperm.xlu1 %14846, %v576_v3  }
  0x53   : > { %1246 = vperm.xlu0 %14845, %v578_v33   ;;  %2335 = vmatpush.bf16.msra.mxu1 %v11134_v63 }
  0x54   : > { %1226 = vperm.xlu2 %14847, %v574_v15   ;;  %v14124_v15 = vld [vmem:[%s15510_s22 + $0x4] sm:$0xf0] }
  0x56   : > { %1776 = vmatpush.bf16.msrb.mxu3 %v10922_v1 }
  0x5a   : > { %2417 = vmatpush.bf16.msra.mxu3 %v11138_v38  ;;  %1251 = vperm.xlu1 %14846, %v579_v41  }
  0x5c   : > { %1241 = vperm.xlu2 %14847, %v577_v0   ;;  %v10783_v0 = vld [vmem:[%s15510_s22 + $0x18] sm:$0xf0] }
  0x5e   : > { %901 = vmatmul.bf16.gmra.mxu0 %v10590_v48 }
  0x5f   : > { %960 = vmatmul.bf16.gmra.mxu1 %v10594_v49  ;;  %1019 = vmatmul.bf16.gmra.mxu2 %v10590_v48  ;;  %v10621_v48 = vld [vmem:[%s15174_s25 + $0x70] sm:$0xf] }
  0x60   : > { %1078 = vmatmul.bf16.gmra.mxu3 %v10594_v49  ;;  %v14118_v49 = vld [vmem:[%s15174_s25 + $0x74] sm:$0xf0] }
  0x61   : > { %v10622_v53 = vor.u32 %v14118_v49, %v10621_v48 }
  0x6e   : > { %906 = vmatmul.bf16.gmra.mxu0 %v10598_v4 }
  0x6f   : > { %965 = vmatmul.bf16.gmra.mxu1 %v10602_v5  ;;  %1024 = vmatmul.bf16.gmra.mxu2 %v10598_v4  ;;  %v15437_v4 = vperm.slane %v612_v55, 0  ;;  %v11101_v55 = vld [vmem:[%s20782_s8 + $0x70] sm:$0xf] }
  0x70   : > { %1083 = vmatmul.bf16.gmra.mxu3 %v10602_v5  ;;  %v14119_v5 = vld [vmem:[%s15174_s25 + $0x84] sm:$0xf]  ;;  %v11102_v58 = vor.u32 %v14278_v56, %v11101_v55 }
  0x71   : > { %v10634_v11 = vor.u32 %v14119_v5, %v10631_v6 }
  0x72   : > { %2290 = vmatpush.bf16.msra.mxu0 %v11102_v58  ;;  %v10781_v58 = vld [vmem:[%s15510_s22 + $0x10] sm:$0xf] }
  0x7e   : > { %911 = vmatmul.bf16.gmra.mxu0 %v10606_v24 }
  0x7f   : > { %970 = vmatmul.bf16.gmra.mxu1 %v10610_v25  ;;  %1029 = vmatmul.bf16.gmra.mxu2 %v10606_v24 }
  0x80   : > { %1088 = vmatmul.bf16.gmra.mxu3 %v10610_v25 }
  0x8e   : > { %916 = vmatmul.bf16.gmra.mxu0 %v10614_v39 }
  0x8f   : > { %975 = vmatmul.bf16.gmra.mxu1 %v10618_v40  ;;  %1034 = vmatmul.bf16.gmra.mxu2 %v10614_v39  ;;  %v14121_v39 = vld [vmem:[%s15174_s25 + $0x94] sm:$0xf] }
  0x90   : > { %1093 = vmatmul.bf16.gmra.mxu3 %v10618_v40  ;;  %v10639_v40 = vld [vmem:[%s15174_s25 + $0x98] sm:$0xf0]  ;;  %s20686_s25 = scalar_lea.vmem %s20785_s11, %s14101_s15 }
  0x91   : > { %v10642_v50 = vor.u32 %v14121_v39, %v10639_v40  ;;  %v11093_v39 = vld [vmem:[%s20782_s8 + $0x60] sm:$0xf]  ;;  %v14276_v40 = vld [vmem:[%s20782_s8 + $0x64] sm:$0xf0] }
  0x95   : > { %v15454_v23 = vpop.permute.xlu0 %1156 }
  0x9d   : > { %v15491_v57 = vpop.permute.xlu0 %1161 }
  0x9e   : > { %921 = vmatmul.bf16.gmra.mxu0 %v10622_v53 }
  0x9f   : > { %980 = vmatmul.bf16.gmra.mxu1 %v10626_v54  ;;  %1039 = vmatmul.bf16.gmra.mxu2 %v10622_v53 }
  0xa0   : > { %1098 = vmatmul.bf16.gmra.mxu3 %v10626_v54 }
  0xab   : > { %v887_v10 = vpop.f32.mrf.mxu0 }
  0xac   : > { %v888_v13 = vadd.f32 %v887_v10, %v15437_v4  ;;  %v946_v14 = vpop.f32.mrf.mxu1  ;;  %v15512_v10 = vpop.permute.xlu1 %1166 }
  0xae   : > { %926 = vmatmul.bf16.gmra.mxu0 %v10630_v7  ;;  %v947_v16 = vadd.f32 %v946_v14, %v888_v13  ;;  %v10773_v14 = vld [vmem:[%s15510_s22] sm:$0xf] }
  0xaf   : > { %985 = vmatmul.bf16.gmra.mxu1 %v10634_v11  ;;  %1044 = vmatmul.bf16.gmra.mxu2 %v10630_v7  ;;  %v10774_v28 = vor.u32 %v14124_v15, %v10773_v14 }
  0xb0   : > { %1103 = vmatmul.bf16.gmra.mxu3 %v10634_v11  ;;  %v1114_v19 = vmax.f32 %v947_v16, 0.0 }
  0xb2   : > { %v1005_v18 = vpop.f32.mrf.mxu2  ;;  %v1254_v34 = vmul.f32 %v15454_v23, %v1114_v19  ;;  %v14275_v19 = vld [vmem:[%s20782_s8 + $0x64] sm:$0xf] }
  0xb3   : > { %v1006_v20 = vadd.f32 %v1005_v18, %v15451_v17  ;;  %v1064_v21 = vpop.f32.mrf.mxu3  ;;  %v889_v22 = vpop.f32.mrf.mxu0 }
  0xb4   : > { %v948_v24 = vpop.f32.mrf.mxu1  ;;  %v890_v26 = vadd.f32 %v889_v22, %v15437_v4  ;;  %v10775_v22 = vld [vmem:[%s15510_s22 + $0x8] sm:$0xf0]  ;;  %v15539_v41 = vpop.permute.xlu1 %1171 }
  0xb5   : > { %v1065_v25 = vadd.f32 %v1064_v21, %v1006_v20  ;;  %v11095_v20 = vld [vmem:[%s20782_s8 + $0x68] sm:$0xf0]  ;;  %v14123_v21 = vld [vmem:[%s15510_s22 + $0x4] sm:$0xf] }
  0xb6   : > { %v949_v43 = vadd.f32 %v948_v24, %v890_v26  ;;  %v11098_v24 = vor.u32 %v14275_v19, %v11095_v20 }
  0xb7   : > { %v1115_v35 = vmax.f32 %v1065_v25, 0.0 }
  0xb8   : > { %v1116_v53 = vmax.f32 %v949_v43, 0.0  ;;  %2373 = vmatpush.bf16.msra.mxu2 %v11098_v24 }
  0xb9   : > { %v1255_v42 = vmul.f32 %v15454_v23, %v1115_v35 }
  0xba   : > { %v1007_v44 = vpop.f32.mrf.mxu2  ;;  %v1256_v1 = vmul.f32 %v15491_v57, %v1116_v53  ;;  %v15544_v53 = vpop.permute.xlu2 %1176 }
  0xbb   : > { %v1908_v46 = vpack.c.bf16 %v1255_v42, %v1254_v34  ;;  %v1008_v47 = vadd.f32 %v1007_v44, %v15451_v17  ;;  %v1066_v48 = vpop.f32.mrf.mxu3  ;;  %v892_v49 = vpop.f32.mrf.mxu0  ;;  %v10778_v34 = vor.u32 %v14123_v21, %v10775_v22  ;;  %v11094_v42 = vor.u32 %v14276_v40, %v11093_v39 }
  0xbc   : > { %v893_v51 = vadd.f32 %v892_v49, %v15437_v4  ;;  %v951_v52 = vpop.f32.mrf.mxu1 }
  0xbd   : > { %1931 = vst.msk [vmem:[#allocation2] sm:$0xff] %vm15157_vm2, %v1908_v46  ;;  %v1067_v54 = vadd.f32 %v1066_v48, %v1008_v47  ;;  %2291 = vmatpush.bf16.msra.mxu0 %v11094_v42 }
  0xbe   : > { %931 = vmatmul.bf16.gmra.mxu0 %v10638_v45  ;;  %v952_v62 = vadd.f32 %v951_v52, %v893_v51 }
  0xbf   : > { %v1117_v61 = vmax.f32 %v1067_v54, 0.0  ;;  %990 = vmatmul.bf16.gmra.mxu1 %v10642_v50  ;;  %1049 = vmatmul.bf16.gmra.mxu2 %v10638_v45 }
  0xc0   : > { %1108 = vmatmul.bf16.gmra.mxu3 %v10642_v50  ;;  %v1118_v6 = vmax.f32 %v952_v62, 0.0  ;;  %v14125_v62 = vld [vmem:[%s15510_s22 + $0x14] sm:$0xf] }
  0xc1   : > { %v1257_v2 = vmul.f32 %v15491_v57, %v1117_v61  ;;  %v14126_v61 = vld [vmem:[%s15510_s22 + $0x14] sm:$0xf0] }
  0xc2   : > { %v1010_v3 = vpop.f32.mrf.mxu2  ;;  %v1258_v16 = vmul.f32 %v15512_v10, %v1118_v6 }
  0xc3   : > { %v1909_v5 = vpack.c.bf16 %v1257_v2, %v1256_v1  ;;  %v1011_v7 = vadd.f32 %v1010_v3, %v15451_v17  ;;  %v1069_v8 = vpop.f32.mrf.mxu3  ;;  %v894_v9 = vpop.f32.mrf.mxu0  ;;  %v14273_v1 = vld [vmem:[%s20782_s8 + $0x54] sm:$0xf]  ;;  %v11087_v2 = vld [vmem:[%s20782_s8 + $0x58] sm:$0xf0] }
  0xc4   : > { %v953_v11 = vpop.f32.mrf.mxu1  ;;  %v895_v13 = vadd.f32 %v894_v9, %v15437_v4  ;;  %v11090_v6 = vor.u32 %v14273_v1, %v11087_v2  ;;  %v10782_v9 = vor.u32 %v14126_v61, %v10781_v58  ;;  %v11125_v2 = vld [vmem:[%s20782_s8 + $0xa0] sm:$0xf] }
  0xc5   : > { %1932 = vst.msk [vmem:[#allocation2 + $0x8] sm:$0xff] %vm15157_vm2, %v1909_v5  ;;  %v1070_v12 = vadd.f32 %v1069_v8, %v1011_v7  ;;  %v3977_v7 = vld [vmem:[#allocation2] sm:$0xee] }
  0xc6   : > { %v954_v26 = vadd.f32 %v953_v11, %v895_v13  ;;  %2374 = vmatpush.bf16.msra.mxu2 %v11090_v6  ;;  %v4386_v24 = vunpack.c.l.b16 %v3977_v7 }
  0xc7   : > { %v1119_v18 = vmax.f32 %v1070_v12, 0.0 }
  0xc8   : > { %v1120_v37 = vmax.f32 %v954_v26, 0.0 }
  0xc9   : > { %v1259_v25 = vmul.f32 %v15512_v10, %v1119_v18  ;;  %v10786_v18 = vor.u32 %v14125_v62, %v10783_v0  ;;  %v11085_v62 = vld [vmem:[%s20782_s8 + $0x50] sm:$0xf]  ;;  %v14274_v0 = vld [vmem:[%s20782_s8 + $0x54] sm:$0xf0] }
  0xca   : > { %v1012_v27 = vpop.f32.mrf.mxu2  ;;  %v1260_v45 = vmul.f32 %v15539_v41, %v1120_v37  ;;  %v11086_v1 = vor.u32 %v14274_v0, %v11085_v62 }
  0xcb   : > { %v1910_v29 = vpack.c.bf16 %v1259_v25, %v1258_v16  ;;  %v1013_v30 = vadd.f32 %v1012_v27, %v15451_v17  ;;  %v1071_v32 = vpop.f32.mrf.mxu3  ;;  %v897_v33 = vpop.f32.mrf.mxu0  ;;  %v4387_v25 = vunpack.c.h.b16 %v3977_v7  ;;  %v10789_v7 = vld [vmem:[%s15510_s22 + $0x20] sm:$0xf] }
  0xcc   : > { %v898_v35 = vadd.f32 %v897_v33, %v15437_v4  ;;  %v956_v36 = vpop.f32.mrf.mxu1  ;;  %v15553_v63 = vld [vmem:[#allocation2 + $0x8] sm:$0xff]  ;;  %2292 = vmatpush.bf16.msra.mxu0 %v11086_v1 }
  0xcd   : > { %1933 = vst.msk [vmem:[#allocation2 + $0x10] sm:$0xff] %vm15157_vm2, %v1910_v29  ;;  %v1072_v38 = vadd.f32 %v1071_v32, %v1013_v30  ;;  %v20789_v11 = vunpack.c.l.b16 %v15553_v63  ;;  %v20788_v12 = vunpack.c.h.b16 %v15553_v63  ;;  %v11127_v29 = vld [vmem:[%s20782_s8 + $0xa8] sm:$0xf0]  ;;  %v15577_v32 = vpop.permute.xlu2 %1181 }
  0xce   : > { %1600 = vmatmul.bf16.vlgmr.msrb.gmra.mxu0 %v10774_v28  ;;  %v957_v44 = vadd.f32 %v956_v36, %v898_v35 }
  0xcf   : > { %v1121_v43 = vmax.f32 %v1072_v38, 0.0  ;;  %1659 = vmatmul.bf16.vlgmr.msrb.gmra.mxu1 %v10778_v34  ;;  %1718 = vmatmul.bf16.vlgmr.msrb.gmra.mxu2 %v10774_v28  ;;  %v14283_v28 = vld [vmem:[%s20782_s8 + $0xa4] sm:$0xf]  ;;  %v4389_v35 = vpack.c.b16 %v20788_v12, %v4387_v25 }
  0xd0   : > { %1777 = vmatmul.bf16.vlgmr.msrb.gmra.mxu3 %v10778_v34  ;;  %v1122_v49 = vmax.f32 %v957_v44, 0.0  ;;  %v11130_v33 = vor.u32 %v14283_v28, %v11127_v29  ;;  %v4388_v34 = vpack.c.b16 %v20789_v11, %v4386_v24  ;;  %v14267_v11 = vld [vmem:[%s20782_s8 + $0x24] sm:$0xf] }
  0xd1   : > { %v1261_v46 = vmul.f32 %v15539_v41, %v1121_v43 }
  0xd2   : > { %v1015_v47 = vpop.f32.mrf.mxu2  ;;  %v1262_v59 = vmul.f32 %v15544_v53, %v1122_v49  ;;  %2418 = vmatpush.bf16.msra.mxu3 %v11130_v33 }
  0xd3   : > { %v1911_v48 = vpack.c.bf16 %v1261_v46, %v1260_v45  ;;  %v1016_v50 = vadd.f32 %v1015_v47, %v15451_v17  ;;  %v1074_v51 = vpop.f32.mrf.mxu3  ;;  %v899_v52 = vpop.f32.mrf.mxu0  ;;  %v4390_v46 = vrot.slane %v4388_v34, 1  ;;  %v4393_v47 = vrot.slane %v4389_v35, 1 }
  0xd4   : > { %v958_v54 = vpop.f32.mrf.mxu1  ;;  %v900_v56 = vadd.f32 %v899_v52, %v15437_v4  ;;  %v11549_v21 = vld [vmem:[#allocation2 + $0x10] sm:$0xf]  ;;  %v14287_v38 = vld [vmem:[#allocation2 + $0x14] sm:$0xf] }
  0xd5   : > { %1934 = vst.msk [vmem:[#allocation2 + $0x18] sm:$0xff] %vm15157_vm2, %v1911_v48  ;;  %v1075_v55 = vadd.f32 %v1074_v51, %v1016_v50 }
  0xd6   : > { %v959_v5 = vadd.f32 %v958_v54, %v900_v56  ;;  %v15590_v56 = vpop.permute.xlu0 %1186 }
  0xd7   : > { %v1123_v60 = vmax.f32 %v1075_v55, 0.0 }
  0xd8   : > { %v1124_v26 = vmax.f32 %v959_v5, 0.0 }
  0xd9   : > { %v1263_v3 = vmul.f32 %v15544_v53, %v1123_v60 }
  0xda   : > { %v1017_v8 = vpop.f32.mrf.mxu2  ;;  %v1264_v42 = vmul.f32 %v15577_v32, %v1124_v26 }
  0xdb   : > { %v1912_v13 = vpack.c.bf16 %v1263_v3, %v1262_v59  ;;  %v1018_v14 = vadd.f32 %v1017_v8, %v15451_v17  ;;  %v1076_v15 = vpop.f32.mrf.mxu3  ;;  %v902_v16 = vpop.f32.mrf.mxu0  ;;  %v14284_v3 = vld [vmem:[%s20782_s8 + $0xa4] sm:$0xf0] }
  0xdc   : > { %v903_v19 = vadd.f32 %v902_v16, %v15437_v4  ;;  %v961_v20 = vpop.f32.mrf.mxu1  ;;  %v14288_v22 = vld [vmem:[#allocation2 + $0x14] sm:$0xf0]  ;;  %v11551_v39 = vld [vmem:[#allocation2 + $0x18] sm:$0xf0]  ;;  %v14128_v8 = vld [vmem:[%s15510_s22 + $0x24] sm:$0xf0] }
  0xdd   : > { %1935 = vst.msk [vmem:[#allocation2 + $0x20] sm:$0xff] %vm15157_vm2, %v1912_v13  ;;  %v1077_v27 = vadd.f32 %v1076_v15, %v1018_v14  ;;  %v15575_v30 = vor.u32 %v14288_v22, %v11549_v21  ;;  %v15583_v40 = vor.u32 %v14287_v38, %v11551_v39  ;;  %v14127_v13 = vld [vmem:[%s15510_s22 + $0x24] sm:$0xf]  ;;  %v10791_v14 = vld [vmem:[%s15510_s22 + $0x28] sm:$0xf0] }
  0xde   : > { %1605 = vmatmul.bf16.gmra.mxu0 %v10782_v9  ;;  %v962_v37 = vadd.f32 %v961_v20, %v903_v19  ;;  %v10790_v19 = vor.u32 %v14128_v8, %v10789_v7  ;;  %v10794_v25 = vor.u32 %v14127_v13, %v10791_v14 }
  0xdf   : > { %v1125_v36 = vmax.f32 %v1077_v27, 0.0  ;;  %1664 = vmatmul.bf16.gmra.mxu1 %v10786_v18  ;;  %1723 = vmatmul.bf16.gmra.mxu2 %v10782_v9  ;;  %v4391_v44 = vrot.slane %v15575_v30, 1  ;;  %v4394_v48 = vrot.slane %v15583_v40, 1  ;;  %v11126_v9 = vor.u32 %v14284_v3, %v11125_v2 }
  0xe0   : > { %1782 = vmatmul.bf16.gmra.mxu3 %v10786_v18  ;;  %v1126_v50 = vmax.f32 %v962_v37, 0.0 }
  0xe1   : > { %v1265_v43 = vmul.f32 %v15577_v32, %v1125_v36  ;;  %v15595_v58 = vsel %vm4034_vm3, %v4390_v46, %v4391_v44  ;;  %v15600_v59 = vsel %vm4034_vm3, %v4393_v47, %v4394_v48  ;;  %2336 = vmatpush.bf16.msra.mxu1 %v11126_v9  ;;  %v15629_v36 = vpop.permute.xlu1 %1191 }
  0xe2   : > { %v1020_v45 = vpop.f32.mrf.mxu2  ;;  %21016 = vst [vmem:[#allocation4_spill] sm:$0xff] %v15595_v58  ;;  %v1266_v6 = vmul.f32 %v15590_v56, %v1126_v50  ;;  %v6756_v50 = vld [vmem:[#allocation2 + $0x10] sm:$0xee] }
  0xe3   : > { %v1913_v49 = vpack.c.bf16 %v1265_v43, %v1264_v42  ;;  %v1021_v51 = vadd.f32 %v1020_v45, %v15451_v17  ;;  %v1079_v52 = vpop.f32.mrf.mxu3  ;;  %v904_v54 = vpop.f32.mrf.mxu0  ;;  %21017 = vst [vmem:[#allocation5_spill] sm:$0xff] %v15600_v59  ;;  %v15633_v45 = vld [vmem:[#allocation2 + $0x18] sm:$0xff]  ;;  %v7164_v13 = vunpack.c.l.b16 %v6756_v50 }
  0xe4   : > { %v963_v55 = vpop.f32.mrf.mxu1  ;;  %v905_v61 = vadd.f32 %v904_v54, %v15437_v4  ;;  %v11557_v28 = vld [vmem:[#allocation2 + $0x20] sm:$0xf]  ;;  %v14289_v37 = vld [vmem:[#allocation2 + $0x24] sm:$0xf]  ;;  %21018 = vst [vmem:[#allocation6_spill] sm:$0xff] %v15633_v45  ;;  %v20786_v8 = vunpack.c.h.b16 %v15633_v45 }
  0xe5   : > { %1936 = vst.msk [vmem:[#allocation2 + $0x28] sm:$0xff] %vm15157_vm2, %v1913_v49  ;;  %v1080_v60 = vadd.f32 %v1079_v52, %v1021_v51  ;;  %v12605_v7 = vld [vmem:[#allocation2 + $0x20] sm:$0xf]  ;;  %v14491_v9 = vld [vmem:[#allocation2 + $0x24] sm:$0xf] }
  0xe6   : > { %v964_v15 = vadd.f32 %v963_v55, %v905_v61 }
  0xe7   : > { %v1127_v5 = vmax.f32 %v1080_v60, 0.0  ;;  %v20787_v60 = vunpack.c.l.b16 %v15633_v45  ;;  %v10823_v45 = vld [vmem:[%s15510_s22 + $0x68] sm:$0xf0] }
  0xe8   : > { %v1128_v33 = vmax.f32 %v964_v15, 0.0 }
  0xe9   : > { %v1267_v16 = vmul.f32 %v15590_v56, %v1127_v5 }
  0xea   : > { %v1022_v18 = vpop.f32.mrf.mxu2  ;;  %v1268_v47 = vmul.f32 %v15629_v36, %v1128_v33 }
  0xeb   : > { %v1914_v20 = vpack.c.bf16 %v1267_v16, %v1266_v6  ;;  %v1023_v21 = vadd.f32 %v1022_v18, %v15451_v17  ;;  %v1081_v22 = vpop.f32.mrf.mxu3  ;;  %v907_v24 = vpop.f32.mrf.mxu0  ;;  %v11079_v16 = vld [vmem:[%s20782_s8 + $0x48] sm:$0xf0] }
  0xec   : > { %v908_v26 = vadd.f32 %v907_v24, %v15437_v4  ;;  %v966_v27 = vpop.f32.mrf.mxu1  ;;  %v14290_v29 = vld [vmem:[#allocation2 + $0x24] sm:$0xf0]  ;;  %v11559_v38 = vld [vmem:[#allocation2 + $0x28] sm:$0xf0]  ;;  %v15648_v6 = vpop.permute.xlu2 %1196  ;;  %v7165_v24 = vunpack.c.h.b16 %v6756_v50 }
  0xed   : > { %1937 = vst.msk [vmem:[#allocation2 + $0x30] sm:$0xff] %vm15157_vm2, %v1914_v20  ;;  %v1082_v34 = vadd.f32 %v1081_v22, %v1023_v21  ;;  %v15627_v35 = vor.u32 %v14290_v29, %v11557_v28  ;;  %v15631_v43 = vor.u32 %v14289_v37, %v11559_v38  ;;  %v14492_v55 = vld [vmem:[#allocation2 + $0x24] sm:$0xf0]  ;;  %v12607_v3 = vld [vmem:[#allocation2 + $0x28] sm:$0xf0] }
  0xee   : > { %1610 = vmatmul.bf16.gmra.mxu0 %v10790_v19  ;;  %v967_v42 = vadd.f32 %v966_v27, %v908_v26  ;;  %v15667_v18 = vor.u32 %v14492_v55, %v12605_v7  ;;  %v11077_v20 = vld [vmem:[%s20782_s8 + $0x40] sm:$0xf]  ;;  %v14272_v21 = vld [vmem:[%s20782_s8 + $0x44] sm:$0xf0]  ;;  %v15675_v22 = vor.u32 %v14491_v9, %v12607_v3  ;;  %v10797_v28 = vld [vmem:[%s15510_s22 + $0x30] sm:$0xf]  ;;  %v7167_v38 = vpack.c.b16 %v20786_v8, %v7165_v24 }
  0xef   : > { %v1129_v39 = vmax.f32 %v1082_v34, 0.0  ;;  %1669 = vmatmul.bf16.gmra.mxu1 %v10794_v25  ;;  %1728 = vmatmul.bf16.gmra.mxu2 %v10790_v19  ;;  %v4396_v46 = vrot.slane %v15627_v35, 1  ;;  %v4398_v54 = vrot.slane %v15631_v43, 1  ;;  %v14130_v29 = vld [vmem:[%s15510_s22 + $0x34] sm:$0xf0]  ;;  %v11078_v33 = vor.u32 %v14272_v21, %v11077_v20 }
  0xf0   : > { %1787 = vmatmul.bf16.gmra.mxu3 %v10794_v25  ;;  %v1130_v62 = vmax.f32 %v967_v42, 0.0  ;;  %21021 = vst [vmem:[#allocation9_spill] sm:$0xff] %v15667_v18  ;;  %v7166_v25 = vpack.c.b16 %v20787_v60, %v7164_v13  ;;  %v14129_v34 = vld [vmem:[%s15510_s22 + $0x34] sm:$0xf]  ;;  %v10799_v37 = vld [vmem:[%s15510_s22 + $0x38] sm:$0xf0]  ;;  %v10798_v50 = vor.u32 %v14130_v29, %v10797_v28 }
  0xf1   : > { %v1269_v49 = vmul.f32 %v15629_v36, %v1129_v39  ;;  %v15643_v52 = vsel %vm4034_vm3, %v4391_v44, %v4396_v46  ;;  %v15655_v44 = vsel %vm4034_vm3, %v4394_v48, %v4398_v54  ;;  %v14271_v48 = vld [vmem:[%s20782_s8 + $0x44] sm:$0xf]  ;;  %21022 = vst [vmem:[#allocation10_spill] sm:$0xff] %v15675_v22  ;;  %2293 = vmatpush.bf16.msra.mxu0 %v11078_v33  ;;  %v20792_v55 = vrot.slane %v15675_v22, 1  ;;  %v14134_v8 = vld [vmem:[%s15510_s22 + $0x54] sm:$0xf0] }
  0xf2   : > { %v1025_v51 = vpop.f32.mrf.mxu2  ;;  %21019 = vst [vmem:[#allocation7_spill] sm:$0xff] %v15643_v52  ;;  %v11082_v19 = vor.u32 %v14271_v48, %v11079_v16  ;;  %v1270_v27 = vmul.f32 %v15648_v6, %v1130_v62 }
  0xf3   : > { %v1915_v61 = vpack.c.bf16 %v1269_v49, %v1268_v47  ;;  %v1026_v0 = vadd.f32 %v1025_v51, %v15451_v17  ;;  %v1084_v1 = vpop.f32.mrf.mxu3  ;;  %v909_v2 = vpop.f32.mrf.mxu0  ;;  %21020 = vst [vmem:[#allocation8_spill] sm:$0xff] %v15655_v44  ;;  %v20793_v47 = vrot.slane %v15667_v18, 1  ;;  %v7168_v51 = vrot.slane %v7166_v25, 1 }
  0xf4   : > { %v968_v5 = vpop.f32.mrf.mxu1  ;;  %v910_v15 = vadd.f32 %v909_v2, %v15437_v4  ;;  %2375 = vmatpush.bf16.msra.mxu2 %v11082_v19  ;;  %v10802_v2 = vor.u32 %v14129_v34, %v10799_v37  ;;  %v15700_v19 = vpop.permute.xlu0 %1201  ;;  %v14291_v20 = vld [vmem:[#allocation2 + $0x34] sm:$0xf] }
  0xf5   : > { %1938 = vst.msk [vmem:[#allocation2 + $0x38] sm:$0xff] %vm15157_vm2, %v1915_v61  ;;  %v1085_v14 = vadd.f32 %v1084_v1, %v1026_v0  ;;  %v15694_v13 = vsel %vm4034_vm3, %v7168_v51, %v20793_v47 }
  0xf6   : > { %v969_v39 = vadd.f32 %v968_v5, %v910_v15  ;;  %v11565_v5 = vld [vmem:[#allocation2 + $0x30] sm:$0xf]  ;;  %21023 = vst [vmem:[#allocation11_spill] sm:$0xff] %v15694_v13  ;;  %v10821_v13 = vld [vmem:[%s15510_s22 + $0x60] sm:$0xf] }
  0xf7   : > { %v1131_v26 = vmax.f32 %v1085_v14, 0.0  ;;  %v7171_v14 = vrot.slane %v7167_v38, 1 }
  0xf8   : > { %v1132_v15 = vmax.f32 %v969_v39, 0.0 }
  0xf9   : > { %v1271_v42 = vmul.f32 %v15648_v6, %v1131_v26  ;;  %v15705_v24 = vsel %vm4034_vm3, %v7171_v14, %v20792_v55 }
  0xfa   : > { %v1027_v49 = vpop.f32.mrf.mxu2  ;;  %21024 = vst [vmem:[#allocation12_spill] sm:$0xff] %v15705_v24  ;;  %v1272_v29 = vmul.f32 %v15700_v19, %v1132_v15 }
  0xfb   : > { %v1916_v61 = vpack.c.bf16 %v1271_v42, %v1270_v27  ;;  %v1028_v62 = vadd.f32 %v1027_v49, %v15451_v17  ;;  %v1086_v0 = vpop.f32.mrf.mxu3  ;;  %v912_v1 = vpop.f32.mrf.mxu0 }
  0xfc   : > { %v913_v3 = vadd.f32 %v912_v1, %v15437_v4  ;;  %v971_v7 = vpop.f32.mrf.mxu1  ;;  %v14292_v9 = vld [vmem:[#allocation2 + $0x34] sm:$0xf0]  ;;  %v11567_v21 = vld [vmem:[#allocation2 + $0x38] sm:$0xf0] }
  0xfd   : > { %1939 = vst.msk [vmem:[#allocation2 + $0x40] sm:$0xff] %vm15157_vm2, %v1916_v61  ;;  %v1087_v48 = vadd.f32 %v1086_v0, %v1028_v62  ;;  %v15698_v16 = vor.u32 %v14292_v9, %v11565_v5  ;;  %v15707_v27 = vor.u32 %v14291_v20, %v11567_v21  ;;  %v15721_v62 = vpop.permute.xlu1 %1206  ;;  %v11119_v9 = vld [vmem:[%s20782_s8 + $0x98] sm:$0xf0]  ;;  %v14131_v20 = vld [vmem:[%s15510_s22 + $0x44] sm:$0xf] }
  0xfe   : > { %1615 = vmatmul.bf16.gmra.mxu0 %v10798_v50  ;;  %v972_v26 = vadd.f32 %v971_v7, %v913_v3  ;;  %v11071_v3 = vld [vmem:[%s20782_s8 + $0x38] sm:$0xf0]  ;;  %v10805_v7 = vld [vmem:[%s15510_s22 + $0x40] sm:$0xf] }
  0xff   : > { %v1133_v25 = vmax.f32 %v1087_v48, 0.0  ;;  %1674 = vmatmul.bf16.gmra.mxu1 %v10802_v2  ;;  %1733 = vmatmul.bf16.gmra.mxu2 %v10798_v50  ;;  %v4400_v28 = vrot.slane %v15698_v16, 1  ;;  %v4402_v38 = vrot.slane %v15707_v27, 1  ;;  %v14132_v48 = vld [vmem:[%s15510_s22 + $0x44] sm:$0xf0] }
 0x100   : > { %1792 = vmatmul.bf16.gmra.mxu3 %v10802_v2  ;;  %v1134_v42 = vmax.f32 %v972_v26, 0.0  ;;  %v14269_v2 = vld [vmem:[%s20782_s8 + $0x34] sm:$0xf]  ;;  %v11069_v26 = vld [vmem:[%s20782_s8 + $0x30] sm:$0xf] }
 0x101   : > { %v1273_v33 = vmul.f32 %v15700_v19, %v1133_v25  ;;  %v15717_v37 = vsel %vm4034_vm3, %v4396_v46, %v4400_v28  ;;  %v15728_v46 = vsel %vm4034_vm3, %v4398_v54, %v4402_v38  ;;  %v11074_v5 = vor.u32 %v14269_v2, %v11071_v3  ;;  %v14281_v54 = vld [vmem:[%s20782_s8 + $0x94] sm:$0xf]  ;;  %v10807_v25 = vld [vmem:[%s15510_s22 + $0x48] sm:$0xf0] }
 0x102   : > { %v1030_v34 = vpop.f32.mrf.mxu2  ;;  %21025 = vst [vmem:[#allocation13_spill] sm:$0xff] %v15717_v37  ;;  %v1274_v15 = vmul.f32 %v15721_v62, %v1134_v42  ;;  %v11122_v21 = vor.u32 %v14281_v54, %v11119_v9  ;;  %v11117_v42 = vld [vmem:[%s20782_s8 + $0x90] sm:$0xf] }
 0x103   : > { %v1917_v39 = vpack.c.bf16 %v1273_v33, %v1272_v29  ;;  %v1031_v49 = vadd.f32 %v1030_v34, %v15451_v17  ;;  %v1089_v50 = vpop.f32.mrf.mxu3  ;;  %v914_v51 = vpop.f32.mrf.mxu0  ;;  %21026 = vst [vmem:[#allocation14_spill] sm:$0xff] %v15728_v46  ;;  %2376 = vmatpush.bf16.msra.mxu2 %v11074_v5  ;;  %v14270_v29 = vld [vmem:[%s20782_s8 + $0x34] sm:$0xf0] }
 0x104   : > { %v973_v61 = vpop.f32.mrf.mxu1  ;;  %v915_v1 = vadd.f32 %v914_v51, %v15437_v4  ;;  %2419 = vmatpush.bf16.msra.mxu3 %v11122_v21  ;;  %v10806_v51 = vor.u32 %v14132_v48, %v10805_v7  ;;  %v14293_v48 = vld [vmem:[#allocation2 + $0x44] sm:$0xf] }
 0x105   : > { %1940 = vst.msk [vmem:[#allocation2 + $0x48] sm:$0xff] %vm15157_vm2, %v1917_v39  ;;  %v1090_v0 = vadd.f32 %v1089_v50, %v1031_v49  ;;  %v11070_v39 = vor.u32 %v14270_v29, %v11069_v26  ;;  %v14282_v49 = vld [vmem:[%s20782_s8 + $0x94] sm:$0xf0] }
 0x106   : > { %v974_v33 = vadd.f32 %v973_v61, %v915_v1  ;;  %v10810_v1 = vor.u32 %v14131_v20, %v10807_v25 }
 0x107   : > { %v1135_v14 = vmax.f32 %v1090_v0, 0.0  ;;  %v11118_v0 = vor.u32 %v14282_v49, %v11117_v42  ;;  %2294 = vmatpush.bf16.msra.mxu0 %v11070_v39 }
 0x108   : > { %v1136_v26 = vmax.f32 %v974_v33, 0.0 }
 0x109   : > { %v1275_v34 = vmul.f32 %v15721_v62, %v1135_v14  ;;  %2337 = vmatpush.bf16.msra.mxu1 %v11118_v0  ;;  %v11573_v14 = vld [vmem:[#allocation2 + $0x40] sm:$0xf] }
 0x10a   : > { %v1032_v50 = vpop.f32.mrf.mxu2 }
 0x10b   : > { %v1918_v2 = vpack.c.bf16 %v1275_v34, %v1274_v15  ;;  %v1033_v3 = vadd.f32 %v1032_v50, %v15451_v17  ;;  %v1091_v5 = vpop.f32.mrf.mxu3  ;;  %v917_v61 = vpop.f32.mrf.mxu0 }
 0x10c   : > { %v918_v54 = vadd.f32 %v917_v61, %v15437_v4  ;;  %v976_v9 = vpop.f32.mrf.mxu1  ;;  %v14294_v21 = vld [vmem:[#allocation2 + $0x44] sm:$0xf0]  ;;  %v15769_v15 = vpop.permute.xlu2 %1211  ;;  %v11575_v34 = vld [vmem:[#allocation2 + $0x48] sm:$0xf0] }
 0x10d   : > { %1941 = vst.msk [vmem:[#allocation2 + $0x50] sm:$0xff] %vm15157_vm2, %v1918_v2  ;;  %v1092_v29 = vadd.f32 %v1091_v5, %v1033_v3  ;;  %v15767_v7 = vor.u32 %v14294_v21, %v11573_v14  ;;  %v15771_v39 = vor.u32 %v14293_v48, %v11575_v34  ;;  %v1276_v42 = vmul.f32 %v15769_v15, %v1136_v26  ;;  %v12615_v3 = vld [vmem:[#allocation2 + $0x38] sm:$0xf0]  ;;  %v14496_v14 = vld [vmem:[#allocation2 + $0x44] sm:$0xf0]  ;;  %v15785_v26 = vpop.permute.xlu0 %1216 }
 0x10e   : > { %1620 = vmatmul.bf16.gmra.mxu0 %v10806_v51  ;;  %v977_v25 = vadd.f32 %v976_v9, %v918_v54  ;;  %v14493_v48 = vld [vmem:[#allocation2 + $0x34] sm:$0xf] }
 0x10f   : > { %v1137_v20 = vmax.f32 %v1092_v29, 0.0  ;;  %1679 = vmatmul.bf16.gmra.mxu1 %v10810_v1  ;;  %1738 = vmatmul.bf16.gmra.mxu2 %v10806_v51  ;;  %v20791_v33 = vrot.slane %v15767_v7, 1  ;;  %v20790_v2 = vrot.slane %v15771_v39, 1  ;;  %v14494_v51 = vld [vmem:[#allocation2 + $0x34] sm:$0xf0] }
 0x110   : > { %1797 = vmatmul.bf16.gmra.mxu3 %v10810_v1  ;;  %v1138_v61 = vmax.f32 %v977_v25, 0.0  ;;  %v12613_v29 = vld [vmem:[#allocation2 + $0x30] sm:$0xf] }
 0x111   : > { %v1277_v49 = vmul.f32 %v15769_v15, %v1137_v20  ;;  %v15781_v0 = vsel %vm4034_vm3, %v4400_v28, %v20791_v33  ;;  %v15792_v28 = vsel %vm4034_vm3, %v4402_v38, %v20790_v2  ;;  %v15797_v25 = vor.u32 %v14494_v51, %v12613_v29  ;;  %v14133_v51 = vld [vmem:[%s15510_s22 + $0x54] sm:$0xf] }
 0x112   : > { %v1035_v50 = vpop.f32.mrf.mxu2  ;;  %21027 = vst [vmem:[#allocation15_spill] sm:$0xff] %v15781_v0  ;;  %v1278_v12 = vmul.f32 %v15785_v26, %v1138_v61 }
 0x113   : > { %v1919_v5 = vpack.c.bf16 %v1277_v49, %v1276_v42  ;;  %v1036_v1 = vadd.f32 %v1035_v50, %v15451_v17  ;;  %v1094_v54 = vpop.f32.mrf.mxu3  ;;  %v919_v9 = vpop.f32.mrf.mxu0  ;;  %21028 = vst [vmem:[#allocation16_spill] sm:$0xff] %v15792_v28  ;;  %v15799_v42 = vor.u32 %v14493_v48, %v12615_v3  ;;  %v12621_v49 = vld [vmem:[#allocation2 + $0x40] sm:$0xf]  ;;  %v10813_v50 = vld [vmem:[%s15510_s22 + $0x50] sm:$0xf] }
 0x114   : > { %v978_v21 = vpop.f32.mrf.mxu1  ;;  %v920_v20 = vadd.f32 %v919_v9, %v15437_v4  ;;  %21029 = vst [vmem:[#allocation17_spill] sm:$0xff] %v15797_v25  ;;  %v15803_v60 = vor.u32 %v14496_v14, %v12621_v49  ;;  %v7174_v14 = vrot.slane %v15797_v25, 1  ;;  %v10814_v61 = vor.u32 %v14134_v8, %v10813_v50  ;;  %v14497_v24 = vld [vmem:[#allocation2 + $0x54] sm:$0xf] }
 0x115   : > { %1942 = vst.msk [vmem:[#allocation2 + $0x58] sm:$0xff] %vm15157_vm2, %v1919_v5  ;;  %v1095_v34 = vadd.f32 %v1094_v54, %v1036_v1  ;;  %v11063_v5 = vld [vmem:[%s20782_s8 + $0x28] sm:$0xf0]  ;;  %v10815_v1 = vld [vmem:[%s15510_s22 + $0x58] sm:$0xf0]  ;;  %v21034_v8 = vrot.slane %v15799_v42, 1 }
 0x116   : > { %21030 = vst [vmem:[#allocation18_spill] sm:$0xff] %v15799_v42  ;;  %v11066_v3 = vor.u32 %v14267_v11, %v11063_v5  ;;  %v979_v54 = vadd.f32 %v978_v21, %v920_v20  ;;  %v10818_v47 = vor.u32 %v14133_v51, %v10815_v1  ;;  %v11581_v20 = vld [vmem:[#allocation2 + $0x50] sm:$0xf]  ;;  %v21032_v5 = vrot.slane %v15667_v18, 1  ;;  %v14135_v18 = vld [vmem:[%s15510_s22 + $0x64] sm:$0xf] }
 0x117   : > { %21031 = vst [vmem:[#allocation19_spill] sm:$0xff] %v15803_v60  ;;  %v1139_v38 = vmax.f32 %v1095_v34, 0.0  ;;  %v20794_v34 = vrot.slane %v15803_v60, 1  ;;  %v21035_v50 = vrot.slane %v15675_v22, 1  ;;  %v10826_v28 = vor.u32 %v14135_v18, %v10823_v45  ;;  %v14279_v45 = vld [vmem:[%s20782_s8 + $0x84] sm:$0xf] }
 0x118   : > { %2377 = vmatpush.bf16.msra.mxu2 %v11066_v3  ;;  %v15823_v29 = vsel %vm4034_vm3, %v21032_v5, %v7174_v14  ;;  %v11061_v3 = vld [vmem:[%s20782_s8 + $0x20] sm:$0xf]  ;;  %v15847_v5 = vpop.permute.xlu1 %1221  ;;  %v11111_v18 = vld [vmem:[%s20782_s8 + $0x88] sm:$0xf0] }
 0x119   : > { %v1279_v9 = vmul.f32 %v15785_v26, %v1139_v38  ;;  %21033 = vst [vmem:[#allocation20_spill] sm:$0xff] %v15823_v29  ;;  %v15835_v51 = vsel %vm4034_vm3, %v7174_v14, %v20794_v34  ;;  %v12629_v29 = vld [vmem:[#allocation2 + $0x50] sm:$0xf] }
 0x11a   : > { %v1037_v48 = vpop.f32.mrf.mxu2  ;;  %21037 = vst [vmem:[#allocation22_spill] sm:$0xff] %v15835_v51 }
 0x11b   : > { %v1920_v49 = vpack.c.bf16 %v1279_v9, %v1278_v12  ;;  %v1038_v2 = vadd.f32 %v1037_v48, %v15451_v17  ;;  %v1096_v33 = vpop.f32.mrf.mxu3  ;;  %v922_v55 = vpop.f32.mrf.mxu0  ;;  %v15830_v12 = vsel %vm4034_vm3, %v21035_v50, %v21034_v8  ;;  %v14268_v9 = vld [vmem:[%s20782_s8 + $0x24] sm:$0xf0] }
 0x11c   : > { %v923_v11 = vadd.f32 %v922_v55, %v15437_v4  ;;  %v981_v21 = vpop.f32.mrf.mxu1  ;;  %v14296_v38 = vld [vmem:[#allocation2 + $0x54] sm:$0xf0]  ;;  %21036 = vst [vmem:[#allocation21_spill] sm:$0xff] %v15830_v12  ;;  %v1140_v55 = vmax.f32 %v979_v54, 0.0  ;;  %v11062_v14 = vor.u32 %v14268_v9, %v11061_v3  ;;  %v12623_v3 = vld [vmem:[#allocation2 + $0x48] sm:$0xf0] }
 0x11d   : > { %1943 = vst.msk [vmem:[#allocation2 + $0x60] sm:$0xff] %vm15157_vm2, %v1920_v49  ;;  %v1097_v1 = vadd.f32 %v1096_v33, %v1038_v2  ;;  %v15845_v48 = vor.u32 %v14296_v38, %v11581_v20  ;;  %v14295_v49 = vld [vmem:[#allocation2 + $0x54] sm:$0xf]  ;;  %v11583_v33 = vld [vmem:[#allocation2 + $0x58] sm:$0xf0] }
 0x11e   : > { %1625 = vmatmul.bf16.gmra.mxu0 %v10814_v61  ;;  %v982_v54 = vadd.f32 %v981_v21, %v923_v11  ;;  %v15849_v2 = vor.u32 %v14295_v49, %v11583_v33  ;;  %v1280_v50 = vmul.f32 %v15847_v5, %v1140_v55  ;;  %v14498_v9 = vld [vmem:[#allocation2 + $0x54] sm:$0xf0]  ;;  %v15856_v55 = vpop.permute.xlu2 %1226 }
 0x11f   : > { %21038 = vst [vmem:[#allocation23_spill] sm:$0xff] %v15845_v48  ;;  %v1141_v8 = vmax.f32 %v1097_v1, 0.0  ;;  %1684 = vmatmul.bf16.gmra.mxu1 %v10818_v47  ;;  %1743 = vmatmul.bf16.gmra.mxu2 %v10814_v61  ;;  %v20800_v20 = vrot.slane %v15845_v48, 1 }
 0x120   : > { %1802 = vmatmul.bf16.gmra.mxu3 %v10818_v47  ;;  %2295 = vmatpush.bf16.msra.mxu0 %v11062_v14  ;;  %21039 = vst [vmem:[#allocation24_spill] sm:$0xff] %v15849_v2  ;;  %v20805_v51 = vrot.slane %v15849_v2, 1  ;;  %v1142_v11 = vmax.f32 %v982_v54, 0.0  ;;  %v12631_v14 = vld [vmem:[#allocation2 + $0x58] sm:$0xf0] }
 0x121   : > { %v1281_v34 = vmul.f32 %v15847_v5, %v1141_v8  ;;  %v21040_v8 = vrot.slane %v15767_v7, 1  ;;  %v15880_v25 = vor.u32 %v14497_v24, %v12631_v14 }
 0x122   : > { %v1040_v38 = vpop.f32.mrf.mxu2 }
 0x123   : > { %v1921_v1 = vpack.c.bf16 %v1281_v34, %v1280_v50  ;;  %v1041_v61 = vadd.f32 %v1040_v38, %v15451_v17  ;;  %v1099_v21 = vpop.f32.mrf.mxu3  ;;  %v924_v47 = vpop.f32.mrf.mxu0  ;;  %v15863_v33 = vsel %vm4034_vm3, %v21040_v8, %v20800_v20  ;;  %v21042_v34 = vrot.slane %v15771_v39, 1  ;;  %v14495_v50 = vld [vmem:[#allocation2 + $0x44] sm:$0xf]  ;;  %21046 = vst [vmem:[#allocation29_spill] sm:$0xff] %v15880_v25 }
 0x124   : > { %v983_v49 = vpop.f32.mrf.mxu1  ;;  %21041 = vst [vmem:[#allocation25_spill] sm:$0xff] %v15863_v33  ;;  %v925_v12 = vadd.f32 %v924_v47, %v15437_v4  ;;  %v15876_v8 = vor.u32 %v14495_v50, %v12623_v3  ;;  %v15878_v20 = vor.u32 %v14498_v9, %v12629_v29  ;;  %v20815_v14 = vrot.slane %v15880_v25, 1 }
 0x125   : > { %v15870_v54 = vsel %vm4034_vm3, %v21042_v34, %v20805_v51  ;;  %1944 = vst.msk [vmem:[#allocation2 + $0x68] sm:$0xff] %vm15157_vm2, %v1921_v1  ;;  %v1100_v38 = vadd.f32 %v1099_v21, %v1041_v61  ;;  %v1282_v34 = vmul.f32 %v15856_v55, %v1142_v11  ;;  %v14136_v51 = vld [vmem:[%s15510_s22 + $0x64] sm:$0xf0]  ;;  %v14265_v1 = vld [vmem:[%s20782_s8 + $0x14] sm:$0xf] }
 0x126   : > { %21043 = vst [vmem:[#allocation26_spill] sm:$0xff] %v15870_v54  ;;  %v11055_v61 = vld [vmem:[%s20782_s8 + $0x18] sm:$0xf0]  ;;  %v984_v3 = vadd.f32 %v983_v49, %v925_v12  ;;  %v10822_v47 = vor.u32 %v14136_v51, %v10821_v13  ;;  %v7180_v9 = vrot.slane %v15876_v8, 1  ;;  %v20813_v11 = vrot.slane %v15878_v20, 1 }
 0x127   : > { %21044 = vst [vmem:[#allocation27_spill] sm:$0xff] %v15876_v8  ;;  %v1143_v22 = vmax.f32 %v1100_v38, 0.0  ;;  %v11058_v21 = vor.u32 %v14265_v1, %v11055_v61  ;;  %v21047_v13 = vrot.slane %v15799_v42, 1 }
 0x128   : > { %21045 = vst [vmem:[#allocation28_spill] sm:$0xff] %v15878_v20  ;;  %v1144_v61 = vmax.f32 %v984_v3, 0.0  ;;  %v21050_v3 = vrot.slane %v15803_v60, 1  ;;  %v10831_v60 = vld [vmem:[%s15510_s22 + $0x78] sm:$0xf0] }
 0x129   : > { %v1283_v29 = vmul.f32 %v15856_v55, %v1143_v22  ;;  %2378 = vmatpush.bf16.msra.mxu2 %v11058_v21  ;;  %v11589_v22 = vld [vmem:[#allocation2 + $0x60] sm:$0xf]  ;;  %v15901_v51 = vsel %vm4034_vm3, %v21047_v13, %v7180_v9  ;;  %v11114_v21 = vor.u32 %v14279_v45, %v11111_v18 }
 0x12a   : > { %v1042_v24 = vpop.f32.mrf.mxu2  ;;  %21048 = vst [vmem:[#allocation30_spill] sm:$0xff] %v15901_v51  ;;  %v14138_v51 = vld [vmem:[%s15510_s22 + $0x74] sm:$0xf0] }
 0x12b   : > { %v1922_v50 = vpack.c.bf16 %v1283_v29, %v1282_v34  ;;  %v1043_v38 = vadd.f32 %v1042_v24, %v15451_v17  ;;  %v1101_v54 = vpop.f32.mrf.mxu3  ;;  %v927_v33 = vpop.f32.mrf.mxu0  ;;  %v15925_v24 = vsel %vm4034_vm3, %v7180_v9, %v20815_v14  ;;  %2420 = vmatpush.bf16.msra.mxu3 %v11114_v21 }
 0x12c   : > { %v928_v12 = vadd.f32 %v927_v33, %v15437_v4  ;;  %v986_v49 = vpop.f32.mrf.mxu1  ;;  %v14298_v1 = vld [vmem:[#allocation2 + $0x64] sm:$0xf0]  ;;  %v15913_v29 = vpop.permute.xlu0 %1231  ;;  %21052 = vst [vmem:[#allocation33_spill] sm:$0xff] %v15925_v24 }
 0x12d   : > { %1945 = vst.msk [vmem:[#allocation2 + $0x70] sm:$0xff] %vm15157_vm2, %v1922_v50  ;;  %v1102_v34 = vadd.f32 %v1101_v54, %v1043_v38  ;;  %v15911_v33 = vor.u32 %v14298_v1, %v11589_v22  ;;  %v15920_v54 = vsel %vm4034_vm3, %v21050_v3, %v20813_v11  ;;  %v11591_v22 = vld [vmem:[#allocation2 + $0x68] sm:$0xf0]  ;;  %v14297_v1 = vld [vmem:[#allocation2 + $0x64] sm:$0xf]  ;;  %v1284_v13 = vmul.f32 %v15913_v29, %v1144_v61 }
 0x12e   : > { %1630 = vmatmul.bf16.gmra.mxu0 %v10822_v47  ;;  %21051 = vst [vmem:[#allocation32_spill] sm:$0xff] %v15920_v54  ;;  %v987_v38 = vadd.f32 %v986_v49, %v928_v12  ;;  %v15929_v18 = vor.u32 %v14297_v1, %v11591_v22  ;;  %v14500_v54 = vld [vmem:[#allocation2 + $0x64] sm:$0xf0]  ;;  %v21054_v61 = vrot.slane %v15845_v48, 1  ;;  %v12639_v22 = vld [vmem:[#allocation2 + $0x68] sm:$0xf0] }
 0x12f   : > { %21049 = vst [vmem:[#allocation31_spill] sm:$0xff] %v15911_v33  ;;  %v1145_v50 = vmax.f32 %v1102_v34, 0.0  ;;  %1689 = vmatmul.bf16.gmra.mxu1 %v10826_v28  ;;  %1748 = vmatmul.bf16.gmra.mxu2 %v10822_v47  ;;  %v20816_v3 = vrot.slane %v15911_v33, 1  ;;  %v15933_v34 = vpop.permute.xlu1 %1236  ;;  %v11053_v1 = vld [vmem:[%s20782_s8 + $0x10] sm:$0xf] }
 0x130   : > { %1807 = vmatmul.bf16.gmra.mxu3 %v10826_v28  ;;  %21053 = vst [vmem:[#allocation34_spill] sm:$0xff] %v15929_v18  ;;  %v1146_v14 = vmax.f32 %v987_v38, 0.0 }
 0x131   : > { %v1285_v45 = vmul.f32 %v15913_v29, %v1145_v50  ;;  %v15940_v21 = vsel %vm4034_vm3, %v21054_v61, %v20816_v3  ;;  %v12637_v50 = vld [vmem:[#allocation2 + $0x60] sm:$0xf]  ;;  %v10829_v3 = vld [vmem:[%s15510_s22 + $0x70] sm:$0xf] }
 0x132   : > { %v1045_v11 = vpop.f32.mrf.mxu2  ;;  %21055 = vst [vmem:[#allocation35_spill] sm:$0xff] %v15940_v21  ;;  %v15952_v61 = vor.u32 %v14500_v54, %v12637_v50  ;;  %v21057_v54 = vrot.slane %v15849_v2, 1 }
 0x133   : > { %v1923_v9 = vpack.c.bf16 %v1285_v45, %v1284_v13  ;;  %v1046_v12 = vadd.f32 %v1045_v11, %v15451_v17  ;;  %v1104_v47 = vpop.f32.mrf.mxu3  ;;  %v929_v49 = vpop.f32.mrf.mxu0  ;;  %v14266_v13 = vld [vmem:[%s20782_s8 + $0x14] sm:$0xf0]  ;;  %v20828_v45 = vrot.slane %v15929_v18, 1 }
 0x134   : > { %v988_v28 = vpop.f32.mrf.mxu1  ;;  %v930_v11 = vadd.f32 %v929_v49, %v15437_v4  ;;  %21056 = vst [vmem:[#allocation36_spill] sm:$0xff] %v15952_v61  ;;  %v11054_v24 = vor.u32 %v14266_v13, %v11053_v1  ;;  %v1286_v49 = vmul.f32 %v15933_v34, %v1146_v14  ;;  %v14499_v1 = vld [vmem:[#allocation2 + $0x64] sm:$0xf]  ;;  %v14137_v13 = vld [vmem:[%s15510_s22 + $0x74] sm:$0xf]  ;;  %v20831_v14 = vrot.slane %v15952_v61, 1 }
 0x135   : > { %1946 = vst.msk [vmem:[#allocation2 + $0x78] sm:$0xff] %vm15157_vm2, %v1923_v9  ;;  %v1105_v38 = vadd.f32 %v1104_v47, %v1046_v12  ;;  %v11109_v9 = vld [vmem:[%s20782_s8 + $0x80] sm:$0xf]  ;;  %v14280_v12 = vld [vmem:[%s20782_s8 + $0x84] sm:$0xf0]  ;;  %v15968_v50 = vsel %vm4034_vm3, %v21057_v54, %v20828_v45  ;;  %v15972_v42 = vor.u32 %v14499_v1, %v12639_v22  ;;  %v10834_v37 = vor.u32 %v14137_v13, %v10831_v60 }
 0x136   : > { %v11110_v8 = vor.u32 %v14280_v12, %v11109_v9  ;;  %21058 = vst [vmem:[#allocation37_spill] sm:$0xff] %v15968_v50  ;;  %2296 = vmatpush.bf16.msra.mxu0 %v11054_v24  ;;  %v989_v21 = vadd.f32 %v988_v28, %v930_v11  ;;  %v10830_v12 = vor.u32 %v14138_v51, %v10829_v3  ;;  %v11597_v1 = vld [vmem:[#allocation2 + $0x70] sm:$0xf]  ;;  %v21062_v51 = vrot.slane %v15880_v25, 1  ;;  %v14221_v2 = vld [vmem:[#allocation2 + $0x74] sm:$0xf] }
 0x137   : > { %v1147_v47 = vmax.f32 %v1105_v38, 0.0  ;;  %21059 = vst [vmem:[#allocation38_spill] sm:$0xff] %v15972_v42  ;;  %v20832_v0 = vrot.slane %v15972_v42, 1 }
 0x138   : > { %2338 = vmatpush.bf16.msra.mxu1 %v11110_v8  ;;  %v21060_v8 = vrot.slane %v15878_v20, 1  ;;  %v1148_v60 = vmax.f32 %v989_v21, 0.0 }
 0x139   : > { %v1287_v38 = vmul.f32 %v15933_v34, %v1147_v47  ;;  %v15991_v3 = vsel %vm4034_vm3, %v21062_v51, %v20832_v0  ;;  %v11047_v0 = vld [vmem:[%s20782_s8 + $0x8] sm:$0xf0] }
 0x13a   : > { %v1047_v9 = vpop.f32.mrf.mxu2  ;;  %v15984_v11 = vsel %vm4034_vm3, %v21060_v8, %v20831_v14  ;;  %21063 = vst [vmem:[#allocation40_spill] sm:$0xff] %v15991_v3 }
 0x13b   : > { %v1924_v46 = vpack.c.bf16 %v1287_v38, %v1286_v49  ;;  %v1048_v54 = vadd.f32 %v1047_v9, %v15451_v17  ;;  %v1106_v45 = vpop.f32.mrf.mxu3  ;;  %v932_v50 = vpop.f32.mrf.mxu0  ;;  %21061 = vst [vmem:[#allocation39_spill] sm:$0xff] %v15984_v11  ;;  %v14299_v38 = vld [vmem:[#allocation2 + $0x74] sm:$0xf] }
 0x13c   : > { %v933_v24 = vadd.f32 %v932_v50, %v15437_v4  ;;  %v991_v22 = vpop.f32.mrf.mxu1  ;;  %v14300_v28 = vld [vmem:[#allocation2 + $0x74] sm:$0xf0]  ;;  %v15997_v50 = vpop.permute.xlu2 %1241  ;;  %v11599_v9 = vld [vmem:[#allocation2 + $0x78] sm:$0xf0] }
 0x13d   : > { %1947 = vst.msk [vmem:[#allocation2 + $0x80] sm:$0xff] %vm15157_vm2, %v1924_v46  ;;  %v1107_v47 = vadd.f32 %v1106_v45, %v1048_v54  ;;  %v15995_v49 = vor.u32 %v14300_v28, %v11597_v1  ;;  %v15999_v14 = vor.u32 %v14299_v38, %v11599_v9  ;;  %v1288_v51 = vmul.f32 %v15997_v50, %v1148_v60  ;;  %v16004_v1 = vpop.permute.xlu0 %1246  ;;  %v1326_v60 = vld [vmem:[%s20780_s6] sm:$0x3] }
 0x13e   : > { %v992_v13 = vadd.f32 %v991_v22, %v933_v24  ;;  %1635 = vmatmul.bf16.gmra.mxu0 %v10830_v12  ;;  %v21066_v24 = vrot.slane %v15911_v33, 1  ;;  %v11213_v33 = vld [vmem:[#allocation2 + $0x70] sm:$0xf] }
 0x13f   : > { %21064 = vst [vmem:[#allocation41_spill] sm:$0xff] %v15995_v49  ;;  %v1149_v8 = vmax.f32 %v1107_v47, 0.0  ;;  %1694 = vmatmul.bf16.gmra.mxu1 %v10834_v37  ;;  %1753 = vmatmul.bf16.gmra.mxu2 %v10830_v12  ;;  %v4416_v21 = vrot.slane %v15995_v49, 1  ;;  %v4418_v12 = vrot.slane %v15999_v14, 1 }
 0x140   : > { %21065 = vst [vmem:[#allocation42_spill] sm:$0xff] %v15999_v14  ;;  %1812 = vmatmul.bf16.gmra.mxu3 %v10834_v37  ;;  %v1150_v45 = vmax.f32 %v992_v13, 0.0 }
 0x141   : > { %v1289_v46 = vmul.f32 %v15997_v50, %v1149_v8  ;;  %v16009_v22 = vsel %vm4034_vm3, %v21066_v24, %v4416_v21  ;;  %v21068_v8 = vrot.slane %v15929_v18, 1 }
 0x142   : > { %v1050_v54 = vpop.f32.mrf.mxu2  ;;  %21067 = vst [vmem:[#allocation43_spill] sm:$0xff] %v16009_v22 }
 0x143   : > { %v1925_v28 = vpack.c.bf16 %v1289_v46, %v1288_v51  ;;  %v1051_v37 = vadd.f32 %v1050_v54, %v15451_v17  ;;  %v1109_v47 = vpop.f32.mrf.mxu3  ;;  %v934_v38 = vpop.f32.mrf.mxu0  ;;  %v16019_v24 = vsel %vm4034_vm3, %v21068_v8, %v4418_v12  ;;  %v14263_v54 = vld [vmem:[%s20782_s8 + $0x4] sm:$0xf]  ;;  %v1290_v8 = vmul.f32 %v16004_v1, %v1150_v45 }
 0x144   : > { %v993_v9 = vpop.f32.mrf.mxu1  ;;  %v2850_v13 = vld [vmem:[#allocation2 + $0x80] sm:$0x11]  ;;  %21069 = vst [vmem:[#allocation44_spill] sm:$0xff] %v16019_v24  ;;  %v935_v46 = vadd.f32 %v934_v38, %v15437_v4  ;;  %v11050_v25 = vor.u32 %v14263_v54, %v11047_v0  ;;  %v14264_v4 = vld [vmem:[%s20782_s8 + $0x4] sm:$0xf0] }
 0x145   : > { %1948 = vst.msk [vmem:[#allocation2 + $0x88] sm:$0xff] %vm15157_vm2, %v1925_v28  ;;  %v1110_v51 = vadd.f32 %v1109_v47, %v1051_v37  ;;  %v3489_v3 = vunpack.c.l.b16 %v2850_v13  ;;  %v3490_v11 = vunpack.c.h.b16 %v2850_v13  ;;  %v11045_v28 = vld [vmem:[%s20782_s8] sm:$0xf]  ;;  %v14140_v38 = vld [vmem:[%s15510_s22 + $0x84] sm:$0xf0]  ;;  %v16043_v13 = vperm.slane %v1326_v60, 0 }
 0x146   : > { %v10837_v47 = vld [vmem:[%s15510_s22 + $0x80] sm:$0xf]  ;;  %v11046_v20 = vor.u32 %v14264_v4, %v11045_v28  ;;  %v14139_v45 = vld [vmem:[%s15510_s22 + $0x84] sm:$0xf]  ;;  %v10839_v0 = vld [vmem:[%s15510_s22 + $0x88] sm:$0xf0]  ;;  %2379 = vmatpush.bf16.msra.mxu2 %v11050_v25  ;;  %v994_v54 = vadd.f32 %v993_v9, %v935_v46 }
 0x147   : > { %v1151_v37 = vmax.f32 %v1110_v51, 0.0  ;;  %v16039_v24 = vpack.c.b16 %v3489_v3, %v3489_v3  ;;  %v16041_v22 = vpack.c.b16 %v3490_v11, %v3490_v11  ;;  %v10838_v51 = vor.u32 %v14140_v38, %v10837_v47  ;;  %v12647_v47 = vld [vmem:[#allocation2 + $0x78] sm:$0xf0] }
 0x148   : > { %2297 = vmatpush.bf16.msra.mxu0 %v11046_v20  ;;  %v10842_v14 = vor.u32 %v14139_v45, %v10839_v0  ;;  %v1152_v9 = vmax.f32 %v994_v54, 0.0  ;;  %v14501_v54 = vld [vmem:[#allocation2 + $0x74] sm:$0xf] }
 0x149   : > { %21070 = vst [vmem:[#allocation45_spill] sm:$0xff] %v16039_v24  ;;  %v1291_v44 = vmul.f32 %v16004_v1, %v1151_v37  ;;  %v4420_v52 = vrot.slane %v16039_v24, 1  ;;  %v4422_v58 = vrot.slane %v16041_v22, 1  ;;  %v16062_v37 = vperm.slane %v1326_v60, 1 }
 0x14a   : > { %21071 = vst [vmem:[#allocation46_spill] sm:$0xff] %v16041_v22  ;;  %v1052_v59 = vpop.f32.mrf.mxu2 }
 0x14b   : > { %v1926_v28 = vpack.c.bf16 %v1291_v44, %v1290_v8  ;;  %v1053_v3 = vadd.f32 %v1052_v59, %v15451_v17  ;;  %v1111_v11 = vpop.f32.mrf.mxu3  ;;  %v1601_v4 = vpop.f32.mrf.mxu0  ;;  %v16053_v25 = vsel %vm4034_vm3, %v4416_v21, %v4420_v52  ;;  %v16056_v20 = vsel %vm4034_vm3, %v4418_v12, %v4422_v58  ;;  %v14502_v44 = vld [vmem:[#allocation2 + $0x74] sm:$0xf0]  ;;  %v12645_v52 = vld [vmem:[#allocation2 + $0x70] sm:$0xf] }
 0x14c   : > { %v1602_v49 = vadd.f32 %v1601_v4, %v16043_v13  ;;  %v1660_v18 = vpop.f32.mrf.mxu1  ;;  %21072 = vst [vmem:[#allocation47_spill] sm:$0xff] %v16053_v25  ;;  %v16060_v8 = vpop.permute.xlu1 %1251  ;;  %v16064_v21 = vor.u32 %v14502_v44, %v12645_v52  ;;  %v14504_v38 = vld [vmem:[#allocation2 + $0x84] sm:$0xf0]  ;;  %v12655_v45 = vld [vmem:[#allocation2 + $0x88] sm:$0xf0]  ;;  %v16069_v4 = vor.u32 %v14501_v54, %v12647_v47 }
 0x14d   : > { %21073 = vst [vmem:[#allocation48_spill] sm:$0xff] %v16056_v20  ;;  %v1112_v46 = vadd.f32 %v1111_v11, %v1053_v3  ;;  %v1292_v58 = vmul.f32 %v16060_v8, %v1152_v9  ;;  %v14245_v54 = vld [vmem:[%s20781_s7 + $0xb4] sm:$0xf] }
 0x14e   : > { %1949 = vst.msk [vmem:[#allocation2 + $0x90] sm:$0xff] %vm15157_vm2, %v1926_v28  ;;  %1640 = vmatmul.bf16.gmra.mxu0 %v10838_v51  ;;  %v1661_v59 = vadd.f32 %v1660_v18, %v1602_v49  ;;  %v7192_v25 = vrot.slane %v16069_v4, 1 }
 0x14f   : > { %v1153_v17 = vmax.f32 %v1112_v46, 0.0  ;;  %1699 = vmatmul.bf16.gmra.mxu1 %v10842_v14  ;;  %1758 = vmatmul.bf16.gmra.mxu2 %v10838_v51  ;;  %21074 = vst [vmem:[#allocation49_spill] sm:$0xff] %v16064_v21  ;;  %v12653_v51 = vld [vmem:[#allocation2 + $0x80] sm:$0xf] }
 0x150   : > { %1817 = vmatmul.bf16.gmra.mxu3 %v10842_v14  ;;  %v1828_v3 = vmax.f32 %v1661_v59, 0.0  ;;  %v14503_v14 = vld [vmem:[#allocation2 + $0x84] sm:$0xf]  ;;  %21075 = vst [vmem:[#allocation50_spill] sm:$0xff] %v16069_v4  ;;  %v16071_v9 = vor.u32 %v14504_v38, %v12653_v51 }
 0x151   : > { %v1293_v12 = vmul.f32 %v16060_v8, %v1153_v17  ;;  %v16073_v46 = vor.u32 %v14503_v14, %v12655_v45  ;;  %v7190_v17 = vrot.slane %v16064_v21, 1  ;;  %v10845_v45 = vld [vmem:[%s15510_s22 + $0x90] sm:$0xf]  ;;  %v14142_v14 = vld [vmem:[%s15510_s22 + $0x94] sm:$0xf0] }
 0x152   : > { %v1719_v0 = vpop.f32.mrf.mxu2  ;;  %21076 = vst [vmem:[#allocation51_spill] sm:$0xff] %v16071_v9  ;;  %v7194_v22 = vrot.slane %v16071_v9, 1 }
 0x153   : > { %v1927_v28 = vpack.c.bf16 %v1293_v12, %v1292_v58  ;;  %v1720_v18 = vadd.f32 %v1719_v0, %v16062_v37  ;;  %v1778_v49 = vpop.f32.mrf.mxu3  ;;  %v1603_v60 = vpop.f32.mrf.mxu0  ;;  %21077 = vst [vmem:[#allocation52_spill] sm:$0xff] %v16073_v46  ;;  %v14237_v58 = vld [vmem:[%s20781_s7 + $0x74] sm:$0xf]  ;;  %v11279_v12 = vld [vmem:[%s20781_s7 + $0x78] sm:$0xf0] }
 0x154   : > { %v1662_v11 = vpop.f32.mrf.mxu1  ;;  %v1604_v52 = vadd.f32 %v1603_v60, %v16043_v13  ;;  %v11282_v0 = vor.u32 %v14237_v58, %v11279_v12  ;;  %v1868_v60 = vmul.f32 %v1828_v3, %v15454_v23  ;;  %v10847_v12 = vld [vmem:[%s15510_s22 + $0x98] sm:$0xf0] }
 0x155   : > { %v5630_v44 = vld [vmem:[#allocation2 + $0x90] sm:$0x11]  ;;  %1950 = vst.msk [vmem:[#allocation2 + $0x98] sm:$0xff] %vm15157_vm2, %v1927_v28  ;;  %v1779_v59 = vadd.f32 %v1778_v49, %v1720_v18  ;;  %v11311_v28 = vld [vmem:[%s20781_s7 + $0xb8] sm:$0xf0]  ;;  %v21078_v18 = vrot.slane %v15952_v61, 1 }
 0x156   : > { %v6268_v47 = vunpack.c.l.b16 %v5630_v44  ;;  %v6269_v38 = vunpack.c.h.b16 %v5630_v44  ;;  %v14141_v44 = vld [vmem:[%s15510_s22 + $0x94] sm:$0xf]  ;;  %v11314_v21 = vor.u32 %v14245_v54, %v11311_v28  ;;  %2752 = vmatpush.bf16.msrb.mxu2 %v11282_v0  ;;  %v7196_v61 = vrot.slane %v16073_v46, 1 }
 0x157   : > { %v16095_v49 = vsel %vm4034_vm3, %v21078_v18, %v7190_v17  ;;  %v1829_v51 = vmax.f32 %v1779_v59, 0.0  ;;  %v10846_v54 = vor.u32 %v14142_v14, %v10845_v45 }
 0x158   : > { %21079 = vst [vmem:[#allocation53_spill] sm:$0xff] %v16095_v49  ;;  %v16100_v58 = vpack.c.b16 %v6268_v47, %v6268_v47  ;;  %v16103_v20 = vpack.c.b16 %v6269_v38, %v6269_v38  ;;  %v1663_v49 = vadd.f32 %v1662_v11, %v1604_v52  ;;  %2797 = vmatpush.bf16.msrb.mxu3 %v11314_v21  ;;  %v21082_v47 = vrot.slane %v15972_v42, 1 }
 0x159   : > { %v1869_v18 = vmul.f32 %v1829_v51, %v15454_v23  ;;  %v16116_v38 = vsel %vm4034_vm3, %v7190_v17, %v7194_v22  ;;  %v16119_v28 = vsel %vm4034_vm3, %v7192_v25, %v7196_v61  ;;  %v10850_v52 = vor.u32 %v14141_v44, %v10847_v12  ;;  %v14238_v44 = vld [vmem:[%s20781_s7 + $0x74] sm:$0xf0] }
 0x15a   : > { %21080 = vst [vmem:[#allocation54_spill] sm:$0xff] %v16100_v58  ;;  %v7198_v3 = vrot.slane %v16100_v58, 1  ;;  %v1721_v59 = vpop.f32.mrf.mxu2  ;;  %v16113_v0 = vsel %vm4034_vm3, %v21082_v47, %v7192_v25  ;;  %v7200_v47 = vrot.slane %v16103_v20, 1  ;;  %v1830_v17 = vmax.f32 %v1663_v49, 0.0 }
 0x15b   : > { %21081 = vst [vmem:[#allocation55_spill] sm:$0xff] %v16103_v20  ;;  %v1951_v46 = vpack.c.bf16 %v1869_v18, %v1868_v60  ;;  %v1722_v23 = vadd.f32 %v1721_v59, %v16062_v37  ;;  %v1780_v11 = vpop.f32.mrf.mxu3  ;;  %v1606_v21 = vpop.f32.mrf.mxu0  ;;  %v11277_v60 = vld [vmem:[%s20781_s7 + $0x70] sm:$0xf] }
 0x15c   : > { %21083 = vst [vmem:[#allocation56_spill] sm:$0xff] %v16113_v0  ;;  %v1607_v51 = vadd.f32 %v1606_v21, %v16043_v13  ;;  %v1665_v45 = vpop.f32.mrf.mxu1  ;;  %v16124_v14 = vsel %vm4034_vm3, %v7194_v22, %v7198_v3  ;;  %v11278_v12 = vor.u32 %v14238_v44, %v11277_v60  ;;  %v11309_v22 = vld [vmem:[%s20781_s7 + $0xb0] sm:$0xf]  ;;  %v16142_v49 = vsel %vm4034_vm3, %v7196_v61, %v7200_v47  ;;  %v14229_v0 = vld [vmem:[%s20781_s7 + $0x34] sm:$0xf] }
 0x15d   : > { %21084 = vst [vmem:[#allocation57_spill] sm:$0xff] %v16116_v38  ;;  %v1781_v25 = vadd.f32 %v1780_v11, %v1722_v23  ;;  %v1870_v23 = vmul.f32 %v1830_v17, %v15491_v57 }
 0x15e   : > { %21085 = vst [vmem:[#allocation58_spill] sm:$0xff] %v16119_v28  ;;  %1645 = vmatmul.bf16.gmra.mxu0 %v10846_v54  ;;  %v1666_v3 = vadd.f32 %v1665_v45, %v1607_v51  ;;  %v14235_v51 = vld [vmem:[%s20781_s7 + $0x64] sm:$0xf] }
 0x15f   : > { %21086 = vst [vmem:[#allocation59_spill] sm:$0xff] %v16124_v14  ;;  %v1831_v18 = vmax.f32 %v1781_v25, 0.0  ;;  %1704 = vmatmul.bf16.gmra.mxu1 %v10850_v52  ;;  %1763 = vmatmul.bf16.gmra.mxu2 %v10846_v54 }
 0x160   : > { %1971 = vst.msk [vmem:[#allocation3] sm:$0xff] %vm15157_vm2, %v1951_v46  ;;  %v14246_v46 = vld [vmem:[%s20781_s7 + $0xb4] sm:$0xf0]  ;;  %1822 = vmatmul.bf16.gmra.mxu3 %v10850_v52  ;;  %2670 = vmatpush.bf16.msrb.mxu0 %v11278_v12  ;;  %v1832_v44 = vmax.f32 %v1666_v3, 0.0 }
 0x161   : > { %21087 = vst [vmem:[#allocation60_spill] sm:$0xff] %v16142_v49  ;;  %v11310_v59 = vor.u32 %v14246_v46, %v11309_v22  ;;  %v1871_v11 = vmul.f32 %v1831_v18, %v15491_v57  ;;  %v11271_v57 = vld [vmem:[%s20781_s7 + $0x68] sm:$0xf0] }
 0x162   : > { %v1724_v21 = vpop.f32.mrf.mxu2  ;;  %v11274_v45 = vor.u32 %v14235_v51, %v11271_v57  ;;  %v1872_v17 = vmul.f32 %v1832_v44, %v15512_v10  ;;  %v14236_v51 = vld [vmem:[%s20781_s7 + $0x64] sm:$0xf0] }
 0x163   : > { %2715 = vmatpush.bf16.msrb.mxu1 %v11310_v59  ;;  %v1952_v60 = vpack.c.bf16 %v1871_v11, %v1870_v23  ;;  %v1725_v14 = vadd.f32 %v1724_v21, %v16062_v37  ;;  %v1783_v28 = vpop.f32.mrf.mxu3  ;;  %v1608_v61 = vpop.f32.mrf.mxu0 }
 0x164   : > { %v1667_v47 = vpop.f32.mrf.mxu1  ;;  %v1609_v52 = vadd.f32 %v1608_v61, %v16043_v13  ;;  %2753 = vmatpush.bf16.msrb.mxu2 %v11274_v45 }
 0x165   : > { %1972 = vst.msk [vmem:[#allocation3 + $0x8] sm:$0xff] %vm15157_vm2, %v1952_v60  ;;  %v1784_v54 = vadd.f32 %v1783_v28, %v1725_v14 }
 0x166   : > { %v1668_v22 = vadd.f32 %v1667_v47, %v1609_v52  ;;  %v11269_v52 = vld [vmem:[%s20781_s7 + $0x60] sm:$0xf] }
 0x167   : > { %v1833_v25 = vmax.f32 %v1784_v54, 0.0  ;;  %v10981_v59 = vld [vmem:[#allocation3] sm:$0xf]  ;;  %v14247_v60 = vld [vmem:[#allocation3 + $0x4] sm:$0xf]  ;;  %v11270_v57 = vor.u32 %v14236_v51, %v11269_v52 }
 0x168   : > { %v1834_v44 = vmax.f32 %v1668_v22, 0.0 }
 0x169   : > { %v1873_v12 = vmul.f32 %v1833_v25, %v15512_v10  ;;  %2671 = vmatpush.bf16.msrb.mxu0 %v11270_v57  ;;  %v4003_v57 = vld [vmem:[#allocation3] sm:$0xee] }
 0x16a   : > { %v1726_v46 = vpop.f32.mrf.mxu2  ;;  %v1874_v25 = vmul.f32 %v1834_v44, %v15539_v41  ;;  %v14243_v44 = vld [vmem:[%s20781_s7 + $0xa4] sm:$0xf] }
 0x16b   : > { %v1953_v28 = vpack.c.bf16 %v1873_v12, %v1872_v17  ;;  %v1727_v14 = vadd.f32 %v1726_v46, %v16062_v37  ;;  %v1785_v18 = vpop.f32.mrf.mxu3  ;;  %v1611_v3 = vpop.f32.mrf.mxu0 }
 0x16c   : > { %v1612_v23 = vadd.f32 %v1611_v3, %v16043_v13  ;;  %v1670_v11 = vpop.f32.mrf.mxu1  ;;  %v14248_v21 = vld [vmem:[#allocation3 + $0x4] sm:$0xf0]  ;;  %v10983_v61 = vld [vmem:[#allocation3 + $0x8] sm:$0xf0] }
 0x16d   : > { %1973 = vst.msk [vmem:[#allocation3 + $0x10] sm:$0xff] %vm15157_vm2, %v1953_v28  ;;  %v1786_v10 = vadd.f32 %v1785_v18, %v1727_v14  ;;  %v10982_v47 = vor.u32 %v14248_v21, %v10981_v59  ;;  %v10986_v54 = vor.u32 %v14247_v60, %v10983_v61  ;;  %v14233_v21 = vld [vmem:[%s20781_s7 + $0x54] sm:$0xf] }
 0x16e   : > { %v1671_v17 = vadd.f32 %v1670_v11, %v1612_v23  ;;  %v16182_v60 = vld [vmem:[#allocation3 + $0x8] sm:$0xff] }
 0x16f   : > { %v1835_v45 = vmax.f32 %v1786_v10, 0.0  ;;  %2298 = vmatmul.bf16.vlgmr.msra.gmra.mxu0 %v10982_v47  ;;  %11139 = vmatmul.msk.bf16.vlgmr.msra.gmra.mxu1 %vm2265_vm4, %v10986_v54  ;;  %v11303_v10 = vld [vmem:[%s20781_s7 + $0xa8] sm:$0xf0] }
 0x170   : > { %2380 = vmatmul.bf16.vlgmr.msra.gmra.mxu2 %v10982_v47  ;;  %11147 = vmatmul.msk.bf16.vlgmr.msra.gmra.mxu3 %vm2265_vm4, %v10986_v54  ;;  %v1836_v28 = vmax.f32 %v1671_v17, 0.0  ;;  %v11306_v51 = vor.u32 %v14243_v44, %v11303_v10 }
 0x171   : > { %v1875_v12 = vmul.f32 %v1835_v45, %v15539_v41  ;;  %v11263_v41 = vld [vmem:[%s20781_s7 + $0x58] sm:$0xf0]  ;;  %v20863_v45 = vunpack.c.l.b16 %v16182_v60 }
 0x172   : > { %v1729_v22 = vpop.f32.mrf.mxu2  ;;  %v11266_v61 = vor.u32 %v14233_v21, %v11263_v41  ;;  %v1876_v47 = vmul.f32 %v1836_v28, %v15544_v53  ;;  %2798 = vmatpush.bf16.msrb.mxu3 %v11306_v51 }
 0x173   : > { %v1954_v46 = vpack.c.bf16 %v1875_v12, %v1874_v25  ;;  %v1730_v14 = vadd.f32 %v1729_v22, %v16062_v37  ;;  %v1788_v18 = vpop.f32.mrf.mxu3  ;;  %v1613_v3 = vpop.f32.mrf.mxu0 }
 0x174   : > { %v1614_v59 = vadd.f32 %v1613_v3, %v16043_v13  ;;  %v1672_v23 = vpop.f32.mrf.mxu1  ;;  %2754 = vmatpush.bf16.msrb.mxu2 %v11266_v61  ;;  %v10989_v12 = vld [vmem:[#allocation3 + $0x10] sm:$0xf]  ;;  %v14325_v10 = vld [vmem:[#allocation3 + $0x14] sm:$0xf] }
 0x175   : > { %1974 = vst.msk [vmem:[#allocation3 + $0x18] sm:$0xff] %vm15157_vm2, %v1954_v46  ;;  %v1789_v11 = vadd.f32 %v1788_v18, %v1730_v14  ;;  %v4030_v46 = vunpack.c.l.b16 %v4003_v57 }
 0x176   : > { %v1673_v52 = vadd.f32 %v1672_v23, %v1614_v59  ;;  %v14249_v59 = vld [vmem:[#allocation3 + $0x14] sm:$0xf]  ;;  %v11381_v23 = vld [vmem:[#allocation3 + $0x10] sm:$0xf] }
 0x177   : > { %v1837_v54 = vmax.f32 %v1789_v11, 0.0  ;;  %v4032_v51 = vpack.c.b16 %v20863_v45, %v4030_v46  ;;  %v11301_v46 = vld [vmem:[%s20781_s7 + $0xa0] sm:$0xf] }
 0x178   : > { %v1838_v18 = vmax.f32 %v1673_v52, 0.0 }
 0x179   : > { %v1877_v17 = vmul.f32 %v1837_v54, %v15544_v53  ;;  %v4031_v54 = vunpack.c.h.b16 %v4003_v57 }
 0x17a   : > { %v1731_v25 = vpop.f32.mrf.mxu2 }
 0x17b   : > { %v1955_v14 = vpack.c.bf16 %v1877_v17, %v1876_v47  ;;  %v1732_v3 = vadd.f32 %v1731_v25, %v16062_v37  ;;  %v1790_v28 = vpop.f32.mrf.mxu3  ;;  %v1616_v11 = vpop.f32.mrf.mxu0  ;;  %v11261_v25 = vld [vmem:[%s20781_s7 + $0x50] sm:$0xf] }
 0x17c   : > { %v1617_v21 = vadd.f32 %v1616_v11, %v16043_v13  ;;  %v1675_v41 = vpop.f32.mrf.mxu1  ;;  %v14250_v61 = vld [vmem:[#allocation3 + $0x14] sm:$0xf0]  ;;  %v10991_v44 = vld [vmem:[#allocation3 + $0x18] sm:$0xf0]  ;;  %v14234_v11 = vld [vmem:[%s20781_s7 + $0x54] sm:$0xf0] }
 0x17d   : > { %v14326_v53 = vld [vmem:[#allocation3 + $0x14] sm:$0xf0]  ;;  %1975 = vst.msk [vmem:[#allocation3 + $0x20] sm:$0xff] %vm15157_vm2, %v1955_v14  ;;  %v1791_v47 = vadd.f32 %v1790_v28, %v1732_v3  ;;  %v10990_v52 = vor.u32 %v14250_v61, %v10989_v12  ;;  %v10994_v17 = vor.u32 %v14249_v59, %v10991_v44  ;;  %v11262_v57 = vor.u32 %v14234_v11, %v11261_v25  ;;  %v14244_v12 = vld [vmem:[%s20781_s7 + $0xa4] sm:$0xf0] }
 0x17e   : > { %v16206_v22 = vor.u32 %v14326_v53, %v11381_v23  ;;  %v11383_v14 = vld [vmem:[#allocation3 + $0x18] sm:$0xf0]  ;;  %v21088_v3 = vunpack.c.h.b16 %v16182_v60  ;;  %v11302_v61 = vor.u32 %v14244_v12, %v11301_v46  ;;  %v4035_v44 = vrot.slane %v4032_v51, 1 }
 0x17f   : > { %v1839_v59 = vmax.f32 %v1791_v47, 0.0  ;;  %2302 = vmatmul.bf16.gmra.mxu0 %v10990_v52  ;;  %11140 = vmatmul.msk.bf16.gmra.mxu1 %vm2265_vm4, %v10994_v17  ;;  %v16217_v23 = vor.u32 %v14325_v10, %v11383_v14  ;;  %v1878_v25 = vmul.f32 %v1838_v18, %v15577_v32  ;;  %v1676_v45 = vadd.f32 %v1675_v41, %v1617_v21  ;;  %v14231_v14 = vld [vmem:[%s20781_s7 + $0x44] sm:$0xf] }
 0x180   : > { %v4033_v28 = vpack.c.b16 %v21088_v3, %v4031_v54  ;;  %2384 = vmatmul.bf16.gmra.mxu2 %v10990_v52  ;;  %11148 = vmatmul.msk.bf16.gmra.mxu3 %vm2265_vm4, %v10994_v17  ;;  %v20865_v53 = vrot.slane %v16206_v22, 1  ;;  %v11255_v3 = vld [vmem:[%s20781_s7 + $0x48] sm:$0xf0] }
 0x181   : > { %v1879_v11 = vmul.f32 %v1839_v59, %v15577_v32  ;;  %2672 = vmatpush.bf16.msrb.mxu0 %v11262_v57  ;;  %2716 = vmatpush.bf16.msrb.mxu1 %v11302_v61  ;;  %v20864_v52 = vrot.slane %v16217_v23, 1  ;;  %v1840_v41 = vmax.f32 %v1676_v45, 0.0 }
 0x182   : > { %v1734_v54 = vpop.f32.mrf.mxu2  ;;  %v16226_v47 = vsel %vm4034_vm3, %v4035_v44, %v20865_v53  ;;  %v4038_v10 = vrot.slane %v4033_v28, 1  ;;  %v11258_v28 = vor.u32 %v14231_v14, %v11255_v3 }
 0x183   : > { %21089 = vst [vmem:[#allocation61_spill] sm:$0xff] %v16226_v47  ;;  %v1956_v17 = vpack.c.bf16 %v1879_v11, %v1878_v25  ;;  %v1735_v51 = vadd.f32 %v1734_v54, %v16062_v37  ;;  %v1793_v46 = vpop.f32.mrf.mxu3  ;;  %v1618_v12 = vpop.f32.mrf.mxu0  ;;  %v1880_v44 = vmul.f32 %v1840_v41, %v15590_v56  ;;  %v11215_v47 = vld [vmem:[#allocation2 + $0x78] sm:$0xf0] }
 0x184   : > { %v1619_v18 = vadd.f32 %v1618_v12, %v16043_v13  ;;  %v1677_v32 = vpop.f32.mrf.mxu1  ;;  %v16234_v21 = vsel %vm4034_vm3, %v4038_v10, %v20864_v52  ;;  %2755 = vmatpush.bf16.msrb.mxu2 %v11258_v28  ;;  %v10997_v54 = vld [vmem:[#allocation3 + $0x20] sm:$0xf]  ;;  %v14251_v12 = vld [vmem:[#allocation3 + $0x24] sm:$0xf]  ;;  %v11253_v28 = vld [vmem:[%s20781_s7 + $0x40] sm:$0xf] }
 0x185   : > { %21090 = vst [vmem:[#allocation62_spill] sm:$0xff] %v16234_v21  ;;  %v1794_v57 = vadd.f32 %v1793_v46, %v1735_v51  ;;  %v11389_v52 = vld [vmem:[#allocation3 + $0x20] sm:$0xf]  ;;  %v14219_v21 = vld [vmem:[#allocation2 + $0x64] sm:$0xf] }
 0x186   : > { %1976 = vst.msk [vmem:[#allocation3 + $0x28] sm:$0xff] %vm15157_vm2, %v1956_v17  ;;  %v1678_v61 = vadd.f32 %v1677_v32, %v1619_v18 }
 0x187   : > { %v1841_v59 = vmax.f32 %v1794_v57, 0.0 }
 0x188   : > { %v1842_v10 = vmax.f32 %v1678_v61, 0.0 }
 0x189   : > { %v1881_v25 = vmul.f32 %v1841_v59, %v15590_v56  ;;  %v14232_v59 = vld [vmem:[%s20781_s7 + $0x44] sm:$0xf0] }
 0x18a   : > { %v1736_v11 = vpop.f32.mrf.mxu2 }
 0x18b   : > { %v1957_v45 = vpack.c.bf16 %v1881_v25, %v1880_v44  ;;  %v1737_v17 = vadd.f32 %v1736_v11, %v16062_v37  ;;  %v1795_v51 = vpop.f32.mrf.mxu3  ;;  %v1621_v46 = vpop.f32.mrf.mxu0  ;;  %v16258_v44 = vld [vmem:[#allocation3 + $0x18] sm:$0xff]  ;;  %v11254_v25 = vor.u32 %v14232_v59, %v11253_v28  ;;  %v14327_v11 = vld [vmem:[#allocation3 + $0x24] sm:$0xf] }
 0x18c   : > { %v1622_v53 = vadd.f32 %v1621_v46, %v16043_v13  ;;  %v1680_v14 = vpop.f32.mrf.mxu1  ;;  %21091 = vst [vmem:[#allocation63_spill] sm:$0xff] %v16258_v44  ;;  %v21096_v38 = vunpack.c.l.b16 %v16258_v44 }
 0x18d   : > { %v14252_v57 = vld [vmem:[#allocation3 + $0x24] sm:$0xf0]  ;;  %v10999_v18 = vld [vmem:[#allocation3 + $0x28] sm:$0xf0]  ;;  %1977 = vst.msk [vmem:[#allocation3 + $0x30] sm:$0xff] %vm15157_vm2, %v1957_v45  ;;  %v1796_v56 = vadd.f32 %v1795_v51, %v1737_v17  ;;  %2673 = vmatpush.bf16.msrb.mxu0 %v11254_v25  ;;  %v21094_v25 = vrot.slane %v16217_v23, 1 }
 0x18e   : > { %v14328_v32 = vld [vmem:[#allocation3 + $0x24] sm:$0xf0]  ;;  %v10998_v41 = vor.u32 %v14252_v57, %v10997_v54  ;;  %v11002_v3 = vor.u32 %v14251_v12, %v10999_v18  ;;  %v11391_v46 = vld [vmem:[#allocation3 + $0x28] sm:$0xf0]  ;;  %v6782_v45 = vld [vmem:[#allocation3 + $0x10] sm:$0xee]  ;;  %v1882_v12 = vmul.f32 %v1842_v10, %v15629_v36  ;;  %v1681_v18 = vadd.f32 %v1680_v14, %v1622_v53 }
 0x18f   : > { %v16256_v61 = vor.u32 %v14328_v32, %v11389_v52  ;;  %v1843_v49 = vmax.f32 %v1796_v56, 0.0  ;;  %v16261_v54 = vor.u32 %v14327_v11, %v11391_v46  ;;  %v21092_v56 = vrot.slane %v16206_v22, 1  ;;  %v14530_v28 = vld [vmem:[#allocation3 + $0x24] sm:$0xf0]  ;;  %v12439_v59 = vld [vmem:[#allocation3 + $0x28] sm:$0xf0] }
 0x190   : > { %2306 = vmatmul.bf16.gmra.mxu0 %v10998_v41  ;;  %11141 = vmatmul.msk.bf16.gmra.mxu1 %vm2265_vm4, %v11002_v3  ;;  %v6809_v11 = vunpack.c.l.b16 %v6782_v45  ;;  %v6810_v46 = vunpack.c.h.b16 %v6782_v45  ;;  %v14529_v52 = vld [vmem:[#allocation3 + $0x24] sm:$0xf] }
 0x191   : > { %2388 = vmatmul.bf16.gmra.mxu2 %v10998_v41  ;;  %11149 = vmatmul.msk.bf16.gmra.mxu3 %vm2265_vm4, %v11002_v3  ;;  %v20867_v17 = vrot.slane %v16256_v61, 1  ;;  %v1883_v57 = vmul.f32 %v1843_v49, %v15629_v36  ;;  %v20870_v3 = vrot.slane %v16261_v54, 1  ;;  %v16300_v20 = vor.u32 %v14529_v52, %v12439_v59 }
 0x192   : > { %v1739_v32 = vpop.f32.mrf.mxu2  ;;  %v6811_v45 = vpack.c.b16 %v21096_v38, %v6809_v11 }
 0x193   : > { %v16274_v41 = vsel %vm4034_vm3, %v21092_v56, %v20867_v17  ;;  %v1958_v51 = vpack.c.bf16 %v1883_v57, %v1882_v12  ;;  %v1740_v10 = vadd.f32 %v1739_v32, %v16062_v37  ;;  %v1798_v36 = vpop.f32.mrf.mxu3  ;;  %v1623_v49 = vpop.f32.mrf.mxu0  ;;  %v16284_v56 = vsel %vm4034_vm3, %v21094_v25, %v20870_v3  ;;  %v12437_v17 = vld [vmem:[#allocation3 + $0x20] sm:$0xf]  ;;  %v11247_v25 = vld [vmem:[%s20781_s7 + $0x38] sm:$0xf0]  ;;  %21099 = vst [vmem:[#allocation67_spill] sm:$0xff] %v16300_v20 }
 0x194   : > { %21093 = vst [vmem:[#allocation64_spill] sm:$0xff] %v16274_v41  ;;  %v1624_v53 = vadd.f32 %v1623_v49, %v16043_v13  ;;  %v1682_v14 = vpop.f32.mrf.mxu1  ;;  %v21097_v12 = vunpack.c.h.b16 %v16258_v44  ;;  %v1844_v32 = vmax.f32 %v1681_v18, 0.0  ;;  %v16298_v3 = vor.u32 %v14530_v28, %v12437_v17  ;;  %v11295_v18 = vld [vmem:[%s20781_s7 + $0x98] sm:$0xf0]  ;;  %v11205_v41 = vld [vmem:[#allocation2 + $0x60] sm:$0xf] }
 0x195   : > { %21095 = vst [vmem:[#allocation65_spill] sm:$0xff] %v16284_v56  ;;  %v1799_v49 = vadd.f32 %v1798_v36, %v1740_v10  ;;  %v11250_v11 = vor.u32 %v14229_v0, %v11247_v25  ;;  %v6813_v36 = vrot.slane %v6811_v45, 1  ;;  %v20875_v28 = vrot.slane %v16300_v20, 1  ;;  %v11397_v45 = vld [vmem:[#allocation3 + $0x30] sm:$0xf] }
 0x196   : > { %v6812_v57 = vpack.c.b16 %v21097_v12, %v6810_v46  ;;  %1978 = vst.msk [vmem:[#allocation3 + $0x38] sm:$0xff] %vm15157_vm2, %v1958_v51  ;;  %v1683_v38 = vadd.f32 %v1682_v14, %v1624_v53  ;;  %v14241_v51 = vld [vmem:[%s20781_s7 + $0x94] sm:$0xf]  ;;  %v1884_v17 = vmul.f32 %v1844_v32, %v15648_v6  ;;  %v20876_v0 = vrot.slane %v16298_v3, 1 }
 0x197   : > { %21098 = vst [vmem:[#allocation66_spill] sm:$0xff] %v16298_v3  ;;  %v1845_v46 = vmax.f32 %v1799_v49, 0.0  ;;  %v11298_v10 = vor.u32 %v14241_v51, %v11295_v18  ;;  %2756 = vmatpush.bf16.msrb.mxu2 %v11250_v11  ;;  %v11005_v51 = vld [vmem:[#allocation3 + $0x30] sm:$0xf]  ;;  %v14253_v11 = vld [vmem:[#allocation3 + $0x34] sm:$0xf] }
 0x198   : > { %v6816_v12 = vrot.slane %v6812_v57, 1  ;;  %v1846_v59 = vmax.f32 %v1683_v38, 0.0  ;;  %v16316_v57 = vsel %vm4034_vm3, %v6813_v36, %v20876_v0  ;;  %v11245_v36 = vld [vmem:[%s20781_s7 + $0x30] sm:$0xf] }
 0x199   : > { %v1885_v52 = vmul.f32 %v1845_v46, %v15648_v6  ;;  %2799 = vmatpush.bf16.msrb.mxu3 %v11298_v10  ;;  %21100 = vst [vmem:[#allocation68_spill] sm:$0xff] %v16316_v57  ;;  %v11293_v0 = vld [vmem:[%s20781_s7 + $0x90] sm:$0xf]  ;;  %v21108_v57 = vrot.slane %v16298_v3, 1 }
 0x19a   : > { %v1741_v53 = vpop.f32.mrf.mxu2  ;;  %v16321_v6 = vsel %vm4034_vm3, %v6816_v12, %v20875_v28  ;;  %v14230_v12 = vld [vmem:[%s20781_s7 + $0x34] sm:$0xf0] }
 0x19b   : > { %v1959_v14 = vpack.c.bf16 %v1885_v52, %v1884_v17  ;;  %v1742_v25 = vadd.f32 %v1741_v53, %v16062_v37  ;;  %v1800_v58 = vpop.f32.mrf.mxu3  ;;  %v1626_v49 = vpop.f32.mrf.mxu0  ;;  %21101 = vst [vmem:[#allocation69_spill] sm:$0xff] %v16321_v6  ;;  %v14329_v17 = vld [vmem:[#allocation3 + $0x34] sm:$0xf]  ;;  %v11246_v28 = vor.u32 %v14230_v12, %v11245_v36 }
 0x19c   : > { %v1627_v32 = vadd.f32 %v1626_v49, %v16043_v13  ;;  %v1685_v38 = vpop.f32.mrf.mxu1 }
 0x19d   : > { %v14254_v18 = vld [vmem:[#allocation3 + $0x34] sm:$0xf0]  ;;  %v11007_v46 = vld [vmem:[#allocation3 + $0x38] sm:$0xf0]  ;;  %1979 = vst.msk [vmem:[#allocation3 + $0x40] sm:$0xff] %vm15157_vm2, %v1959_v14  ;;  %v1801_v52 = vadd.f32 %v1800_v58, %v1742_v25  ;;  %2674 = vmatpush.bf16.msrb.mxu0 %v11246_v28 }
 0x19e   : > { %v14330_v10 = vld [vmem:[#allocation3 + $0x34] sm:$0xf0]  ;;  %v11006_v53 = vor.u32 %v14254_v18, %v11005_v51  ;;  %v11010_v9 = vor.u32 %v14253_v11, %v11007_v46  ;;  %v14242_v58 = vld [vmem:[%s20781_s7 + $0x94] sm:$0xf0]  ;;  %v11399_v14 = vld [vmem:[#allocation3 + $0x38] sm:$0xf0]  ;;  %v1886_v18 = vmul.f32 %v1846_v59, %v15700_v19 }
 0x19f   : > { %v16332_v49 = vor.u32 %v14330_v10, %v11397_v45  ;;  %v1847_v25 = vmax.f32 %v1801_v52, 0.0  ;;  %v11294_v51 = vor.u32 %v14242_v58, %v11293_v0  ;;  %v16341_v11 = vor.u32 %v14329_v17, %v11399_v14  ;;  %v14532_v36 = vld [vmem:[#allocation3 + $0x34] sm:$0xf0] }
 0x1a0   : > { %2310 = vmatmul.bf16.gmra.mxu0 %v11006_v53  ;;  %11142 = vmatmul.msk.bf16.gmra.mxu1 %vm2265_vm4, %v11010_v9  ;;  %v1686_v10 = vadd.f32 %v1685_v38, %v1627_v32  ;;  %v21102_v0 = vrot.slane %v16256_v61, 1  ;;  %v12445_v32 = vld [vmem:[#allocation3 + $0x30] sm:$0xf]  ;;  %v21104_v14 = vrot.slane %v16261_v54, 1 }
 0x1a1   : > { %2392 = vmatmul.bf16.gmra.mxu2 %v11006_v53  ;;  %11150 = vmatmul.msk.bf16.gmra.mxu3 %vm2265_vm4, %v11010_v9  ;;  %v20877_v45 = vrot.slane %v16332_v49, 1  ;;  %v1887_v46 = vmul.f32 %v1847_v25, %v15700_v19  ;;  %v20878_v9 = vrot.slane %v16341_v11, 1  ;;  %v12447_v53 = vld [vmem:[#allocation3 + $0x38] sm:$0xf0] }
 0x1a2   : > { %2717 = vmatpush.bf16.msrb.mxu1 %v11294_v51  ;;  %v1744_v52 = vpop.f32.mrf.mxu2  ;;  %v16364_v51 = vor.u32 %v14532_v36, %v12445_v32 }
 0x1a3   : > { %v16352_v17 = vsel %vm4034_vm3, %v21102_v0, %v20877_v45  ;;  %v1960_v12 = vpack.c.bf16 %v1887_v46, %v1886_v18  ;;  %v1745_v59 = vadd.f32 %v1744_v52, %v16062_v37  ;;  %v1803_v58 = vpop.f32.mrf.mxu3  ;;  %v1628_v19 = vpop.f32.mrf.mxu0  ;;  %v16362_v25 = vsel %vm4034_vm3, %v21104_v14, %v20878_v9  ;;  %v14531_v0 = vld [vmem:[#allocation3 + $0x34] sm:$0xf]  ;;  %v14227_v52 = vld [vmem:[%s20781_s7 + $0x24] sm:$0xf] }
 0x1a4   : > { %21103 = vst [vmem:[#allocation70_spill] sm:$0xff] %v16352_v17  ;;  %v1629_v28 = vadd.f32 %v1628_v19, %v16043_v13  ;;  %v1687_v38 = vpop.f32.mrf.mxu1  ;;  %v1848_v18 = vmax.f32 %v1686_v10, 0.0  ;;  %v11239_v19 = vld [vmem:[%s20781_s7 + $0x28] sm:$0xf0]  ;;  %v16374_v45 = vor.u32 %v14531_v0, %v12447_v53  ;;  %v20883_v32 = vrot.slane %v16364_v51, 1 }
 0x1a5   : > { %21105 = vst [vmem:[#allocation71_spill] sm:$0xff] %v16362_v25  ;;  %v1804_v46 = vadd.f32 %v1803_v58, %v1745_v59  ;;  %v11242_v14 = vor.u32 %v14227_v52, %v11239_v19  ;;  %v11013_v6 = vld [vmem:[#allocation3 + $0x40] sm:$0xf]  ;;  %v14255_v52 = vld [vmem:[#allocation3 + $0x44] sm:$0xf] }
 0x1a6   : > { %21106 = vst [vmem:[#allocation72_spill] sm:$0xff] %v16364_v51  ;;  %v1688_v36 = vadd.f32 %v1687_v38, %v1629_v28  ;;  %v1888_v10 = vmul.f32 %v1848_v18, %v15721_v62  ;;  %v16385_v53 = vsel %vm4034_vm3, %v21108_v57, %v20883_v32  ;;  %v21110_v28 = vrot.slane %v16300_v20, 1  ;;  %v11405_v19 = vld [vmem:[#allocation3 + $0x40] sm:$0xf] }
 0x1a7   : > { %1980 = vst.msk [vmem:[#allocation3 + $0x48] sm:$0xff] %vm15157_vm2, %v1960_v12  ;;  %v1849_v9 = vmax.f32 %v1804_v46, 0.0  ;;  %2757 = vmatpush.bf16.msrb.mxu2 %v11242_v14  ;;  %v20887_v12 = vrot.slane %v16374_v45, 1 }
 0x1a8   : > { %21107 = vst [vmem:[#allocation73_spill] sm:$0xff] %v16374_v45  ;;  %v1850_v18 = vmax.f32 %v1688_v36, 0.0  ;;  %v11237_v36 = vld [vmem:[%s20781_s7 + $0x20] sm:$0xf] }
 0x1a9   : > { %v1889_v59 = vmul.f32 %v1849_v9, %v15721_v62  ;;  %21109 = vst [vmem:[#allocation74_spill] sm:$0xff] %v16385_v53  ;;  %v16392_v38 = vsel %vm4034_vm3, %v21110_v28, %v20887_v12 }
 0x1aa   : > { %v1746_v58 = vpop.f32.mrf.mxu2  ;;  %21111 = vst [vmem:[#allocation75_spill] sm:$0xff] %v16392_v38 }
 0x1ab   : > { %v1961_v0 = vpack.c.bf16 %v1889_v59, %v1888_v10  ;;  %v1747_v62 = vadd.f32 %v1746_v58, %v16062_v37  ;;  %v1805_v9 = vpop.f32.mrf.mxu3  ;;  %v1631_v46 = vpop.f32.mrf.mxu0  ;;  %v14228_v10 = vld [vmem:[%s20781_s7 + $0x24] sm:$0xf0] }
 0x1ac   : > { %v1632_v14 = vadd.f32 %v1631_v46, %v16043_v13  ;;  %v1690_v4 = vpop.f32.mrf.mxu1  ;;  %v11238_v58 = vor.u32 %v14228_v10, %v11237_v36  ;;  %v14331_v46 = vld [vmem:[#allocation3 + $0x44] sm:$0xf]  ;;  %v12453_v10 = vld [vmem:[#allocation3 + $0x40] sm:$0xf] }
 0x1ad   : > { %1981 = vst.msk [vmem:[#allocation3 + $0x50] sm:$0xff] %vm15157_vm2, %v1961_v0  ;;  %v1806_v42 = vadd.f32 %v1805_v9, %v1747_v62 }
 0x1ae   : > { %v14256_v57 = vld [vmem:[#allocation3 + $0x44] sm:$0xf0]  ;;  %v11015_v32 = vld [vmem:[#allocation3 + $0x48] sm:$0xf0]  ;;  %2675 = vmatpush.bf16.msrb.mxu0 %v11238_v58  ;;  %v14533_v58 = vld [vmem:[#allocation3 + $0x44] sm:$0xf] }
 0x1af   : > { %v14332_v53 = vld [vmem:[#allocation3 + $0x44] sm:$0xf0]  ;;  %v11014_v28 = vor.u32 %v14256_v57, %v11013_v6  ;;  %v11018_v12 = vor.u32 %v14255_v52, %v11015_v32  ;;  %v11407_v38 = vld [vmem:[#allocation3 + $0x48] sm:$0xf0]  ;;  %v1851_v20 = vmax.f32 %v1806_v42, 0.0  ;;  %v1890_v32 = vmul.f32 %v1850_v18, %v15769_v15 }
 0x1b0   : > { %v16404_v59 = vor.u32 %v14332_v53, %v11405_v19  ;;  %v16407_v0 = vor.u32 %v14331_v46, %v11407_v38  ;;  %v1691_v53 = vadd.f32 %v1690_v4, %v1632_v14  ;;  %v21112_v42 = vrot.slane %v16332_v49, 1  ;;  %v14534_v19 = vld [vmem:[#allocation3 + $0x44] sm:$0xf0] }
 0x1b1   : > { %2314 = vmatmul.bf16.gmra.mxu0 %v11014_v28  ;;  %11143 = vmatmul.msk.bf16.gmra.mxu1 %vm2265_vm4, %v11018_v12  ;;  %v1891_v62 = vmul.f32 %v1851_v20, %v15769_v15  ;;  %v21114_v4 = vrot.slane %v16341_v11, 1 }
 0x1b2   : > { %2396 = vmatmul.bf16.gmra.mxu2 %v11014_v28  ;;  %11151 = vmatmul.msk.bf16.gmra.mxu3 %vm2265_vm4, %v11018_v12  ;;  %v20892_v6 = vrot.slane %v16404_v59, 1  ;;  %v1749_v9 = vpop.f32.mrf.mxu2  ;;  %v20891_v38 = vrot.slane %v16407_v0, 1  ;;  %v12455_v12 = vld [vmem:[#allocation3 + $0x48] sm:$0xf0]  ;;  %v1852_v46 = vmax.f32 %v1691_v53, 0.0 }
 0x1b3   : > { %v1962_v57 = vpack.c.bf16 %v1891_v62, %v1890_v32  ;;  %v1750_v28 = vadd.f32 %v1749_v9, %v16062_v37  ;;  %v1808_v18 = vpop.f32.mrf.mxu3  ;;  %v1633_v36 = vpop.f32.mrf.mxu0  ;;  %v14225_v62 = vld [vmem:[%s20781_s7 + $0x14] sm:$0xf]  ;;  %v11231_v9 = vld [vmem:[%s20781_s7 + $0x18] sm:$0xf0]  ;;  %v11287_v53 = vld [vmem:[%s20781_s7 + $0x88] sm:$0xf0] }
 0x1b4   : > { %v16418_v52 = vsel %vm4034_vm3, %v21112_v42, %v20892_v6  ;;  %v1634_v15 = vadd.f32 %v1633_v36, %v16043_v13  ;;  %v1692_v20 = vpop.f32.mrf.mxu1  ;;  %v16428_v14 = vsel %vm4034_vm3, %v21114_v4, %v20891_v38  ;;  %v16438_v42 = vor.u32 %v14534_v19, %v12453_v10  ;;  %v11021_v44 = vld [vmem:[#allocation3 + $0x50] sm:$0xf] }
 0x1b5   : > { %21113 = vst [vmem:[#allocation76_spill] sm:$0xff] %v16418_v52  ;;  %v1809_v32 = vadd.f32 %v1808_v18, %v1750_v28  ;;  %v16440_v36 = vor.u32 %v14533_v58, %v12455_v12  ;;  %v11234_v38 = vor.u32 %v14225_v62, %v11231_v9  ;;  %v1892_v6 = vmul.f32 %v1852_v46, %v15785_v26 }
 0x1b6   : > { %21115 = vst [vmem:[#allocation77_spill] sm:$0xff] %v16428_v14  ;;  %v1693_v4 = vadd.f32 %v1692_v20, %v1634_v15  ;;  %v20899_v12 = vrot.slane %v16438_v42, 1  ;;  %v21120_v46 = vrot.slane %v16374_v45, 1 }
 0x1b7   : > { %1982 = vst.msk [vmem:[#allocation3 + $0x58] sm:$0xff] %vm15157_vm2, %v1962_v57  ;;  %v14239_v57 = vld [vmem:[%s20781_s7 + $0x84] sm:$0xf]  ;;  %v1853_v28 = vmax.f32 %v1809_v32, 0.0  ;;  %2758 = vmatpush.bf16.msrb.mxu2 %v11234_v38  ;;  %v20901_v15 = vrot.slane %v16440_v36, 1  ;;  %v21118_v38 = vrot.slane %v16364_v51, 1 }
 0x1b8   : > { %21116 = vst [vmem:[#allocation78_spill] sm:$0xff] %v16438_v42  ;;  %v11290_v18 = vor.u32 %v14239_v57, %v11287_v53  ;;  %v1854_v20 = vmax.f32 %v1693_v4, 0.0  ;;  %v14257_v32 = vld [vmem:[#allocation3 + $0x54] sm:$0xf]  ;;  %v11413_v57 = vld [vmem:[#allocation3 + $0x50] sm:$0xf] }
 0x1b9   : > { %21117 = vst [vmem:[#allocation79_spill] sm:$0xff] %v16440_v36  ;;  %v1893_v19 = vmul.f32 %v1853_v28, %v15785_v26  ;;  %v16458_v26 = vsel %vm4034_vm3, %v21118_v38, %v20899_v12 }
 0x1ba   : > { %2800 = vmatpush.bf16.msrb.mxu3 %v11290_v18  ;;  %v1751_v10 = vpop.f32.mrf.mxu2  ;;  %21119 = vst [vmem:[#allocation80_spill] sm:$0xff] %v16458_v26  ;;  %v11229_v26 = vld [vmem:[%s20781_s7 + $0x10] sm:$0xf] }
 0x1bb   : > { %v1963_v58 = vpack.c.bf16 %v1893_v19, %v1892_v6  ;;  %v1752_v62 = vadd.f32 %v1751_v10, %v16062_v37  ;;  %v1810_v9 = vpop.f32.mrf.mxu3  ;;  %v1636_v3 = vpop.f32.mrf.mxu0  ;;  %v16465_v6 = vsel %vm4034_vm3, %v21120_v46, %v20901_v15  ;;  %v14333_v10 = vld [vmem:[#allocation3 + $0x54] sm:$0xf]  ;;  %v14226_v46 = vld [vmem:[%s20781_s7 + $0x14] sm:$0xf0] }
 0x1bc   : > { %21121 = vst [vmem:[#allocation81_spill] sm:$0xff] %v16465_v6  ;;  %v1637_v4 = vadd.f32 %v1636_v3, %v16043_v13  ;;  %v1695_v53 = vpop.f32.mrf.mxu1  ;;  %v11230_v15 = vor.u32 %v14226_v46, %v11229_v26  ;;  %v11285_v6 = vld [vmem:[%s20781_s7 + $0x80] sm:$0xf]  ;;  %v1894_v26 = vmul.f32 %v1854_v20, %v15847_v5 }
 0x1bd   : > { %1983 = vst.msk [vmem:[#allocation3 + $0x60] sm:$0xff] %vm15157_vm2, %v1963_v58  ;;  %v1811_v51 = vadd.f32 %v1810_v9, %v1752_v62 }
 0x1be   : > { %v14258_v28 = vld [vmem:[#allocation3 + $0x54] sm:$0xf0]  ;;  %v11023_v18 = vld [vmem:[#allocation3 + $0x58] sm:$0xf0]  ;;  %2676 = vmatpush.bf16.msrb.mxu0 %v11230_v15 }
 0x1bf   : > { %v14334_v19 = vld [vmem:[#allocation3 + $0x54] sm:$0xf0]  ;;  %v11022_v38 = vor.u32 %v14258_v28, %v11021_v44  ;;  %v11026_v12 = vor.u32 %v14257_v32, %v11023_v18  ;;  %v14240_v44 = vld [vmem:[%s20781_s7 + $0x84] sm:$0xf0]  ;;  %v11415_v58 = vld [vmem:[#allocation3 + $0x58] sm:$0xf0]  ;;  %v1696_v18 = vadd.f32 %v1695_v53, %v1637_v4 }
 0x1c0   : > { %v16476_v3 = vor.u32 %v14334_v19, %v11413_v57  ;;  %v1855_v62 = vmax.f32 %v1811_v51, 0.0  ;;  %v11286_v9 = vor.u32 %v14240_v44, %v11285_v6  ;;  %v16485_v32 = vor.u32 %v14333_v10, %v11415_v58  ;;  %v14536_v19 = vld [vmem:[#allocation3 + $0x54] sm:$0xf0]  ;;  %v12461_v4 = vld [vmem:[#allocation3 + $0x50] sm:$0xf] }
 0x1c1   : > { %2318 = vmatmul.bf16.gmra.mxu0 %v11022_v38  ;;  %11144 = vmatmul.msk.bf16.gmra.mxu1 %vm2265_vm4, %v11026_v12  ;;  %v21122_v6 = vrot.slane %v16404_v59, 1  ;;  %v21124_v58 = vrot.slane %v16407_v0, 1 }
 0x1c2   : > { %2400 = vmatmul.bf16.gmra.mxu2 %v11022_v38  ;;  %11152 = vmatmul.msk.bf16.gmra.mxu3 %vm2265_vm4, %v11026_v12  ;;  %v20903_v57 = vrot.slane %v16476_v3, 1  ;;  %v1895_v28 = vmul.f32 %v1855_v62, %v15847_v5  ;;  %v1754_v51 = vpop.f32.mrf.mxu2  ;;  %v20904_v12 = vrot.slane %v16485_v32, 1  ;;  %v12463_v38 = vld [vmem:[#allocation3 + $0x58] sm:$0xf0] }
 0x1c3   : > { %2718 = vmatpush.bf16.msrb.mxu1 %v11286_v9  ;;  %v1755_v20 = vadd.f32 %v1754_v51, %v16062_v37  ;;  %v1813_v44 = vpop.f32.mrf.mxu3  ;;  %v1638_v5 = vpop.f32.mrf.mxu0  ;;  %v16508_v9 = vor.u32 %v14536_v19, %v12461_v4  ;;  %v14223_v51 = vld [vmem:[%s20781_s7 + $0x4] sm:$0xf] }
 0x1c4   : > { %v16496_v10 = vsel %vm4034_vm3, %v21122_v6, %v20903_v57  ;;  %v1964_v46 = vpack.c.bf16 %v1895_v28, %v1894_v26  ;;  %v1639_v15 = vadd.f32 %v1638_v5, %v16043_v13  ;;  %v1697_v53 = vpop.f32.mrf.mxu1  ;;  %v16506_v62 = vsel %vm4034_vm3, %v21124_v58, %v20904_v12  ;;  %v14535_v6 = vld [vmem:[#allocation3 + $0x54] sm:$0xf]  ;;  %v11223_v5 = vld [vmem:[%s20781_s7 + $0x8] sm:$0xf0]  ;;  %v11029_v45 = vld [vmem:[#allocation3 + $0x60] sm:$0xf] }
 0x1c5   : > { %21123 = vst [vmem:[#allocation82_spill] sm:$0xff] %v16496_v10  ;;  %v1856_v26 = vmax.f32 %v1696_v18, 0.0  ;;  %v1814_v28 = vadd.f32 %v1813_v44, %v1755_v20  ;;  %v16518_v57 = vor.u32 %v14535_v6, %v12463_v38  ;;  %v11226_v58 = vor.u32 %v14223_v51, %v11223_v5  ;;  %v14224_v38 = vld [vmem:[%s20781_s7 + $0x4] sm:$0xf0] }
 0x1c6   : > { %21125 = vst [vmem:[#allocation83_spill] sm:$0xff] %v16506_v62  ;;  %v1698_v19 = vadd.f32 %v1697_v53, %v1639_v15  ;;  %v20912_v4 = vrot.slane %v16508_v9, 1  ;;  %v11221_v62 = vld [vmem:[%s20781_s7] sm:$0xf]  ;;  %v21128_v15 = vrot.slane %v16438_v42, 1 }
 0x1c7   : > { %21126 = vst [vmem:[#allocation84_spill] sm:$0xff] %v16508_v9  ;;  %v1857_v12 = vmax.f32 %v1814_v28, 0.0  ;;  %2759 = vmatpush.bf16.msrb.mxu2 %v11226_v58  ;;  %v1896_v18 = vmul.f32 %v1856_v26, %v15856_v55  ;;  %v14259_v58 = vld [vmem:[#allocation3 + $0x64] sm:$0xf]  ;;  %v11222_v10 = vor.u32 %v14224_v38, %v11221_v62  ;;  %v11421_v14 = vld [vmem:[#allocation3 + $0x60] sm:$0xf] }
 0x1c8   : > { %1984 = vst.msk [vmem:[#allocation3 + $0x68] sm:$0xff] %vm15157_vm2, %v1964_v46  ;;  %v20915_v46 = vrot.slane %v16518_v57, 1  ;;  %v16535_v53 = vsel %vm4034_vm3, %v21128_v15, %v20912_v4  ;;  %v1858_v26 = vmax.f32 %v1698_v19, 0.0  ;;  %v14335_v19 = vld [vmem:[#allocation3 + $0x64] sm:$0xf] }
 0x1c9   : > { %21127 = vst [vmem:[#allocation85_spill] sm:$0xff] %v16518_v57  ;;  %v1897_v20 = vmul.f32 %v1857_v12, %v15856_v55  ;;  %v21130_v55 = vrot.slane %v16440_v36, 1  ;;  %2677 = vmatpush.bf16.msrb.mxu0 %v11222_v10 }
 0x1ca   : > { %v1756_v44 = vpop.f32.mrf.mxu2  ;;  %21129 = vst [vmem:[#allocation86_spill] sm:$0xff] %v16535_v53  ;;  %v1898_v38 = vmul.f32 %v1858_v26, %v15913_v29  ;;  %v21132_v26 = vrot.slane %v16476_v3, 1 }
 0x1cb   : > { %v16542_v12 = vsel %vm4034_vm3, %v21130_v55, %v20915_v46  ;;  %v1965_v6 = vpack.c.bf16 %v1897_v20, %v1896_v18  ;;  %v1757_v28 = vadd.f32 %v1756_v44, %v16062_v37  ;;  %v1815_v51 = vpop.f32.mrf.mxu3  ;;  %v1641_v5 = vpop.f32.mrf.mxu0 }
 0x1cc   : > { %21131 = vst [vmem:[#allocation87_spill] sm:$0xff] %v16542_v12  ;;  %v1642_v42 = vadd.f32 %v1641_v5, %v16043_v13  ;;  %v1700_v15 = vpop.f32.mrf.mxu1 }
 0x1cd   : > { %1985 = vst.msk [vmem:[#allocation3 + $0x70] sm:$0xff] %vm15157_vm2, %v1965_v6  ;;  %v1816_v55 = vadd.f32 %v1815_v51, %v1757_v28 }
 0x1cf   : > { %v14260_v4 = vld [vmem:[#allocation3 + $0x64] sm:$0xf0]  ;;  %v11031_v53 = vld [vmem:[#allocation3 + $0x68] sm:$0xf0]  ;;  %v1859_v62 = vmax.f32 %v1816_v55, 0.0 }
 0x1d0   : > { %v14336_v52 = vld [vmem:[#allocation3 + $0x64] sm:$0xf0]  ;;  %v11030_v46 = vor.u32 %v14260_v4, %v11029_v45  ;;  %v11034_v18 = vor.u32 %v14259_v58, %v11031_v53  ;;  %v11423_v20 = vld [vmem:[#allocation3 + $0x68] sm:$0xf0]  ;;  %v1701_v45 = vadd.f32 %v1700_v15, %v1642_v42 }
 0x1d1   : > { %v16548_v44 = vor.u32 %v14336_v52, %v11421_v14  ;;  %v16550_v12 = vor.u32 %v14335_v19, %v11423_v20  ;;  %v1899_v6 = vmul.f32 %v1859_v62, %v15913_v29  ;;  %v21134_v29 = vrot.slane %v16485_v32, 1  ;;  %v14538_v5 = vld [vmem:[#allocation3 + $0x64] sm:$0xf0]  ;;  %v12471_v58 = vld [vmem:[#allocation3 + $0x68] sm:$0xf0] }
 0x1d2   : > { %2322 = vmatmul.bf16.gmra.mxu0 %v11030_v46  ;;  %11145 = vmatmul.msk.bf16.gmra.mxu1 %vm2265_vm4, %v11034_v18  ;;  %v1759_v52 = vpop.f32.mrf.mxu2  ;;  %v14537_v19 = vld [vmem:[#allocation3 + $0x64] sm:$0xf]  ;;  %v1860_v20 = vmax.f32 %v1701_v45, 0.0  ;;  %v11493_v45 = vld [vmem:[%s20782_s8 + $0x130] sm:$0xf] }
 0x1d3   : > { %2404 = vmatmul.bf16.gmra.mxu2 %v11030_v46  ;;  %11153 = vmatmul.msk.bf16.gmra.mxu3 %vm2265_vm4, %v11034_v18  ;;  %v20918_v10 = vrot.slane %v16548_v44, 1  ;;  %v20917_v4 = vrot.slane %v16550_v12, 1  ;;  %v1966_v14 = vpack.c.bf16 %v1899_v6, %v1898_v38  ;;  %v1760_v53 = vadd.f32 %v1759_v52, %v16062_v37  ;;  %v1818_v28 = vpop.f32.mrf.mxu3  ;;  %v1643_v51 = vpop.f32.mrf.mxu0  ;;  %v12469_v18 = vld [vmem:[#allocation3 + $0x60] sm:$0xf]  ;;  %v14353_v38 = vld [vmem:[%s20782_s8 + $0x134] sm:$0xf] }
 0x1d4   : > { %v1644_v15 = vadd.f32 %v1643_v51, %v16043_v13  ;;  %v1702_v55 = vpop.f32.mrf.mxu1  ;;  %v11495_v6 = vld [vmem:[%s20782_s8 + $0x138] sm:$0xf0]  ;;  %v14361_v51 = vld [vmem:[%s20782_s8 + $0x174] sm:$0xf] }
 0x1d5   : > { %v16564_v46 = vsel %vm4034_vm3, %v21132_v26, %v20918_v10  ;;  %v16571_v42 = vsel %vm4034_vm3, %v21134_v29, %v20917_v4  ;;  %1986 = vst.msk [vmem:[#allocation3 + $0x78] sm:$0xff] %vm15157_vm2, %v1966_v14  ;;  %v1819_v62 = vadd.f32 %v1818_v28, %v1760_v53  ;;  %v11498_v52 = vor.u32 %v14353_v38, %v11495_v6  ;;  %v11527_v26 = vld [vmem:[%s20782_s8 + $0x178] sm:$0xf0]  ;;  %v14354_v38 = vld [vmem:[%s20782_s8 + $0x134] sm:$0xf0] }
 0x1d6   : > { %21133 = vst [vmem:[#allocation88_spill] sm:$0xff] %v16564_v46  ;;  %v16591_v14 = vor.u32 %v14538_v5, %v12469_v18  ;;  %v16593_v53 = vor.u32 %v14537_v19, %v12471_v58  ;;  %v1703_v29 = vadd.f32 %v1702_v55, %v1644_v15  ;;  %v11530_v4 = vor.u32 %v14361_v51, %v11527_v26  ;;  %v11525_v6 = vld [vmem:[%s20782_s8 + $0x170] sm:$0xf]  ;;  %v14362_v5 = vld [vmem:[%s20782_s8 + $0x174] sm:$0xf0] }
 0x1d7   : > { %21135 = vst [vmem:[#allocation89_spill] sm:$0xff] %v16571_v42  ;;  %v1861_v28 = vmax.f32 %v1819_v62, 0.0  ;;  %3358 = vmatpush.bf16.msra.mxu2 %v11498_v52  ;;  %v11494_v10 = vor.u32 %v14354_v38, %v11493_v45  ;;  %v1900_v58 = vmul.f32 %v1860_v20, %v15933_v34  ;;  %v11526_v15 = vor.u32 %v14362_v5, %v11525_v6  ;;  %v11037_v19 = vld [vmem:[#allocation3 + $0x70] sm:$0xf]  ;;  %v14261_v42 = vld [vmem:[#allocation3 + $0x74] sm:$0xf] }
 0x1d8   : > { %21136 = vst [vmem:[#allocation90_spill] sm:$0xff] %v16591_v14  ;;  %3403 = vmatpush.bf16.msra.mxu3 %v11530_v4  ;;  %v20927_v62 = vrot.slane %v16591_v14, 1  ;;  %v20928_v51 = vrot.slane %v16593_v53, 1  ;;  %v1862_v52 = vmax.f32 %v1703_v29, 0.0  ;;  %v11429_v20 = vld [vmem:[#allocation3 + $0x70] sm:$0xf] }
 0x1d9   : > { %21137 = vst [vmem:[#allocation91_spill] sm:$0xff] %v16593_v53  ;;  %v1901_v18 = vmul.f32 %v1861_v28, %v15933_v34  ;;  %3276 = vmatpush.bf16.msra.mxu0 %v11494_v10  ;;  %3321 = vmatpush.bf16.msra.mxu1 %v11526_v15  ;;  %v21138_v10 = vrot.slane %v16508_v9, 1  ;;  %v21140_v29 = vrot.slane %v16518_v57, 1  ;;  %v14337_v25 = vld [vmem:[#allocation3 + $0x74] sm:$0xf] }
 0x1da   : > { %v1761_v55 = vpop.f32.mrf.mxu2 }
 0x1db   : > { %v1967_v26 = vpack.c.bf16 %v1901_v18, %v1900_v58  ;;  %v1762_v45 = vadd.f32 %v1761_v55, %v16062_v37  ;;  %v1820_v38 = vpop.f32.mrf.mxu3  ;;  %v1646_v36 = vpop.f32.mrf.mxu0  ;;  %v16615_v58 = vsel %vm4034_vm3, %v21138_v10, %v20927_v62  ;;  %v16622_v18 = vsel %vm4034_vm3, %v21140_v29, %v20928_v51 }
 0x1dc   : > { %v1647_v34 = vadd.f32 %v1646_v36, %v16043_v13  ;;  %v1705_v4 = vpop.f32.mrf.mxu1  ;;  %v14262_v28 = vld [vmem:[#allocation3 + $0x74] sm:$0xf0]  ;;  %v11039_v6 = vld [vmem:[#allocation3 + $0x78] sm:$0xf0]  ;;  %21139 = vst [vmem:[#allocation92_spill] sm:$0xff] %v16615_v58 }
 0x1dd   : > { %v14338_v5 = vld [vmem:[#allocation3 + $0x74] sm:$0xf0]  ;;  %21141 = vst [vmem:[#allocation93_spill] sm:$0xff] %v16622_v18  ;;  %v1821_v36 = vadd.f32 %v1820_v38, %v1762_v45  ;;  %v11038_v15 = vor.u32 %v14262_v28, %v11037_v19  ;;  %v11042_v55 = vor.u32 %v14261_v42, %v11039_v6  ;;  %v11431_v9 = vld [vmem:[#allocation3 + $0x78] sm:$0xf0]  ;;  %v21142_v38 = vrot.slane %v16548_v44, 1 }
 0x1de   : > { %1987 = vst.msk [vmem:[#allocation3 + $0x80] sm:$0xff] %vm15157_vm2, %v1967_v26  ;;  %v16626_v46 = vor.u32 %v14338_v5, %v11429_v20  ;;  %v16628_v17 = vor.u32 %v14337_v25, %v11431_v9  ;;  %v1706_v62 = vadd.f32 %v1705_v4, %v1647_v34  ;;  %v14351_v42 = vld [vmem:[%s20782_s8 + $0x124] sm:$0xf]  ;;  %v11487_v19 = vld [vmem:[%s20782_s8 + $0x128] sm:$0xf0]  ;;  %v1902_v25 = vmul.f32 %v1862_v52, %v15997_v50 }
 0x1df   : > { %v1863_v10 = vmax.f32 %v1821_v36, 0.0  ;;  %v11490_v26 = vor.u32 %v14351_v42, %v11487_v19  ;;  %v12479_v58 = vld [vmem:[#allocation3 + $0x78] sm:$0xf0] }
 0x1e0   : > { %v4061_v29 = vrot.slane %v16626_v46, 1  ;;  %v4063_v34 = vrot.slane %v16628_v17, 1  ;;  %v1864_v28 = vmax.f32 %v1706_v62, 0.0  ;;  %v21144_v62 = vrot.slane %v16550_v12, 1 }
 0x1e1   : > { %v1903_v9 = vmul.f32 %v1863_v10, %v15997_v50  ;;  %3359 = vmatpush.bf16.msra.mxu2 %v11490_v26  ;;  %v14352_v10 = vld [vmem:[%s20782_s8 + $0x124] sm:$0xf0] }
 0x1e2   : > { %2326 = vmatmul.bf16.gmra.mxu0 %v11038_v15  ;;  %11146 = vmatmul.msk.bf16.gmra.mxu1 %vm2265_vm4, %v11042_v55  ;;  %v1764_v45 = vpop.f32.mrf.mxu2  ;;  %v16644_v20 = vsel %vm4034_vm3, %v21142_v38, %v4061_v29  ;;  %v16658_v19 = vsel %vm4034_vm3, %v21144_v62, %v4063_v34  ;;  %v1904_v62 = vmul.f32 %v1864_v28, %v16004_v1 }
 0x1e3   : > { %2408 = vmatmul.bf16.gmra.mxu2 %v11038_v15  ;;  %11154 = vmatmul.msk.bf16.gmra.mxu3 %vm2265_vm4, %v11042_v55  ;;  %21143 = vst [vmem:[#allocation94_spill] sm:$0xff] %v16644_v20  ;;  %v1968_v4 = vpack.c.bf16 %v1903_v9, %v1902_v25  ;;  %v1765_v6 = vadd.f32 %v1764_v45, %v16062_v37  ;;  %v1823_v5 = vpop.f32.mrf.mxu3  ;;  %v1648_v36 = vpop.f32.mrf.mxu0  ;;  %v14540_v15 = vld [vmem:[#allocation3 + $0x74] sm:$0xf0]  ;;  %v12477_v45 = vld [vmem:[#allocation3 + $0x70] sm:$0xf] }
 0x1e4   : > { %v1649_v52 = vadd.f32 %v1648_v36, %v16043_v13  ;;  %v1707_v50 = vpop.f32.mrf.mxu1  ;;  %v11485_v55 = vld [vmem:[%s20782_s8 + $0x120] sm:$0xf]  ;;  %21145 = vst [vmem:[#allocation95_spill] sm:$0xff] %v16658_v19  ;;  %v16666_v18 = vor.u32 %v14540_v15, %v12477_v45 }
 0x1e5   : > { %v2892_v42 = vld [vmem:[#allocation3 + $0x80] sm:$0x11]  ;;  %1988 = vst.msk [vmem:[#allocation3 + $0x88] sm:$0xff] %vm15157_vm2, %v1968_v4  ;;  %v1824_v25 = vadd.f32 %v1823_v5, %v1765_v6  ;;  %v11486_v13 = vor.u32 %v14352_v10, %v11485_v55  ;;  %v11157_v15 = vld [vmem:[#allocation2] sm:$0xf] }
 0x1e6   : > { %v2967_v9 = vunpack.c.l.b16 %v2892_v42  ;;  %v2968_v26 = vunpack.c.h.b16 %v2892_v42  ;;  %21146 = vst [vmem:[#allocation96_spill] sm:$0xff] %v16666_v18  ;;  %v1708_v19 = vadd.f32 %v1707_v50, %v1649_v52  ;;  %v14208_v4 = vld [vmem:[#allocation2 + $0x4] sm:$0xf0]  ;;  %v11159_v55 = vld [vmem:[#allocation2 + $0x8] sm:$0xf0]  ;;  %v6835_v28 = vrot.slane %v16666_v18, 1 }
 0x1e7   : > { %v1865_v38 = vmax.f32 %v1824_v25, 0.0  ;;  %3277 = vmatpush.bf16.msra.mxu0 %v11486_v13  ;;  %v14539_v42 = vld [vmem:[#allocation3 + $0x74] sm:$0xf]  ;;  %v11158_v52 = vor.u32 %v14208_v4, %v11157_v15  ;;  %v14207_v50 = vld [vmem:[#allocation2 + $0x4] sm:$0xf] }
 0x1e8   : > { %v16662_v36 = vpack.c.b16 %v2967_v9, %v2967_v9  ;;  %v16664_v51 = vpack.c.b16 %v2968_v26, %v2968_v26  ;;  %v16673_v26 = vor.u32 %v14539_v42, %v12479_v58  ;;  %v11519_v15 = vld [vmem:[%s20782_s8 + $0x168] sm:$0xf0] }
 0x1e9   : > { %v1905_v57 = vmul.f32 %v1865_v38, %v16004_v1 }
 0x1ea   : > { %v4065_v6 = vrot.slane %v16662_v36, 1  ;;  %v1766_v5 = vpop.f32.mrf.mxu2  ;;  %v4067_v10 = vrot.slane %v16664_v51, 1  ;;  %21147 = vst [vmem:[#allocation97_spill] sm:$0xff] %v16673_v26 }
 0x1eb   : > { %v1969_v25 = vpack.c.bf16 %v1905_v57, %v1904_v62  ;;  %v1767_v13 = vadd.f32 %v1766_v5, %v16062_v37  ;;  %v1825_v9 = vpop.f32.mrf.mxu3  ;;  %v1866_v37 = vmax.f32 %v1708_v19, 0.0  ;;  %v11162_v62 = vor.u32 %v14207_v50, %v11159_v55  ;;  %v12485_v5 = vld [vmem:[#allocation3 + $0x80] sm:$0xf]  ;;  %v14349_v19 = vld [vmem:[%s20782_s8 + $0x114] sm:$0xf] }
 0x1ec   : > { %v2299_v45 = vpop.f32.mrf.mxu0  ;;  %v2340_v1 = vpop.f32.mrf.mxu1  ;;  %v16677_v38 = vsel %vm4034_vm3, %v4061_v29, %v4065_v6  ;;  %v16680_v20 = vsel %vm4034_vm3, %v4063_v34, %v4067_v10  ;;  %v14542_v56 = vld [vmem:[#allocation3 + $0x84] sm:$0xf0]  ;;  %v12487_v29 = vld [vmem:[#allocation3 + $0x88] sm:$0xf0]  ;;  %v21151_v34 = vrot.slane %v16591_v14, 1  ;;  %v6837_v10 = vrot.slane %v16673_v26, 1 }
 0x1ed   : > { %21148 = vst [vmem:[#allocation98_spill] sm:$0xff] %v16677_v38  ;;  %v1826_v57 = vadd.f32 %v1825_v9, %v1767_v13  ;;  %v16684_v58 = vadd.f32 %v2340_v1, %v2299_v45  ;;  %v16687_v4 = vor.u32 %v14542_v56, %v12485_v5  ;;  %v11479_v56 = vld [vmem:[%s20782_s8 + $0x118] sm:$0xf0]  ;;  %v14359_v55 = vld [vmem:[%s20782_s8 + $0x164] sm:$0xf] }
 0x1ee   : > { %21149 = vst [vmem:[#allocation99_spill] sm:$0xff] %v16680_v20  ;;  %v16692_v6 = vsel %vm4034_vm3, %v21151_v34, %v6835_v28  ;;  %v11482_v9 = vor.u32 %v14349_v19, %v11479_v56  ;;  %v11522_v45 = vor.u32 %v14359_v55, %v11519_v15  ;;  %v14541_v1 = vld [vmem:[#allocation3 + $0x84] sm:$0xf]  ;;  %v11477_v56 = vld [vmem:[%s20782_s8 + $0x110] sm:$0xf] }
 0x1ef   : > { %1989 = vst.msk [vmem:[#allocation3 + $0x90] sm:$0xff] %vm15157_vm2, %v1969_v25  ;;  %v1867_v42 = vmax.f32 %v1826_v57, 0.0  ;;  %v1906_v25 = vmul.f32 %v1866_v37, %v16060_v8  ;;  %v16715_v34 = vor.u32 %v14541_v1, %v12487_v29  ;;  %v14350_v55 = vld [vmem:[%s20782_s8 + $0x114] sm:$0xf0]  ;;  %v11517_v29 = vld [vmem:[%s20782_s8 + $0x160] sm:$0xf] }
 0x1f0   : > { %21150 = vst [vmem:[#allocation100_spill] sm:$0xff] %v16687_v4  ;;  %3360 = vmatpush.bf16.msra.mxu2 %v11482_v9  ;;  %3404 = vmatpush.bf16.msra.mxu3 %v11522_v45  ;;  %v14218_v14 = vld [vmem:[#allocation2 + $0x54] sm:$0xf0]  ;;  %v11199_v20 = vld [vmem:[#allocation2 + $0x58] sm:$0xf0] }
 0x1f1   : > { %21152 = vst [vmem:[#allocation101_spill] sm:$0xff] %v16692_v6  ;;  %v1907_v13 = vmul.f32 %v1867_v42, %v16060_v8  ;;  %v6839_v8 = vrot.slane %v16687_v4, 1 }
 0x1f2   : > { %2678 = vmatmul.bf16.vlgmr.msrb.gmra.mxu0 %v11158_v52  ;;  %11315 = vmatmul.msk.bf16.vlgmr.msrb.gmra.mxu1 %vm2265_vm4, %v11162_v62  ;;  %21155 = vst [vmem:[#allocation103_spill] sm:$0xff] %v16715_v34 }
 0x1f3   : > { %2760 = vmatmul.bf16.vlgmr.msrb.gmra.mxu2 %v11158_v52  ;;  %11323 = vmatmul.msk.bf16.vlgmr.msrb.gmra.mxu3 %vm2265_vm4, %v11162_v62  ;;  %v21153_v52 = vrot.slane %v16593_v53, 1  ;;  %v1970_v57 = vpack.c.bf16 %v1907_v13, %v1906_v25  ;;  %v2381_v62 = vpop.f32.mrf.mxu2  ;;  %v2422_v5 = vpop.f32.mrf.mxu3  ;;  %v11478_v25 = vor.u32 %v14350_v55, %v11477_v56  ;;  %v14360_v13 = vld [vmem:[%s20782_s8 + $0x164] sm:$0xf0] }
 0x1f4   : > { %v16718_v37 = vadd.f32 %v2422_v5, %v2381_v62  ;;  %v2301_v42 = vpop.f32.mrf.mxu0  ;;  %v2342_v19 = vpop.f32.mrf.mxu1  ;;  %v11518_v15 = vor.u32 %v14360_v13, %v11517_v29  ;;  %v6841_v62 = vrot.slane %v16715_v34, 1 }
 0x1f5   : > { %v16713_v50 = vsel %vm4034_vm3, %v21153_v52, %v6837_v10  ;;  %1990 = vst.msk [vmem:[#allocation3 + $0x98] sm:$0xff] %vm15157_vm2, %v1970_v57  ;;  %3278 = vmatpush.bf16.msra.mxu0 %v11478_v25  ;;  %v16735_v52 = vsel %vm4034_vm3, %v6835_v28, %v6839_v8  ;;  %v14210_v42 = vld [vmem:[#allocation2 + $0x14] sm:$0xf0]  ;;  %v11167_v19 = vld [vmem:[#allocation2 + $0x18] sm:$0xf0] }
 0x1f6   : > { %21154 = vst [vmem:[#allocation102_spill] sm:$0xff] %v16713_v50  ;;  %v5672_v9 = vld [vmem:[#allocation3 + $0x90] sm:$0x11]  ;;  %3322 = vmatpush.bf16.msra.mxu1 %v11518_v15  ;;  %v16743_v57 = vsel %vm4034_vm3, %v6837_v10, %v6841_v62  ;;  %v14213_v50 = vld [vmem:[#allocation2 + $0x34] sm:$0xf] }
 0x1f7   : > { %v5747_v45 = vunpack.c.l.b16 %v5672_v9  ;;  %v5748_v1 = vunpack.c.h.b16 %v5672_v9  ;;  %21156 = vst [vmem:[#allocation104_spill] sm:$0xff] %v16735_v52  ;;  %v11165_v9 = vld [vmem:[#allocation2 + $0x10] sm:$0xf]  ;;  %v14209_v52 = vld [vmem:[#allocation2 + $0x14] sm:$0xf] }
 0x1f8   : > { %21159 = vst [vmem:[#allocation107_spill] sm:$0xff] %v16743_v57  ;;  %v11170_v57 = vor.u32 %v14209_v52, %v11167_v19 }
 0x1f9   : > { %v16738_v5 = vpack.c.b16 %v5747_v45, %v5747_v45  ;;  %v16740_v31 = vpack.c.b16 %v5748_v1, %v5748_v1  ;;  %v11166_v1 = vor.u32 %v14210_v42, %v11165_v9  ;;  %v11175_v9 = vld [vmem:[#allocation2 + $0x28] sm:$0xf0] }
 0x1fb   : > { %21157 = vst [vmem:[#allocation105_spill] sm:$0xff] %v16738_v5  ;;  %v6843_v56 = vrot.slane %v16738_v5, 1  ;;  %v6845_v55 = vrot.slane %v16740_v31, 1  ;;  %v2383_v29 = vpop.f32.mrf.mxu2  ;;  %v2424_v25 = vpop.f32.mrf.mxu3 }
 0x1fc   : > { %21158 = vst [vmem:[#allocation106_spill] sm:$0xff] %v16740_v31  ;;  %v2303_v28 = vpop.f32.mrf.mxu0  ;;  %v2344_v13 = vpop.f32.mrf.mxu1  ;;  %v14347_v29 = vld [vmem:[%s20782_s8 + $0x104] sm:$0xf]  ;;  %v14348_v25 = vld [vmem:[%s20782_s8 + $0x104] sm:$0xf0] }
 0x1fd   : > { %v16748_v15 = vsel %vm4034_vm3, %v6839_v8, %v6843_v56  ;;  %v16751_v45 = vsel %vm4034_vm3, %v6841_v62, %v6845_v55  ;;  %v16753_v10 = vadd.f32 %v2344_v13, %v2303_v28  ;;  %v11471_v8 = vld [vmem:[%s20782_s8 + $0x108] sm:$0xf0]  ;;  %v14212_v13 = vld [vmem:[#allocation2 + $0x24] sm:$0xf0] }
 0x1fe   : > { %21160 = vst [vmem:[#allocation108_spill] sm:$0xff] %v16748_v15  ;;  %v11474_v62 = vor.u32 %v14347_v29, %v11471_v8  ;;  %v11181_v15 = vld [vmem:[#allocation2 + $0x30] sm:$0xf] }
 0x1ff   : > { %21161 = vst [vmem:[#allocation109_spill] sm:$0xff] %v16751_v45 }
 0x200   : > { %3361 = vmatpush.bf16.msra.mxu2 %v11474_v62 }
 0x202   : > { %2682 = vmatmul.bf16.gmra.mxu0 %v11166_v1  ;;  %11316 = vmatmul.msk.bf16.gmra.mxu1 %vm2265_vm4, %v11170_v57 }
 0x203   : > { %2764 = vmatmul.bf16.gmra.mxu2 %v11166_v1  ;;  %11324 = vmatmul.msk.bf16.gmra.mxu3 %vm2265_vm4, %v11170_v57  ;;  %v2385_v56 = vpop.f32.mrf.mxu2  ;;  %v2426_v55 = vpop.f32.mrf.mxu3  ;;  %v11469_v57 = vld [vmem:[%s20782_s8 + $0x100] sm:$0xf] }
 0x204   : > { %v16763_v42 = vadd.f32 %v2426_v55, %v2385_v56  ;;  %v2305_v52 = vpop.f32.mrf.mxu0  ;;  %v2346_v19 = vpop.f32.mrf.mxu1  ;;  %v11470_v28 = vor.u32 %v14348_v25, %v11469_v57  ;;  %v11173_v56 = vld [vmem:[#allocation2 + $0x20] sm:$0xf]  ;;  %v14211_v55 = vld [vmem:[#allocation2 + $0x24] sm:$0xf]  ;;  %v14345_v57 = vld [vmem:[%s20782_s8 + $0xf4] sm:$0xf] }
 0x205   : > { %v11174_v19 = vor.u32 %v14212_v13, %v11173_v56  ;;  %v11178_v45 = vor.u32 %v14211_v55, %v11175_v9  ;;  %v11463_v25 = vld [vmem:[%s20782_s8 + $0xf8] sm:$0xf0]  ;;  %v11461_v55 = vld [vmem:[%s20782_s8 + $0xf0] sm:$0xf] }
 0x206   : > { %3279 = vmatpush.bf16.msra.mxu0 %v11470_v28  ;;  %v14357_v28 = vld [vmem:[%s20782_s8 + $0x154] sm:$0xf]  ;;  %v11466_v13 = vor.u32 %v14345_v57, %v11463_v25  ;;  %v11511_v9 = vld [vmem:[%s20782_s8 + $0x158] sm:$0xf0]  ;;  %v11509_v57 = vld [vmem:[%s20782_s8 + $0x150] sm:$0xf] }
 0x208   : > { %3362 = vmatpush.bf16.msra.mxu2 %v11466_v13 }
 0x20b   : > { %v2387_v1 = vpop.f32.mrf.mxu2  ;;  %v2428_v29 = vpop.f32.mrf.mxu3 }
 0x20c   : > { %v11514_v1 = vor.u32 %v14357_v28, %v11511_v9  ;;  %v14358_v28 = vld [vmem:[%s20782_s8 + $0x154] sm:$0xf0] }
 0x20d   : > { %v2307_v8 = vpop.f32.mrf.mxu0  ;;  %v2348_v62 = vpop.f32.mrf.mxu1  ;;  %v11510_v13 = vor.u32 %v14358_v28, %v11509_v57  ;;  %v14214_v9 = vld [vmem:[#allocation2 + $0x34] sm:$0xf0] }
 0x20e   : > { %v16771_v52 = vadd.f32 %v2348_v62, %v2307_v8  ;;  %3405 = vmatpush.bf16.msra.mxu3 %v11514_v1  ;;  %v11183_v1 = vld [vmem:[#allocation2 + $0x38] sm:$0xf0]  ;;  %v11182_v31 = vor.u32 %v14214_v9, %v11181_v15 }
 0x20f   : > { %3323 = vmatpush.bf16.msra.mxu1 %v11510_v13  ;;  %v11186_v5 = vor.u32 %v14213_v50, %v11183_v1  ;;  %v14216_v1 = vld [vmem:[#allocation2 + $0x44] sm:$0xf0] }
 0x212   : > { %2686 = vmatmul.bf16.gmra.mxu0 %v11174_v19  ;;  %11317 = vmatmul.msk.bf16.gmra.mxu1 %vm2265_vm4, %v11178_v45 }
 0x213   : > { %2768 = vmatmul.bf16.gmra.mxu2 %v11174_v19  ;;  %11325 = vmatmul.msk.bf16.gmra.mxu3 %vm2265_vm4, %v11178_v45  ;;  %v14346_v19 = vld [vmem:[%s20782_s8 + $0xf4] sm:$0xf0] }
 0x214   : > { %v2389_v29 = vpop.f32.mrf.mxu2  ;;  %v2430_v45 = vpop.f32.mrf.mxu3  ;;  %v11462_v25 = vor.u32 %v14346_v19, %v11461_v55  ;;  %v14343_v55 = vld [vmem:[%s20782_s8 + $0xe4] sm:$0xf]  ;;  %v11455_v19 = vld [vmem:[%s20782_s8 + $0xe8] sm:$0xf0] }
 0x215   : > { %v16787_v8 = vadd.f32 %v2430_v45, %v2389_v29  ;;  %v2309_v62 = vpop.f32.mrf.mxu0  ;;  %v2350_v56 = vpop.f32.mrf.mxu1  ;;  %v11458_v57 = vor.u32 %v14343_v55, %v11455_v19  ;;  %v11189_v19 = vld [vmem:[#allocation2 + $0x40] sm:$0xf] }
 0x216   : > { %3280 = vmatpush.bf16.msra.mxu0 %v11462_v25 }
 0x217   : > { %3363 = vmatpush.bf16.msra.mxu2 %v11458_v57  ;;  %v14215_v57 = vld [vmem:[#allocation2 + $0x44] sm:$0xf] }
 0x21c   : > { %v2391_v29 = vpop.f32.mrf.mxu2  ;;  %v2432_v45 = vpop.f32.mrf.mxu3 }
 0x21d   : > { %v2311_v62 = vpop.f32.mrf.mxu0  ;;  %v2352_v56 = vpop.f32.mrf.mxu1  ;;  %v11191_v29 = vld [vmem:[#allocation2 + $0x48] sm:$0xf0] }
 0x21e   : > { %v16801_v6 = vadd.f32 %v2352_v56, %v2311_v62 }
 0x222   : > { %2690 = vmatmul.bf16.gmra.mxu0 %v11182_v31  ;;  %11318 = vmatmul.msk.bf16.gmra.mxu1 %vm2265_vm4, %v11186_v5 }
 0x223   : > { %2772 = vmatmul.bf16.gmra.mxu2 %v11182_v31  ;;  %11326 = vmatmul.msk.bf16.gmra.mxu3 %vm2265_vm4, %v11186_v5  ;;  %v11453_v5 = vld [vmem:[%s20782_s8 + $0xe0] sm:$0xf]  ;;  %v14344_v31 = vld [vmem:[%s20782_s8 + $0xe4] sm:$0xf0] }
 0x224   : > { %v2393_v25 = vpop.f32.mrf.mxu2  ;;  %v2434_v28 = vpop.f32.mrf.mxu3  ;;  %v11454_v9 = vor.u32 %v14344_v31, %v11453_v5  ;;  %v11447_v5 = vld [vmem:[%s20782_s8 + $0xd8] sm:$0xf0]  ;;  %v14355_v31 = vld [vmem:[%s20782_s8 + $0x144] sm:$0xf] }
 0x225   : > { %v16811_v15 = vadd.f32 %v2434_v28, %v2393_v25  ;;  %v2313_v50 = vpop.f32.mrf.mxu0  ;;  %v2354_v13 = vpop.f32.mrf.mxu1  ;;  %v11190_v28 = vor.u32 %v14216_v1, %v11189_v19  ;;  %v11503_v1 = vld [vmem:[%s20782_s8 + $0x148] sm:$0xf0]  ;;  %v14701_v19 = vld [vmem:[#allocation2 + $0x64] sm:$0xf] }
 0x226   : > { %3281 = vmatpush.bf16.msra.mxu0 %v11454_v9  ;;  %v11194_v50 = vor.u32 %v14215_v57, %v11191_v29  ;;  %v14341_v13 = vld [vmem:[%s20782_s8 + $0xd4] sm:$0xf]  ;;  %v11506_v29 = vor.u32 %v14355_v31, %v11503_v1  ;;  %v13687_v57 = vld [vmem:[#allocation2 + $0x68] sm:$0xf0]  ;;  %v11501_v31 = vld [vmem:[%s20782_s8 + $0x140] sm:$0xf] }
 0x227   : > { %v11450_v9 = vor.u32 %v14341_v13, %v11447_v5  ;;  %v11445_v13 = vld [vmem:[%s20782_s8 + $0xd0] sm:$0xf]  ;;  %v14342_v5 = vld [vmem:[%s20782_s8 + $0xd4] sm:$0xf0]  ;;  %v14356_v1 = vld [vmem:[%s20782_s8 + $0x144] sm:$0xf0] }
 0x228   : > { %3406 = vmatpush.bf16.msra.mxu3 %v11506_v29  ;;  %v14703_v29 = vld [vmem:[#allocation2 + $0x74] sm:$0xf] }
 0x229   : > { %3364 = vmatpush.bf16.msra.mxu2 %v11450_v9  ;;  %v11446_v9 = vor.u32 %v14342_v5, %v11445_v13 }
 0x22b   : > { %3282 = vmatpush.bf16.msra.mxu0 %v11446_v9 }
 0x22c   : > { %v2395_v45 = vpop.f32.mrf.mxu2  ;;  %v2436_v62 = vpop.f32.mrf.mxu3 }
 0x22d   : > { %v13685_v45 = vld [vmem:[#allocation2 + $0x60] sm:$0xf]  ;;  %v14702_v62 = vld [vmem:[#allocation2 + $0x64] sm:$0xf0] }
 0x22e   : > { %v2315_v56 = vpop.f32.mrf.mxu0  ;;  %v2356_v55 = vpop.f32.mrf.mxu1 }
 0x22f   : > { %v16819_v25 = vadd.f32 %v2356_v55, %v2315_v56 }
 0x232   : > { %2694 = vmatmul.bf16.gmra.mxu0 %v11190_v28  ;;  %11319 = vmatmul.msk.bf16.gmra.mxu1 %vm2265_vm4, %v11194_v50 }
 0x233   : > { %2776 = vmatmul.bf16.gmra.mxu2 %v11190_v28  ;;  %11327 = vmatmul.msk.bf16.gmra.mxu3 %vm2265_vm4, %v11194_v50  ;;  %v14704_v28 = vld [vmem:[#allocation2 + $0x74] sm:$0xf0]  ;;  %v13695_v50 = vld [vmem:[#allocation2 + $0x78] sm:$0xf0] }
 0x234   : > { %v16855_v53 = vor.u32 %v14703_v29, %v13695_v50 }
 0x235   : > { %v2397_v56 = vpop.f32.mrf.mxu2  ;;  %v2438_v55 = vpop.f32.mrf.mxu3 }
 0x236   : > { %v16835_v34 = vadd.f32 %v2438_v55, %v2397_v56  ;;  %v2317_v4 = vpop.f32.mrf.mxu0  ;;  %v2358_v26 = vpop.f32.mrf.mxu1  ;;  %v11502_v56 = vor.u32 %v14356_v1, %v11501_v31  ;;  %v16851_v55 = vor.u32 %v14701_v19, %v13687_v57  ;;  %21165 = vst [vmem:[#allocation113_spill] sm:$0xff] %v16855_v53  ;;  %v14217_v1 = vld [vmem:[#allocation2 + $0x54] sm:$0xf] }
 0x237   : > { %v16849_v4 = vor.u32 %v14702_v62, %v13685_v45  ;;  %v13693_v26 = vld [vmem:[#allocation2 + $0x70] sm:$0xf]  ;;  %v9966_v62 = vrot.slane %v16855_v53, 1 }
 0x238   : > { %21163 = vst [vmem:[#allocation111_spill] sm:$0xff] %v16851_v55  ;;  %v16853_v18 = vor.u32 %v14704_v28, %v13693_v26  ;;  %3324 = vmatpush.bf16.msra.mxu1 %v11502_v56  ;;  %v20958_v5 = vrot.slane %v16851_v55, 1  ;;  %v11197_v28 = vld [vmem:[#allocation2 + $0x50] sm:$0xf]  ;;  %v11202_v56 = vor.u32 %v14217_v1, %v11199_v20  ;;  %v13703_v20 = vld [vmem:[#allocation2 + $0x88] sm:$0xf0] }
 0x239   : > { %21162 = vst [vmem:[#allocation110_spill] sm:$0xff] %v16849_v4  ;;  %v20959_v13 = vrot.slane %v16849_v4, 1  ;;  %v11198_v29 = vor.u32 %v14218_v14, %v11197_v28  ;;  %v14706_v14 = vld [vmem:[#allocation2 + $0x84] sm:$0xf0] }
 0x23a   : > { %21164 = vst [vmem:[#allocation112_spill] sm:$0xff] %v16853_v18  ;;  %v9964_v45 = vrot.slane %v16853_v18, 1  ;;  %v16869_v9 = vsel %vm4034_vm3, %v20958_v5, %v9966_v62 }
 0x23b   : > { %21167 = vst [vmem:[#allocation115_spill] sm:$0xff] %v16869_v9 }
 0x23c   : > { %v16864_v50 = vsel %vm4034_vm3, %v20959_v13, %v9964_v45 }
 0x23d   : > { %v2399_v38 = vpop.f32.mrf.mxu2  ;;  %v2440_v31 = vpop.f32.mrf.mxu3  ;;  %21166 = vst [vmem:[#allocation114_spill] sm:$0xff] %v16864_v50  ;;  %v13701_v50 = vld [vmem:[#allocation2 + $0x80] sm:$0xf] }
 0x23e   : > { %v2319_v19 = vpop.f32.mrf.mxu0  ;;  %v2360_v57 = vpop.f32.mrf.mxu1  ;;  %v14339_v38 = vld [vmem:[%s20782_s8 + $0xc4] sm:$0xf]  ;;  %v11439_v31 = vld [vmem:[%s20782_s8 + $0xc8] sm:$0xf0] }
 0x23f   : > { %v16871_v26 = vadd.f32 %v2360_v57, %v2319_v19  ;;  %v11442_v5 = vor.u32 %v14339_v38, %v11439_v31  ;;  %v14705_v38 = vld [vmem:[#allocation2 + $0x84] sm:$0xf]  ;;  %v16889_v31 = vor.u32 %v14706_v14, %v13701_v50 }
 0x241   : > { %3365 = vmatpush.bf16.msra.mxu2 %v11442_v5  ;;  %21168 = vst [vmem:[#allocation116_spill] sm:$0xff] %v16889_v31  ;;  %v16891_v5 = vor.u32 %v14705_v38, %v13703_v20 }
 0x242   : > { %2698 = vmatmul.bf16.gmra.mxu0 %v11198_v29  ;;  %11320 = vmatmul.msk.bf16.gmra.mxu1 %vm2265_vm4, %v11202_v56 }
 0x243   : > { %2780 = vmatmul.bf16.gmra.mxu2 %v11198_v29  ;;  %11328 = vmatmul.msk.bf16.gmra.mxu3 %vm2265_vm4, %v11202_v56  ;;  %v11437_v29 = vld [vmem:[%s20782_s8 + $0xc0] sm:$0xf]  ;;  %v14340_v56 = vld [vmem:[%s20782_s8 + $0xc4] sm:$0xf0]  ;;  %21169 = vst [vmem:[#allocation117_spill] sm:$0xff] %v16891_v5 }
 0x244   : > { %v11438_v9 = vor.u32 %v14340_v56, %v11437_v29 }
 0x245   : > { %v2401_v13 = vpop.f32.mrf.mxu2  ;;  %v2442_v19 = vpop.f32.mrf.mxu3 }
 0x246   : > { %v16881_v57 = vadd.f32 %v2442_v19, %v2401_v13  ;;  %v2321_v28 = vpop.f32.mrf.mxu0  ;;  %v2362_v1 = vpop.f32.mrf.mxu1  ;;  %3283 = vmatpush.bf16.msra.mxu0 %v11438_v9  ;;  %v14220_v13 = vld [vmem:[#allocation2 + $0x64] sm:$0xf0]  ;;  %v11207_v19 = vld [vmem:[#allocation2 + $0x68] sm:$0xf0] }
 0x247   : > { %v20973_v28 = vrot.slane %v16889_v31, 1  ;;  %v20972_v1 = vrot.slane %v16891_v5, 1  ;;  %v11206_v20 = vor.u32 %v14220_v13, %v11205_v41  ;;  %v11210_v29 = vor.u32 %v14219_v21, %v11207_v19  ;;  %v14323_v41 = vld [vmem:[%s20781_s7 + $0x174] sm:$0xf]  ;;  %v14708_v19 = vld [vmem:[#allocation2 + $0x94] sm:$0xf0] }
 0x249   : > { %v16898_v50 = vsel %vm4034_vm3, %v9964_v45, %v20973_v28  ;;  %v16903_v9 = vsel %vm4034_vm3, %v9966_v62, %v20972_v1  ;;  %v11663_v45 = vld [vmem:[%s20781_s7 + $0x138] sm:$0xf0] }
 0x24a   : > { %21170 = vst [vmem:[#allocation118_spill] sm:$0xff] %v16898_v50  ;;  %v14707_v50 = vld [vmem:[#allocation2 + $0x94] sm:$0xf] }
 0x24b   : > { %21171 = vst [vmem:[#allocation119_spill] sm:$0xff] %v16903_v9  ;;  %v13709_v9 = vld [vmem:[#allocation2 + $0x90] sm:$0xf] }
 0x24d   : > { %v2403_v53 = vpop.f32.mrf.mxu2  ;;  %v2444_v18 = vpop.f32.mrf.mxu3 }
 0x24e   : > { %v8408_v53 = vld [vmem:[#allocation2 + $0xa0] sm:$0x11]  ;;  %v14315_v18 = vld [vmem:[%s20781_s7 + $0x134] sm:$0xf] }
 0x24f   : > { %v2323_v55 = vpop.f32.mrf.mxu0  ;;  %v2364_v4 = vpop.f32.mrf.mxu1  ;;  %v11666_v21 = vor.u32 %v14315_v18, %v11663_v45  ;;  %v9046_v62 = vunpack.c.l.b16 %v8408_v53  ;;  %v9047_v56 = vunpack.c.h.b16 %v8408_v53  ;;  %v11661_v18 = vld [vmem:[%s20781_s7 + $0x130] sm:$0xf]  ;;  %v14316_v53 = vld [vmem:[%s20781_s7 + $0x134] sm:$0xf0] }
 0x250   : > { %v16905_v14 = vadd.f32 %v2364_v4, %v2323_v55  ;;  %v11695_v4 = vld [vmem:[%s20781_s7 + $0x178] sm:$0xf0]  ;;  %v11693_v45 = vld [vmem:[%s20781_s7 + $0x170] sm:$0xf] }
 0x251   : > { %v11698_v55 = vor.u32 %v14323_v41, %v11695_v4  ;;  %3879 = vmatpush.bf16.msrb.mxu2 %v11666_v21  ;;  %v16932_v41 = vor.u32 %v14708_v19, %v13709_v9  ;;  %v11662_v4 = vor.u32 %v14316_v53, %v11661_v18 }
 0x252   : > { %2702 = vmatmul.bf16.gmra.mxu0 %v11206_v20  ;;  %11321 = vmatmul.msk.bf16.gmra.mxu1 %vm2265_vm4, %v11210_v29 }
 0x253   : > { %2784 = vmatmul.bf16.gmra.mxu2 %v11206_v20  ;;  %11329 = vmatmul.msk.bf16.gmra.mxu3 %vm2265_vm4, %v11210_v29  ;;  %v13711_v20 = vld [vmem:[#allocation2 + $0x98] sm:$0xf0]  ;;  %21172 = vst [vmem:[#allocation120_spill] sm:$0xff] %v16932_v41  ;;  %v9972_v24 = vrot.slane %v16932_v41, 1 }
 0x254   : > { %3924 = vmatpush.bf16.msrb.mxu3 %v11698_v55  ;;  %v16934_v21 = vor.u32 %v14707_v50, %v13711_v20  ;;  %v14324_v55 = vld [vmem:[%s20781_s7 + $0x174] sm:$0xf0]  ;;  %3797 = vmatpush.bf16.msrb.mxu0 %v11662_v4  ;;  %v2876_v20 = vld [vmem:[#allocation3] sm:$0xff] }
 0x255   : > { %v2935_v41 = vunpack.c.l.b16 %v2876_v20 }
 0x256   : > { %v2405_v38 = vpop.f32.mrf.mxu2  ;;  %v2446_v13 = vpop.f32.mrf.mxu3  ;;  %21173 = vst [vmem:[#allocation121_spill] sm:$0xff] %v16934_v21  ;;  %v9974_v9 = vrot.slane %v16934_v21, 1  ;;  %v11218_v21 = vor.u32 %v14221_v2, %v11215_v47  ;;  %v11655_v2 = vld [vmem:[%s20781_s7 + $0x128] sm:$0xf0] }
 0x257   : > { %v16921_v29 = vadd.f32 %v2446_v13, %v2405_v38  ;;  %v2325_v1 = vpop.f32.mrf.mxu0  ;;  %v2366_v28 = vpop.f32.mrf.mxu1  ;;  %v11694_v38 = vor.u32 %v14324_v55, %v11693_v45  ;;  %v14222_v13 = vld [vmem:[#allocation2 + $0x74] sm:$0xf0]  ;;  %v21176_v45 = vrot.slane %v16889_v31, 1  ;;  %v21178_v55 = vrot.slane %v16891_v5, 1 }
 0x258   : > { %v16936_v28 = vpack.c.b16 %v9046_v62, %v9046_v62  ;;  %v16938_v1 = vpack.c.b16 %v9047_v56, %v9047_v56  ;;  %v2936_v31 = vunpack.c.h.b16 %v2876_v20 }
 0x259   : > { %3842 = vmatpush.bf16.msrb.mxu1 %v11694_v38  ;;  %v16950_v4 = vsel %vm4034_vm3, %v21176_v45, %v9972_v24  ;;  %v16955_v38 = vsel %vm4034_vm3, %v21178_v55, %v9974_v9  ;;  %v21182_v45 = vunpack.c.l.b16 %v16182_v60 }
 0x25a   : > { %21174 = vst [vmem:[#allocation122_spill] sm:$0xff] %v16936_v28  ;;  %v9976_v50 = vrot.slane %v16936_v28, 1  ;;  %v9978_v62 = vrot.slane %v16938_v1, 1 }
 0x25b   : > { %21175 = vst [vmem:[#allocation123_spill] sm:$0xff] %v16938_v1  ;;  %v11214_v1 = vor.u32 %v14222_v13, %v11213_v33  ;;  %v2969_v55 = vpack.c.b16 %v21182_v45, %v2935_v41 }
 0x25c   : > { %21177 = vst [vmem:[#allocation124_spill] sm:$0xff] %v16950_v4  ;;  %v16958_v28 = vsel %vm4034_vm3, %v9972_v24, %v9976_v50  ;;  %v21183_v24 = vunpack.c.h.b16 %v16182_v60  ;;  %v2996_v60 = vshll.u32 %v16206_v22, 16 }
 0x25d   : > { %21179 = vst [vmem:[#allocation125_spill] sm:$0xff] %v16955_v38  ;;  %v2991_v41 = vshll.u32 %v2969_v55, 16 }
 0x25e   : > { %v2407_v56 = vpop.f32.mrf.mxu2  ;;  %v2448_v19 = vpop.f32.mrf.mxu3  ;;  %21180 = vst [vmem:[#allocation126_spill] sm:$0xff] %v16958_v28  ;;  %v2970_v50 = vpack.c.b16 %v21183_v24, %v2936_v31  ;;  %v3008_v31 = vshll.u32 %v16217_v23, 16 }
 0x25f   : > { %v2327_v18 = vpop.f32.mrf.mxu0  ;;  %v2368_v53 = vpop.f32.mrf.mxu1  ;;  %v16961_v56 = vsel %vm4034_vm3, %v9974_v9, %v9978_v62  ;;  %v14313_v9 = vld [vmem:[%s20781_s7 + $0x124] sm:$0xf]  ;;  %v2993_v24 = vrot.slane %v2991_v41, 1 }
 0x260   : > { %21181 = vst [vmem:[#allocation127_spill] sm:$0xff] %v16961_v56  ;;  %v16963_v19 = vadd.f32 %v2368_v53, %v2327_v18  ;;  %v11658_v33 = vor.u32 %v14313_v9, %v11655_v2  ;;  %v3003_v20 = vshll.u32 %v2970_v50, 16  ;;  %v11653_v18 = vld [vmem:[%s20781_s7 + $0x120] sm:$0xf]  ;;  %v14314_v53 = vld [vmem:[%s20781_s7 + $0x124] sm:$0xf0] }
 0x261   : > { %v11654_v45 = vor.u32 %v14314_v53, %v11653_v18  ;;  %v2989_v2 = vshrl.u32 %v2969_v55, 16  ;;  %v14311_v55 = vld [vmem:[%s20781_s7 + $0x114] sm:$0xf]  ;;  %v3024_v53 = vshll.u32 %v16261_v54, 16 }
 0x262   : > { %2706 = vmatmul.bf16.gmra.mxu0 %v11214_v1  ;;  %11322 = vmatmul.msk.bf16.gmra.mxu1 %vm2265_vm4, %v11218_v21  ;;  %v3005_v9 = vrot.slane %v3003_v20, 1 }
 0x263   : > { %2788 = vmatmul.bf16.gmra.mxu2 %v11214_v1  ;;  %11330 = vmatmul.msk.bf16.gmra.mxu3 %vm2265_vm4, %v11218_v21  ;;  %v2994_v38 = vor.u32 %v2993_v24, %v2989_v2  ;;  %v11645_v24 = vld [vmem:[%s20781_s7 + $0x110] sm:$0xf] }
 0x264   : > { %3880 = vmatpush.bf16.msrb.mxu2 %v11658_v33  ;;  %3798 = vmatpush.bf16.msrb.mxu0 %v11654_v45  ;;  %v2998_v33 = vrot.slane %v2996_v60, 1 }
 0x266   : > { %v2409_v47 = vpop.f32.mrf.mxu2  ;;  %v2450_v13 = vpop.f32.mrf.mxu3  ;;  %v2999_v48 = vsel %vm2987_vm5, %v2994_v38, %v2998_v33 }
 0x267   : > { %v16977_v1 = vadd.f32 %v2450_v13, %v2409_v47  ;;  %v2329_v21 = vpop.f32.mrf.mxu0  ;;  %v2370_v62 = vpop.f32.mrf.mxu1  ;;  %v3001_v47 = vshrl.u32 %v2970_v50, 16  ;;  %v3010_v13 = vrot.slane %v3008_v31, 1  ;;  %v3016_v31 = vshll.u32 %v16256_v61, 16 }
 0x269   : > { %v3006_v4 = vor.u32 %v3005_v9, %v3001_v47  ;;  %v14312_v9 = vld [vmem:[%s20781_s7 + $0x114] sm:$0xf0]  ;;  %v14322_v47 = vld [vmem:[%s20781_s7 + $0x164] sm:$0xf0] }
 0x26a   : > { %v11646_v2 = vor.u32 %v14312_v9, %v11645_v24 }
 0x26b   : > { %v3011_v18 = vsel %vm2987_vm5, %v3006_v4, %v3010_v13  ;;  %v14321_v4 = vld [vmem:[%s20781_s7 + $0x164] sm:$0xf] }
 0x26c   : > { %3799 = vmatpush.bf16.msrb.mxu0 %v11646_v2  ;;  %v3032_v2 = vshll.u32 %v16332_v49, 16 }
 0x26e   : > { %v2411_v21 = vpop.f32.mrf.mxu2  ;;  %v2452_v62 = vpop.f32.mrf.mxu3 }
 0x26f   : > { %v2679_v56 = vpop.f32.mrf.mxu0  ;;  %v2720_v28 = vpop.f32.mrf.mxu1  ;;  %v3012_v62 = vshrl.u32 %v16206_v22, 16  ;;  %v14309_v22 = vld [vmem:[%s20781_s7 + $0x104] sm:$0xf] }
 0x270   : > { %v2680_v5 = vadd.f32 %v2679_v56, %v16684_v58  ;;  %v11647_v58 = vld [vmem:[%s20781_s7 + $0x118] sm:$0xf0] }
 0x272   : > { %v16990_v41 = vadd.f32 %v2720_v28, %v2680_v5  ;;  %3284 = vmatmul.bf16.vlgmr.msra.gmra.mxu0 %v2999_v48  ;;  %11531 = vmatmul.msk.bf16.vlgmr.msra.gmra.mxu1 %vm2265_vm4, %v3011_v18  ;;  %v11650_v5 = vor.u32 %v14311_v55, %v11647_v58  ;;  %v11687_v28 = vld [vmem:[%s20781_s7 + $0x168] sm:$0xf0]  ;;  %v3020_v55 = vshrl.u32 %v16217_v23, 16  ;;  %v3026_v58 = vrot.slane %v3024_v53, 1 }
 0x273   : > { %3366 = vmatmul.bf16.vlgmr.msra.gmra.mxu2 %v2999_v48  ;;  %11539 = vmatmul.msk.bf16.vlgmr.msra.gmra.mxu3 %vm2265_vm4, %v3011_v18  ;;  %v11690_v48 = vor.u32 %v14321_v4, %v11687_v28  ;;  %v3018_v18 = vrot.slane %v3016_v31, 1  ;;  %v11639_v23 = vld [vmem:[%s20781_s7 + $0x108] sm:$0xf0] }
 0x274   : > { %3881 = vmatpush.bf16.msrb.mxu2 %v11650_v5 }
 0x275   : > { %3925 = vmatpush.bf16.msrb.mxu3 %v11690_v48 }
 0x276   : > { %v2761_v38 = vpop.f32.mrf.mxu2  ;;  %v2802_v56 = vpop.f32.mrf.mxu3 }
 0x277   : > { %v2762_v50 = vadd.f32 %v2761_v38, %v16718_v37  ;;  %v2681_v20 = vpop.f32.mrf.mxu0  ;;  %v2722_v60 = vpop.f32.mrf.mxu1  ;;  %v11685_v37 = vld [vmem:[%s20781_s7 + $0x160] sm:$0xf]  ;;  %v3014_v38 = vor.u32 %v3012_v62, %v2998_v33  ;;  %v14310_v62 = vld [vmem:[%s20781_s7 + $0x104] sm:$0xf0] }
 0x278   : > { %v11686_v21 = vor.u32 %v14322_v47, %v11685_v37  ;;  %v3040_v47 = vshll.u32 %v16341_v11, 16 }
 0x279   : > { %v17009_v45 = vadd.f32 %v2802_v56, %v2762_v50  ;;  %v3022_v56 = vor.u32 %v3020_v55, %v3010_v13  ;;  %v3019_v20 = vsel %vm2987_vm5, %v3014_v38, %v3018_v18 }
 0x27a   : > { %3843 = vmatpush.bf16.msrb.mxu1 %v11686_v21  ;;  %v11637_v21 = vld [vmem:[%s20781_s7 + $0x100] sm:$0xf] }
 0x27b   : > { %v3027_v60 = vsel %vm2987_vm5, %v3022_v56, %v3026_v58  ;;  %v11638_v55 = vor.u32 %v14310_v62, %v11637_v21  ;;  %v3048_v21 = vshll.u32 %v16404_v59, 16  ;;  %v3056_v62 = vshll.u32 %v16407_v0, 16 }
 0x27d   : > { %3800 = vmatpush.bf16.msrb.mxu0 %v11638_v55 }
 0x27e   : > { %v2763_v4 = vpop.f32.mrf.mxu2  ;;  %v2804_v5 = vpop.f32.mrf.mxu3 }
 0x27f   : > { %v2683_v28 = vpop.f32.mrf.mxu0  ;;  %v2724_v48 = vpop.f32.mrf.mxu1  ;;  %v3034_v4 = vrot.slane %v3032_v2, 1  ;;  %v3036_v5 = vshrl.u32 %v16261_v54, 16  ;;  %v11631_v54 = vld [vmem:[%s20781_s7 + $0xf8] sm:$0xf0] }
 0x280   : > { %v2684_v50 = vadd.f32 %v2683_v28, %v16753_v10  ;;  %v11642_v10 = vor.u32 %v14309_v22, %v11639_v23  ;;  %v3042_v28 = vrot.slane %v3040_v47, 1 }
 0x282   : > { %v17028_v24 = vadd.f32 %v2724_v48, %v2684_v50  ;;  %3288 = vmatmul.bf16.gmra.mxu0 %v3019_v20  ;;  %11532 = vmatmul.msk.bf16.gmra.mxu1 %vm2265_vm4, %v3027_v60 }
 0x283   : > { %3370 = vmatmul.bf16.gmra.mxu2 %v3019_v20  ;;  %11540 = vmatmul.msk.bf16.gmra.mxu3 %vm2265_vm4, %v3027_v60  ;;  %v3038_v60 = vor.u32 %v3036_v5, %v3026_v58  ;;  %v11679_v58 = vld [vmem:[%s20781_s7 + $0x158] sm:$0xf0]  ;;  %v14308_v5 = vld [vmem:[%s20781_s7 + $0xf4] sm:$0xf0] }
 0x284   : > { %3882 = vmatpush.bf16.msrb.mxu2 %v11642_v10 }
 0x285   : > { %v3043_v10 = vsel %vm2987_vm5, %v3038_v60, %v3042_v28  ;;  %v3052_v60 = vshrl.u32 %v16341_v11, 16  ;;  %v11623_v11 = vld [vmem:[%s20781_s7 + $0xe8] sm:$0xf0] }
 0x286   : > { %v2765_v33 = vpop.f32.mrf.mxu2  ;;  %v2806_v13 = vpop.f32.mrf.mxu3 }
 0x287   : > { %v2766_v31 = vadd.f32 %v2765_v33, %v16763_v42  ;;  %v2685_v53 = vpop.f32.mrf.mxu0  ;;  %v2726_v9 = vpop.f32.mrf.mxu1  ;;  %v3028_v42 = vshrl.u32 %v16256_v61, 16  ;;  %v14307_v61 = vld [vmem:[%s20781_s7 + $0xf4] sm:$0xf] }
 0x289   : > { %v17039_v37 = vadd.f32 %v2806_v13, %v2766_v31  ;;  %v3030_v20 = vor.u32 %v3028_v42, %v3018_v18  ;;  %v11634_v18 = vor.u32 %v14307_v61, %v11631_v54  ;;  %v11629_v42 = vld [vmem:[%s20781_s7 + $0xf0] sm:$0xf] }
 0x28b   : > { %v3035_v23 = vsel %vm2987_vm5, %v3030_v20, %v3034_v4  ;;  %3883 = vmatpush.bf16.msrb.mxu2 %v11634_v18  ;;  %v3050_v20 = vrot.slane %v3048_v21, 1  ;;  %v3054_v18 = vor.u32 %v3052_v60, %v3042_v28 }
 0x28e   : > { %v2767_v48 = vpop.f32.mrf.mxu2  ;;  %v2808_v38 = vpop.f32.mrf.mxu3 }
 0x28f   : > { %v2687_v56 = vpop.f32.mrf.mxu0  ;;  %v2728_v50 = vpop.f32.mrf.mxu1  ;;  %v11630_v48 = vor.u32 %v14308_v5, %v11629_v42  ;;  %v14320_v38 = vld [vmem:[%s20781_s7 + $0x154] sm:$0xf0]  ;;  %v3072_v42 = vshll.u32 %v16485_v32, 16  ;;  %v11621_v5 = vld [vmem:[%s20781_s7 + $0xe0] sm:$0xf] }
 0x290   : > { %v2688_v22 = vadd.f32 %v2687_v56, %v16771_v52  ;;  %v14319_v52 = vld [vmem:[%s20781_s7 + $0x154] sm:$0xf] }
 0x291   : > { %v11682_v13 = vor.u32 %v14319_v52, %v11679_v58  ;;  %3801 = vmatpush.bf16.msrb.mxu0 %v11630_v48 }
 0x292   : > { %v17054_v33 = vadd.f32 %v2728_v50, %v2688_v22  ;;  %3292 = vmatmul.bf16.gmra.mxu0 %v3035_v23  ;;  %11533 = vmatmul.msk.bf16.gmra.mxu1 %vm2265_vm4, %v3043_v10  ;;  %v3044_v50 = vshrl.u32 %v16332_v49, 16  ;;  %v3058_v22 = vrot.slane %v3056_v62, 1  ;;  %v14305_v49 = vld [vmem:[%s20781_s7 + $0xe4] sm:$0xf]  ;;  %v3064_v62 = vshll.u32 %v16476_v3, 16 }
 0x293   : > { %3374 = vmatmul.bf16.gmra.mxu2 %v3035_v23  ;;  %11541 = vmatmul.msk.bf16.gmra.mxu3 %vm2265_vm4, %v3043_v10 }
 0x294   : > { %3926 = vmatpush.bf16.msrb.mxu3 %v11682_v13  ;;  %v3046_v52 = vor.u32 %v3044_v50, %v3034_v4  ;;  %v3074_v50 = vrot.slane %v3072_v42, 1  ;;  %v11613_v42 = vld [vmem:[%s20781_s7 + $0xd0] sm:$0xf] }
 0x296   : > { %v2769_v31 = vpop.f32.mrf.mxu2  ;;  %v2810_v53 = vpop.f32.mrf.mxu3  ;;  %v3051_v13 = vsel %vm2987_vm5, %v3046_v52, %v3050_v20 }
 0x297   : > { %v2770_v9 = vadd.f32 %v2769_v31, %v16787_v8  ;;  %v2689_v2 = vpop.f32.mrf.mxu0  ;;  %v2730_v47 = vpop.f32.mrf.mxu1  ;;  %v11677_v8 = vld [vmem:[%s20781_s7 + $0x150] sm:$0xf]  ;;  %v3059_v31 = vsel %vm2987_vm5, %v3054_v18, %v3058_v22 }
 0x298   : > { %v11678_v56 = vor.u32 %v14320_v38, %v11677_v8  ;;  %v14306_v8 = vld [vmem:[%s20781_s7 + $0xe4] sm:$0xf0]  ;;  %v3066_v38 = vrot.slane %v3064_v62, 1 }
 0x299   : > { %v17073_v55 = vadd.f32 %v2810_v53, %v2770_v9  ;;  %v11622_v48 = vor.u32 %v14306_v8, %v11621_v5  ;;  %v14304_v5 = vld [vmem:[%s20781_s7 + $0xd4] sm:$0xf0] }
 0x29a   : > { %3844 = vmatpush.bf16.msrb.mxu1 %v11678_v56  ;;  %v3068_v56 = vshrl.u32 %v16407_v0, 16  ;;  %v11615_v0 = vld [vmem:[%s20781_s7 + $0xd8] sm:$0xf0]  ;;  %v11614_v8 = vor.u32 %v14304_v5, %v11613_v42  ;;  %v3100_v5 = vshrl.u32 %v16550_v12, 16 }
 0x29b   : > { %3802 = vmatpush.bf16.msrb.mxu0 %v11622_v48  ;;  %v14318_v48 = vld [vmem:[%s20781_s7 + $0x144] sm:$0xf0] }
 0x29c   : > { %v3070_v52 = vor.u32 %v3068_v56, %v3058_v22  ;;  %v11671_v22 = vld [vmem:[%s20781_s7 + $0x148] sm:$0xf0]  ;;  %v3076_v56 = vshrl.u32 %v16476_v3, 16  ;;  %v14301_v3 = vld [vmem:[%s20781_s7 + $0xc4] sm:$0xf] }
 0x29e   : > { %v2771_v23 = vpop.f32.mrf.mxu2  ;;  %v2812_v10 = vpop.f32.mrf.mxu3 }
 0x29f   : > { %v2691_v61 = vpop.f32.mrf.mxu0  ;;  %v2732_v54 = vpop.f32.mrf.mxu1  ;;  %3803 = vmatpush.bf16.msrb.mxu0 %v11614_v8 }
 0x2a0   : > { %v2692_v58 = vadd.f32 %v2691_v61, %v16801_v6  ;;  %v11626_v6 = vor.u32 %v14305_v49, %v11623_v11 }
 0x2a2   : > { %v17092_v53 = vadd.f32 %v2732_v54, %v2692_v58  ;;  %3296 = vmatmul.bf16.gmra.mxu0 %v3051_v13  ;;  %11534 = vmatmul.msk.bf16.gmra.mxu1 %vm2265_vm4, %v3059_v31 }
 0x2a3   : > { %3378 = vmatmul.bf16.gmra.mxu2 %v3051_v13  ;;  %11542 = vmatmul.msk.bf16.gmra.mxu3 %vm2265_vm4, %v3059_v31  ;;  %v3075_v13 = vsel %vm2987_vm5, %v3070_v52, %v3074_v50 }
 0x2a4   : > { %3884 = vmatpush.bf16.msrb.mxu2 %v11626_v6 }
 0x2a6   : > { %v2773_v4 = vpop.f32.mrf.mxu2  ;;  %v2814_v28 = vpop.f32.mrf.mxu3 }
 0x2a7   : > { %v2774_v9 = vadd.f32 %v2773_v4, %v16811_v15  ;;  %v2693_v2 = vpop.f32.mrf.mxu0  ;;  %v2734_v47 = vpop.f32.mrf.mxu1  ;;  %v3060_v15 = vshrl.u32 %v16404_v59, 16  ;;  %v14303_v59 = vld [vmem:[%s20781_s7 + $0xd4] sm:$0xf] }
 0x2a8   : > { %v3080_v2 = vshll.u32 %v16548_v44, 16  ;;  %v3088_v47 = vshll.u32 %v16550_v12, 16  ;;  %v14401_v12 = vld [vmem:[%s20782_s8 + $0x1f4] sm:$0xf] }
 0x2a9   : > { %v17103_v21 = vadd.f32 %v2814_v28, %v2774_v9  ;;  %v3062_v54 = vor.u32 %v3060_v15, %v3050_v20  ;;  %v11618_v20 = vor.u32 %v14303_v59, %v11615_v0 }
 0x2ab   : > { %v3067_v58 = vsel %vm2987_vm5, %v3062_v54, %v3066_v38  ;;  %3885 = vmatpush.bf16.msrb.mxu2 %v11618_v20 }
 0x2ae   : > { %v2775_v60 = vpop.f32.mrf.mxu2  ;;  %v2816_v23 = vpop.f32.mrf.mxu3 }
 0x2af   : > { %v2695_v10 = vpop.f32.mrf.mxu0  ;;  %v2736_v61 = vpop.f32.mrf.mxu1  ;;  %v3082_v60 = vrot.slane %v3080_v2, 1  ;;  %v3084_v23 = vshrl.u32 %v16485_v32, 16  ;;  %v11607_v32 = vld [vmem:[%s20781_s7 + $0xc8] sm:$0xf0]  ;;  %v14302_v2 = vld [vmem:[%s20781_s7 + $0xc4] sm:$0xf0] }
 0x2b0   : > { %v2696_v18 = vadd.f32 %v2695_v10, %v16819_v25  ;;  %v14317_v25 = vld [vmem:[%s20781_s7 + $0x144] sm:$0xf]  ;;  %v3090_v10 = vrot.slane %v3088_v47, 1 }
 0x2b1   : > { %v11674_v49 = vor.u32 %v14317_v25, %v11671_v22 }
 0x2b2   : > { %v17118_v31 = vadd.f32 %v2736_v61, %v2696_v18  ;;  %3300 = vmatmul.bf16.gmra.mxu0 %v3067_v58  ;;  %11535 = vmatmul.msk.bf16.gmra.mxu1 %vm2265_vm4, %v3075_v13 }
 0x2b3   : > { %3382 = vmatmul.bf16.gmra.mxu2 %v3067_v58  ;;  %11543 = vmatmul.msk.bf16.gmra.mxu3 %vm2265_vm4, %v3075_v13  ;;  %v3078_v58 = vor.u32 %v3076_v56, %v3066_v38  ;;  %v3086_v13 = vor.u32 %v3084_v23, %v3074_v50 }
 0x2b4   : > { %3927 = vmatpush.bf16.msrb.mxu3 %v11674_v49 }
 0x2b5   : > { %v3083_v0 = vsel %vm2987_vm5, %v3078_v58, %v3082_v60  ;;  %v3091_v25 = vsel %vm2987_vm5, %v3086_v13, %v3090_v10 }
 0x2b6   : > { %v2777_v11 = vpop.f32.mrf.mxu2  ;;  %v2818_v6 = vpop.f32.mrf.mxu3 }
 0x2b7   : > { %v2778_v4 = vadd.f32 %v2777_v11, %v16835_v34  ;;  %v2697_v28 = vpop.f32.mrf.mxu0  ;;  %v2738_v9 = vpop.f32.mrf.mxu1  ;;  %v11669_v34 = vld [vmem:[%s20781_s7 + $0x140] sm:$0xf] }
 0x2b8   : > { %v11670_v15 = vor.u32 %v14318_v48, %v11669_v34  ;;  %v3104_v28 = vshll.u32 %v16628_v17, 16  ;;  %v11605_v9 = vld [vmem:[%s20781_s7 + $0xc0] sm:$0xf] }
 0x2b9   : > { %v17137_v62 = vadd.f32 %v2818_v6, %v2778_v4  ;;  %v3096_v4 = vshll.u32 %v16626_v46, 16  ;;  %v11606_v47 = vor.u32 %v14302_v2, %v11605_v9  ;;  %v3108_v9 = vshrl.u32 %v16626_v46, 16 }
 0x2ba   : > { %3845 = vmatpush.bf16.msrb.mxu1 %v11670_v15  ;;  %v3106_v34 = vrot.slane %v3104_v28, 1 }
 0x2bb   : > { %3804 = vmatpush.bf16.msrb.mxu0 %v11606_v47  ;;  %v3098_v42 = vrot.slane %v3096_v4, 1  ;;  %v3120_v4 = vshll.u32 %v16664_v51, 16  ;;  %v3116_v47 = vshrl.u32 %v16628_v17, 16  ;;  %v21184_v17 = vunpack.c.l.b16 %v15553_v63 }
 0x2be   : > { %v2779_v61 = vpop.f32.mrf.mxu2  ;;  %v2820_v54 = vpop.f32.mrf.mxu3 }
 0x2bf   : > { %v2699_v52 = vpop.f32.mrf.mxu0  ;;  %v2740_v18 = vpop.f32.mrf.mxu1  ;;  %v3102_v61 = vor.u32 %v3100_v5, %v3090_v10  ;;  %v11855_v10 = vld [vmem:[%s20782_s8 + $0x238] sm:$0xf0] }
 0x2c0   : > { %v2700_v59 = vadd.f32 %v2699_v52, %v16871_v26  ;;  %v11610_v26 = vor.u32 %v14301_v3, %v11607_v32 }
 0x2c2   : > { %v17156_v20 = vadd.f32 %v2740_v18, %v2700_v59  ;;  %3304 = vmatmul.bf16.gmra.mxu0 %v3083_v0  ;;  %11536 = vmatmul.msk.bf16.gmra.mxu1 %vm2265_vm4, %v3091_v25  ;;  %v3107_v18 = vsel %vm2987_vm5, %v3102_v61, %v3106_v34  ;;  %v3118_v61 = vor.u32 %v3116_v47, %v3106_v34  ;;  %v21185_v34 = vunpack.c.h.b16 %v15553_v63  ;;  %v11813_v63 = vld [vmem:[%s20782_s8 + $0x1e0] sm:$0xf] }
 0x2c3   : > { %3386 = vmatmul.bf16.gmra.mxu2 %v3083_v0  ;;  %11544 = vmatmul.msk.bf16.gmra.mxu3 %vm2265_vm4, %v3091_v25 }
 0x2c4   : > { %3886 = vmatpush.bf16.msrb.mxu2 %v11610_v26  ;;  %v11821_v26 = vld [vmem:[%s20782_s8 + $0x1f0] sm:$0xf] }
 0x2c6   : > { %v2781_v38 = vpop.f32.mrf.mxu2  ;;  %v2822_v50 = vpop.f32.mrf.mxu3 }
 0x2c7   : > { %v2782_v22 = vadd.f32 %v2781_v38, %v16881_v57  ;;  %v2701_v49 = vpop.f32.mrf.mxu0  ;;  %v2742_v11 = vpop.f32.mrf.mxu1  ;;  %v3092_v57 = vshrl.u32 %v16548_v44, 16  ;;  %v11823_v44 = vld [vmem:[%s20782_s8 + $0x1f8] sm:$0xf0]  ;;  %v14402_v38 = vld [vmem:[%s20782_s8 + $0x1f4] sm:$0xf0] }
 0x2c8   : > { %v3112_v11 = vshll.u32 %v16662_v36, 16 }
 0x2c9   : > { %v17167_v6 = vadd.f32 %v2822_v50, %v2782_v22  ;;  %v3094_v23 = vor.u32 %v3092_v57, %v3082_v60  ;;  %v11826_v60 = vor.u32 %v14401_v12, %v11823_v44  ;;  %v11853_v50 = vld [vmem:[%s20782_s8 + $0x230] sm:$0xf]  ;;  %v11822_v22 = vor.u32 %v14402_v38, %v11821_v26  ;;  %v14399_v12 = vld [vmem:[%s20782_s8 + $0x1e4] sm:$0xf]  ;;  %v11815_v44 = vld [vmem:[%s20782_s8 + $0x1e8] sm:$0xf0] }
 0x2ca   : > { %v3114_v2 = vrot.slane %v3112_v11, 1  ;;  %v3122_v57 = vrot.slane %v3120_v4, 1 }
 0x2cb   : > { %v3099_v52 = vsel %vm2987_vm5, %v3094_v23, %v3098_v42  ;;  %4303 = vmatpush.bf16.msra.mxu2 %v11826_v60  ;;  %4221 = vmatpush.bf16.msra.mxu0 %v11822_v22  ;;  %v3110_v23 = vor.u32 %v3108_v9, %v3098_v42  ;;  %v3529_v22 = vshll.u32 %v15583_v40, 16 }
 0x2cd   : > { %v3115_v51 = vsel %vm2987_vm5, %v3110_v23, %v3114_v2  ;;  %v3531_v9 = vrot.slane %v3529_v22, 1 }
 0x2ce   : > { %v2783_v8 = vpop.f32.mrf.mxu2  ;;  %v2824_v48 = vpop.f32.mrf.mxu3 }
 0x2cf   : > { %v2703_v15 = vpop.f32.mrf.mxu0  ;;  %v2744_v56 = vpop.f32.mrf.mxu1  ;;  %v2834_v48 = vld [vmem:[#allocation2] sm:$0xff] }
 0x2d0   : > { %v2704_v54 = vadd.f32 %v2703_v15, %v16905_v14  ;;  %v14409_v14 = vld [vmem:[%s20782_s8 + $0x234] sm:$0xf] }
 0x2d1   : > { %v11858_v13 = vor.u32 %v14409_v14, %v11855_v10  ;;  %v11818_v14 = vor.u32 %v14399_v12, %v11815_v44  ;;  %v11805_v44 = vld [vmem:[%s20782_s8 + $0x1d0] sm:$0xf] }
 0x2d2   : > { %v17182_v58 = vadd.f32 %v2744_v56, %v2704_v54  ;;  %3308 = vmatmul.bf16.gmra.mxu0 %v3099_v52  ;;  %11537 = vmatmul.msk.bf16.gmra.mxu1 %vm2265_vm4, %v3107_v18  ;;  %v3123_v54 = vsel %vm2987_vm5, %v3118_v61, %v3122_v57  ;;  %v14397_v61 = vld [vmem:[%s20782_s8 + $0x1d4] sm:$0xf] }
 0x2d3   : > { %3390 = vmatmul.bf16.gmra.mxu2 %v3099_v52  ;;  %11545 = vmatmul.msk.bf16.gmra.mxu3 %vm2265_vm4, %v3107_v18  ;;  %v3457_v52 = vunpack.c.l.b16 %v2834_v48  ;;  %v3458_v18 = vunpack.c.h.b16 %v2834_v48 }
 0x2d4   : > { %4348 = vmatpush.bf16.msra.mxu3 %v11858_v13  ;;  %4304 = vmatpush.bf16.msra.mxu2 %v11818_v14  ;;  %v14398_v14 = vld [vmem:[%s20782_s8 + $0x1d4] sm:$0xf0] }
 0x2d5   : > { %v3491_v42 = vpack.c.b16 %v21184_v17, %v3457_v52  ;;  %v11847_v52 = vld [vmem:[%s20782_s8 + $0x228] sm:$0xf0] }
 0x2d6   : > { %v2785_v59 = vpop.f32.mrf.mxu2  ;;  %v2826_v0 = vpop.f32.mrf.mxu3 }
 0x2d7   : > { %v2786_v25 = vadd.f32 %v2785_v59, %v16921_v29  ;;  %v2705_v3 = vpop.f32.mrf.mxu0  ;;  %v2746_v32 = vpop.f32.mrf.mxu1  ;;  %v14410_v29 = vld [vmem:[%s20782_s8 + $0x234] sm:$0xf0]  ;;  %v3510_v11 = vshrl.u32 %v3491_v42, 16 }
 0x2d8   : > { %v11854_v28 = vor.u32 %v14410_v29, %v11853_v50  ;;  %v14400_v32 = vld [vmem:[%s20782_s8 + $0x1e4] sm:$0xf0]  ;;  %v3517_v50 = vshll.u32 %v15575_v30, 16 }
 0x2d9   : > { %v17211_v49 = vadd.f32 %v2826_v0, %v2786_v25  ;;  %v3512_v25 = vshll.u32 %v3491_v42, 16  ;;  %v11814_v26 = vor.u32 %v14400_v32, %v11813_v63  ;;  %v3541_v32 = vshrl.u32 %v15583_v40, 16  ;;  %v11799_v40 = vld [vmem:[%s20782_s8 + $0x1c8] sm:$0xf0] }
 0x2da   : > { %4266 = vmatpush.bf16.msra.mxu1 %v11854_v28  ;;  %v3519_v4 = vrot.slane %v3517_v50, 1 }
 0x2db   : > { %4222 = vmatpush.bf16.msra.mxu0 %v11814_v26 }
 0x2de   : > { %v2787_v5 = vpop.f32.mrf.mxu2  ;;  %v2828_v8 = vpop.f32.mrf.mxu3 }
 0x2df   : > { %v2707_v15 = vpop.f32.mrf.mxu0  ;;  %v2748_v56 = vpop.f32.mrf.mxu1 }
 0x2e0   : > { %v2708_v36 = vadd.f32 %v2707_v15, %v16963_v19  ;;  %v3492_v19 = vpack.c.b16 %v21185_v34, %v3458_v18 }
 0x2e2   : > { %v17220_v46 = vadd.f32 %v2748_v56, %v2708_v36  ;;  %3312 = vmatmul.bf16.gmra.mxu0 %v3115_v51  ;;  %11538 = vmatmul.msk.bf16.gmra.mxu1 %vm2265_vm4, %v3123_v54  ;;  %v3524_v3 = vshll.u32 %v3492_v19, 16  ;;  %v3522_v28 = vshrl.u32 %v3492_v19, 16  ;;  %v11807_v36 = vld [vmem:[%s20782_s8 + $0x1d8] sm:$0xf0] }
 0x2e3   : > { %3394 = vmatmul.bf16.gmra.mxu2 %v3115_v51  ;;  %11546 = vmatmul.msk.bf16.gmra.mxu3 %vm2265_vm4, %v3123_v54  ;;  %v14407_v51 = vld [vmem:[%s20782_s8 + $0x224] sm:$0xf]  ;;  %v11810_v54 = vor.u32 %v14397_v61, %v11807_v36  ;;  %v14396_v61 = vld [vmem:[%s20782_s8 + $0x1c4] sm:$0xf0] }
 0x2e4   : > { %v3526_v29 = vrot.slane %v3524_v3, 1  ;;  %v11850_v18 = vor.u32 %v14407_v51, %v11847_v52  ;;  %v3533_v3 = vshrl.u32 %v15575_v30, 16  ;;  %v14395_v30 = vld [vmem:[%s20782_s8 + $0x1c4] sm:$0xf]  ;;  %v3553_v51 = vshll.u32 %v15698_v16, 16 }
 0x2e5   : > { %4305 = vmatpush.bf16.msra.mxu2 %v11810_v54  ;;  %v3561_v54 = vshll.u32 %v15707_v27, 16  ;;  %v3549_v52 = vshrl.u32 %v15627_v35, 16 }
 0x2e6   : > { %v2789_v60 = vpop.f32.mrf.mxu2  ;;  %v2830_v10 = vpop.f32.mrf.mxu3  ;;  %v3527_v48 = vor.u32 %v3526_v29, %v3522_v28  ;;  %4349 = vmatpush.bf16.msra.mxu3 %v11850_v18  ;;  %v3543_v28 = vor.u32 %v3541_v32, %v3531_v9  ;;  %v3555_v18 = vrot.slane %v3553_v51, 1 }
 0x2e7   : > { %v2790_v13 = vadd.f32 %v2789_v60, %v16977_v1  ;;  %v2709_v59 = vpop.f32.mrf.mxu0  ;;  %v2750_v0 = vpop.f32.mrf.mxu1  ;;  %v3514_v1 = vrot.slane %v3512_v25, 1  ;;  %v11845_v60 = vld [vmem:[%s20782_s8 + $0x220] sm:$0xf] }
 0x2e8   : > { %v3532_v23 = vsel %vm2987_vm5, %v3527_v48, %v3531_v9  ;;  %v3537_v59 = vshll.u32 %v15627_v35, 16  ;;  %v3545_v0 = vshll.u32 %v15631_v43, 16  ;;  %v14393_v35 = vld [vmem:[%s20782_s8 + $0x1b4] sm:$0xf] }
 0x2e9   : > { %v17241_v38 = vadd.f32 %v2830_v10, %v2790_v13  ;;  %v3515_v8 = vor.u32 %v3514_v1, %v3510_v11  ;;  %v11806_v10 = vor.u32 %v14398_v14, %v11805_v44  ;;  %v14408_v13 = vld [vmem:[%s20782_s8 + $0x224] sm:$0xf0]  ;;  %v3535_v11 = vor.u32 %v3533_v3, %v3519_v4 }
 0x2ea   : > { %v11846_v25 = vor.u32 %v14408_v13, %v11845_v60  ;;  %v3539_v63 = vrot.slane %v3537_v59, 1  ;;  %v3547_v26 = vrot.slane %v3545_v0, 1 }
 0x2eb   : > { %v3520_v56 = vsel %vm2987_vm5, %v3515_v8, %v3519_v4  ;;  %4223 = vmatpush.bf16.msra.mxu0 %v11806_v10  ;;  %v11802_v4 = vor.u32 %v14395_v30, %v11799_v40  ;;  %v14406_v30 = vld [vmem:[%s20782_s8 + $0x214] sm:$0xf0]  ;;  %v3569_v40 = vshll.u32 %v15767_v7, 16 }
 0x2ec   : > { %4267 = vmatpush.bf16.msra.mxu1 %v11846_v25  ;;  %v3551_v60 = vor.u32 %v3549_v52, %v3539_v63  ;;  %v14405_v25 = vld [vmem:[%s20782_s8 + $0x214] sm:$0xf] }
 0x2ed   : > { %4306 = vmatpush.bf16.msra.mxu2 %v11802_v4  ;;  %v3577_v4 = vshll.u32 %v15771_v39, 16 }
 0x2ee   : > { %v2791_v2 = vpop.f32.mrf.mxu2  ;;  %v2832_v47 = vpop.f32.mrf.mxu3  ;;  %v3556_v59 = vsel %vm2987_vm5, %v3551_v60, %v3555_v18 }
 0x2ef   : > { %v3285_v57 = vpop.f32.mrf.mxu0  ;;  %v3326_v5 = vpop.f32.mrf.mxu1  ;;  %v3540_v47 = vsel %vm2987_vm5, %v3535_v11, %v3539_v63  ;;  %v11839_v63 = vld [vmem:[%s20782_s8 + $0x218] sm:$0xf0]  ;;  %v11789_v11 = vld [vmem:[%s20782_s8 + $0x1b0] sm:$0xf] }
 0x2f0   : > { %v17245_v15 = vadd.f32 %v3326_v5, %v3285_v57  ;;  %v3548_v57 = vsel %vm2987_vm5, %v3543_v28, %v3547_v26  ;;  %v11842_v32 = vor.u32 %v14405_v25, %v11839_v63  ;;  %v14394_v28 = vld [vmem:[%s20782_s8 + $0x1b4] sm:$0xf0]  ;;  %v21186_v25 = vld [vmem:[#allocation23_spill] sm:$0xff]  ;;  %v21187_v63 = vld [vmem:[#allocation24_spill] sm:$0xff] }
 0x2f2   : > { %3805 = vmatmul.bf16.vlgmr.msrb.gmra.mxu0 %v3520_v56  ;;  %11699 = vmatmul.msk.bf16.vlgmr.msrb.gmra.mxu1 %vm2265_vm4, %v3532_v23 }
 0x2f3   : > { %3887 = vmatmul.bf16.vlgmr.msrb.gmra.mxu2 %v3520_v56  ;;  %11707 = vmatmul.msk.bf16.vlgmr.msrb.gmra.mxu3 %vm2265_vm4, %v3532_v23  ;;  %v11797_v23 = vld [vmem:[%s20782_s8 + $0x1c0] sm:$0xf] }
 0x2f4   : > { %v11798_v36 = vor.u32 %v14396_v61, %v11797_v23  ;;  %4350 = vmatpush.bf16.msra.mxu3 %v11842_v32  ;;  %v3579_v23 = vrot.slane %v3577_v4, 1  ;;  %v3593_v32 = vshll.u32 %v21187_v63, 16 }
 0x2f6   : > { %v3367_v17 = vpop.f32.mrf.mxu2  ;;  %v3408_v42 = vpop.f32.mrf.mxu3  ;;  %4224 = vmatpush.bf16.msra.mxu0 %v11798_v36 }
 0x2f7   : > { %v17263_v34 = vadd.f32 %v3408_v42, %v3367_v17  ;;  %v3287_v19 = vpop.f32.mrf.mxu0  ;;  %v3328_v12 = vpop.f32.mrf.mxu1  ;;  %v3557_v17 = vshrl.u32 %v15631_v43, 16  ;;  %v3563_v42 = vrot.slane %v3561_v54, 1  ;;  %v11791_v43 = vld [vmem:[%s20782_s8 + $0x1b8] sm:$0xf0] }
 0x2f8   : > { %v11794_v3 = vor.u32 %v14393_v35, %v11791_v43  ;;  %v14392_v35 = vld [vmem:[%s20782_s8 + $0x1a4] sm:$0xf0] }
 0x2f9   : > { %v3559_v10 = vor.u32 %v3557_v17, %v3547_v26 }
 0x2fa   : > { %4307 = vmatpush.bf16.msra.mxu2 %v11794_v3  ;;  %v3585_v3 = vshll.u32 %v21186_v25, 16 }
 0x2fb   : > { %v3564_v0 = vsel %vm2987_vm5, %v3559_v10, %v3563_v42 }
 0x2fe   : > { %v3369_v50 = vpop.f32.mrf.mxu2  ;;  %v3410_v22 = vpop.f32.mrf.mxu3 }
 0x2ff   : > { %v3289_v1 = vpop.f32.mrf.mxu0  ;;  %v3330_v29 = vpop.f32.mrf.mxu1 }
 0x300   : > { %v17281_v2 = vadd.f32 %v3330_v29, %v3289_v1 }
 0x302   : > { %3809 = vmatmul.bf16.gmra.mxu0 %v3540_v47  ;;  %11700 = vmatmul.msk.bf16.gmra.mxu1 %vm2265_vm4, %v3548_v57 }
 0x303   : > { %3891 = vmatmul.bf16.gmra.mxu2 %v3540_v47  ;;  %11708 = vmatmul.msk.bf16.gmra.mxu3 %vm2265_vm4, %v3548_v57  ;;  %v11837_v47 = vld [vmem:[%s20782_s8 + $0x210] sm:$0xf]  ;;  %v11790_v57 = vor.u32 %v14394_v28, %v11789_v11 }
 0x305   : > { %4225 = vmatpush.bf16.msra.mxu0 %v11790_v57 }
 0x306   : > { %v3371_v9 = vpop.f32.mrf.mxu2  ;;  %v3412_v5 = vpop.f32.mrf.mxu3 }
 0x307   : > { %v17293_v8 = vadd.f32 %v3412_v5, %v3371_v9  ;;  %v3291_v48 = vpop.f32.mrf.mxu0  ;;  %v3332_v56 = vpop.f32.mrf.mxu1  ;;  %v11838_v9 = vor.u32 %v14406_v30, %v11837_v47  ;;  %v3565_v5 = vshrl.u32 %v15698_v16, 16  ;;  %v14391_v16 = vld [vmem:[%s20782_s8 + $0x1a4] sm:$0xf] }
 0x308   : > { %v3571_v48 = vrot.slane %v3569_v40, 1  ;;  %v3573_v56 = vshrl.u32 %v15707_v27, 16  ;;  %v11783_v27 = vld [vmem:[%s20782_s8 + $0x1a8] sm:$0xf0] }
 0x309   : > { %4268 = vmatpush.bf16.msra.mxu1 %v11838_v9  ;;  %v3567_v52 = vor.u32 %v3565_v5, %v3555_v18  ;;  %v11786_v18 = vor.u32 %v14391_v16, %v11783_v27  ;;  %v11829_v16 = vld [vmem:[%s20782_s8 + $0x200] sm:$0xf] }
 0x30a   : > { %v3575_v17 = vor.u32 %v3573_v56, %v3563_v42 }
 0x30b   : > { %4308 = vmatpush.bf16.msra.mxu2 %v11786_v18  ;;  %v14404_v18 = vld [vmem:[%s20782_s8 + $0x204] sm:$0xf0] }
 0x30e   : > { %v3373_v19 = vpop.f32.mrf.mxu2  ;;  %v3414_v12 = vpop.f32.mrf.mxu3 }
 0x30f   : > { %v3293_v44 = vpop.f32.mrf.mxu0  ;;  %v3334_v14 = vpop.f32.mrf.mxu1  ;;  %v3572_v12 = vsel %vm2987_vm5, %v3567_v52, %v3571_v48 }
 0x310   : > { %v17305_v13 = vadd.f32 %v3334_v14, %v3293_v44  ;;  %v3580_v44 = vsel %vm2987_vm5, %v3575_v17, %v3579_v23 }
 0x312   : > { %3813 = vmatmul.bf16.gmra.mxu0 %v3556_v59  ;;  %11701 = vmatmul.msk.bf16.gmra.mxu1 %vm2265_vm4, %v3564_v0 }
 0x313   : > { %3895 = vmatmul.bf16.gmra.mxu2 %v3556_v59  ;;  %11709 = vmatmul.msk.bf16.gmra.mxu3 %vm2265_vm4, %v3564_v0  ;;  %v11781_v0 = vld [vmem:[%s20782_s8 + $0x1a0] sm:$0xf] }
 0x314   : > { %v11782_v43 = vor.u32 %v14392_v35, %v11781_v0  ;;  %v11830_v0 = vor.u32 %v14404_v18, %v11829_v16  ;;  %v3597_v35 = vshrl.u32 %v21186_v25, 16  ;;  %v14387_v25 = vld [vmem:[%s20782_s8 + $0x184] sm:$0xf] }
 0x316   : > { %v3375_v26 = vpop.f32.mrf.mxu2  ;;  %v3416_v50 = vpop.f32.mrf.mxu3  ;;  %4226 = vmatpush.bf16.msra.mxu0 %v11782_v43  ;;  %4269 = vmatpush.bf16.msra.mxu1 %v11830_v0 }
 0x317   : > { %v17323_v22 = vadd.f32 %v3416_v50, %v3375_v26  ;;  %v3295_v1 = vpop.f32.mrf.mxu0  ;;  %v3336_v29 = vpop.f32.mrf.mxu1  ;;  %v3581_v26 = vshrl.u32 %v15767_v7, 16  ;;  %v3587_v50 = vrot.slane %v3585_v3, 1  ;;  %v14389_v7 = vld [vmem:[%s20782_s8 + $0x194] sm:$0xf]  ;;  %v3605_v3 = vshrl.u32 %v21187_v63, 16 }
 0x318   : > { %v3589_v1 = vshrl.u32 %v15771_v39, 16  ;;  %v3595_v29 = vrot.slane %v3593_v32, 1  ;;  %v11775_v39 = vld [vmem:[%s20782_s8 + $0x198] sm:$0xf0]  ;;  %v11767_v63 = vld [vmem:[%s20782_s8 + $0x188] sm:$0xf0] }
 0x319   : > { %v3583_v30 = vor.u32 %v3581_v26, %v3571_v48  ;;  %v14403_v48 = vld [vmem:[%s20782_s8 + $0x204] sm:$0xf]  ;;  %v11778_v56 = vor.u32 %v14389_v7, %v11775_v39 }
 0x31a   : > { %v3591_v40 = vor.u32 %v3589_v1, %v3579_v23  ;;  %v11831_v23 = vld [vmem:[%s20782_s8 + $0x208] sm:$0xf0] }
 0x31b   : > { %v3588_v9 = vsel %vm2987_vm5, %v3583_v30, %v3587_v50  ;;  %4309 = vmatpush.bf16.msra.mxu2 %v11778_v56  ;;  %v11765_v56 = vld [vmem:[%s20782_s8 + $0x180] sm:$0xf] }
 0x31c   : > { %v3596_v5 = vsel %vm2987_vm5, %v3591_v40, %v3595_v29 }
 0x31e   : > { %v3377_v61 = vpop.f32.mrf.mxu2  ;;  %v3418_v36 = vpop.f32.mrf.mxu3 }
 0x31f   : > { %v3297_v51 = vpop.f32.mrf.mxu0  ;;  %v3338_v54 = vpop.f32.mrf.mxu1  ;;  %v11834_v61 = vor.u32 %v14403_v48, %v11831_v23  ;;  %v14388_v23 = vld [vmem:[%s20782_s8 + $0x184] sm:$0xf0] }
 0x320   : > { %v17341_v19 = vadd.f32 %v3338_v54, %v3297_v51 }
 0x321   : > { %4351 = vmatpush.bf16.msra.mxu3 %v11834_v61  ;;  %v11766_v61 = vor.u32 %v14388_v23, %v11765_v56  ;;  %v14378_v56 = vld [vmem:[%s20781_s7 + $0x1f4] sm:$0xf0]  ;;  %v11965_v23 = vld [vmem:[%s20781_s7 + $0x230] sm:$0xf] }
 0x322   : > { %3817 = vmatmul.bf16.gmra.mxu0 %v3572_v12  ;;  %11702 = vmatmul.msk.bf16.gmra.mxu1 %vm2265_vm4, %v3580_v44 }
 0x323   : > { %3899 = vmatmul.bf16.gmra.mxu2 %v3572_v12  ;;  %11710 = vmatmul.msk.bf16.gmra.mxu3 %vm2265_vm4, %v3580_v44  ;;  %v11773_v12 = vld [vmem:[%s20782_s8 + $0x190] sm:$0xf]  ;;  %v14390_v44 = vld [vmem:[%s20782_s8 + $0x194] sm:$0xf0] }
 0x324   : > { %v11774_v27 = vor.u32 %v14390_v44, %v11773_v12 }
 0x326   : > { %v3379_v42 = vpop.f32.mrf.mxu2  ;;  %v3420_v14 = vpop.f32.mrf.mxu3  ;;  %4227 = vmatpush.bf16.msra.mxu0 %v11774_v27 }
 0x327   : > { %v17353_v60 = vadd.f32 %v3420_v14, %v3379_v42  ;;  %v3299_v10 = vpop.f32.mrf.mxu0  ;;  %v3340_v59 = vpop.f32.mrf.mxu1  ;;  %v21188_v42 = vld [vmem:[#allocation31_spill] sm:$0xff] }
 0x328   : > { %v3601_v14 = vshll.u32 %v21188_v42, 16  ;;  %v21189_v10 = vld [vmem:[#allocation34_spill] sm:$0xff]  ;;  %v3613_v12 = vshrl.u32 %v21188_v42, 16  ;;  %v14377_v42 = vld [vmem:[%s20781_s7 + $0x1f4] sm:$0xf] }
 0x329   : > { %v3609_v59 = vshll.u32 %v21189_v10, 16  ;;  %v3621_v16 = vshrl.u32 %v21189_v10, 16  ;;  %v11935_v10 = vld [vmem:[%s20781_s7 + $0x1f8] sm:$0xf0] }
 0x32a   : > { %v3603_v43 = vrot.slane %v3601_v14, 1  ;;  %4228 = vmatpush.bf16.msra.mxu0 %v11766_v61 }
 0x32b   : > { %v3611_v32 = vrot.slane %v3609_v59, 1 }
 0x32e   : > { %v3381_v11 = vpop.f32.mrf.mxu2  ;;  %v3422_v28 = vpop.f32.mrf.mxu3 }
 0x32f   : > { %v3301_v47 = vpop.f32.mrf.mxu0  ;;  %v3342_v57 = vpop.f32.mrf.mxu1 }
 0x330   : > { %v17365_v4 = vadd.f32 %v3342_v57, %v3301_v47  ;;  %v3599_v47 = vor.u32 %v3597_v35, %v3587_v50  ;;  %v3607_v57 = vor.u32 %v3605_v3, %v3595_v29  ;;  %v11770_v50 = vor.u32 %v14387_v25, %v11767_v63 }
 0x331   : > { %v3615_v35 = vor.u32 %v3613_v12, %v3603_v43  ;;  %v3623_v3 = vor.u32 %v3621_v16, %v3611_v32 }
 0x332   : > { %3821 = vmatmul.bf16.gmra.mxu0 %v3588_v9  ;;  %11703 = vmatmul.msk.bf16.gmra.mxu1 %vm2265_vm4, %v3596_v5  ;;  %v3604_v40 = vsel %vm2987_vm5, %v3599_v47, %v3603_v43  ;;  %v14385_v43 = vld [vmem:[%s20781_s7 + $0x234] sm:$0xf] }
 0x333   : > { %3903 = vmatmul.bf16.gmra.mxu2 %v3588_v9  ;;  %11711 = vmatmul.msk.bf16.gmra.mxu3 %vm2265_vm4, %v3596_v5  ;;  %v3612_v9 = vsel %vm2987_vm5, %v3607_v57, %v3611_v32  ;;  %v11938_v32 = vor.u32 %v14377_v42, %v11935_v10 }
 0x334   : > { %4310 = vmatpush.bf16.msra.mxu2 %v11770_v50  ;;  %v21192_v50 = vld [vmem:[#allocation45_spill] sm:$0xff] }
 0x336   : > { %v3383_v36 = vpop.f32.mrf.mxu2  ;;  %v3424_v51 = vpop.f32.mrf.mxu3 }
 0x337   : > { %v17383_v54 = vadd.f32 %v3424_v51, %v3383_v36  ;;  %v3303_v52 = vpop.f32.mrf.mxu0  ;;  %v3344_v17 = vpop.f32.mrf.mxu1  ;;  %v21190_v36 = vld [vmem:[#allocation41_spill] sm:$0xff] }
 0x338   : > { %v3617_v51 = vshll.u32 %v21190_v36, 16  ;;  %v21191_v52 = vld [vmem:[#allocation42_spill] sm:$0xff]  ;;  %4658 = vmatpush.bf16.msrb.mxu2 %v11938_v32  ;;  %v3629_v61 = vshrl.u32 %v21190_v36, 16 }
 0x339   : > { %v3625_v17 = vshll.u32 %v21191_v52, 16  ;;  %v3637_v16 = vshrl.u32 %v21191_v52, 16  ;;  %v14375_v52 = vld [vmem:[%s20781_s7 + $0x1e4] sm:$0xf] }
 0x33a   : > { %v3619_v44 = vrot.slane %v3617_v51, 1 }
 0x33b   : > { %v3627_v27 = vrot.slane %v3625_v17, 1  ;;  %v14386_v17 = vld [vmem:[%s20781_s7 + $0x234] sm:$0xf0] }
 0x33e   : > { %v3385_v26 = vpop.f32.mrf.mxu2  ;;  %v3426_v1 = vpop.f32.mrf.mxu3 }
 0x33f   : > { %v3305_v11 = vpop.f32.mrf.mxu0  ;;  %v3346_v28 = vpop.f32.mrf.mxu1  ;;  %v3620_v1 = vsel %vm2987_vm5, %v3615_v35, %v3619_v44 }
 0x340   : > { %v17401_v30 = vadd.f32 %v3346_v28, %v3305_v11  ;;  %v3628_v11 = vsel %vm2987_vm5, %v3623_v3, %v3627_v27  ;;  %v11967_v28 = vld [vmem:[%s20781_s7 + $0x238] sm:$0xf0] }
 0x342   : > { %3825 = vmatmul.bf16.gmra.mxu0 %v3604_v40  ;;  %11704 = vmatmul.msk.bf16.gmra.mxu1 %vm2265_vm4, %v3612_v9 }
 0x343   : > { %3907 = vmatmul.bf16.gmra.mxu2 %v3604_v40  ;;  %11712 = vmatmul.msk.bf16.gmra.mxu3 %vm2265_vm4, %v3612_v9  ;;  %v11970_v40 = vor.u32 %v14385_v43, %v11967_v28 }
 0x345   : > { %4703 = vmatpush.bf16.msrb.mxu3 %v11970_v40  ;;  %v11925_v40 = vld [vmem:[%s20781_s7 + $0x1e0] sm:$0xf] }
 0x346   : > { %v3387_v29 = vpop.f32.mrf.mxu2  ;;  %v3428_v5 = vpop.f32.mrf.mxu3 }
 0x347   : > { %v17413_v7 = vadd.f32 %v3428_v5, %v3387_v29  ;;  %v3307_v39 = vpop.f32.mrf.mxu0  ;;  %v3348_v48 = vpop.f32.mrf.mxu1  ;;  %v3633_v29 = vshll.u32 %v21192_v50, 16  ;;  %v21193_v5 = vld [vmem:[#allocation46_spill] sm:$0xff] }
 0x348   : > { %v3641_v39 = vshll.u32 %v21193_v5, 16  ;;  %v11933_v48 = vld [vmem:[%s20781_s7 + $0x1f0] sm:$0xf] }
 0x349   : > { %v11934_v51 = vor.u32 %v14378_v56, %v11933_v48  ;;  %v3635_v12 = vrot.slane %v3633_v29, 1 }
 0x34b   : > { %4576 = vmatpush.bf16.msrb.mxu0 %v11934_v51 }
 0x34e   : > { %v3389_v18 = vpop.f32.mrf.mxu2  ;;  %v3430_v14 = vpop.f32.mrf.mxu3 }
 0x34f   : > { %v3309_v59 = vpop.f32.mrf.mxu0  ;;  %v3350_v0 = vpop.f32.mrf.mxu1  ;;  %v3643_v18 = vrot.slane %v3641_v39, 1  ;;  %v11966_v14 = vor.u32 %v14386_v17, %v11965_v23  ;;  %v21194_v23 = vld [vmem:[#allocation61_spill] sm:$0xff]  ;;  %v14373_v17 = vld [vmem:[%s20781_s7 + $0x1d4] sm:$0xf] }
 0x350   : > { %v17425_v26 = vadd.f32 %v3350_v0, %v3309_v59 }
 0x351   : > { %4621 = vmatpush.bf16.msrb.mxu1 %v11966_v14 }
 0x352   : > { %3829 = vmatmul.bf16.gmra.mxu0 %v3620_v1  ;;  %11705 = vmatmul.msk.bf16.gmra.mxu1 %vm2265_vm4, %v3628_v11 }
 0x353   : > { %3911 = vmatmul.bf16.gmra.mxu2 %v3620_v1  ;;  %11713 = vmatmul.msk.bf16.gmra.mxu3 %vm2265_vm4, %v3628_v11  ;;  %v3631_v1 = vor.u32 %v3629_v61, %v3619_v44  ;;  %v3639_v11 = vor.u32 %v3637_v16, %v3627_v27  ;;  %v11927_v44 = vld [vmem:[%s20781_s7 + $0x1e8] sm:$0xf0]  ;;  %v21195_v61 = vld [vmem:[#allocation62_spill] sm:$0xff] }
 0x354   : > { %v11930_v27 = vor.u32 %v14375_v52, %v11927_v44  ;;  %v14384_v44 = vld [vmem:[%s20781_s7 + $0x224] sm:$0xf0] }
 0x355   : > { %v3636_v36 = vsel %vm2987_vm5, %v3631_v1, %v3635_v12  ;;  %v3644_v10 = vsel %vm2987_vm5, %v3639_v11, %v3643_v18  ;;  %v14383_v12 = vld [vmem:[%s20781_s7 + $0x224] sm:$0xf]  ;;  %v11959_v18 = vld [vmem:[%s20781_s7 + $0x228] sm:$0xf0] }
 0x356   : > { %v3391_v47 = vpop.f32.mrf.mxu2  ;;  %v3432_v57 = vpop.f32.mrf.mxu3  ;;  %4659 = vmatpush.bf16.msrb.mxu2 %v11930_v27 }
 0x357   : > { %v17443_v9 = vadd.f32 %v3432_v57, %v3391_v47  ;;  %v3311_v25 = vpop.f32.mrf.mxu0  ;;  %v3352_v63 = vpop.f32.mrf.mxu1 }
 0x358   : > { %v14376_v25 = vld [vmem:[%s20781_s7 + $0x1e4] sm:$0xf0] }
 0x359   : > { %v11926_v63 = vor.u32 %v14376_v25, %v11925_v40  ;;  %v21196_v25 = vld [vmem:[#allocation64_spill] sm:$0xff] }
 0x35b   : > { %4577 = vmatpush.bf16.msrb.mxu0 %v11926_v63  ;;  %v21197_v63 = vld [vmem:[#allocation65_spill] sm:$0xff] }
 0x35e   : > { %v3393_v59 = vpop.f32.mrf.mxu2  ;;  %v3434_v0 = vpop.f32.mrf.mxu3 }
 0x35f   : > { %v3313_v35 = vpop.f32.mrf.mxu0  ;;  %v3354_v3 = vpop.f32.mrf.mxu1  ;;  %v11962_v59 = vor.u32 %v14383_v12, %v11959_v18  ;;  %v14372_v12 = vld [vmem:[%s20781_s7 + $0x1c4] sm:$0xf0] }
 0x360   : > { %v17461_v42 = vadd.f32 %v3354_v3, %v3313_v35 }
 0x361   : > { %4704 = vmatpush.bf16.msrb.mxu3 %v11962_v59 }
 0x362   : > { %3833 = vmatmul.bf16.gmra.mxu0 %v3636_v36  ;;  %11706 = vmatmul.msk.bf16.gmra.mxu1 %vm2265_vm4, %v3644_v10 }
 0x363   : > { %3915 = vmatmul.bf16.gmra.mxu2 %v3636_v36  ;;  %11714 = vmatmul.msk.bf16.gmra.mxu3 %vm2265_vm4, %v3644_v10  ;;  %v11917_v36 = vld [vmem:[%s20781_s7 + $0x1d0] sm:$0xf]  ;;  %v14374_v10 = vld [vmem:[%s20781_s7 + $0x1d4] sm:$0xf0] }
 0x364   : > { %v11918_v52 = vor.u32 %v14374_v10, %v11917_v36  ;;  %v14381_v36 = vld [vmem:[%s20781_s7 + $0x214] sm:$0xf] }
 0x366   : > { %v3395_v43 = vpop.f32.mrf.mxu2  ;;  %v3436_v32 = vpop.f32.mrf.mxu3  ;;  %4578 = vmatpush.bf16.msrb.mxu0 %v11918_v52 }
 0x367   : > { %v17473_v28 = vadd.f32 %v3436_v32, %v3395_v43  ;;  %v3315_v47 = vpop.f32.mrf.mxu0  ;;  %v3356_v57 = vpop.f32.mrf.mxu1 }
 0x36e   : > { %v3397_v50 = vpop.f32.mrf.mxu2  ;;  %v3438_v29 = vpop.f32.mrf.mxu3 }
 0x36f   : > { %v3806_v5 = vpop.f32.mrf.mxu0  ;;  %v3847_v39 = vpop.f32.mrf.mxu1  ;;  %v14371_v29 = vld [vmem:[%s20781_s7 + $0x1c4] sm:$0xf] }
 0x370   : > { %v3807_v48 = vadd.f32 %v3806_v5, %v17245_v15  ;;  %v11919_v15 = vld [vmem:[%s20781_s7 + $0x1d8] sm:$0xf0] }
 0x371   : > { %v11922_v16 = vor.u32 %v14373_v17, %v11919_v15  ;;  %v11909_v15 = vld [vmem:[%s20781_s7 + $0x1c0] sm:$0xf] }
 0x372   : > { %v3848_v56 = vadd.f32 %v3847_v39, %v3807_v48  ;;  %4229 = vmatmul.bf16.vlgmr.msra.gmra.mxu0 %v21194_v23  ;;  %11859 = vmatmul.msk.bf16.vlgmr.msra.gmra.mxu1 %vm2265_vm4, %v21195_v61 }
 0x373   : > { %4311 = vmatmul.bf16.vlgmr.msra.gmra.mxu2 %v21194_v23  ;;  %11867 = vmatmul.msk.bf16.vlgmr.msra.gmra.mxu3 %vm2265_vm4, %v21195_v61 }
 0x374   : > { %v17489_v51 = vadd.f32 %v3848_v56, %v16990_v41  ;;  %4660 = vmatpush.bf16.msrb.mxu2 %v11922_v16  ;;  %v11910_v16 = vor.u32 %v14372_v12, %v11909_v15  ;;  %v14367_v15 = vld [vmem:[%s20781_s7 + $0x1a4] sm:$0xf] }
 0x376   : > { %v3888_v14 = vpop.f32.mrf.mxu2  ;;  %v3929_v41 = vpop.f32.mrf.mxu3  ;;  %4579 = vmatpush.bf16.msrb.mxu0 %v11910_v16 }
 0x377   : > { %v3889_v0 = vadd.f32 %v3888_v14, %v17263_v34  ;;  %v3808_v35 = vpop.f32.mrf.mxu0  ;;  %v3849_v3 = vpop.f32.mrf.mxu1  ;;  %v11957_v34 = vld [vmem:[%s20781_s7 + $0x220] sm:$0xf] }
 0x378   : > { %v11958_v27 = vor.u32 %v14384_v44, %v11957_v34  ;;  %v21198_v35 = vld [vmem:[#allocation70_spill] sm:$0xff]  ;;  %v11951_v34 = vld [vmem:[%s20781_s7 + $0x218] sm:$0xf0] }
 0x379   : > { %v3930_v1 = vadd.f32 %v3929_v41, %v3889_v0  ;;  %v11954_v44 = vor.u32 %v14381_v36, %v11951_v34 }
 0x37a   : > { %4622 = vmatpush.bf16.msrb.mxu1 %v11958_v27 }
 0x37b   : > { %v17505_v11 = vadd.f32 %v3930_v1, %v17009_v45  ;;  %v14369_v1 = vld [vmem:[%s20781_s7 + $0x1b4] sm:$0xf]  ;;  %4705 = vmatpush.bf16.msrb.mxu3 %v11954_v44 }
 0x37c   : > { %v14365_v44 = vld [vmem:[%s20781_s7 + $0x194] sm:$0xf] }
 0x37e   : > { %v3890_v45 = vpop.f32.mrf.mxu2  ;;  %v3931_v43 = vpop.f32.mrf.mxu3 }
 0x37f   : > { %v3810_v32 = vpop.f32.mrf.mxu0  ;;  %v3851_v47 = vpop.f32.mrf.mxu1 }
 0x380   : > { %v3811_v57 = vadd.f32 %v3810_v32, %v17281_v2  ;;  %v11911_v2 = vld [vmem:[%s20781_s7 + $0x1c8] sm:$0xf0] }
 0x381   : > { %v11914_v5 = vor.u32 %v14371_v29, %v11911_v2 }
 0x382   : > { %v3852_v40 = vadd.f32 %v3851_v47, %v3811_v57  ;;  %4233 = vmatmul.bf16.gmra.mxu0 %v21196_v25  ;;  %11860 = vmatmul.msk.bf16.gmra.mxu1 %vm2265_vm4, %v21197_v63  ;;  %v11901_v57 = vld [vmem:[%s20781_s7 + $0x1b0] sm:$0xf] }
 0x383   : > { %4315 = vmatmul.bf16.gmra.mxu2 %v21196_v25  ;;  %11868 = vmatmul.msk.bf16.gmra.mxu3 %vm2265_vm4, %v21197_v63  ;;  %v14382_v63 = vld [vmem:[%s20781_s7 + $0x214] sm:$0xf0] }
 0x384   : > { %v17527_v50 = vadd.f32 %v3852_v40, %v17028_v24  ;;  %4661 = vmatpush.bf16.msrb.mxu2 %v11914_v5  ;;  %v14370_v40 = vld [vmem:[%s20781_s7 + $0x1b4] sm:$0xf0] }
 0x385   : > { %v11902_v25 = vor.u32 %v14370_v40, %v11901_v57 }
 0x386   : > { %v3892_v39 = vpop.f32.mrf.mxu2  ;;  %v3933_v48 = vpop.f32.mrf.mxu3 }
 0x387   : > { %v3893_v56 = vadd.f32 %v3892_v39, %v17293_v8  ;;  %v3812_v23 = vpop.f32.mrf.mxu0  ;;  %v3853_v61 = vpop.f32.mrf.mxu1  ;;  %4580 = vmatpush.bf16.msrb.mxu0 %v11902_v25 }
 0x388   : > { %v21200_v23 = vld [vmem:[#allocation76_spill] sm:$0xff]  ;;  %v21201_v61 = vld [vmem:[#allocation77_spill] sm:$0xff] }
 0x389   : > { %v3934_v17 = vadd.f32 %v3933_v48, %v3893_v56 }
 0x38b   : > { %v17537_v24 = vadd.f32 %v3934_v17, %v17039_v37  ;;  %v21199_v37 = vld [vmem:[#allocation71_spill] sm:$0xff] }
 0x38e   : > { %v3894_v18 = vpop.f32.mrf.mxu2  ;;  %v3935_v14 = vpop.f32.mrf.mxu3 }
 0x38f   : > { %v3814_v8 = vpop.f32.mrf.mxu0  ;;  %v3855_v41 = vpop.f32.mrf.mxu1 }
 0x390   : > { %v3815_v59 = vadd.f32 %v3814_v8, %v17305_v13  ;;  %v11903_v13 = vld [vmem:[%s20781_s7 + $0x1b8] sm:$0xf0] }
 0x391   : > { %v11906_v10 = vor.u32 %v14369_v1, %v11903_v13 }
 0x392   : > { %v3856_v0 = vadd.f32 %v3855_v41, %v3815_v59  ;;  %4237 = vmatmul.bf16.gmra.mxu0 %v21198_v35  ;;  %11861 = vmatmul.msk.bf16.gmra.mxu1 %vm2265_vm4, %v21199_v37 }
 0x393   : > { %4319 = vmatmul.bf16.gmra.mxu2 %v21198_v35  ;;  %11869 = vmatmul.msk.bf16.gmra.mxu3 %vm2265_vm4, %v21199_v37  ;;  %v14368_v35 = vld [vmem:[%s20781_s7 + $0x1a4] sm:$0xf0] }
 0x394   : > { %v17553_v3 = vadd.f32 %v3856_v0, %v17054_v33  ;;  %4662 = vmatpush.bf16.msrb.mxu2 %v11906_v10  ;;  %v11893_v0 = vld [vmem:[%s20781_s7 + $0x1a0] sm:$0xf] }
 0x395   : > { %v11894_v37 = vor.u32 %v14368_v35, %v11893_v0 }
 0x396   : > { %v3896_v52 = vpop.f32.mrf.mxu2  ;;  %v3937_v33 = vpop.f32.mrf.mxu3 }
 0x397   : > { %v3897_v27 = vadd.f32 %v3896_v52, %v17323_v22  ;;  %v3816_v45 = vpop.f32.mrf.mxu0  ;;  %v3857_v43 = vpop.f32.mrf.mxu1  ;;  %v11949_v22 = vld [vmem:[%s20781_s7 + $0x210] sm:$0xf]  ;;  %4581 = vmatpush.bf16.msrb.mxu0 %v11894_v37  ;;  %v21202_v52 = vld [vmem:[#allocation82_spill] sm:$0xff] }
 0x398   : > { %v11950_v29 = vor.u32 %v14382_v63, %v11949_v22  ;;  %v11943_v43 = vld [vmem:[%s20781_s7 + $0x208] sm:$0xf0] }
 0x399   : > { %v3938_v32 = vadd.f32 %v3937_v33, %v3897_v27  ;;  %v14379_v27 = vld [vmem:[%s20781_s7 + $0x204] sm:$0xf] }
 0x39a   : > { %4623 = vmatpush.bf16.msrb.mxu1 %v11950_v29  ;;  %v11946_v57 = vor.u32 %v14379_v27, %v11943_v43  ;;  %v14481_v27 = vld [vmem:[%s20782_s8 + $0x2b4] sm:$0xf] }
 0x39b   : > { %v17569_v47 = vadd.f32 %v3938_v32, %v17073_v55 }
 0x39c   : > { %4706 = vmatpush.bf16.msrb.mxu3 %v11946_v57 }
 0x39e   : > { %v3898_v55 = vpop.f32.mrf.mxu2  ;;  %v3939_v2 = vpop.f32.mrf.mxu3 }
 0x39f   : > { %v3818_v5 = vpop.f32.mrf.mxu0  ;;  %v3859_v39 = vpop.f32.mrf.mxu1  ;;  %v11885_v55 = vld [vmem:[%s20781_s7 + $0x190] sm:$0xf]  ;;  %v14366_v2 = vld [vmem:[%s20781_s7 + $0x194] sm:$0xf0] }
 0x3a0   : > { %v3819_v48 = vadd.f32 %v3818_v5, %v17341_v19  ;;  %v11895_v19 = vld [vmem:[%s20781_s7 + $0x1a8] sm:$0xf0]  ;;  %v11886_v5 = vor.u32 %v14366_v2, %v11885_v55  ;;  %v12157_v2 = vld [vmem:[%s20782_s8 + $0x2b0] sm:$0xf] }
 0x3a1   : > { %v11898_v12 = vor.u32 %v14367_v15, %v11895_v19 }
 0x3a2   : > { %v3860_v56 = vadd.f32 %v3859_v39, %v3819_v48  ;;  %4241 = vmatmul.bf16.gmra.mxu0 %v21200_v23  ;;  %11862 = vmatmul.msk.bf16.gmra.mxu1 %vm2265_vm4, %v21201_v61  ;;  %v14380_v39 = vld [vmem:[%s20781_s7 + $0x204] sm:$0xf0] }
 0x3a3   : > { %4323 = vmatmul.bf16.gmra.mxu2 %v21200_v23  ;;  %11870 = vmatmul.msk.bf16.gmra.mxu3 %vm2265_vm4, %v21201_v61 }
 0x3a4   : > { %v17591_v17 = vadd.f32 %v3860_v56, %v17092_v53  ;;  %4663 = vmatpush.bf16.msrb.mxu2 %v11898_v12  ;;  %4582 = vmatpush.bf16.msrb.mxu0 %v11886_v5  ;;  %v21204_v12 = vld [vmem:[#allocation88_spill] sm:$0xff] }
 0x3a6   : > { %v3900_v16 = vpop.f32.mrf.mxu2  ;;  %v3941_v18 = vpop.f32.mrf.mxu3 }
 0x3a7   : > { %v3901_v14 = vadd.f32 %v3900_v16, %v17353_v60  ;;  %v3820_v8 = vpop.f32.mrf.mxu0  ;;  %v3861_v41 = vpop.f32.mrf.mxu1  ;;  %v21205_v16 = vld [vmem:[#allocation89_spill] sm:$0xff] }
 0x3a9   : > { %v3942_v59 = vadd.f32 %v3941_v18, %v3901_v14  ;;  %v14363_v14 = vld [vmem:[%s20781_s7 + $0x184] sm:$0xf] }
 0x3ab   : > { %v17601_v53 = vadd.f32 %v3942_v59, %v17103_v21  ;;  %v21203_v21 = vld [vmem:[#allocation83_spill] sm:$0xff] }
 0x3ae   : > { %v3902_v1 = vpop.f32.mrf.mxu2  ;;  %v3943_v13 = vpop.f32.mrf.mxu3 }
 0x3af   : > { %v3822_v60 = vpop.f32.mrf.mxu0  ;;  %v3863_v36 = vpop.f32.mrf.mxu1  ;;  %v11877_v13 = vld [vmem:[%s20781_s7 + $0x180] sm:$0xf] }
 0x3b0   : > { %v3823_v10 = vadd.f32 %v3822_v60, %v17365_v4  ;;  %v11887_v4 = vld [vmem:[%s20781_s7 + $0x198] sm:$0xf0]  ;;  %v14364_v60 = vld [vmem:[%s20781_s7 + $0x184] sm:$0xf0] }
 0x3b1   : > { %v11890_v45 = vor.u32 %v14365_v44, %v11887_v4  ;;  %v21206_v4 = vld [vmem:[#allocation94_spill] sm:$0xff] }
 0x3b2   : > { %v3864_v34 = vadd.f32 %v3863_v36, %v3823_v10  ;;  %4245 = vmatmul.bf16.gmra.mxu0 %v21202_v52  ;;  %11863 = vmatmul.msk.bf16.gmra.mxu1 %vm2265_vm4, %v21203_v21  ;;  %v11878_v36 = vor.u32 %v14364_v60, %v11877_v13  ;;  %v14480_v13 = vld [vmem:[%s20782_s8 + $0x2a4] sm:$0xf0] }
 0x3b3   : > { %4327 = vmatmul.bf16.gmra.mxu2 %v21202_v52  ;;  %11871 = vmatmul.msk.bf16.gmra.mxu3 %vm2265_vm4, %v21203_v21 }
 0x3b4   : > { %v17617_v33 = vadd.f32 %v3864_v34, %v17118_v31  ;;  %4664 = vmatpush.bf16.msrb.mxu2 %v11890_v45  ;;  %4583 = vmatpush.bf16.msrb.mxu0 %v11878_v36  ;;  %v12159_v45 = vld [vmem:[%s20782_s8 + $0x2b8] sm:$0xf0] }
 0x3b6   : > { %v3904_v32 = vpop.f32.mrf.mxu2  ;;  %v3945_v31 = vpop.f32.mrf.mxu3 }
 0x3b7   : > { %v3905_v40 = vadd.f32 %v3904_v32, %v17383_v54  ;;  %v3824_v22 = vpop.f32.mrf.mxu0  ;;  %v3865_v25 = vpop.f32.mrf.mxu1  ;;  %v11941_v54 = vld [vmem:[%s20781_s7 + $0x200] sm:$0xf]  ;;  %v12162_v32 = vor.u32 %v14481_v27, %v12159_v45  ;;  %v12183_v45 = vld [vmem:[%s20782_s8 + $0x2e8] sm:$0xf0] }
 0x3b8   : > { %v11942_v48 = vor.u32 %v14380_v39, %v11941_v54  ;;  %v12189_v54 = vld [vmem:[%s20782_s8 + $0x2f0] sm:$0xf] }
 0x3b9   : > { %v3946_v63 = vadd.f32 %v3945_v31, %v3905_v40  ;;  %v12191_v31 = vld [vmem:[%s20782_s8 + $0x2f8] sm:$0xf0] }
 0x3ba   : > { %4624 = vmatpush.bf16.msrb.mxu1 %v11942_v48 }
 0x3bb   : > { %v17633_v29 = vadd.f32 %v3946_v63, %v17137_v62 }
 0x3be   : > { %v3906_v62 = vpop.f32.mrf.mxu2  ;;  %v3947_v56 = vpop.f32.mrf.mxu3 }
 0x3bf   : > { %v3826_v23 = vpop.f32.mrf.mxu0  ;;  %v3867_v61 = vpop.f32.mrf.mxu1 }
 0x3c0   : > { %v3827_v15 = vadd.f32 %v3826_v23, %v17401_v30  ;;  %v11879_v30 = vld [vmem:[%s20781_s7 + $0x188] sm:$0xf0] }
 0x3c1   : > { %v11882_v8 = vor.u32 %v14363_v14, %v11879_v30  ;;  %v21209_v14 = vld [vmem:[#allocation99_spill] sm:$0xff] }
 0x3c2   : > { %v3868_v19 = vadd.f32 %v3867_v61, %v3827_v15  ;;  %4249 = vmatmul.bf16.gmra.mxu0 %v21204_v12  ;;  %11864 = vmatmul.msk.bf16.gmra.mxu1 %vm2265_vm4, %v21205_v16  ;;  %v12151_v30 = vld [vmem:[%s20782_s8 + $0x2a8] sm:$0xf0] }
 0x3c3   : > { %4331 = vmatmul.bf16.gmra.mxu2 %v21204_v12  ;;  %11872 = vmatmul.msk.bf16.gmra.mxu3 %vm2265_vm4, %v21205_v16  ;;  %v21208_v16 = vld [vmem:[#allocation98_spill] sm:$0xff] }
 0x3c4   : > { %v17655_v18 = vadd.f32 %v3868_v19, %v17156_v20  ;;  %4665 = vmatpush.bf16.msrb.mxu2 %v11882_v8 }
 0x3c6   : > { %v3908_v41 = vpop.f32.mrf.mxu2  ;;  %v3949_v59 = vpop.f32.mrf.mxu3 }
 0x3c7   : > { %v3909_v0 = vadd.f32 %v3908_v41, %v17413_v7  ;;  %v3828_v35 = vpop.f32.mrf.mxu0  ;;  %v3869_v37 = vpop.f32.mrf.mxu1 }
 0x3c8   : > { %5136 = vmatpush.bf16.msra.mxu2 %v12162_v32 }
 0x3c9   : > { %v3950_v1 = vadd.f32 %v3949_v59, %v3909_v0 }
 0x3cb   : > { %v17665_v20 = vadd.f32 %v3950_v1, %v17167_v6  ;;  %v21207_v6 = vld [vmem:[#allocation95_spill] sm:$0xff]  ;;  %v12149_v1 = vld [vmem:[%s20782_s8 + $0x2a0] sm:$0xf] }
 0x3cc   : > { %v12150_v60 = vor.u32 %v14480_v13, %v12149_v1 }
 0x3ce   : > { %v3910_v10 = vpop.f32.mrf.mxu2  ;;  %v3951_v34 = vpop.f32.mrf.mxu3 }
 0x3cf   : > { %v3830_v7 = vpop.f32.mrf.mxu0  ;;  %v3871_v52 = vpop.f32.mrf.mxu1 }
 0x3d0   : > { %v3831_v21 = vadd.f32 %v3830_v7, %v17425_v26  ;;  %v14489_v26 = vld [vmem:[%s20782_s8 + $0x2f4] sm:$0xf] }
 0x3d1   : > { %v12194_v57 = vor.u32 %v14489_v26, %v12191_v31 }
 0x3d2   : > { %v3872_v44 = vadd.f32 %v3871_v52, %v3831_v21  ;;  %4253 = vmatmul.bf16.gmra.mxu0 %v21206_v4  ;;  %11865 = vmatmul.msk.bf16.gmra.mxu1 %vm2265_vm4, %v21207_v6  ;;  %v21210_v21 = vld [vmem:[#allocation4_spill] sm:$0xff] }
 0x3d3   : > { %4335 = vmatmul.bf16.gmra.mxu2 %v21206_v4  ;;  %11873 = vmatmul.msk.bf16.gmra.mxu3 %vm2265_vm4, %v21207_v6  ;;  %v12143_v4 = vld [vmem:[%s20782_s8 + $0x298] sm:$0xf0]  ;;  %v14487_v6 = vld [vmem:[%s20782_s8 + $0x2e4] sm:$0xf] }
 0x3d4   : > { %v17690_v43 = vadd.f32 %v3872_v44, %v17182_v58  ;;  %5181 = vmatpush.bf16.msra.mxu3 %v12194_v57  ;;  %v14482_v58 = vld [vmem:[%s20782_s8 + $0x2b4] sm:$0xf0]  ;;  %v12186_v26 = vor.u32 %v14487_v6, %v12183_v45 }
 0x3d5   : > { %v12158_v5 = vor.u32 %v14482_v58, %v12157_v2  ;;  %v21211_v44 = vld [vmem:[#allocation5_spill] sm:$0xff]  ;;  %v14488_v58 = vld [vmem:[%s20782_s8 + $0x2e4] sm:$0xf0] }
 0x3d6   : > { %v3912_v40 = vpop.f32.mrf.mxu2  ;;  %v3953_v22 = vpop.f32.mrf.mxu3 }
 0x3d7   : > { %v3913_v25 = vadd.f32 %v3912_v40, %v17443_v9  ;;  %v3832_v63 = vpop.f32.mrf.mxu0  ;;  %v3873_v55 = vpop.f32.mrf.mxu1  ;;  %v14490_v9 = vld [vmem:[%s20782_s8 + $0x2f4] sm:$0xf0]  ;;  %5054 = vmatpush.bf16.msra.mxu0 %v12158_v5 }
 0x3d8   : > { %v12190_v48 = vor.u32 %v14490_v9, %v12189_v54  ;;  %5182 = vmatpush.bf16.msra.mxu3 %v12186_v26  ;;  %v14478_v63 = vld [vmem:[%s20782_s8 + $0x294] sm:$0xf0]  ;;  %v12181_v55 = vld [vmem:[%s20782_s8 + $0x2e0] sm:$0xf] }
 0x3d9   : > { %v3954_v39 = vadd.f32 %v3953_v22, %v3913_v25  ;;  %v12141_v25 = vld [vmem:[%s20782_s8 + $0x290] sm:$0xf]  ;;  %v12182_v54 = vor.u32 %v14488_v58, %v12181_v55 }
 0x3da   : > { %5099 = vmatpush.bf16.msra.mxu1 %v12190_v48  ;;  %v12142_v2 = vor.u32 %v14478_v63, %v12141_v25  ;;  %v14486_v25 = vld [vmem:[%s20782_s8 + $0x2d4] sm:$0xf0] }
 0x3db   : > { %v17709_v62 = vadd.f32 %v3954_v39, %v17211_v49  ;;  %v14479_v49 = vld [vmem:[%s20782_s8 + $0x2a4] sm:$0xf]  ;;  %5055 = vmatpush.bf16.msra.mxu0 %v12150_v60 }
 0x3dc   : > { %v12154_v8 = vor.u32 %v14479_v49, %v12151_v30 }
 0x3de   : > { %v3914_v56 = vpop.f32.mrf.mxu2  ;;  %v3955_v23 = vpop.f32.mrf.mxu3  ;;  %5137 = vmatpush.bf16.msra.mxu2 %v12154_v8  ;;  %5100 = vmatpush.bf16.msra.mxu1 %v12182_v54 }
 0x3df   : > { %v3834_v61 = vpop.f32.mrf.mxu0  ;;  %v3875_v15 = vpop.f32.mrf.mxu1  ;;  %5056 = vmatpush.bf16.msra.mxu0 %v12142_v2  ;;  %v21212_v23 = vld [vmem:[#allocation7_spill] sm:$0xff] }
 0x3e0   : > { %v3835_v19 = vadd.f32 %v3834_v61, %v17461_v42  ;;  %v21213_v61 = vld [vmem:[#allocation8_spill] sm:$0xff] }
 0x3e2   : > { %v3876_v12 = vadd.f32 %v3875_v15, %v3835_v19  ;;  %4257 = vmatmul.bf16.gmra.mxu0 %v21208_v16  ;;  %11866 = vmatmul.msk.bf16.gmra.mxu1 %vm2265_vm4, %v21209_v14  ;;  %v14475_v15 = vld [vmem:[%s20782_s8 + $0x284] sm:$0xf]  ;;  %v12135_v19 = vld [vmem:[%s20782_s8 + $0x288] sm:$0xf0] }
 0x3e3   : > { %4339 = vmatmul.bf16.gmra.mxu2 %v21208_v16  ;;  %11874 = vmatmul.msk.bf16.gmra.mxu3 %vm2265_vm4, %v21209_v14 }
 0x3e4   : > { %v17725_v42 = vadd.f32 %v3876_v12, %v17220_v46  ;;  %v12138_v12 = vor.u32 %v14475_v15, %v12135_v19 }
 0x3e6   : > { %v3916_v41 = vpop.f32.mrf.mxu2  ;;  %v3957_v59 = vpop.f32.mrf.mxu3 }
 0x3e7   : > { %v3917_v0 = vadd.f32 %v3916_v41, %v17473_v28  ;;  %v3836_v35 = vpop.f32.mrf.mxu0  ;;  %v3877_v37 = vpop.f32.mrf.mxu1  ;;  %v12133_v41 = vld [vmem:[%s20782_s8 + $0x280] sm:$0xf] }
 0x3e9   : > { %v3958_v36 = vadd.f32 %v3957_v59, %v3917_v0  ;;  %v14476_v59 = vld [vmem:[%s20782_s8 + $0x284] sm:$0xf0] }
 0x3ea   : > { %v12134_v0 = vor.u32 %v14476_v59, %v12133_v41 }
 0x3eb   : > { %v17735_v46 = vadd.f32 %v3958_v36, %v17241_v38  ;;  %v14477_v38 = vld [vmem:[%s20782_s8 + $0x294] sm:$0xf]  ;;  %v21214_v36 = vld [vmem:[#allocation13_spill] sm:$0xff] }
 0x3ec   : > { %v12146_v27 = vor.u32 %v14477_v38, %v12143_v4  ;;  %5057 = vmatpush.bf16.msra.mxu0 %v12134_v0 }
 0x3ee   : > { %v3918_v10 = vpop.f32.mrf.mxu2  ;;  %v3959_v34 = vpop.f32.mrf.mxu3  ;;  %5138 = vmatpush.bf16.msra.mxu2 %v12146_v27 }
 0x3ef   : > { %v4230_v7 = vpop.f32.mrf.mxu0  ;;  %v4271_v28 = vpop.f32.mrf.mxu1  ;;  %v21215_v10 = vld [vmem:[#allocation14_spill] sm:$0xff]  ;;  %v14473_v34 = vld [vmem:[%s20782_s8 + $0x274] sm:$0xf] }
 0x3f0   : > { %v17737_v52 = vadd.f32 %v4271_v28, %v4230_v7  ;;  %v12127_v7 = vld [vmem:[%s20782_s8 + $0x278] sm:$0xf0]  ;;  %v14485_v28 = vld [vmem:[%s20782_s8 + $0x2d4] sm:$0xf] }
 0x3f2   : > { %4584 = vmatmul.bf16.vlgmr.msrb.gmra.mxu0 %v21210_v21  ;;  %11971 = vmatmul.msk.bf16.vlgmr.msrb.gmra.mxu1 %vm2265_vm4, %v21211_v44 }
 0x3f3   : > { %4666 = vmatmul.bf16.vlgmr.msrb.gmra.mxu2 %v21210_v21  ;;  %11979 = vmatmul.msk.bf16.vlgmr.msrb.gmra.mxu3 %vm2265_vm4, %v21211_v44  ;;  %v12130_v21 = vor.u32 %v14473_v34, %v12127_v7  ;;  %v12175_v44 = vld [vmem:[%s20782_s8 + $0x2d8] sm:$0xf0]  ;;  %v14483_v7 = vld [vmem:[%s20782_s8 + $0x2c4] sm:$0xf] }
 0x3f4   : > { %5139 = vmatpush.bf16.msra.mxu2 %v12138_v12  ;;  %v12178_v38 = vor.u32 %v14485_v28, %v12175_v44  ;;  %v12111_v34 = vld [vmem:[%s20782_s8 + $0x258] sm:$0xf0] }
 0x3f6   : > { %v4312_v32 = vpop.f32.mrf.mxu2  ;;  %v4353_v31 = vpop.f32.mrf.mxu3  ;;  %5183 = vmatpush.bf16.msra.mxu3 %v12178_v38 }
 0x3f7   : > { %v17757_v57 = vadd.f32 %v4353_v31, %v4312_v32  ;;  %v4232_v40 = vpop.f32.mrf.mxu0  ;;  %v4273_v22 = vpop.f32.mrf.mxu1  ;;  %v12125_v32 = vld [vmem:[%s20782_s8 + $0x270] sm:$0xf]  ;;  %v14474_v31 = vld [vmem:[%s20782_s8 + $0x274] sm:$0xf0] }
 0x3f8   : > { %5140 = vmatpush.bf16.msra.mxu2 %v12130_v21  ;;  %v12173_v40 = vld [vmem:[%s20782_s8 + $0x2d0] sm:$0xf]  ;;  %v12126_v22 = vor.u32 %v14474_v31, %v12125_v32  ;;  %v12167_v21 = vld [vmem:[%s20782_s8 + $0x2c8] sm:$0xf0]  ;;  %v14470_v31 = vld [vmem:[%s20782_s8 + $0x254] sm:$0xf0] }
 0x3f9   : > { %v12174_v63 = vor.u32 %v14486_v25, %v12173_v40  ;;  %v12170_v44 = vor.u32 %v14483_v7, %v12167_v21  ;;  %v12109_v32 = vld [vmem:[%s20782_s8 + $0x250] sm:$0xf]  ;;  %v12165_v40 = vld [vmem:[%s20782_s8 + $0x2c0] sm:$0xf]  ;;  %v14484_v25 = vld [vmem:[%s20782_s8 + $0x2c4] sm:$0xf0] }
 0x3fa   : > { %5058 = vmatpush.bf16.msra.mxu0 %v12126_v22  ;;  %v12110_v22 = vor.u32 %v14470_v31, %v12109_v32  ;;  %v21223_v7 = vld [vmem:[#allocation44_spill] sm:$0xff]  ;;  %v12335_v21 = vld [vmem:[%s20781_s7 + $0x2b8] sm:$0xf0] }
 0x3fb   : > { %5101 = vmatpush.bf16.msra.mxu1 %v12174_v63  ;;  %5184 = vmatpush.bf16.msra.mxu3 %v12170_v44  ;;  %v12166_v63 = vor.u32 %v14484_v25, %v12165_v40  ;;  %v14449_v44 = vld [vmem:[%s20781_s7 + $0x2f4] sm:$0xf]  ;;  %v12333_v25 = vld [vmem:[%s20781_s7 + $0x2b0] sm:$0xf] }
 0x3fe   : > { %v4314_v5 = vpop.f32.mrf.mxu2  ;;  %v4355_v9 = vpop.f32.mrf.mxu3 }
 0x3ff   : > { %v4234_v39 = vpop.f32.mrf.mxu0  ;;  %v4275_v48 = vpop.f32.mrf.mxu1  ;;  %v21216_v9 = vld [vmem:[#allocation15_spill] sm:$0xff]  ;;  %5102 = vmatpush.bf16.msra.mxu1 %v12166_v63  ;;  %v14442_v63 = vld [vmem:[%s20781_s7 + $0x2b4] sm:$0xf0] }
 0x400   : > { %v17771_v56 = vadd.f32 %v4275_v48, %v4234_v39  ;;  %v21217_v39 = vld [vmem:[#allocation16_spill] sm:$0xff]  ;;  %v14471_v48 = vld [vmem:[%s20782_s8 + $0x264] sm:$0xf] }
 0x402   : > { %4588 = vmatmul.bf16.gmra.mxu0 %v21212_v23  ;;  %11972 = vmatmul.msk.bf16.gmra.mxu1 %vm2265_vm4, %v21213_v61 }
 0x403   : > { %4670 = vmatmul.bf16.gmra.mxu2 %v21212_v23  ;;  %11980 = vmatmul.msk.bf16.gmra.mxu3 %vm2265_vm4, %v21213_v61  ;;  %v12119_v23 = vld [vmem:[%s20782_s8 + $0x268] sm:$0xf0] }
 0x404   : > { %v12122_v61 = vor.u32 %v14471_v48, %v12119_v23  ;;  %v21221_v48 = vld [vmem:[#allocation37_spill] sm:$0xff]  ;;  %v14467_v23 = vld [vmem:[%s20782_s8 + $0x244] sm:$0xf] }
 0x406   : > { %v4316_v16 = vpop.f32.mrf.mxu2  ;;  %v4357_v14 = vpop.f32.mrf.mxu3  ;;  %5141 = vmatpush.bf16.msra.mxu2 %v12122_v61  ;;  %v12103_v61 = vld [vmem:[%s20782_s8 + $0x248] sm:$0xf0] }
 0x407   : > { %v17785_v49 = vadd.f32 %v4357_v14, %v4316_v16  ;;  %v4236_v30 = vpop.f32.mrf.mxu0  ;;  %v4277_v8 = vpop.f32.mrf.mxu1 }
 0x408   : > { %v12117_v30 = vld [vmem:[%s20782_s8 + $0x260] sm:$0xf]  ;;  %v14472_v8 = vld [vmem:[%s20782_s8 + $0x264] sm:$0xf0] }
 0x409   : > { %v12118_v41 = vor.u32 %v14472_v8, %v12117_v30 }
 0x40b   : > { %5059 = vmatpush.bf16.msra.mxu0 %v12118_v41  ;;  %v12101_v41 = vld [vmem:[%s20782_s8 + $0x240] sm:$0xf] }
 0x40e   : > { %v4318_v35 = vpop.f32.mrf.mxu2  ;;  %v4359_v37 = vpop.f32.mrf.mxu3 }
 0x40f   : > { %v4238_v1 = vpop.f32.mrf.mxu0  ;;  %v4279_v13 = vpop.f32.mrf.mxu1  ;;  %5060 = vmatpush.bf16.msra.mxu0 %v12110_v22 }
 0x410   : > { %v17793_v60 = vadd.f32 %v4279_v13, %v4238_v1  ;;  %v21218_v13 = vld [vmem:[#allocation25_spill] sm:$0xff] }
 0x412   : > { %4592 = vmatmul.bf16.gmra.mxu0 %v21214_v36  ;;  %11973 = vmatmul.msk.bf16.gmra.mxu1 %vm2265_vm4, %v21215_v10 }
 0x413   : > { %4674 = vmatmul.bf16.gmra.mxu2 %v21214_v36  ;;  %11981 = vmatmul.msk.bf16.gmra.mxu3 %vm2265_vm4, %v21215_v10  ;;  %v21219_v36 = vld [vmem:[#allocation26_spill] sm:$0xff]  ;;  %v14469_v10 = vld [vmem:[%s20782_s8 + $0x254] sm:$0xf] }
 0x414   : > { %v12114_v28 = vor.u32 %v14469_v10, %v12111_v34  ;;  %v21222_v34 = vld [vmem:[#allocation43_spill] sm:$0xff] }
 0x416   : > { %v4320_v4 = vpop.f32.mrf.mxu2  ;;  %v4361_v6 = vpop.f32.mrf.mxu3  ;;  %5142 = vmatpush.bf16.msra.mxu2 %v12114_v28  ;;  %v14441_v28 = vld [vmem:[%s20781_s7 + $0x2b4] sm:$0xf] }
 0x417   : > { %v17813_v27 = vadd.f32 %v4361_v6, %v4320_v4  ;;  %v4240_v45 = vpop.f32.mrf.mxu0  ;;  %v4281_v26 = vpop.f32.mrf.mxu1 }
 0x41e   : > { %v4322_v55 = vpop.f32.mrf.mxu2  ;;  %v4363_v2 = vpop.f32.mrf.mxu3 }
 0x41f   : > { %v4242_v58 = vpop.f32.mrf.mxu0  ;;  %v4283_v54 = vpop.f32.mrf.mxu1 }
 0x420   : > { %v17827_v5 = vadd.f32 %v4283_v54, %v4242_v58 }
 0x422   : > { %4596 = vmatmul.bf16.gmra.mxu0 %v21216_v9  ;;  %11974 = vmatmul.msk.bf16.gmra.mxu1 %vm2265_vm4, %v21217_v39 }
 0x423   : > { %4678 = vmatmul.bf16.gmra.mxu2 %v21216_v9  ;;  %11982 = vmatmul.msk.bf16.gmra.mxu3 %vm2265_vm4, %v21217_v39  ;;  %v21220_v39 = vld [vmem:[#allocation35_spill] sm:$0xff] }
 0x426   : > { %v4324_v15 = vpop.f32.mrf.mxu2  ;;  %v4365_v19 = vpop.f32.mrf.mxu3 }
 0x427   : > { %v17841_v12 = vadd.f32 %v4365_v19, %v4324_v15  ;;  %v4244_v16 = vpop.f32.mrf.mxu0  ;;  %v4285_v14 = vpop.f32.mrf.mxu1  ;;  %v12106_v15 = vor.u32 %v14467_v23, %v12103_v61 }
 0x429   : > { %5143 = vmatpush.bf16.msra.mxu2 %v12106_v15 }
 0x42e   : > { %v4326_v59 = vpop.f32.mrf.mxu2  ;;  %v4367_v0 = vpop.f32.mrf.mxu3 }
 0x42f   : > { %v4246_v35 = vpop.f32.mrf.mxu0  ;;  %v4287_v37 = vpop.f32.mrf.mxu1  ;;  %v14468_v59 = vld [vmem:[%s20782_s8 + $0x244] sm:$0xf0] }
 0x430   : > { %v17849_v1 = vadd.f32 %v4287_v37, %v4246_v35  ;;  %v12102_v0 = vor.u32 %v14468_v59, %v12101_v41 }
 0x432   : > { %4600 = vmatmul.bf16.gmra.mxu0 %v21218_v13  ;;  %11975 = vmatmul.msk.bf16.gmra.mxu1 %vm2265_vm4, %v21219_v36 }
 0x433   : > { %4682 = vmatmul.bf16.gmra.mxu2 %v21218_v13  ;;  %11983 = vmatmul.msk.bf16.gmra.mxu3 %vm2265_vm4, %v21219_v36 }
 0x434   : > { %5061 = vmatpush.bf16.msra.mxu0 %v12102_v0 }
 0x436   : > { %v4328_v38 = vpop.f32.mrf.mxu2  ;;  %v4369_v4 = vpop.f32.mrf.mxu3 }
 0x437   : > { %v17869_v6 = vadd.f32 %v4369_v4, %v4328_v38  ;;  %v4248_v45 = vpop.f32.mrf.mxu0  ;;  %v4289_v26 = vpop.f32.mrf.mxu1  ;;  %v12338_v38 = vor.u32 %v14441_v28, %v12335_v21  ;;  %v12367_v4 = vld [vmem:[%s20781_s7 + $0x2f8] sm:$0xf0]  ;;  %v14452_v28 = vld [vmem:[#allocation3 + $0x14] sm:$0xf0]  ;;  %v12039_v21 = vld [vmem:[#allocation3 + $0x18] sm:$0xf0] }
 0x438   : > { %v12370_v32 = vor.u32 %v14449_v44, %v12367_v4 }
 0x439   : > { %5516 = vmatpush.bf16.msrb.mxu2 %v12338_v38 }
 0x43a   : > { %5561 = vmatpush.bf16.msrb.mxu3 %v12370_v32  ;;  %v14451_v32 = vld [vmem:[#allocation3 + $0x14] sm:$0xf] }
 0x43e   : > { %v4330_v55 = vpop.f32.mrf.mxu2  ;;  %v4371_v2 = vpop.f32.mrf.mxu3 }
 0x43f   : > { %v4250_v58 = vpop.f32.mrf.mxu0  ;;  %v4291_v54 = vpop.f32.mrf.mxu1  ;;  %v12365_v55 = vld [vmem:[%s20781_s7 + $0x2f0] sm:$0xf]  ;;  %v12334_v2 = vor.u32 %v14442_v63, %v12333_v25  ;;  %v12042_v25 = vor.u32 %v14451_v32, %v12039_v21 }
 0x440   : > { %v17883_v9 = vadd.f32 %v4291_v54, %v4250_v58  ;;  %v14450_v58 = vld [vmem:[%s20781_s7 + $0x2f4] sm:$0xf0] }
 0x441   : > { %v12366_v54 = vor.u32 %v14450_v58, %v12365_v55  ;;  %5434 = vmatpush.bf16.msrb.mxu0 %v12334_v2  ;;  %v14437_v2 = vld [vmem:[%s20781_s7 + $0x294] sm:$0xf]  ;;  %v14447_v58 = vld [vmem:[%s20781_s7 + $0x2e4] sm:$0xf] }
 0x442   : > { %4604 = vmatmul.bf16.gmra.mxu0 %v21220_v39  ;;  %11976 = vmatmul.msk.bf16.gmra.mxu1 %vm2265_vm4, %v21221_v48 }
 0x443   : > { %4686 = vmatmul.bf16.gmra.mxu2 %v21220_v39  ;;  %11984 = vmatmul.msk.bf16.gmra.mxu3 %vm2265_vm4, %v21221_v48 }
 0x444   : > { %5479 = vmatpush.bf16.msrb.mxu1 %v12366_v54 }
 0x446   : > { %v4332_v19 = vpop.f32.mrf.mxu2  ;;  %v4373_v16 = vpop.f32.mrf.mxu3 }
 0x447   : > { %v17897_v14 = vadd.f32 %v4373_v16, %v4332_v19  ;;  %v4252_v30 = vpop.f32.mrf.mxu0  ;;  %v4293_v8 = vpop.f32.mrf.mxu1  ;;  %v21224_v19 = vld [vmem:[#allocation47_spill] sm:$0xff]  ;;  %v21225_v16 = vld [vmem:[#allocation48_spill] sm:$0xff] }
 0x448   : > { %v14439_v30 = vld [vmem:[%s20781_s7 + $0x2a4] sm:$0xf]  ;;  %v12327_v8 = vld [vmem:[%s20781_s7 + $0x2a8] sm:$0xf0] }
 0x449   : > { %v12330_v41 = vor.u32 %v14439_v30, %v12327_v8 }
 0x44b   : > { %5517 = vmatpush.bf16.msrb.mxu2 %v12330_v41  ;;  %v12317_v41 = vld [vmem:[%s20781_s7 + $0x290] sm:$0xf] }
 0x44e   : > { %v4334_v35 = vpop.f32.mrf.mxu2  ;;  %v4375_v37 = vpop.f32.mrf.mxu3 }
 0x44f   : > { %v4254_v13 = vpop.f32.mrf.mxu0  ;;  %v4295_v36 = vpop.f32.mrf.mxu1 }
 0x450   : > { %v17905_v10 = vadd.f32 %v4295_v36, %v4254_v13  ;;  %v12325_v36 = vld [vmem:[%s20781_s7 + $0x2a0] sm:$0xf] }
 0x452   : > { %4608 = vmatmul.bf16.gmra.mxu0 %v21222_v34  ;;  %11977 = vmatmul.msk.bf16.gmra.mxu1 %vm2265_vm4, %v21223_v7 }
 0x453   : > { %4690 = vmatmul.bf16.gmra.mxu2 %v21222_v34  ;;  %11985 = vmatmul.msk.bf16.gmra.mxu3 %vm2265_vm4, %v21223_v7  ;;  %v14440_v34 = vld [vmem:[%s20781_s7 + $0x2a4] sm:$0xf0] }
 0x454   : > { %v12326_v7 = vor.u32 %v14440_v34, %v12325_v36 }
 0x456   : > { %v4336_v45 = vpop.f32.mrf.mxu2  ;;  %v4377_v26 = vpop.f32.mrf.mxu3  ;;  %5435 = vmatpush.bf16.msrb.mxu0 %v12326_v7 }
 0x457   : > { %v17925_v31 = vadd.f32 %v4377_v26, %v4336_v45  ;;  %v4256_v40 = vpop.f32.mrf.mxu0  ;;  %v4297_v22 = vpop.f32.mrf.mxu1  ;;  %v12037_v26 = vld [vmem:[#allocation3 + $0x10] sm:$0xf] }
 0x458   : > { %v12038_v22 = vor.u32 %v14452_v28, %v12037_v26 }
 0x45e   : > { %v4338_v39 = vpop.f32.mrf.mxu2  ;;  %v4379_v48 = vpop.f32.mrf.mxu3 }
 0x45f   : > { %v4258_v23 = vpop.f32.mrf.mxu0  ;;  %v4299_v61 = vpop.f32.mrf.mxu1  ;;  %v12359_v39 = vld [vmem:[%s20781_s7 + $0x2e8] sm:$0xf0] }
 0x460   : > { %v17939_v15 = vadd.f32 %v4299_v61, %v4258_v23  ;;  %v12362_v23 = vor.u32 %v14447_v58, %v12359_v39 }
 0x462   : > { %4612 = vmatmul.bf16.gmra.mxu0 %v21224_v19  ;;  %11978 = vmatmul.msk.bf16.gmra.mxu1 %vm2265_vm4, %v21225_v16 }
 0x463   : > { %4694 = vmatmul.bf16.gmra.mxu2 %v21224_v19  ;;  %11986 = vmatmul.msk.bf16.gmra.mxu3 %vm2265_vm4, %v21225_v16 }
 0x464   : > { %5562 = vmatpush.bf16.msrb.mxu3 %v12362_v23 }
 0x466   : > { %v4340_v59 = vpop.f32.mrf.mxu2  ;;  %v4381_v0 = vpop.f32.mrf.mxu3 }
 0x467   : > { %v17953_v35 = vadd.f32 %v4381_v0, %v4340_v59  ;;  %v4260_v37 = vpop.f32.mrf.mxu0  ;;  %v4301_v13 = vpop.f32.mrf.mxu1  ;;  %v14438_v59 = vld [vmem:[%s20781_s7 + $0x294] sm:$0xf0] }
 0x468   : > { %v12318_v0 = vor.u32 %v14438_v59, %v12317_v41  ;;  %v14448_v37 = vld [vmem:[%s20781_s7 + $0x2e4] sm:$0xf0]  ;;  %v14454_v13 = vld [vmem:[#allocation3 + $0x24] sm:$0xf0]  ;;  %v12053_v59 = vld [vmem:[#allocation3 + $0x30] sm:$0xf] }
 0x46a   : > { %5436 = vmatpush.bf16.msrb.mxu0 %v12318_v0 }
 0x46e   : > { %v4342_v44 = vpop.f32.mrf.mxu2  ;;  %v4383_v38 = vpop.f32.mrf.mxu3 }
 0x46f   : > { %v4585_v4 = vpop.f32.mrf.mxu0  ;;  %v4626_v45 = vpop.f32.mrf.mxu1  ;;  %v12045_v44 = vld [vmem:[#allocation3 + $0x20] sm:$0xf]  ;;  %v14453_v38 = vld [vmem:[#allocation3 + $0x24] sm:$0xf] }
 0x470   : > { %v4586_v40 = vadd.f32 %v4585_v4, %v17737_v52  ;;  %v12319_v52 = vld [vmem:[%s20781_s7 + $0x298] sm:$0xf0] }
 0x471   : > { %v12322_v54 = vor.u32 %v14437_v2, %v12319_v52 }
 0x472   : > { %v4627_v63 = vadd.f32 %v4626_v45, %v4586_v40  ;;  %5062 = vmatmul.bf16.vlgmr.msra.gmra.mxu0 %v12038_v22  ;;  %12195 = vmatmul.msk.bf16.vlgmr.msra.gmra.mxu1 %vm2265_vm4, %v12042_v25  ;;  %v12046_v45 = vor.u32 %v14454_v13, %v12045_v44 }
 0x473   : > { %5144 = vmatmul.bf16.vlgmr.msra.gmra.mxu2 %v12038_v22  ;;  %12203 = vmatmul.msk.bf16.vlgmr.msra.gmra.mxu3 %vm2265_vm4, %v12042_v25  ;;  %v14435_v22 = vld [vmem:[%s20781_s7 + $0x284] sm:$0xf] }
 0x474   : > { %v17965_v55 = vadd.f32 %v4627_v63, %v17489_v51  ;;  %5518 = vmatpush.bf16.msrb.mxu2 %v12322_v54 }
 0x476   : > { %v4667_v48 = vpop.f32.mrf.mxu2  ;;  %v4708_v51 = vpop.f32.mrf.mxu3 }
 0x477   : > { %v4668_v61 = vadd.f32 %v4667_v48, %v17757_v57  ;;  %v4587_v19 = vpop.f32.mrf.mxu0  ;;  %v4628_v16 = vpop.f32.mrf.mxu1  ;;  %v12357_v57 = vld [vmem:[%s20781_s7 + $0x2e0] sm:$0xf] }
 0x478   : > { %v12358_v36 = vor.u32 %v14448_v37, %v12357_v57  ;;  %v12309_v48 = vld [vmem:[%s20781_s7 + $0x280] sm:$0xf]  ;;  %v12055_v19 = vld [vmem:[#allocation3 + $0x38] sm:$0xf0]  ;;  %v14455_v57 = vld [vmem:[#allocation3 + $0x34] sm:$0xf] }
 0x479   : > { %v4709_v30 = vadd.f32 %v4708_v51, %v4668_v61  ;;  %v14436_v51 = vld [vmem:[%s20781_s7 + $0x284] sm:$0xf0]  ;;  %v14456_v61 = vld [vmem:[#allocation3 + $0x34] sm:$0xf0]  ;;  %v12058_v37 = vor.u32 %v14455_v57, %v12055_v19 }
 0x47a   : > { %5480 = vmatpush.bf16.msrb.mxu1 %v12358_v36  ;;  %v12310_v23 = vor.u32 %v14436_v51, %v12309_v48  ;;  %v12054_v0 = vor.u32 %v14456_v61, %v12053_v59  ;;  %v14433_v36 = vld [vmem:[%s20781_s7 + $0x274] sm:$0xf]  ;;  %v12061_v51 = vld [vmem:[#allocation3 + $0x40] sm:$0xf] }
 0x47b   : > { %v17981_v8 = vadd.f32 %v4709_v30, %v17505_v11  ;;  %v12047_v11 = vld [vmem:[#allocation3 + $0x28] sm:$0xf0] }
 0x47c   : > { %v12050_v26 = vor.u32 %v14453_v38, %v12047_v11  ;;  %5437 = vmatpush.bf16.msrb.mxu0 %v12310_v23  ;;  %v14457_v23 = vld [vmem:[#allocation3 + $0x44] sm:$0xf] }
 0x47e   : > { %v4669_v34 = vpop.f32.mrf.mxu2  ;;  %v4710_v7 = vpop.f32.mrf.mxu3 }
 0x47f   : > { %v4589_v28 = vpop.f32.mrf.mxu0  ;;  %v4630_v21 = vpop.f32.mrf.mxu1  ;;  %v14445_v34 = vld [vmem:[%s20781_s7 + $0x2d4] sm:$0xf] }
 0x480   : > { %v4590_v4 = vadd.f32 %v4589_v28, %v17771_v56  ;;  %v12311_v56 = vld [vmem:[%s20781_s7 + $0x288] sm:$0xf0]  ;;  %v12351_v28 = vld [vmem:[%s20781_s7 + $0x2d8] sm:$0xf0] }
 0x481   : > { %v12314_v25 = vor.u32 %v14435_v22, %v12311_v56  ;;  %v12354_v44 = vor.u32 %v14445_v34, %v12351_v28  ;;  %v12301_v22 = vld [vmem:[%s20781_s7 + $0x270] sm:$0xf]  ;;  %v14434_v56 = vld [vmem:[%s20781_s7 + $0x274] sm:$0xf0]  ;;  %v14432_v34 = vld [vmem:[%s20781_s7 + $0x264] sm:$0xf0] }
 0x482   : > { %v4631_v32 = vadd.f32 %v4630_v21, %v4590_v4  ;;  %5066 = vmatmul.bf16.gmra.mxu0 %v12046_v45  ;;  %12196 = vmatmul.msk.bf16.gmra.mxu1 %vm2265_vm4, %v12050_v26  ;;  %v14460_v28 = vld [vmem:[#allocation3 + $0x54] sm:$0xf0] }
 0x483   : > { %5148 = vmatmul.bf16.gmra.mxu2 %v12046_v45  ;;  %12204 = vmatmul.msk.bf16.gmra.mxu3 %vm2265_vm4, %v12050_v26 }
 0x484   : > { %v17999_v40 = vadd.f32 %v4631_v32, %v17527_v50  ;;  %5519 = vmatpush.bf16.msrb.mxu2 %v12314_v25  ;;  %5563 = vmatpush.bf16.msrb.mxu3 %v12354_v44  ;;  %v12302_v25 = vor.u32 %v14434_v56, %v12301_v22 }
 0x486   : > { %v4671_v63 = vpop.f32.mrf.mxu2  ;;  %v4712_v2 = vpop.f32.mrf.mxu3  ;;  %5438 = vmatpush.bf16.msrb.mxu0 %v12302_v25  ;;  %v14429_v25 = vld [vmem:[%s20781_s7 + $0x254] sm:$0xf] }
 0x487   : > { %v4672_v52 = vadd.f32 %v4671_v63, %v17785_v49  ;;  %v4591_v58 = vpop.f32.mrf.mxu0  ;;  %v4632_v54 = vpop.f32.mrf.mxu1  ;;  %v14446_v63 = vld [vmem:[%s20781_s7 + $0x2d4] sm:$0xf0] }
 0x489   : > { %v4713_v39 = vadd.f32 %v4712_v2, %v4672_v52  ;;  %v14458_v2 = vld [vmem:[#allocation3 + $0x44] sm:$0xf0] }
 0x48a   : > { %v12062_v19 = vor.u32 %v14458_v2, %v12061_v51 }
 0x48b   : > { %v18009_v50 = vadd.f32 %v4713_v39, %v17537_v24 }
 0x48e   : > { %v4673_v16 = vpop.f32.mrf.mxu2  ;;  %v4714_v49 = vpop.f32.mrf.mxu3 }
 0x48f   : > { %v4593_v30 = vpop.f32.mrf.mxu0  ;;  %v4634_v41 = vpop.f32.mrf.mxu1 }
 0x490   : > { %v4594_v24 = vadd.f32 %v4593_v30, %v17793_v60  ;;  %v12303_v60 = vld [vmem:[%s20781_s7 + $0x278] sm:$0xf0] }
 0x491   : > { %v12306_v7 = vor.u32 %v14433_v36, %v12303_v60  ;;  %v12293_v60 = vld [vmem:[%s20781_s7 + $0x260] sm:$0xf] }
 0x492   : > { %v4635_v13 = vadd.f32 %v4634_v41, %v4594_v24  ;;  %5070 = vmatmul.bf16.gmra.mxu0 %v12054_v0  ;;  %12197 = vmatmul.msk.bf16.gmra.mxu1 %vm2265_vm4, %v12058_v37  ;;  %v14431_v41 = vld [vmem:[%s20781_s7 + $0x264] sm:$0xf] }
 0x493   : > { %5152 = vmatmul.bf16.gmra.mxu2 %v12054_v0  ;;  %12205 = vmatmul.msk.bf16.gmra.mxu3 %vm2265_vm4, %v12058_v37 }
 0x494   : > { %v18021_v11 = vadd.f32 %v4635_v13, %v17553_v3  ;;  %5520 = vmatpush.bf16.msrb.mxu2 %v12306_v7  ;;  %v12294_v7 = vor.u32 %v14432_v34, %v12293_v60 }
 0x496   : > { %v4675_v21 = vpop.f32.mrf.mxu2  ;;  %v4716_v3 = vpop.f32.mrf.mxu3  ;;  %5439 = vmatpush.bf16.msrb.mxu0 %v12294_v7 }
 0x497   : > { %v4676_v38 = vadd.f32 %v4675_v21, %v17813_v27  ;;  %v4595_v4 = vpop.f32.mrf.mxu0  ;;  %v4636_v45 = vpop.f32.mrf.mxu1  ;;  %v12349_v27 = vld [vmem:[%s20781_s7 + $0x2d0] sm:$0xf]  ;;  %v12071_v21 = vld [vmem:[#allocation3 + $0x58] sm:$0xf0] }
 0x498   : > { %v12350_v52 = vor.u32 %v14446_v63, %v12349_v27  ;;  %v12069_v4 = vld [vmem:[#allocation3 + $0x50] sm:$0xf]  ;;  %v14459_v45 = vld [vmem:[#allocation3 + $0x54] sm:$0xf]  ;;  %v14443_v63 = vld [vmem:[%s20781_s7 + $0x2c4] sm:$0xf] }
 0x499   : > { %v4717_v26 = vadd.f32 %v4716_v3, %v4676_v38  ;;  %v12074_v22 = vor.u32 %v14459_v45, %v12071_v21  ;;  %v14427_v21 = vld [vmem:[%s20781_s7 + $0x244] sm:$0xf] }
 0x49a   : > { %5481 = vmatpush.bf16.msrb.mxu1 %v12350_v52 }
 0x49b   : > { %v18037_v32 = vadd.f32 %v4717_v26, %v17569_v47  ;;  %v12063_v47 = vld [vmem:[#allocation3 + $0x48] sm:$0xf0]  ;;  %v12070_v26 = vor.u32 %v14460_v28, %v12069_v4 }
 0x49c   : > { %v12066_v16 = vor.u32 %v14457_v23, %v12063_v47  ;;  %v12343_v47 = vld [vmem:[%s20781_s7 + $0x2c8] sm:$0xf0] }
 0x49e   : > { %v4677_v58 = vpop.f32.mrf.mxu2  ;;  %v4718_v54 = vpop.f32.mrf.mxu3 }
 0x49f   : > { %v4597_v39 = vpop.f32.mrf.mxu0  ;;  %v4638_v48 = vpop.f32.mrf.mxu1  ;;  %v12346_v58 = vor.u32 %v14443_v63, %v12343_v47 }
 0x4a0   : > { %v4598_v61 = vadd.f32 %v4597_v39, %v17827_v5  ;;  %v12295_v5 = vld [vmem:[%s20781_s7 + $0x268] sm:$0xf0] }
 0x4a1   : > { %v12298_v59 = vor.u32 %v14431_v41, %v12295_v5  ;;  %5564 = vmatpush.bf16.msrb.mxu3 %v12346_v58  ;;  %v14462_v41 = vld [vmem:[#allocation3 + $0x64] sm:$0xf0] }
 0x4a2   : > { %v4639_v49 = vadd.f32 %v4638_v48, %v4598_v61  ;;  %5074 = vmatmul.bf16.gmra.mxu0 %v12062_v19  ;;  %12198 = vmatmul.msk.bf16.gmra.mxu1 %vm2265_vm4, %v12066_v16  ;;  %v12285_v61 = vld [vmem:[%s20781_s7 + $0x250] sm:$0xf] }
 0x4a3   : > { %5156 = vmatmul.bf16.gmra.mxu2 %v12062_v19  ;;  %12206 = vmatmul.msk.bf16.gmra.mxu3 %vm2265_vm4, %v12066_v16  ;;  %v14430_v19 = vld [vmem:[%s20781_s7 + $0x254] sm:$0xf0] }
 0x4a4   : > { %v18055_v30 = vadd.f32 %v4639_v49, %v17591_v17  ;;  %5521 = vmatpush.bf16.msrb.mxu2 %v12298_v59  ;;  %v12286_v16 = vor.u32 %v14430_v19, %v12285_v61  ;;  %v14444_v49 = vld [vmem:[%s20781_s7 + $0x2c4] sm:$0xf0] }
 0x4a6   : > { %v4679_v57 = vpop.f32.mrf.mxu2  ;;  %v4720_v24 = vpop.f32.mrf.mxu3  ;;  %5440 = vmatpush.bf16.msrb.mxu0 %v12286_v16 }
 0x4a7   : > { %v4680_v0 = vadd.f32 %v4679_v57, %v17841_v12  ;;  %v4599_v37 = vpop.f32.mrf.mxu0  ;;  %v4640_v13 = vpop.f32.mrf.mxu1 }
 0x4a8   : > { %v12077_v37 = vld [vmem:[#allocation3 + $0x60] sm:$0xf]  ;;  %v14461_v13 = vld [vmem:[#allocation3 + $0x64] sm:$0xf] }
 0x4a9   : > { %v4721_v36 = vadd.f32 %v4720_v24, %v4680_v0  ;;  %v12078_v60 = vor.u32 %v14462_v41, %v12077_v37 }
 0x4ab   : > { %v18065_v17 = vadd.f32 %v4721_v36, %v17601_v53 }
 0x4ae   : > { %v4681_v3 = vpop.f32.mrf.mxu2  ;;  %v4722_v12 = vpop.f32.mrf.mxu3 }
 0x4af   : > { %v4601_v44 = vpop.f32.mrf.mxu0  ;;  %v4642_v38 = vpop.f32.mrf.mxu1 }
 0x4b0   : > { %v4602_v53 = vadd.f32 %v4601_v44, %v17849_v1  ;;  %v12287_v1 = vld [vmem:[%s20781_s7 + $0x258] sm:$0xf0] }
 0x4b1   : > { %v12290_v2 = vor.u32 %v14429_v25, %v12287_v1  ;;  %v14464_v25 = vld [vmem:[#allocation3 + $0x74] sm:$0xf0]  ;;  %v12087_v1 = vld [vmem:[#allocation3 + $0x78] sm:$0xf0] }
 0x4b2   : > { %v4643_v56 = vadd.f32 %v4642_v38, %v4602_v53  ;;  %5078 = vmatmul.bf16.gmra.mxu0 %v12070_v26  ;;  %12199 = vmatmul.msk.bf16.gmra.mxu1 %vm2265_vm4, %v12074_v22 }
 0x4b3   : > { %5160 = vmatmul.bf16.gmra.mxu2 %v12070_v26  ;;  %12207 = vmatmul.msk.bf16.gmra.mxu3 %vm2265_vm4, %v12074_v22  ;;  %v12277_v26 = vld [vmem:[%s20781_s7 + $0x240] sm:$0xf]  ;;  %v14428_v22 = vld [vmem:[%s20781_s7 + $0x244] sm:$0xf0] }
 0x4b4   : > { %v18077_v27 = vadd.f32 %v4643_v56, %v17617_v33  ;;  %5522 = vmatpush.bf16.msrb.mxu2 %v12290_v2  ;;  %v12278_v56 = vor.u32 %v14428_v22, %v12277_v26  ;;  %v12543_v26 = vld [vmem:[%s20782_s8 + $0x368] sm:$0xf0] }
 0x4b6   : > { %v4683_v52 = vpop.f32.mrf.mxu2  ;;  %v4724_v33 = vpop.f32.mrf.mxu3  ;;  %5441 = vmatpush.bf16.msrb.mxu0 %v12278_v56 }
 0x4b7   : > { %v4684_v54 = vadd.f32 %v4683_v52, %v17869_v6  ;;  %v4603_v39 = vpop.f32.mrf.mxu0  ;;  %v4644_v48 = vpop.f32.mrf.mxu1  ;;  %v12341_v6 = vld [vmem:[%s20781_s7 + $0x2c0] sm:$0xf]  ;;  %v12085_v52 = vld [vmem:[#allocation3 + $0x70] sm:$0xf] }
 0x4b8   : > { %v12342_v5 = vor.u32 %v14444_v49, %v12341_v6  ;;  %v12086_v58 = vor.u32 %v14464_v25, %v12085_v52  ;;  %v14557_v48 = vld [vmem:[%s20782_s8 + $0x374] sm:$0xf]  ;;  %v12583_v6 = vld [vmem:[%s20782_s8 + $0x3b8] sm:$0xf0] }
 0x4b9   : > { %v4725_v51 = vadd.f32 %v4724_v33, %v4684_v54  ;;  %v14463_v33 = vld [vmem:[#allocation3 + $0x74] sm:$0xf] }
 0x4ba   : > { %5482 = vmatpush.bf16.msrb.mxu1 %v12342_v5  ;;  %v12090_v54 = vor.u32 %v14463_v33, %v12087_v1 }
 0x4bb   : > { %v18093_v23 = vadd.f32 %v4725_v51, %v17633_v29  ;;  %v12079_v29 = vld [vmem:[#allocation3 + $0x68] sm:$0xf0]  ;;  %v12551_v51 = vld [vmem:[%s20782_s8 + $0x378] sm:$0xf0] }
 0x4bc   : > { %v12082_v34 = vor.u32 %v14461_v13, %v12079_v29  ;;  %v12554_v19 = vor.u32 %v14557_v48, %v12551_v51  ;;  %v12213_v51 = vld [vmem:[#allocation2 + $0x10] sm:$0xf] }
 0x4be   : > { %v4685_v59 = vpop.f32.mrf.mxu2  ;;  %v4726_v57 = vpop.f32.mrf.mxu3 }
 0x4bf   : > { %v4605_v24 = vpop.f32.mrf.mxu0  ;;  %v4646_v0 = vpop.f32.mrf.mxu1  ;;  %v12549_v57 = vld [vmem:[%s20782_s8 + $0x370] sm:$0xf] }
 0x4c0   : > { %v4606_v36 = vadd.f32 %v4605_v24, %v17883_v9  ;;  %v12279_v9 = vld [vmem:[%s20781_s7 + $0x248] sm:$0xf0]  ;;  %v12581_v24 = vld [vmem:[%s20782_s8 + $0x3b0] sm:$0xf] }
 0x4c1   : > { %v12282_v3 = vor.u32 %v14427_v21, %v12279_v9 }
 0x4c2   : > { %v4647_v7 = vadd.f32 %v4646_v0, %v4606_v36  ;;  %5082 = vmatmul.bf16.gmra.mxu0 %v12078_v60  ;;  %12200 = vmatmul.msk.bf16.gmra.mxu1 %vm2265_vm4, %v12082_v34 }
 0x4c3   : > { %5164 = vmatmul.bf16.gmra.mxu2 %v12078_v60  ;;  %12208 = vmatmul.msk.bf16.gmra.mxu3 %vm2265_vm4, %v12082_v34  ;;  %v14466_v60 = vld [vmem:[#allocation3 + $0x84] sm:$0xf0]  ;;  %v12095_v34 = vld [vmem:[#allocation3 + $0x88] sm:$0xf0] }
 0x4c4   : > { %v18111_v28 = vadd.f32 %v4647_v7, %v17655_v18  ;;  %5523 = vmatpush.bf16.msrb.mxu2 %v12282_v3 }
 0x4c6   : > { %v4687_v12 = vpop.f32.mrf.mxu2  ;;  %v4728_v44 = vpop.f32.mrf.mxu3 }
 0x4c7   : > { %v4688_v38 = vadd.f32 %v4687_v12, %v17897_v14  ;;  %v4607_v4 = vpop.f32.mrf.mxu0  ;;  %v4648_v45 = vpop.f32.mrf.mxu1  ;;  %v12093_v12 = vld [vmem:[#allocation3 + $0x80] sm:$0xf] }
 0x4c8   : > { %6137 = vmatpush.bf16.msra.mxu2 %v12554_v19  ;;  %v12094_v4 = vor.u32 %v14466_v60, %v12093_v12  ;;  %v12573_v60 = vld [vmem:[%s20782_s8 + $0x3a0] sm:$0xf] }
 0x4c9   : > { %v4729_v53 = vadd.f32 %v4728_v44, %v4688_v38  ;;  %v14465_v44 = vld [vmem:[#allocation3 + $0x84] sm:$0xf] }
 0x4ca   : > { %v12098_v45 = vor.u32 %v14465_v44, %v12095_v34 }
 0x4cb   : > { %v18121_v18 = vadd.f32 %v4729_v53, %v17665_v20 }
 0x4ce   : > { %v4689_v63 = vpop.f32.mrf.mxu2  ;;  %v4730_v14 = vpop.f32.mrf.mxu3 }
 0x4cf   : > { %v4609_v2 = vpop.f32.mrf.mxu0  ;;  %v4650_v47 = vpop.f32.mrf.mxu1 }
 0x4d0   : > { %v4610_v20 = vadd.f32 %v4609_v2, %v17905_v10  ;;  %v14565_v10 = vld [vmem:[%s20782_s8 + $0x3b4] sm:$0xf]  ;;  %v12541_v2 = vld [vmem:[%s20782_s8 + $0x360] sm:$0xf] }
 0x4d1   : > { %v12586_v16 = vor.u32 %v14565_v10, %v12583_v6  ;;  %v14411_v10 = vld [vmem:[#allocation2 + $0x14] sm:$0xf] }
 0x4d2   : > { %v4651_v39 = vadd.f32 %v4650_v47, %v4610_v20  ;;  %5086 = vmatmul.bf16.gmra.mxu0 %v12086_v58  ;;  %12201 = vmatmul.msk.bf16.gmra.mxu1 %vm2265_vm4, %v12090_v54  ;;  %v14556_v47 = vld [vmem:[%s20782_s8 + $0x364] sm:$0xf0]  ;;  %v14412_v20 = vld [vmem:[#allocation2 + $0x14] sm:$0xf0] }
 0x4d3   : > { %5168 = vmatmul.bf16.gmra.mxu2 %v12086_v58  ;;  %12209 = vmatmul.msk.bf16.gmra.mxu3 %vm2265_vm4, %v12090_v54  ;;  %v12542_v52 = vor.u32 %v14556_v47, %v12541_v2  ;;  %v12215_v58 = vld [vmem:[#allocation2 + $0x18] sm:$0xf0]  ;;  %v12214_v6 = vor.u32 %v14412_v20, %v12213_v51  ;;  %v14552_v20 = vld [vmem:[%s20782_s8 + $0x344] sm:$0xf0] }
 0x4d4   : > { %v18142_v61 = vadd.f32 %v4651_v39, %v17690_v43  ;;  %6182 = vmatpush.bf16.msra.mxu3 %v12586_v16  ;;  %v14558_v43 = vld [vmem:[%s20782_s8 + $0x374] sm:$0xf0]  ;;  %v12218_v16 = vor.u32 %v14411_v10, %v12215_v58 }
 0x4d5   : > { %v12550_v0 = vor.u32 %v14558_v43, %v12549_v57 }
 0x4d6   : > { %v4691_v49 = vpop.f32.mrf.mxu2  ;;  %v4732_v41 = vpop.f32.mrf.mxu3 }
 0x4d7   : > { %v4692_v29 = vadd.f32 %v4691_v49, %v17925_v31  ;;  %v4611_v5 = vpop.f32.mrf.mxu0  ;;  %v4652_v59 = vpop.f32.mrf.mxu1  ;;  %v14566_v31 = vld [vmem:[%s20782_s8 + $0x3b4] sm:$0xf0]  ;;  %6055 = vmatpush.bf16.msra.mxu0 %v12550_v0  ;;  %v12535_v49 = vld [vmem:[%s20782_s8 + $0x358] sm:$0xf0] }
 0x4d8   : > { %v12582_v13 = vor.u32 %v14566_v31, %v12581_v24  ;;  %v12575_v5 = vld [vmem:[%s20782_s8 + $0x3a8] sm:$0xf0] }
 0x4d9   : > { %v4733_v37 = vadd.f32 %v4732_v41, %v4692_v29  ;;  %v14563_v41 = vld [vmem:[%s20782_s8 + $0x3a4] sm:$0xf] }
 0x4da   : > { %6100 = vmatpush.bf16.msra.mxu1 %v12582_v13  ;;  %v12578_v59 = vor.u32 %v14563_v41, %v12575_v5  ;;  %v14554_v13 = vld [vmem:[%s20782_s8 + $0x354] sm:$0xf0]  ;;  %v12519_v5 = vld [vmem:[%s20782_s8 + $0x338] sm:$0xf0] }
 0x4db   : > { %v18161_v36 = vadd.f32 %v4733_v37, %v17709_v62  ;;  %v14555_v62 = vld [vmem:[%s20782_s8 + $0x364] sm:$0xf]  ;;  %6056 = vmatpush.bf16.msra.mxu0 %v12542_v52  ;;  %v12533_v37 = vld [vmem:[%s20782_s8 + $0x350] sm:$0xf] }
 0x4dc   : > { %6183 = vmatpush.bf16.msra.mxu3 %v12578_v59  ;;  %v12534_v34 = vor.u32 %v14554_v13, %v12533_v37  ;;  %v14561_v59 = vld [vmem:[%s20782_s8 + $0x394] sm:$0xf] }
 0x4de   : > { %v4693_v7 = vpop.f32.mrf.mxu2  ;;  %v4734_v21 = vpop.f32.mrf.mxu3 }
 0x4df   : > { %v4613_v9 = vpop.f32.mrf.mxu0  ;;  %v4654_v3 = vpop.f32.mrf.mxu1  ;;  %v14564_v7 = vld [vmem:[%s20782_s8 + $0x3a4] sm:$0xf0]  ;;  %6057 = vmatpush.bf16.msra.mxu0 %v12534_v34 }
 0x4e0   : > { %v4614_v38 = vadd.f32 %v4613_v9, %v17939_v15  ;;  %v12546_v15 = vor.u32 %v14555_v62, %v12543_v26  ;;  %v12574_v21 = vor.u32 %v14564_v7, %v12573_v60  ;;  %v14414_v9 = vld [vmem:[#allocation2 + $0x24] sm:$0xf0]  ;;  %v12517_v7 = vld [vmem:[%s20782_s8 + $0x330] sm:$0xf] }
 0x4e2   : > { %v4655_v53 = vadd.f32 %v4654_v3, %v4614_v38  ;;  %5090 = vmatmul.bf16.gmra.mxu0 %v12094_v4  ;;  %12202 = vmatmul.msk.bf16.gmra.mxu1 %vm2265_vm4, %v12098_v45  ;;  %v12223_v3 = vld [vmem:[#allocation2 + $0x28] sm:$0xf0] }
 0x4e3   : > { %5172 = vmatmul.bf16.gmra.mxu2 %v12094_v4  ;;  %12210 = vmatmul.msk.bf16.gmra.mxu3 %vm2265_vm4, %v12098_v45  ;;  %v12221_v45 = vld [vmem:[#allocation2 + $0x20] sm:$0xf] }
 0x4e4   : > { %v18173_v22 = vadd.f32 %v4655_v53, %v17725_v42  ;;  %6138 = vmatpush.bf16.msra.mxu2 %v12546_v15  ;;  %6101 = vmatpush.bf16.msra.mxu1 %v12574_v21  ;;  %v14413_v53 = vld [vmem:[#allocation2 + $0x24] sm:$0xf]  ;;  %v12222_v26 = vor.u32 %v14414_v9, %v12221_v45  ;;  %v14550_v21 = vld [vmem:[%s20782_s8 + $0x334] sm:$0xf0]  ;;  %v12565_v9 = vld [vmem:[%s20782_s8 + $0x390] sm:$0xf] }
 0x4e5   : > { %v12226_v15 = vor.u32 %v14413_v53, %v12223_v3  ;;  %v12518_v3 = vor.u32 %v14550_v21, %v12517_v7  ;;  %v12559_v21 = vld [vmem:[%s20782_s8 + $0x388] sm:$0xf0] }
 0x4e6   : > { %v4695_v56 = vpop.f32.mrf.mxu2  ;;  %v4736_v25 = vpop.f32.mrf.mxu3 }
 0x4e7   : > { %v4696_v1 = vadd.f32 %v4695_v56, %v17953_v35  ;;  %v4615_v63 = vpop.f32.mrf.mxu0  ;;  %v4656_v14 = vpop.f32.mrf.mxu1  ;;  %v14551_v56 = vld [vmem:[%s20782_s8 + $0x344] sm:$0xf] }
 0x4e9   : > { %v4737_v33 = vadd.f32 %v4736_v25, %v4696_v1  ;;  %v12527_v25 = vld [vmem:[%s20782_s8 + $0x348] sm:$0xf0] }
 0x4ea   : > { %v12530_v1 = vor.u32 %v14551_v56, %v12527_v25  ;;  %v12237_v56 = vld [vmem:[#allocation2 + $0x40] sm:$0xf]  ;;  %v14417_v25 = vld [vmem:[#allocation2 + $0x44] sm:$0xf] }
 0x4eb   : > { %v18183_v42 = vadd.f32 %v4737_v33, %v17735_v46  ;;  %v14553_v46 = vld [vmem:[%s20782_s8 + $0x354] sm:$0xf]  ;;  %v12525_v33 = vld [vmem:[%s20782_s8 + $0x340] sm:$0xf] }
 0x4ec   : > { %v12538_v29 = vor.u32 %v14553_v46, %v12535_v49  ;;  %v12526_v58 = vor.u32 %v14552_v20, %v12525_v33 }
 0x4ee   : > { %v4697_v54 = vpop.f32.mrf.mxu2  ;;  %v4738_v35 = vpop.f32.mrf.mxu3  ;;  %6139 = vmatpush.bf16.msra.mxu2 %v12538_v29  ;;  %6058 = vmatpush.bf16.msra.mxu0 %v12526_v58  ;;  %v14549_v29 = vld [vmem:[%s20782_s8 + $0x334] sm:$0xf] }
 0x4ef   : > { %v5063_v39 = vpop.f32.mrf.mxu0  ;;  %v5104_v48 = vpop.f32.mrf.mxu1  ;;  %v14416_v54 = vld [vmem:[#allocation2 + $0x34] sm:$0xf0]  ;;  %v12231_v35 = vld [vmem:[#allocation2 + $0x38] sm:$0xf0] }
 0x4f0   : > { %v18185_v19 = vadd.f32 %v5104_v48, %v5063_v39 }
 0x4f2   : > { %5442 = vmatmul.bf16.vlgmr.msrb.gmra.mxu0 %v12214_v6  ;;  %12371 = vmatmul.msk.bf16.vlgmr.msrb.gmra.mxu1 %vm2265_vm4, %v12218_v16 }
 0x4f3   : > { %5524 = vmatmul.bf16.vlgmr.msrb.gmra.mxu2 %v12214_v6  ;;  %12379 = vmatmul.msk.bf16.vlgmr.msrb.gmra.mxu3 %vm2265_vm4, %v12218_v16  ;;  %v12229_v6 = vld [vmem:[#allocation2 + $0x30] sm:$0xf]  ;;  %v14415_v16 = vld [vmem:[#allocation2 + $0x34] sm:$0xf] }
 0x4f4   : > { %6140 = vmatpush.bf16.msra.mxu2 %v12530_v1  ;;  %v12230_v49 = vor.u32 %v14416_v54, %v12229_v6  ;;  %v12234_v41 = vor.u32 %v14415_v16, %v12231_v35  ;;  %6059 = vmatpush.bf16.msra.mxu0 %v12518_v3  ;;  %v14420_v6 = vld [vmem:[#allocation2 + $0x54] sm:$0xf0]  ;;  %v12247_v16 = vld [vmem:[#allocation2 + $0x58] sm:$0xf0] }
 0x4f6   : > { %v5145_v57 = vpop.f32.mrf.mxu2  ;;  %v5186_v43 = vpop.f32.mrf.mxu3 }
 0x4f7   : > { %v18201_v24 = vadd.f32 %v5186_v43, %v5145_v57  ;;  %v5065_v0 = vpop.f32.mrf.mxu0  ;;  %v5106_v31 = vpop.f32.mrf.mxu1  ;;  %v12522_v57 = vor.u32 %v14549_v29, %v12519_v5  ;;  %v12567_v43 = vld [vmem:[%s20782_s8 + $0x398] sm:$0xf0] }
 0x4f8   : > { %v12570_v0 = vor.u32 %v14561_v59, %v12567_v43  ;;  %v12245_v59 = vld [vmem:[#allocation2 + $0x50] sm:$0xf] }
 0x4f9   : > { %6141 = vmatpush.bf16.msra.mxu2 %v12522_v57  ;;  %v14419_v57 = vld [vmem:[#allocation2 + $0x54] sm:$0xf] }
 0x4fa   : > { %6184 = vmatpush.bf16.msra.mxu3 %v12570_v0  ;;  %v12246_v0 = vor.u32 %v14420_v6, %v12245_v59  ;;  %v12495_v6 = vld [vmem:[%s20782_s8 + $0x308] sm:$0xf0] }
 0x4fe   : > { %v5147_v12 = vpop.f32.mrf.mxu2  ;;  %v5188_v44 = vpop.f32.mrf.mxu3 }
 0x4ff   : > { %v5067_v38 = vpop.f32.mrf.mxu0  ;;  %v5108_v4 = vpop.f32.mrf.mxu1  ;;  %v14562_v12 = vld [vmem:[%s20782_s8 + $0x394] sm:$0xf0] }
 0x500   : > { %v18215_v62 = vadd.f32 %v5108_v4, %v5067_v38  ;;  %v12566_v44 = vor.u32 %v14562_v12, %v12565_v9  ;;  %v14418_v38 = vld [vmem:[#allocation2 + $0x44] sm:$0xf0]  ;;  %v12239_v4 = vld [vmem:[#allocation2 + $0x48] sm:$0xf0] }
 0x502   : > { %5446 = vmatmul.bf16.gmra.mxu0 %v12222_v26  ;;  %12372 = vmatmul.msk.bf16.gmra.mxu1 %vm2265_vm4, %v12226_v15 }
 0x503   : > { %5528 = vmatmul.bf16.gmra.mxu2 %v12222_v26  ;;  %12380 = vmatmul.msk.bf16.gmra.mxu3 %vm2265_vm4, %v12226_v15 }
 0x504   : > { %6102 = vmatpush.bf16.msra.mxu1 %v12566_v44 }
 0x506   : > { %v5149_v63 = vpop.f32.mrf.mxu2  ;;  %v5190_v14 = vpop.f32.mrf.mxu3 }
 0x507   : > { %v18225_v2 = vadd.f32 %v5190_v14, %v5149_v63  ;;  %v5069_v47 = vpop.f32.mrf.mxu0  ;;  %v5110_v52 = vpop.f32.mrf.mxu1  ;;  %v12238_v63 = vor.u32 %v14418_v38, %v12237_v56  ;;  %v12242_v14 = vor.u32 %v14417_v25, %v12239_v4  ;;  %v14560_v56 = vld [vmem:[%s20782_s8 + $0x384] sm:$0xf0] }
 0x508   : > { %v14547_v47 = vld [vmem:[%s20782_s8 + $0x324] sm:$0xf]  ;;  %v12511_v52 = vld [vmem:[%s20782_s8 + $0x328] sm:$0xf0] }
 0x509   : > { %v12514_v33 = vor.u32 %v14547_v47, %v12511_v52 }
 0x50b   : > { %6142 = vmatpush.bf16.msra.mxu2 %v12514_v33 }
 0x50e   : > { %v5151_v39 = vpop.f32.mrf.mxu2  ;;  %v5192_v48 = vpop.f32.mrf.mxu3 }
 0x50f   : > { %v5071_v51 = vpop.f32.mrf.mxu0  ;;  %v5112_v10 = vpop.f32.mrf.mxu1  ;;  %v12509_v48 = vld [vmem:[%s20782_s8 + $0x320] sm:$0xf] }
 0x510   : > { %v18233_v46 = vadd.f32 %v5112_v10, %v5071_v51  ;;  %v14548_v51 = vld [vmem:[%s20782_s8 + $0x324] sm:$0xf0] }
 0x511   : > { %v12510_v10 = vor.u32 %v14548_v51, %v12509_v48 }
 0x512   : > { %5450 = vmatmul.bf16.gmra.mxu0 %v12230_v49  ;;  %12373 = vmatmul.msk.bf16.gmra.mxu1 %vm2265_vm4, %v12234_v41 }
 0x513   : > { %5532 = vmatmul.bf16.gmra.mxu2 %v12230_v49  ;;  %12381 = vmatmul.msk.bf16.gmra.mxu3 %vm2265_vm4, %v12234_v41 }
 0x514   : > { %6060 = vmatpush.bf16.msra.mxu0 %v12510_v10  ;;  %v14543_v10 = vld [vmem:[%s20782_s8 + $0x304] sm:$0xf] }
 0x516   : > { %v5153_v31 = vpop.f32.mrf.mxu2  ;;  %v5194_v37 = vpop.f32.mrf.mxu3 }
 0x517   : > { %v18249_v13 = vadd.f32 %v5194_v37, %v5153_v31  ;;  %v5073_v60 = vpop.f32.mrf.mxu0  ;;  %v5114_v34 = vpop.f32.mrf.mxu1  ;;  %v12250_v31 = vor.u32 %v14419_v57, %v12247_v16  ;;  %v14545_v37 = vld [vmem:[%s20782_s8 + $0x314] sm:$0xf]  ;;  %v12498_v16 = vor.u32 %v14543_v10, %v12495_v6  ;;  %v12493_v57 = vld [vmem:[%s20782_s8 + $0x300] sm:$0xf]  ;;  %v14528_v10 = vld [vmem:[%s20781_s7 + $0x3b4] sm:$0xf0] }
 0x518   : > { %v12503_v60 = vld [vmem:[%s20782_s8 + $0x318] sm:$0xf0]  ;;  %v14559_v34 = vld [vmem:[%s20782_s8 + $0x384] sm:$0xf]  ;;  %v14426_v6 = vld [vmem:[#allocation2 + $0x84] sm:$0xf0] }
 0x519   : > { %v12506_v7 = vor.u32 %v14545_v37, %v12503_v60  ;;  %v12562_v9 = vor.u32 %v14559_v34, %v12559_v21  ;;  %v14424_v37 = vld [vmem:[#allocation2 + $0x74] sm:$0xf0]  ;;  %v12263_v60 = vld [vmem:[#allocation2 + $0x78] sm:$0xf0] }
 0x51b   : > { %6143 = vmatpush.bf16.msra.mxu2 %v12506_v7  ;;  %6185 = vmatpush.bf16.msra.mxu3 %v12562_v9 }
 0x51e   : > { %v5155_v45 = vpop.f32.mrf.mxu2  ;;  %v5196_v53 = vpop.f32.mrf.mxu3 }
 0x51f   : > { %v5075_v26 = vpop.f32.mrf.mxu0  ;;  %v5116_v15 = vpop.f32.mrf.mxu1  ;;  %v12501_v45 = vld [vmem:[%s20782_s8 + $0x310] sm:$0xf]  ;;  %v14546_v53 = vld [vmem:[%s20782_s8 + $0x314] sm:$0xf0]  ;;  %6144 = vmatpush.bf16.msra.mxu2 %v12498_v16  ;;  %v12271_v16 = vld [vmem:[#allocation2 + $0x88] sm:$0xf0] }
 0x520   : > { %v18263_v1 = vadd.f32 %v5116_v15, %v5075_v26  ;;  %v12557_v26 = vld [vmem:[%s20782_s8 + $0x380] sm:$0xf]  ;;  %v12502_v15 = vor.u32 %v14546_v53, %v12501_v45  ;;  %v14519_v53 = vld [vmem:[%s20781_s7 + $0x374] sm:$0xf] }
 0x521   : > { %v12558_v25 = vor.u32 %v14560_v56, %v12557_v26  ;;  %v12719_v26 = vld [vmem:[%s20781_s7 + $0x378] sm:$0xf0] }
 0x522   : > { %5454 = vmatmul.bf16.gmra.mxu0 %v12238_v63  ;;  %12374 = vmatmul.msk.bf16.gmra.mxu1 %vm2265_vm4, %v12242_v14  ;;  %v12722_v56 = vor.u32 %v14519_v53, %v12719_v26  ;;  %v14517_v26 = vld [vmem:[%s20781_s7 + $0x364] sm:$0xf] }
 0x523   : > { %5536 = vmatmul.bf16.gmra.mxu2 %v12238_v63  ;;  %12382 = vmatmul.msk.bf16.gmra.mxu3 %vm2265_vm4, %v12242_v14  ;;  %v14422_v63 = vld [vmem:[#allocation2 + $0x64] sm:$0xf0]  ;;  %v12255_v14 = vld [vmem:[#allocation2 + $0x68] sm:$0xf0] }
 0x524   : > { %6061 = vmatpush.bf16.msra.mxu0 %v12502_v15  ;;  %6103 = vmatpush.bf16.msra.mxu1 %v12558_v25  ;;  %v14527_v15 = vld [vmem:[%s20781_s7 + $0x3b4] sm:$0xf]  ;;  %v12751_v25 = vld [vmem:[%s20781_s7 + $0x3b8] sm:$0xf0] }
 0x525   : > { %6658 = vmatpush.bf16.msrb.mxu2 %v12722_v56 }
 0x526   : > { %v5157_v20 = vpop.f32.mrf.mxu2  ;;  %v5198_v58 = vpop.f32.mrf.mxu3 }
 0x527   : > { %v18273_v54 = vadd.f32 %v5198_v58, %v5157_v20  ;;  %v5077_v35 = vpop.f32.mrf.mxu0  ;;  %v5118_v39 = vpop.f32.mrf.mxu1  ;;  %v12253_v58 = vld [vmem:[#allocation2 + $0x60] sm:$0xf] }
 0x528   : > { %v14421_v35 = vld [vmem:[#allocation2 + $0x64] sm:$0xf]  ;;  %v12254_v48 = vor.u32 %v14422_v63, %v12253_v58  ;;  %v12717_v58 = vld [vmem:[%s20781_s7 + $0x370] sm:$0xf] }
 0x529   : > { %v12258_v51 = vor.u32 %v14421_v35, %v12255_v14  ;;  %v14520_v35 = vld [vmem:[%s20781_s7 + $0x374] sm:$0xf0] }
 0x52e   : > { %v5159_v49 = vpop.f32.mrf.mxu2  ;;  %v5200_v41 = vpop.f32.mrf.mxu3 }
 0x52f   : > { %v5079_v29 = vpop.f32.mrf.mxu0  ;;  %v5120_v5 = vpop.f32.mrf.mxu1 }
 0x530   : > { %v18281_v43 = vadd.f32 %v5120_v5, %v5079_v29 }
 0x532   : > { %5458 = vmatmul.bf16.gmra.mxu0 %v12246_v0  ;;  %12375 = vmatmul.msk.bf16.gmra.mxu1 %vm2265_vm4, %v12250_v31 }
 0x533   : > { %5540 = vmatmul.bf16.gmra.mxu2 %v12246_v0  ;;  %12383 = vmatmul.msk.bf16.gmra.mxu3 %vm2265_vm4, %v12250_v31  ;;  %v14544_v0 = vld [vmem:[%s20782_s8 + $0x304] sm:$0xf0] }
 0x534   : > { %v12494_v31 = vor.u32 %v14544_v0, %v12493_v57 }
 0x536   : > { %v5161_v3 = vpop.f32.mrf.mxu2  ;;  %v5202_v12 = vpop.f32.mrf.mxu3  ;;  %6062 = vmatpush.bf16.msra.mxu0 %v12494_v31  ;;  %v12269_v31 = vld [vmem:[#allocation2 + $0x80] sm:$0xf] }
 0x537   : > { %v18297_v44 = vadd.f32 %v5202_v12, %v5161_v3  ;;  %v5081_v38 = vpop.f32.mrf.mxu0  ;;  %v5122_v4 = vpop.f32.mrf.mxu1  ;;  %v12261_v3 = vld [vmem:[#allocation2 + $0x70] sm:$0xf]  ;;  %v14423_v12 = vld [vmem:[#allocation2 + $0x74] sm:$0xf] }
 0x538   : > { %v12262_v4 = vor.u32 %v14424_v37, %v12261_v3  ;;  %v12266_v45 = vor.u32 %v14423_v12, %v12263_v60  ;;  %v14425_v37 = vld [vmem:[#allocation2 + $0x84] sm:$0xf]  ;;  %v21226_v3 = vld [vmem:[#allocation63_spill] sm:$0xff] }
 0x539   : > { %v21227_v12 = vunpack.c.l.b16 %v21226_v3 }
 0x53e   : > { %v5163_v47 = vpop.f32.mrf.mxu2  ;;  %v5204_v52 = vpop.f32.mrf.mxu3 }
 0x53f   : > { %v5083_v33 = vpop.f32.mrf.mxu0  ;;  %v5124_v20 = vpop.f32.mrf.mxu1  ;;  %v12754_v47 = vor.u32 %v14527_v15, %v12751_v25  ;;  %v12711_v15 = vld [vmem:[%s20781_s7 + $0x368] sm:$0xf0] }
 0x540   : > { %v18311_v39 = vadd.f32 %v5124_v20, %v5083_v33  ;;  %v12714_v56 = vor.u32 %v14517_v26, %v12711_v15 }
 0x541   : > { %6703 = vmatpush.bf16.msrb.mxu3 %v12754_v47 }
 0x542   : > { %5462 = vmatmul.bf16.gmra.mxu0 %v12254_v48  ;;  %12376 = vmatmul.msk.bf16.gmra.mxu1 %vm2265_vm4, %v12258_v51 }
 0x543   : > { %5544 = vmatmul.bf16.gmra.mxu2 %v12254_v48  ;;  %12384 = vmatmul.msk.bf16.gmra.mxu3 %vm2265_vm4, %v12258_v51  ;;  %v12749_v48 = vld [vmem:[%s20781_s7 + $0x3b0] sm:$0xf]  ;;  %v12718_v51 = vor.u32 %v14520_v35, %v12717_v58  ;;  %v21229_v35 = vld [vmem:[#allocation66_spill] sm:$0xff] }
 0x544   : > { %6659 = vmatpush.bf16.msrb.mxu2 %v12714_v56  ;;  %v14525_v56 = vld [vmem:[%s20781_s7 + $0x3a4] sm:$0xf] }
 0x545   : > { %6576 = vmatpush.bf16.msrb.mxu0 %v12718_v51  ;;  %v21230_v51 = vld [vmem:[#allocation67_spill] sm:$0xff] }
 0x546   : > { %v5165_v49 = vpop.f32.mrf.mxu2  ;;  %v5206_v41 = vpop.f32.mrf.mxu3 }
 0x547   : > { %v18321_v29 = vadd.f32 %v5206_v41, %v5165_v49  ;;  %v5085_v5 = vpop.f32.mrf.mxu0  ;;  %v5126_v59 = vpop.f32.mrf.mxu1  ;;  %v12750_v49 = vor.u32 %v14528_v10, %v12749_v48  ;;  %v5775_v48 = vshll.u32 %v21229_v35, 16  ;;  %v5787_v10 = vshll.u32 %v21230_v51, 16 }
 0x548   : > { %v5656_v59 = vld [vmem:[#allocation3 + $0x10] sm:$0xff] }
 0x549   : > { %6621 = vmatpush.bf16.msrb.mxu1 %v12750_v49  ;;  %v12709_v49 = vld [vmem:[%s20781_s7 + $0x360] sm:$0xf] }
 0x54e   : > { %v5167_v34 = vpop.f32.mrf.mxu2  ;;  %v5208_v7 = vpop.f32.mrf.mxu3 }
 0x54f   : > { %v5087_v21 = vpop.f32.mrf.mxu0  ;;  %v5128_v9 = vpop.f32.mrf.mxu1  ;;  %v12270_v34 = vor.u32 %v14426_v6, %v12269_v31  ;;  %v12274_v7 = vor.u32 %v14425_v37, %v12271_v16  ;;  %v5789_v31 = vrot.slane %v5787_v10, 1 }
 0x550   : > { %v18329_v38 = vadd.f32 %v5128_v9, %v5087_v21  ;;  %v5715_v21 = vunpack.c.l.b16 %v5656_v59  ;;  %v5716_v9 = vunpack.c.h.b16 %v5656_v59 }
 0x552   : > { %5466 = vmatmul.bf16.gmra.mxu0 %v12262_v4  ;;  %12377 = vmatmul.msk.bf16.gmra.mxu1 %vm2265_vm4, %v12266_v45 }
 0x553   : > { %5548 = vmatmul.bf16.gmra.mxu2 %v12262_v4  ;;  %12385 = vmatmul.msk.bf16.gmra.mxu3 %vm2265_vm4, %v12266_v45  ;;  %v5749_v4 = vpack.c.b16 %v21227_v12, %v5715_v21  ;;  %v21228_v45 = vunpack.c.h.b16 %v21226_v3 }
 0x555   : > { %v5750_v53 = vpack.c.b16 %v21228_v45, %v5716_v9  ;;  %v5768_v59 = vshrl.u32 %v5749_v4, 16 }
 0x556   : > { %v5169_v63 = vpop.f32.mrf.mxu2  ;;  %v5210_v14 = vpop.f32.mrf.mxu3 }
 0x557   : > { %v18345_v52 = vadd.f32 %v5210_v14, %v5169_v63  ;;  %v5089_v33 = vpop.f32.mrf.mxu0  ;;  %v5130_v20 = vpop.f32.mrf.mxu1  ;;  %v5782_v58 = vshll.u32 %v5750_v53, 16 }
 0x558   : > { %v5770_v20 = vshll.u32 %v5749_v4, 16 }
 0x559   : > { %v5784_v16 = vrot.slane %v5782_v58, 1 }
 0x55a   : > { %v5772_v6 = vrot.slane %v5770_v20, 1 }
 0x55c   : > { %v5773_v9 = vor.u32 %v5772_v6, %v5768_v59  ;;  %v21231_v6 = vld [vmem:[#allocation72_spill] sm:$0xff] }
 0x55d   : > { %v12701_v59 = vld [vmem:[%s20781_s7 + $0x350] sm:$0xf] }
 0x55e   : > { %v5171_v41 = vpop.f32.mrf.mxu2  ;;  %v5212_v5 = vpop.f32.mrf.mxu3 }
 0x55f   : > { %v5091_v57 = vpop.f32.mrf.mxu0  ;;  %v5132_v0 = vpop.f32.mrf.mxu1  ;;  %v14518_v41 = vld [vmem:[%s20781_s7 + $0x364] sm:$0xf0] }
 0x560   : > { %v18359_v60 = vadd.f32 %v5132_v0, %v5091_v57  ;;  %v12710_v5 = vor.u32 %v14518_v41, %v12709_v49  ;;  %v5777_v57 = vrot.slane %v5775_v48, 1  ;;  %v5780_v0 = vshrl.u32 %v5750_v53, 16  ;;  %v14515_v53 = vld [vmem:[%s20781_s7 + $0x354] sm:$0xf]  ;;  %v21232_v49 = vld [vmem:[#allocation73_spill] sm:$0xff] }
 0x561   : > { %v5803_v41 = vshll.u32 %v21232_v49, 16 }
 0x562   : > { %5470 = vmatmul.bf16.gmra.mxu0 %v12270_v34  ;;  %12378 = vmatmul.msk.bf16.gmra.mxu1 %vm2265_vm4, %v12274_v7  ;;  %v5785_v3 = vor.u32 %v5784_v16, %v5780_v0  ;;  %v5778_v45 = vsel %vm2987_vm5, %v5773_v9, %v5777_v57  ;;  %v5795_v16 = vshll.u32 %v21231_v6, 16  ;;  %v12741_v0 = vld [vmem:[%s20781_s7 + $0x3a0] sm:$0xf] }
 0x563   : > { %5552 = vmatmul.bf16.gmra.mxu2 %v12270_v34  ;;  %12386 = vmatmul.msk.bf16.gmra.mxu3 %vm2265_vm4, %v12274_v7  ;;  %v5805_v9 = vrot.slane %v5803_v41, 1 }
 0x564   : > { %6577 = vmatpush.bf16.msrb.mxu0 %v12710_v5  ;;  %v5790_v26 = vsel %vm2987_vm5, %v5785_v3, %v5789_v31 }
 0x566   : > { %v5173_v25 = vpop.f32.mrf.mxu2  ;;  %v5214_v63 = vpop.f32.mrf.mxu3 }
 0x567   : > { %v18373_v14 = vadd.f32 %v5214_v63, %v5173_v25  ;;  %v5093_v47 = vpop.f32.mrf.mxu0  ;;  %v5134_v33 = vpop.f32.mrf.mxu1  ;;  %v12743_v63 = vld [vmem:[%s20781_s7 + $0x3a8] sm:$0xf0] }
 0x568   : > { %v12746_v33 = vor.u32 %v14525_v56, %v12743_v63 }
 0x56a   : > { %6704 = vmatpush.bf16.msrb.mxu3 %v12746_v33 }
 0x56e   : > { %v5175_v37 = vpop.f32.mrf.mxu2  ;;  %v5216_v34 = vpop.f32.mrf.mxu3 }
 0x56f   : > { %v5443_v7 = vpop.f32.mrf.mxu0  ;;  %v5484_v21 = vpop.f32.mrf.mxu1  ;;  %v5791_v37 = vshrl.u32 %v21229_v35, 16 }
 0x570   : > { %v5444_v12 = vadd.f32 %v5443_v7, %v18185_v19  ;;  %v12703_v19 = vld [vmem:[%s20781_s7 + $0x358] sm:$0xf0]  ;;  %v5797_v7 = vrot.slane %v5795_v16, 1  ;;  %v21234_v16 = vld [vmem:[#allocation79_spill] sm:$0xff] }
 0x571   : > { %v12706_v25 = vor.u32 %v14515_v53, %v12703_v19  ;;  %v5793_v53 = vor.u32 %v5791_v37, %v5777_v57  ;;  %v14513_v57 = vld [vmem:[%s20781_s7 + $0x344] sm:$0xf]  ;;  %v5819_v41 = vshll.u32 %v21234_v16, 16  ;;  %v5807_v37 = vshrl.u32 %v21231_v6, 16 }
 0x572   : > { %v5485_v15 = vadd.f32 %v5484_v21, %v5444_v12  ;;  %6063 = vmatmul.bf16.vlgmr.msra.gmra.mxu0 %v5778_v45  ;;  %12587 = vmatmul.msk.bf16.vlgmr.msra.gmra.mxu1 %vm2265_vm4, %v5790_v26  ;;  %v5799_v21 = vshrl.u32 %v21230_v51, 16 }
 0x573   : > { %6145 = vmatmul.bf16.vlgmr.msra.gmra.mxu2 %v5778_v45  ;;  %12595 = vmatmul.msk.bf16.vlgmr.msra.gmra.mxu3 %vm2265_vm4, %v5790_v26  ;;  %v5798_v56 = vsel %vm2987_vm5, %v5793_v53, %v5797_v7 }
 0x574   : > { %v18389_v4 = vadd.f32 %v5485_v15, %v17965_v55  ;;  %6660 = vmatpush.bf16.msrb.mxu2 %v12706_v25  ;;  %v5801_v19 = vor.u32 %v5799_v21, %v5789_v31  ;;  %v5821_v21 = vrot.slane %v5819_v41, 1  ;;  %v12685_v41 = vld [vmem:[%s20781_s7 + $0x330] sm:$0xf] }
 0x576   : > { %v5525_v47 = vpop.f32.mrf.mxu2  ;;  %v5566_v55 = vpop.f32.mrf.mxu3  ;;  %v5806_v25 = vsel %vm2987_vm5, %v5801_v19, %v5805_v9 }
 0x577   : > { %v5526_v20 = vadd.f32 %v5525_v47, %v18201_v24  ;;  %v5445_v58 = vpop.f32.mrf.mxu0  ;;  %v5486_v48 = vpop.f32.mrf.mxu1  ;;  %v14516_v24 = vld [vmem:[%s20781_s7 + $0x354] sm:$0xf0] }
 0x578   : > { %v12702_v34 = vor.u32 %v14516_v24, %v12701_v59  ;;  %v12693_v24 = vld [vmem:[%s20781_s7 + $0x340] sm:$0xf] }
 0x579   : > { %v5567_v10 = vadd.f32 %v5566_v55, %v5526_v20 }
 0x57a   : > { %6578 = vmatpush.bf16.msrb.mxu0 %v12702_v34 }
 0x57b   : > { %v18407_v5 = vadd.f32 %v5567_v10, %v17981_v8  ;;  %v14526_v8 = vld [vmem:[%s20781_s7 + $0x3a4] sm:$0xf0]  ;;  %v21233_v10 = vld [vmem:[#allocation78_spill] sm:$0xff] }
 0x57c   : > { %v12742_v3 = vor.u32 %v14526_v8, %v12741_v0  ;;  %v14514_v0 = vld [vmem:[%s20781_s7 + $0x344] sm:$0xf0]  ;;  %v5815_v8 = vshrl.u32 %v21232_v49, 16  ;;  %v14511_v49 = vld [vmem:[%s20781_s7 + $0x334] sm:$0xf] }
 0x57e   : > { %v5527_v12 = vpop.f32.mrf.mxu2  ;;  %v5568_v45 = vpop.f32.mrf.mxu3  ;;  %6622 = vmatpush.bf16.msrb.mxu1 %v12742_v3 }
 0x57f   : > { %v5447_v26 = vpop.f32.mrf.mxu0  ;;  %v5488_v15 = vpop.f32.mrf.mxu1 }
 0x580   : > { %v5448_v35 = vadd.f32 %v5447_v26, %v18215_v62  ;;  %v12695_v62 = vld [vmem:[%s20781_s7 + $0x348] sm:$0xf0]  ;;  %v5809_v26 = vor.u32 %v5807_v37, %v5797_v7  ;;  %v14523_v7 = vld [vmem:[%s20781_s7 + $0x394] sm:$0xf] }
 0x581   : > { %v12698_v31 = vor.u32 %v14513_v57, %v12695_v62 }
 0x582   : > { %v5489_v63 = vadd.f32 %v5488_v15, %v5448_v35  ;;  %6067 = vmatmul.bf16.gmra.mxu0 %v5798_v56  ;;  %12588 = vmatmul.msk.bf16.gmra.mxu1 %vm2265_vm4, %v5806_v25  ;;  %v5817_v15 = vor.u32 %v5815_v8, %v5805_v9  ;;  %v5831_v8 = vshrl.u32 %v21234_v16, 16 }
 0x583   : > { %6149 = vmatmul.bf16.gmra.mxu2 %v5798_v56  ;;  %12596 = vmatmul.msk.bf16.gmra.mxu3 %vm2265_vm4, %v5806_v25  ;;  %v12735_v25 = vld [vmem:[%s20781_s7 + $0x398] sm:$0xf0] }
 0x584   : > { %v18429_v51 = vadd.f32 %v5489_v63, %v17999_v40  ;;  %6661 = vmatpush.bf16.msrb.mxu2 %v12698_v31  ;;  %v5811_v40 = vshll.u32 %v21233_v10, 16  ;;  %v5822_v35 = vsel %vm2987_vm5, %v5817_v15, %v5821_v21  ;;  %v12738_v57 = vor.u32 %v14523_v7, %v12735_v25 }
 0x586   : > { %v5529_v47 = vpop.f32.mrf.mxu2  ;;  %v5570_v55 = vpop.f32.mrf.mxu3  ;;  %v5813_v34 = vrot.slane %v5811_v40, 1  ;;  %6705 = vmatpush.bf16.msrb.mxu3 %v12738_v57  ;;  %v21237_v57 = vld [vmem:[#allocation90_spill] sm:$0xff] }
 0x587   : > { %v5530_v33 = vadd.f32 %v5529_v47, %v18225_v2  ;;  %v5449_v20 = vpop.f32.mrf.mxu0  ;;  %v5490_v58 = vpop.f32.mrf.mxu1  ;;  %v12694_v2 = vor.u32 %v14514_v0, %v12693_v24  ;;  %v12733_v24 = vld [vmem:[%s20781_s7 + $0x390] sm:$0xf]  ;;  %v5823_v0 = vshrl.u32 %v21233_v10, 16 }
 0x588   : > { %v5814_v19 = vsel %vm2987_vm5, %v5809_v26, %v5813_v34  ;;  %v21236_v58 = vld [vmem:[#allocation85_spill] sm:$0xff] }
 0x589   : > { %v5571_v48 = vadd.f32 %v5570_v55, %v5530_v33  ;;  %6579 = vmatpush.bf16.msrb.mxu0 %v12694_v2  ;;  %v21235_v33 = vld [vmem:[#allocation84_spill] sm:$0xff] }
 0x58a   : > { %v5827_v20 = vshll.u32 %v21235_v33, 16 }
 0x58b   : > { %v18441_v59 = vadd.f32 %v5571_v48, %v18009_v50  ;;  %v5835_v48 = vshll.u32 %v21236_v58, 16 }
 0x58c   : > { %v5829_v37 = vrot.slane %v5827_v20, 1  ;;  %v14510_v20 = vld [vmem:[%s20781_s7 + $0x324] sm:$0xf0] }
 0x58e   : > { %v5531_v3 = vpop.f32.mrf.mxu2  ;;  %v5572_v12 = vpop.f32.mrf.mxu3 }
 0x58f   : > { %v5451_v50 = vpop.f32.mrf.mxu0  ;;  %v5492_v45 = vpop.f32.mrf.mxu1  ;;  %v5837_v3 = vrot.slane %v5835_v48, 1  ;;  %v5839_v48 = vshrl.u32 %v21235_v33, 16 }
 0x590   : > { %v5452_v53 = vadd.f32 %v5451_v50, %v18233_v46  ;;  %v12687_v46 = vld [vmem:[%s20781_s7 + $0x338] sm:$0xf0] }
 0x591   : > { %v12690_v9 = vor.u32 %v14511_v49, %v12687_v46 }
 0x592   : > { %v5493_v56 = vadd.f32 %v5492_v45, %v5452_v53  ;;  %6071 = vmatmul.bf16.gmra.mxu0 %v5814_v19  ;;  %12589 = vmatmul.msk.bf16.gmra.mxu1 %vm2265_vm4, %v5822_v35  ;;  %v5825_v53 = vor.u32 %v5823_v0, %v5813_v34  ;;  %v14509_v34 = vld [vmem:[%s20781_s7 + $0x324] sm:$0xf] }
 0x593   : > { %6153 = vmatmul.bf16.gmra.mxu2 %v5814_v19  ;;  %12597 = vmatmul.msk.bf16.gmra.mxu3 %vm2265_vm4, %v5822_v35  ;;  %v5833_v19 = vor.u32 %v5831_v8, %v5821_v21  ;;  %v5841_v8 = vor.u32 %v5839_v48, %v5829_v37 }
 0x594   : > { %v18457_v6 = vadd.f32 %v5493_v56, %v18021_v11  ;;  %6662 = vmatpush.bf16.msrb.mxu2 %v12690_v9  ;;  %v5830_v35 = vsel %vm2987_vm5, %v5825_v53, %v5829_v37  ;;  %v14521_v37 = vld [vmem:[%s20781_s7 + $0x384] sm:$0xf]  ;;  %v12727_v53 = vld [vmem:[%s20781_s7 + $0x388] sm:$0xf0] }
 0x595   : > { %v5838_v56 = vsel %vm2987_vm5, %v5833_v19, %v5837_v3 }
 0x596   : > { %v5533_v63 = vpop.f32.mrf.mxu2  ;;  %v5574_v11 = vpop.f32.mrf.mxu3 }
 0x597   : > { %v5534_v62 = vadd.f32 %v5533_v63, %v18249_v13  ;;  %v5453_v31 = vpop.f32.mrf.mxu0  ;;  %v5494_v47 = vpop.f32.mrf.mxu1  ;;  %v14512_v13 = vld [vmem:[%s20781_s7 + $0x334] sm:$0xf0] }
 0x598   : > { %v12686_v2 = vor.u32 %v14512_v13, %v12685_v41  ;;  %v5847_v13 = vshrl.u32 %v21236_v58, 16  ;;  %v14507_v58 = vld [vmem:[%s20781_s7 + $0x314] sm:$0xf] }
 0x599   : > { %v5575_v55 = vadd.f32 %v5574_v11, %v5534_v62  ;;  %v21238_v62 = vld [vmem:[#allocation91_spill] sm:$0xff] }
 0x59a   : > { %6580 = vmatpush.bf16.msrb.mxu0 %v12686_v2  ;;  %v5851_v31 = vshll.u32 %v21238_v62, 16 }
 0x59b   : > { %v18475_v40 = vadd.f32 %v5575_v55, %v18037_v32  ;;  %v14524_v32 = vld [vmem:[%s20781_s7 + $0x394] sm:$0xf0]  ;;  %v12677_v55 = vld [vmem:[%s20781_s7 + $0x320] sm:$0xf] }
 0x59c   : > { %v12734_v12 = vor.u32 %v14524_v32, %v12733_v24  ;;  %v5853_v24 = vrot.slane %v5851_v31, 1 }
 0x59e   : > { %v5535_v50 = vpop.f32.mrf.mxu2  ;;  %v5576_v45 = vpop.f32.mrf.mxu3  ;;  %6623 = vmatpush.bf16.msrb.mxu1 %v12734_v12  ;;  %v5849_v12 = vor.u32 %v5847_v13, %v5837_v3 }
 0x59f   : > { %v5455_v26 = vpop.f32.mrf.mxu0  ;;  %v5496_v15 = vpop.f32.mrf.mxu1 }
 0x5a0   : > { %v5456_v10 = vadd.f32 %v5455_v26, %v18263_v1  ;;  %v12679_v1 = vld [vmem:[%s20781_s7 + $0x328] sm:$0xf0]  ;;  %v5854_v26 = vsel %vm2987_vm5, %v5849_v12, %v5853_v24 }
 0x5a1   : > { %v12682_v21 = vor.u32 %v14509_v34, %v12679_v1  ;;  %v21239_v1 = vld [vmem:[#allocation96_spill] sm:$0xff] }
 0x5a2   : > { %v5497_v49 = vadd.f32 %v5496_v15, %v5456_v10  ;;  %6075 = vmatmul.bf16.gmra.mxu0 %v5830_v35  ;;  %12590 = vmatmul.msk.bf16.gmra.mxu1 %vm2265_vm4, %v5838_v56  ;;  %v12730_v10 = vor.u32 %v14521_v37, %v12727_v53  ;;  %v21242_v53 = vld [vmem:[#allocation103_spill] sm:$0xff] }
 0x5a3   : > { %6157 = vmatmul.bf16.gmra.mxu2 %v5830_v35  ;;  %12598 = vmatmul.msk.bf16.gmra.mxu3 %vm2265_vm4, %v5838_v56 }
 0x5a4   : > { %v18497_v16 = vadd.f32 %v5497_v49, %v18055_v30  ;;  %6663 = vmatpush.bf16.msrb.mxu2 %v12682_v21  ;;  %v5843_v30 = vshll.u32 %v21237_v57, 16  ;;  %6706 = vmatpush.bf16.msrb.mxu3 %v12730_v10  ;;  %v5859_v21 = vshll.u32 %v21239_v1, 16  ;;  %v12661_v10 = vld [vmem:[%s20781_s7 + $0x300] sm:$0xf] }
 0x5a6   : > { %v5537_v46 = vpop.f32.mrf.mxu2  ;;  %v5578_v7 = vpop.f32.mrf.mxu3  ;;  %v5845_v41 = vrot.slane %v5843_v30, 1  ;;  %v5861_v31 = vrot.slane %v5859_v21, 1 }
 0x5a7   : > { %v5538_v9 = vadd.f32 %v5537_v46, %v18273_v54  ;;  %v5457_v25 = vpop.f32.mrf.mxu0  ;;  %v5498_v63 = vpop.f32.mrf.mxu1  ;;  %v12678_v54 = vor.u32 %v14510_v20, %v12677_v55  ;;  %v21240_v46 = vld [vmem:[#allocation97_spill] sm:$0xff]  ;;  %v5863_v55 = vshrl.u32 %v21238_v62, 16 }
 0x5a8   : > { %v5846_v45 = vsel %vm2987_vm5, %v5841_v8, %v5845_v41  ;;  %v12669_v25 = vld [vmem:[%s20781_s7 + $0x310] sm:$0xf]  ;;  %v12725_v63 = vld [vmem:[%s20781_s7 + $0x380] sm:$0xf] }
 0x5a9   : > { %v5579_v11 = vadd.f32 %v5578_v7, %v5538_v9  ;;  %6581 = vmatpush.bf16.msrb.mxu0 %v12678_v54  ;;  %v5867_v7 = vshll.u32 %v21240_v46, 16 }
 0x5ab   : > { %v18509_v47 = vadd.f32 %v5579_v11, %v18065_v17  ;;  %v5855_v11 = vshrl.u32 %v21237_v57, 16  ;;  %v5869_v20 = vrot.slane %v5867_v7, 1 }
 0x5ae   : > { %v5539_v0 = vpop.f32.mrf.mxu2  ;;  %v5580_v2 = vpop.f32.mrf.mxu3 }
 0x5af   : > { %v5459_v17 = vpop.f32.mrf.mxu0  ;;  %v5500_v32 = vpop.f32.mrf.mxu1 }
 0x5b0   : > { %v5460_v50 = vadd.f32 %v5459_v17, %v18281_v43  ;;  %v12671_v43 = vld [vmem:[%s20781_s7 + $0x318] sm:$0xf0]  ;;  %v5857_v17 = vor.u32 %v5855_v11, %v5845_v41  ;;  %v14505_v41 = vld [vmem:[%s20781_s7 + $0x304] sm:$0xf] }
 0x5b1   : > { %v12674_v3 = vor.u32 %v14507_v58, %v12671_v43 }
 0x5b2   : > { %v5501_v15 = vadd.f32 %v5500_v32, %v5460_v50  ;;  %6079 = vmatmul.bf16.gmra.mxu0 %v5846_v45  ;;  %12591 = vmatmul.msk.bf16.gmra.mxu1 %vm2265_vm4, %v5854_v26  ;;  %v5865_v32 = vor.u32 %v5863_v55, %v5853_v24  ;;  %v5862_v8 = vsel %vm2987_vm5, %v5857_v17, %v5861_v31 }
 0x5b3   : > { %6161 = vmatmul.bf16.gmra.mxu2 %v5846_v45  ;;  %12599 = vmatmul.msk.bf16.gmra.mxu3 %vm2265_vm4, %v5854_v26 }
 0x5b4   : > { %v18525_v33 = vadd.f32 %v5501_v15, %v18077_v27  ;;  %6664 = vmatpush.bf16.msrb.mxu2 %v12674_v3  ;;  %v5870_v12 = vsel %vm2987_vm5, %v5865_v32, %v5869_v20  ;;  %v21241_v3 = vld [vmem:[#allocation100_spill] sm:$0xff] }
 0x5b6   : > { %v5541_v19 = vpop.f32.mrf.mxu2  ;;  %v5582_v27 = vpop.f32.mrf.mxu3 }
 0x5b7   : > { %v5542_v35 = vadd.f32 %v5541_v19, %v18297_v44  ;;  %v5461_v56 = vpop.f32.mrf.mxu0  ;;  %v5502_v49 = vpop.f32.mrf.mxu1  ;;  %v14508_v44 = vld [vmem:[%s20781_s7 + $0x314] sm:$0xf0]  ;;  %v5883_v19 = vshll.u32 %v21242_v53, 16 }
 0x5b8   : > { %v12670_v30 = vor.u32 %v14508_v44, %v12669_v25  ;;  %v5871_v56 = vshrl.u32 %v21239_v1, 16  ;;  %v14605_v1 = vld [vmem:[%s20782_s8 + $0x434] sm:$0xf] }
 0x5b9   : > { %v5583_v34 = vadd.f32 %v5582_v27, %v5542_v35  ;;  %v14506_v35 = vld [vmem:[%s20781_s7 + $0x304] sm:$0xf0]  ;;  %v5885_v21 = vrot.slane %v5883_v19, 1 }
 0x5ba   : > { %6582 = vmatpush.bf16.msrb.mxu0 %v12670_v30 }
 0x5bb   : > { %v18543_v9 = vadd.f32 %v5583_v34, %v18093_v23  ;;  %v14522_v23 = vld [vmem:[%s20781_s7 + $0x384] sm:$0xf0]  ;;  %v5879_v34 = vshrl.u32 %v21240_v46, 16  ;;  %v12879_v46 = vld [vmem:[%s20782_s8 + $0x438] sm:$0xf0] }
 0x5bc   : > { %v12726_v54 = vor.u32 %v14522_v23, %v12725_v63  ;;  %v5873_v63 = vor.u32 %v5871_v56, %v5861_v31 }
 0x5bd   : > { %v5881_v11 = vor.u32 %v5879_v34, %v5869_v20  ;;  %v12882_v20 = vor.u32 %v14605_v1, %v12879_v46 }
 0x5be   : > { %v5543_v48 = vpop.f32.mrf.mxu2  ;;  %v5584_v13 = vpop.f32.mrf.mxu3  ;;  %6624 = vmatpush.bf16.msrb.mxu1 %v12726_v54 }
 0x5bf   : > { %v5463_v0 = vpop.f32.mrf.mxu0  ;;  %v5504_v2 = vpop.f32.mrf.mxu1  ;;  %v5886_v55 = vsel %vm2987_vm5, %v5881_v11, %v5885_v21  ;;  %v12911_v48 = vld [vmem:[%s20782_s8 + $0x478] sm:$0xf0] }
 0x5c0   : > { %v5464_v57 = vadd.f32 %v5463_v0, %v18311_v39  ;;  %v12663_v39 = vld [vmem:[%s20781_s7 + $0x308] sm:$0xf0] }
 0x5c1   : > { %v12666_v24 = vor.u32 %v14505_v41, %v12663_v39  ;;  %v21243_v39 = vld [vmem:[#allocation105_spill] sm:$0xff] }
 0x5c2   : > { %v5505_v50 = vadd.f32 %v5504_v2, %v5464_v57  ;;  %6083 = vmatmul.bf16.gmra.mxu0 %v5862_v8  ;;  %12592 = vmatmul.msk.bf16.gmra.mxu1 %vm2265_vm4, %v5870_v12 }
 0x5c3   : > { %6165 = vmatmul.bf16.gmra.mxu2 %v5862_v8  ;;  %12600 = vmatmul.msk.bf16.gmra.mxu3 %vm2265_vm4, %v5870_v12  ;;  %v12877_v8 = vld [vmem:[%s20782_s8 + $0x430] sm:$0xf] }
 0x5c4   : > { %v18565_v62 = vadd.f32 %v5505_v50, %v18111_v28  ;;  %6665 = vmatpush.bf16.msrb.mxu2 %v12666_v24  ;;  %v5875_v28 = vshll.u32 %v21241_v3, 16  ;;  %v12909_v12 = vld [vmem:[%s20782_s8 + $0x470] sm:$0xf]  ;;  %v5891_v24 = vshll.u32 %v21243_v39, 16 }
 0x5c6   : > { %v5545_v45 = vpop.f32.mrf.mxu2  ;;  %v5586_v26 = vpop.f32.mrf.mxu3  ;;  %v5877_v49 = vrot.slane %v5875_v28, 1  ;;  %v5895_v28 = vshrl.u32 %v21242_v53, 16  ;;  %v21245_v53 = vld [vmem:[#allocation6_spill] sm:$0xff] }
 0x5c7   : > { %v5546_v15 = vadd.f32 %v5545_v45, %v18321_v29  ;;  %v5465_v58 = vpop.f32.mrf.mxu0  ;;  %v5506_v43 = vpop.f32.mrf.mxu1  ;;  %v12662_v29 = vor.u32 %v14506_v35, %v12661_v10  ;;  %v21244_v45 = vld [vmem:[#allocation106_spill] sm:$0xff] }
 0x5c8   : > { %v5878_v23 = vsel %vm2987_vm5, %v5873_v63, %v5877_v49  ;;  %7081 = vmatpush.bf16.msra.mxu2 %v12882_v20  ;;  %v5887_v43 = vshrl.u32 %v21241_v3, 16 }
 0x5c9   : > { %v5587_v37 = vadd.f32 %v5586_v26, %v5546_v15  ;;  %6583 = vmatpush.bf16.msrb.mxu0 %v12662_v29  ;;  %v5899_v26 = vshll.u32 %v21244_v45, 16  ;;  %v5614_v29 = vld [vmem:[#allocation2 + $0x10] sm:$0xff] }
 0x5ca   : > { %v6236_v63 = vunpack.c.l.b16 %v5614_v29  ;;  %v6237_v11 = vunpack.c.h.b16 %v5614_v29 }
 0x5cb   : > { %v18577_v27 = vadd.f32 %v5587_v37, %v18121_v18  ;;  %v5893_v37 = vrot.slane %v5891_v24, 1  ;;  %v5901_v19 = vrot.slane %v5899_v26, 1 }
 0x5ce   : > { %v5547_v7 = vpop.f32.mrf.mxu2  ;;  %v5588_v25 = vpop.f32.mrf.mxu3 }
 0x5cf   : > { %v5467_v18 = vpop.f32.mrf.mxu0  ;;  %v5508_v44 = vpop.f32.mrf.mxu1  ;;  %v5889_v7 = vor.u32 %v5887_v43, %v5877_v49  ;;  %v5897_v25 = vor.u32 %v5895_v28, %v5885_v21  ;;  %v21247_v49 = vunpack.c.h.b16 %v21245_v53 }
 0x5d0   : > { %v5468_v30 = vadd.f32 %v5467_v18, %v18329_v38  ;;  %v14613_v38 = vld [vmem:[%s20782_s8 + $0x474] sm:$0xf] }
 0x5d1   : > { %v12914_v13 = vor.u32 %v14613_v38, %v12911_v48  ;;  %v6271_v21 = vpack.c.b16 %v21247_v49, %v6237_v11  ;;  %v12901_v49 = vld [vmem:[%s20782_s8 + $0x460] sm:$0xf] }
 0x5d2   : > { %v5509_v54 = vadd.f32 %v5508_v44, %v5468_v30  ;;  %6087 = vmatmul.bf16.gmra.mxu0 %v5878_v23  ;;  %12593 = vmatmul.msk.bf16.gmra.mxu1 %vm2265_vm4, %v5886_v55  ;;  %v5894_v44 = vsel %vm2987_vm5, %v5889_v7, %v5893_v37  ;;  %v21246_v30 = vunpack.c.l.b16 %v21245_v53  ;;  %v14611_v7 = vld [vmem:[%s20782_s8 + $0x464] sm:$0xf] }
 0x5d3   : > { %6169 = vmatmul.bf16.gmra.mxu2 %v5878_v23  ;;  %12601 = vmatmul.msk.bf16.gmra.mxu3 %vm2265_vm4, %v5886_v55  ;;  %v12871_v55 = vld [vmem:[%s20782_s8 + $0x428] sm:$0xf0]  ;;  %v6301_v45 = vshrl.u32 %v6271_v21, 16 }
 0x5d4   : > { %v18602_v31 = vadd.f32 %v5509_v54, %v18142_v61  ;;  %7126 = vmatpush.bf16.msra.mxu3 %v12914_v13  ;;  %v14606_v61 = vld [vmem:[%s20782_s8 + $0x434] sm:$0xf0]  ;;  %v6270_v23 = vpack.c.b16 %v21246_v30, %v6236_v63  ;;  %v12861_v30 = vld [vmem:[%s20782_s8 + $0x410] sm:$0xf] }
 0x5d5   : > { %v12878_v50 = vor.u32 %v14606_v61, %v12877_v8  ;;  %v21248_v8 = vld [vmem:[#allocation9_spill] sm:$0xff] }
 0x5d6   : > { %v5549_v0 = vpop.f32.mrf.mxu2  ;;  %v5590_v2 = vpop.f32.mrf.mxu3  ;;  %v6296_v61 = vshll.u32 %v21248_v8, 16  ;;  %v6289_v39 = vshrl.u32 %v6270_v23, 16 }
 0x5d7   : > { %v5550_v17 = vadd.f32 %v5549_v0, %v18345_v52  ;;  %v5469_v32 = vpop.f32.mrf.mxu0  ;;  %v5510_v57 = vpop.f32.mrf.mxu1  ;;  %v14614_v52 = vld [vmem:[%s20782_s8 + $0x474] sm:$0xf0]  ;;  %6999 = vmatpush.bf16.msra.mxu0 %v12878_v50  ;;  %v6291_v0 = vshll.u32 %v6270_v23, 16 }
 0x5d8   : > { %v12910_v15 = vor.u32 %v14614_v52, %v12909_v12  ;;  %v14604_v32 = vld [vmem:[%s20782_s8 + $0x424] sm:$0xf0]  ;;  %v21249_v12 = vld [vmem:[#allocation10_spill] sm:$0xff]  ;;  %v6298_v24 = vrot.slane %v6296_v61, 1  ;;  %v14602_v23 = vld [vmem:[%s20782_s8 + $0x414] sm:$0xf0] }
 0x5d9   : > { %v5591_v41 = vadd.f32 %v5590_v2, %v5550_v17  ;;  %v6303_v2 = vshll.u32 %v6271_v21, 16  ;;  %v12869_v17 = vld [vmem:[%s20782_s8 + $0x420] sm:$0xf]  ;;  %v6308_v50 = vshll.u32 %v21249_v12, 16  ;;  %v6293_v52 = vrot.slane %v6291_v0, 1 }
 0x5da   : > { %7044 = vmatpush.bf16.msra.mxu1 %v12910_v15  ;;  %v12862_v21 = vor.u32 %v14602_v23, %v12861_v30  ;;  %v6320_v0 = vshrl.u32 %v21249_v12, 16  ;;  %v12855_v12 = vld [vmem:[%s20782_s8 + $0x408] sm:$0xf0] }
 0x5db   : > { %v18623_v58 = vadd.f32 %v5591_v41, %v18161_v36  ;;  %v5902_v36 = vsel %vm2987_vm5, %v5897_v25, %v5901_v19  ;;  %v6305_v41 = vrot.slane %v6303_v2, 1  ;;  %v6310_v26 = vrot.slane %v6308_v50, 1 }
 0x5dc   : > { %v6294_v19 = vor.u32 %v6293_v52, %v6289_v39 }
 0x5dd   : > { %v6322_v50 = vor.u32 %v6320_v0, %v6310_v26 }
 0x5de   : > { %v5551_v10 = vpop.f32.mrf.mxu2  ;;  %v5592_v35 = vpop.f32.mrf.mxu3  ;;  %v6299_v29 = vsel %vm2987_vm5, %v6294_v19, %v6298_v24  ;;  %v14600_v19 = vld [vmem:[%s20782_s8 + $0x404] sm:$0xf0] }
 0x5df   : > { %v5471_v56 = vpop.f32.mrf.mxu0  ;;  %v5512_v34 = vpop.f32.mrf.mxu1  ;;  %v6306_v10 = vor.u32 %v6305_v41, %v6301_v45 }
 0x5e0   : > { %v5472_v18 = vadd.f32 %v5471_v56, %v18359_v60  ;;  %v14603_v60 = vld [vmem:[%s20782_s8 + $0x424] sm:$0xf] }
 0x5e1   : > { %v12874_v1 = vor.u32 %v14603_v60, %v12871_v55  ;;  %v6311_v56 = vsel %vm2987_vm5, %v6306_v10, %v6310_v26  ;;  %v14612_v60 = vld [vmem:[%s20782_s8 + $0x464] sm:$0xf0]  ;;  %v21250_v55 = vld [vmem:[#allocation17_spill] sm:$0xff] }
 0x5e2   : > { %v5513_v3 = vadd.f32 %v5512_v34, %v5472_v18  ;;  %6091 = vmatmul.bf16.gmra.mxu0 %v5894_v44  ;;  %12594 = vmatmul.msk.bf16.gmra.mxu1 %vm2265_vm4, %v5902_v36  ;;  %v12863_v34 = vld [vmem:[%s20782_s8 + $0x418] sm:$0xf0]  ;;  %v12903_v18 = vld [vmem:[%s20782_s8 + $0x468] sm:$0xf0] }
 0x5e3   : > { %6173 = vmatmul.bf16.gmra.mxu2 %v5894_v44  ;;  %12602 = vmatmul.msk.bf16.gmra.mxu3 %vm2265_vm4, %v5902_v36  ;;  %v12906_v44 = vor.u32 %v14611_v7, %v12903_v18  ;;  %v6328_v7 = vshrl.u32 %v21250_v55, 16 }
 0x5e4   : > { %v18643_v54 = vadd.f32 %v5513_v3, %v18173_v22  ;;  %7082 = vmatpush.bf16.msra.mxu2 %v12874_v1  ;;  %v12870_v22 = vor.u32 %v14604_v32, %v12869_v17  ;;  %v6316_v1 = vshll.u32 %v21250_v55, 16  ;;  %v14597_v55 = vld [vmem:[%s20782_s8 + $0x3f4] sm:$0xf] }
 0x5e5   : > { %7127 = vmatpush.bf16.msra.mxu3 %v12906_v44 }
 0x5e6   : > { %v5553_v46 = vpop.f32.mrf.mxu2  ;;  %v5594_v38 = vpop.f32.mrf.mxu3  ;;  %7000 = vmatpush.bf16.msra.mxu0 %v12870_v22 }
 0x5e7   : > { %v5554_v20 = vadd.f32 %v5553_v46, %v18373_v14  ;;  %v5473_v48 = vpop.f32.mrf.mxu0  ;;  %v5514_v13 = vpop.f32.mrf.mxu1  ;;  %v21251_v46 = vld [vmem:[#allocation18_spill] sm:$0xff] }
 0x5e8   : > { %v6312_v48 = vshrl.u32 %v21248_v8, 16  ;;  %v6318_v13 = vrot.slane %v6316_v1, 1  ;;  %v14599_v8 = vld [vmem:[%s20782_s8 + $0x404] sm:$0xf]  ;;  %v6336_v18 = vshrl.u32 %v21251_v46, 16 }
 0x5e9   : > { %v5595_v57 = vadd.f32 %v5594_v38, %v5554_v20  ;;  %v6324_v38 = vshll.u32 %v21251_v46, 16  ;;  %v12902_v20 = vor.u32 %v14612_v60, %v12901_v49  ;;  %v12847_v1 = vld [vmem:[%s20782_s8 + $0x3f8] sm:$0xf0]  ;;  %v14609_v46 = vld [vmem:[%s20782_s8 + $0x454] sm:$0xf] }
 0x5ea   : > { %7001 = vmatpush.bf16.msra.mxu0 %v12862_v21  ;;  %v6314_v61 = vor.u32 %v6312_v48, %v6298_v24  ;;  %v12858_v24 = vor.u32 %v14599_v8, %v12855_v12  ;;  %v6330_v30 = vor.u32 %v6328_v7, %v6318_v13  ;;  %v21255_v12 = vld [vmem:[#allocation29_spill] sm:$0xff] }
 0x5eb   : > { %v18655_v14 = vadd.f32 %v5595_v57, %v18183_v42  ;;  %v14601_v42 = vld [vmem:[%s20782_s8 + $0x414] sm:$0xf]  ;;  %7045 = vmatpush.bf16.msra.mxu1 %v12902_v20  ;;  %v6326_v2 = vrot.slane %v6324_v38, 1  ;;  %v12850_v38 = vor.u32 %v14597_v55, %v12847_v1  ;;  %v12895_v20 = vld [vmem:[%s20782_s8 + $0x458] sm:$0xf0] }
 0x5ec   : > { %v12866_v25 = vor.u32 %v14601_v42, %v12863_v34  ;;  %v6319_v41 = vsel %vm2987_vm5, %v6314_v61, %v6318_v13  ;;  %v21253_v42 = vld [vmem:[#allocation27_spill] sm:$0xff]  ;;  %v12898_v48 = vor.u32 %v14609_v46, %v12895_v20  ;;  %v12893_v61 = vld [vmem:[%s20782_s8 + $0x450] sm:$0xf]  ;;  %v21257_v20 = vld [vmem:[#allocation38_spill] sm:$0xff] }
 0x5ed   : > { %v6327_v39 = vsel %vm2987_vm5, %v6322_v50, %v6326_v2  ;;  %v6340_v34 = vshll.u32 %v21253_v42, 16  ;;  %v6338_v23 = vor.u32 %v6336_v18, %v6326_v2  ;;  %v14596_v55 = vld [vmem:[%s20782_s8 + $0x3e4] sm:$0xf0]  ;;  %v21256_v46 = vld [vmem:[#allocation36_spill] sm:$0xff] }
 0x5ee   : > { %v5555_v15 = vpop.f32.mrf.mxu2  ;;  %v5596_v43 = vpop.f32.mrf.mxu3  ;;  %7083 = vmatpush.bf16.msra.mxu2 %v12866_v25  ;;  %7128 = vmatpush.bf16.msra.mxu3 %v12898_v48  ;;  %v6372_v48 = vshll.u32 %v21257_v20, 16 }
 0x5ef   : > { %v6064_v37 = vpop.f32.mrf.mxu0  ;;  %v6105_v28 = vpop.f32.mrf.mxu1  ;;  %v6342_v44 = vrot.slane %v6340_v34, 1 }
 0x5f0   : > { %v18657_v35 = vadd.f32 %v6105_v28, %v6064_v37  ;;  %v12853_v28 = vld [vmem:[%s20782_s8 + $0x400] sm:$0xf] }
 0x5f1   : > { %v12854_v10 = vor.u32 %v14600_v19, %v12853_v28  ;;  %v6343_v60 = vsel %vm2987_vm5, %v6338_v23, %v6342_v44 }
 0x5f2   : > { %6584 = vmatmul.bf16.vlgmr.msrb.gmra.mxu0 %v6299_v29  ;;  %12755 = vmatmul.msk.bf16.vlgmr.msrb.gmra.mxu1 %vm2265_vm4, %v6311_v56 }
 0x5f3   : > { %6666 = vmatmul.bf16.vlgmr.msrb.gmra.mxu2 %v6299_v29  ;;  %12763 = vmatmul.msk.bf16.vlgmr.msrb.gmra.mxu3 %vm2265_vm4, %v6311_v56  ;;  %v21252_v29 = vld [vmem:[#allocation19_spill] sm:$0xff] }
 0x5f4   : > { %7084 = vmatpush.bf16.msra.mxu2 %v12858_v24  ;;  %v6332_v56 = vshll.u32 %v21252_v29, 16  ;;  %7002 = vmatpush.bf16.msra.mxu0 %v12854_v10  ;;  %v6356_v24 = vshll.u32 %v21255_v12, 16 }
 0x5f6   : > { %v6146_v36 = vpop.f32.mrf.mxu2  ;;  %v6187_v63 = vpop.f32.mrf.mxu3  ;;  %v6334_v25 = vrot.slane %v6332_v56, 1  ;;  %v6358_v28 = vrot.slane %v6356_v24, 1 }
 0x5f7   : > { %v18675_v11 = vadd.f32 %v6187_v63, %v6146_v36  ;;  %v6066_v3 = vpop.f32.mrf.mxu0  ;;  %v6107_v53 = vpop.f32.mrf.mxu1 }
 0x5f8   : > { %v6335_v21 = vsel %vm2987_vm5, %v6330_v30, %v6334_v25  ;;  %7085 = vmatpush.bf16.msra.mxu2 %v12850_v38  ;;  %v6364_v38 = vshll.u32 %v21256_v46, 16 }
 0x5fe   : > { %v6148_v17 = vpop.f32.mrf.mxu2  ;;  %v6189_v32 = vpop.f32.mrf.mxu3 }
 0x5ff   : > { %v6068_v22 = vpop.f32.mrf.mxu0  ;;  %v6109_v57 = vpop.f32.mrf.mxu1 }
 0x600   : > { %v18693_v52 = vadd.f32 %v6109_v57, %v6068_v22  ;;  %v12845_v22 = vld [vmem:[%s20782_s8 + $0x3f0] sm:$0xf]  ;;  %v14598_v57 = vld [vmem:[%s20782_s8 + $0x3f4] sm:$0xf0] }
 0x601   : > { %v12846_v50 = vor.u32 %v14598_v57, %v12845_v22 }
 0x602   : > { %6588 = vmatmul.bf16.gmra.mxu0 %v6319_v41  ;;  %12756 = vmatmul.msk.bf16.gmra.mxu1 %vm2265_vm4, %v6327_v39 }
 0x603   : > { %6670 = vmatmul.bf16.gmra.mxu2 %v6319_v41  ;;  %12764 = vmatmul.msk.bf16.gmra.mxu3 %vm2265_vm4, %v6327_v39  ;;  %v14610_v41 = vld [vmem:[%s20782_s8 + $0x454] sm:$0xf0]  ;;  %v21254_v39 = vld [vmem:[#allocation28_spill] sm:$0xff] }
 0x604   : > { %v6348_v8 = vshll.u32 %v21254_v39, 16  ;;  %7003 = vmatpush.bf16.msra.mxu0 %v12846_v50 }
 0x606   : > { %v6150_v45 = vpop.f32.mrf.mxu2  ;;  %v6191_v26 = vpop.f32.mrf.mxu3 }
 0x607   : > { %v18705_v15 = vadd.f32 %v6191_v26, %v6150_v45  ;;  %v6070_v43 = vpop.f32.mrf.mxu0  ;;  %v6111_v37 = vpop.f32.mrf.mxu1  ;;  %v12894_v45 = vor.u32 %v14610_v41, %v12893_v61  ;;  %v6344_v26 = vshrl.u32 %v21252_v29, 16  ;;  %v14595_v29 = vld [vmem:[%s20782_s8 + $0x3e4] sm:$0xf] }
 0x608   : > { %v6350_v43 = vrot.slane %v6348_v8, 1  ;;  %v6352_v37 = vshrl.u32 %v21253_v42, 16  ;;  %v12839_v42 = vld [vmem:[%s20782_s8 + $0x3e8] sm:$0xf0] }
 0x609   : > { %7046 = vmatpush.bf16.msra.mxu1 %v12894_v45  ;;  %v6346_v7 = vor.u32 %v6344_v26, %v6334_v25  ;;  %v12842_v25 = vor.u32 %v14595_v29, %v12839_v42  ;;  %v12885_v29 = vld [vmem:[%s20782_s8 + $0x440] sm:$0xf] }
 0x60a   : > { %v6354_v18 = vor.u32 %v6352_v37, %v6342_v44 }
 0x60b   : > { %7086 = vmatpush.bf16.msra.mxu2 %v12842_v25  ;;  %v14608_v25 = vld [vmem:[%s20782_s8 + $0x444] sm:$0xf0] }
 0x60e   : > { %v6152_v36 = vpop.f32.mrf.mxu2  ;;  %v6193_v63 = vpop.f32.mrf.mxu3 }
 0x60f   : > { %v6072_v3 = vpop.f32.mrf.mxu0  ;;  %v6113_v53 = vpop.f32.mrf.mxu1  ;;  %v6351_v63 = vsel %vm2987_vm5, %v6346_v7, %v6350_v43 }
 0x610   : > { %v18717_v49 = vadd.f32 %v6113_v53, %v6072_v3  ;;  %v6359_v3 = vsel %vm2987_vm5, %v6354_v18, %v6358_v28 }
 0x612   : > { %6592 = vmatmul.bf16.gmra.mxu0 %v6335_v21  ;;  %12757 = vmatmul.msk.bf16.gmra.mxu1 %vm2265_vm4, %v6343_v60 }
 0x613   : > { %6674 = vmatmul.bf16.gmra.mxu2 %v6335_v21  ;;  %12765 = vmatmul.msk.bf16.gmra.mxu3 %vm2265_vm4, %v6343_v60  ;;  %v12837_v60 = vld [vmem:[%s20782_s8 + $0x3e0] sm:$0xf] }
 0x614   : > { %v12838_v1 = vor.u32 %v14596_v55, %v12837_v60  ;;  %v12886_v60 = vor.u32 %v14608_v25, %v12885_v29  ;;  %v6376_v55 = vshrl.u32 %v21256_v46, 16  ;;  %v14591_v46 = vld [vmem:[%s20782_s8 + $0x3c4] sm:$0xf] }
 0x616   : > { %v6154_v13 = vpop.f32.mrf.mxu2  ;;  %v6195_v0 = vpop.f32.mrf.mxu3  ;;  %7004 = vmatpush.bf16.msra.mxu0 %v12838_v1  ;;  %7047 = vmatpush.bf16.msra.mxu1 %v12886_v60 }
 0x617   : > { %v18735_v2 = vadd.f32 %v6195_v0, %v6154_v13  ;;  %v6074_v17 = vpop.f32.mrf.mxu0  ;;  %v6115_v32 = vpop.f32.mrf.mxu1  ;;  %v6360_v13 = vshrl.u32 %v21254_v39, 16  ;;  %v6366_v0 = vrot.slane %v6364_v38, 1  ;;  %v14593_v39 = vld [vmem:[%s20782_s8 + $0x3d4] sm:$0xf]  ;;  %v6384_v38 = vshrl.u32 %v21257_v20, 16 }
 0x618   : > { %v6368_v17 = vshrl.u32 %v21255_v12, 16  ;;  %v6374_v32 = vrot.slane %v6372_v48, 1  ;;  %v12831_v12 = vld [vmem:[%s20782_s8 + $0x3d8] sm:$0xf0]  ;;  %v12823_v20 = vld [vmem:[%s20782_s8 + $0x3c8] sm:$0xf0] }
 0x619   : > { %v6362_v41 = vor.u32 %v6360_v13, %v6350_v43  ;;  %v14607_v43 = vld [vmem:[%s20782_s8 + $0x444] sm:$0xf]  ;;  %v12834_v37 = vor.u32 %v14593_v39, %v12831_v12 }
 0x61a   : > { %v6370_v8 = vor.u32 %v6368_v17, %v6358_v28  ;;  %v12887_v28 = vld [vmem:[%s20782_s8 + $0x448] sm:$0xf0] }
 0x61b   : > { %v6367_v45 = vsel %vm2987_vm5, %v6362_v41, %v6366_v0  ;;  %7087 = vmatpush.bf16.msra.mxu2 %v12834_v37  ;;  %v12821_v37 = vld [vmem:[%s20782_s8 + $0x3c0] sm:$0xf] }
 0x61c   : > { %v6375_v26 = vsel %vm2987_vm5, %v6370_v8, %v6374_v32 }
 0x61e   : > { %v6156_v19 = vpop.f32.mrf.mxu2  ;;  %v6197_v10 = vpop.f32.mrf.mxu3 }
 0x61f   : > { %v6076_v56 = vpop.f32.mrf.mxu0  ;;  %v6117_v34 = vpop.f32.mrf.mxu1  ;;  %v12890_v19 = vor.u32 %v14607_v43, %v12887_v28  ;;  %v14592_v28 = vld [vmem:[%s20782_s8 + $0x3c4] sm:$0xf0] }
 0x620   : > { %v18753_v36 = vadd.f32 %v6117_v34, %v6076_v56 }
 0x621   : > { %7129 = vmatpush.bf16.msra.mxu3 %v12890_v19  ;;  %v12822_v19 = vor.u32 %v14592_v28, %v12821_v37  ;;  %v14582_v37 = vld [vmem:[%s20781_s7 + $0x434] sm:$0xf0]  ;;  %v13021_v28 = vld [vmem:[%s20781_s7 + $0x470] sm:$0xf] }
 0x622   : > { %6596 = vmatmul.bf16.gmra.mxu0 %v6351_v63  ;;  %12758 = vmatmul.msk.bf16.gmra.mxu1 %vm2265_vm4, %v6359_v3 }
 0x623   : > { %6678 = vmatmul.bf16.gmra.mxu2 %v6351_v63  ;;  %12766 = vmatmul.msk.bf16.gmra.mxu3 %vm2265_vm4, %v6359_v3  ;;  %v12829_v63 = vld [vmem:[%s20782_s8 + $0x3d0] sm:$0xf]  ;;  %v14594_v3 = vld [vmem:[%s20782_s8 + $0x3d4] sm:$0xf0] }
 0x624   : > { %v12830_v42 = vor.u32 %v14594_v3, %v12829_v63 }
 0x626   : > { %v6158_v44 = vpop.f32.mrf.mxu2  ;;  %v6199_v53 = vpop.f32.mrf.mxu3  ;;  %7005 = vmatpush.bf16.msra.mxu0 %v12830_v42 }
 0x627   : > { %v18765_v30 = vadd.f32 %v6199_v53, %v6158_v44  ;;  %v6078_v23 = vpop.f32.mrf.mxu0  ;;  %v6119_v21 = vpop.f32.mrf.mxu1  ;;  %v21258_v44 = vld [vmem:[#allocation49_spill] sm:$0xff] }
 0x628   : > { %v6380_v53 = vshll.u32 %v21258_v44, 16  ;;  %v21259_v23 = vld [vmem:[#allocation50_spill] sm:$0xff]  ;;  %v6392_v63 = vshrl.u32 %v21258_v44, 16  ;;  %v14581_v44 = vld [vmem:[%s20781_s7 + $0x434] sm:$0xf] }
 0x629   : > { %v6388_v21 = vshll.u32 %v21259_v23, 16  ;;  %v6400_v29 = vshrl.u32 %v21259_v23, 16  ;;  %v12991_v23 = vld [vmem:[%s20781_s7 + $0x438] sm:$0xf0] }
 0x62a   : > { %v6382_v1 = vrot.slane %v6380_v53, 1  ;;  %7006 = vmatpush.bf16.msra.mxu0 %v12822_v19 }
 0x62b   : > { %v6390_v48 = vrot.slane %v6388_v21, 1 }
 0x62e   : > { %v6160_v22 = vpop.f32.mrf.mxu2  ;;  %v6201_v57 = vpop.f32.mrf.mxu3 }
 0x62f   : > { %v6080_v61 = vpop.f32.mrf.mxu0  ;;  %v6121_v50 = vpop.f32.mrf.mxu1 }
 0x630   : > { %v18777_v24 = vadd.f32 %v6121_v50, %v6080_v61  ;;  %v6378_v61 = vor.u32 %v6376_v55, %v6366_v0  ;;  %v6386_v50 = vor.u32 %v6384_v38, %v6374_v32  ;;  %v12826_v0 = vor.u32 %v14591_v46, %v12823_v20 }
 0x631   : > { %v6394_v55 = vor.u32 %v6392_v63, %v6382_v1  ;;  %v6402_v38 = vor.u32 %v6400_v29, %v6390_v48 }
 0x632   : > { %6600 = vmatmul.bf16.gmra.mxu0 %v6367_v45  ;;  %12759 = vmatmul.msk.bf16.gmra.mxu1 %vm2265_vm4, %v6375_v26  ;;  %v6383_v8 = vsel %vm2987_vm5, %v6378_v61, %v6382_v1  ;;  %v14589_v1 = vld [vmem:[%s20781_s7 + $0x474] sm:$0xf] }
 0x633   : > { %6682 = vmatmul.bf16.gmra.mxu2 %v6367_v45  ;;  %12767 = vmatmul.msk.bf16.gmra.mxu3 %vm2265_vm4, %v6375_v26  ;;  %v6391_v45 = vsel %vm2987_vm5, %v6386_v50, %v6390_v48  ;;  %v12994_v48 = vor.u32 %v14581_v44, %v12991_v23 }
 0x634   : > { %7088 = vmatpush.bf16.msra.mxu2 %v12826_v0  ;;  %v21262_v0 = vld [vmem:[#allocation54_spill] sm:$0xff] }
 0x636   : > { %v6162_v10 = vpop.f32.mrf.mxu2  ;;  %v6203_v56 = vpop.f32.mrf.mxu3 }
 0x637   : > { %v18795_v34 = vadd.f32 %v6203_v56, %v6162_v10  ;;  %v6082_v7 = vpop.f32.mrf.mxu0  ;;  %v6123_v18 = vpop.f32.mrf.mxu1  ;;  %v21260_v10 = vld [vmem:[#allocation51_spill] sm:$0xff] }
 0x638   : > { %v6396_v56 = vshll.u32 %v21260_v10, 16  ;;  %v21261_v7 = vld [vmem:[#allocation52_spill] sm:$0xff]  ;;  %7436 = vmatpush.bf16.msrb.mxu2 %v12994_v48  ;;  %v6408_v19 = vshrl.u32 %v21260_v10, 16 }
 0x639   : > { %v6404_v18 = vshll.u32 %v21261_v7, 16  ;;  %v6416_v29 = vshrl.u32 %v21261_v7, 16  ;;  %v14579_v7 = vld [vmem:[%s20781_s7 + $0x424] sm:$0xf] }
 0x63a   : > { %v6398_v3 = vrot.slane %v6396_v56, 1 }
 0x63b   : > { %v6406_v42 = vrot.slane %v6404_v18, 1  ;;  %v14590_v18 = vld [vmem:[%s20781_s7 + $0x474] sm:$0xf0] }
 0x63e   : > { %v6164_v13 = vpop.f32.mrf.mxu2  ;;  %v6205_v17 = vpop.f32.mrf.mxu3 }
 0x63f   : > { %v6084_v22 = vpop.f32.mrf.mxu0  ;;  %v6125_v57 = vpop.f32.mrf.mxu1  ;;  %v6399_v17 = vsel %vm2987_vm5, %v6394_v55, %v6398_v3 }
 0x640   : > { %v18813_v41 = vadd.f32 %v6125_v57, %v6084_v22  ;;  %v6407_v22 = vsel %vm2987_vm5, %v6402_v38, %v6406_v42  ;;  %v13023_v57 = vld [vmem:[%s20781_s7 + $0x478] sm:$0xf0] }
 0x642   : > { %6604 = vmatmul.bf16.gmra.mxu0 %v6383_v8  ;;  %12760 = vmatmul.msk.bf16.gmra.mxu1 %vm2265_vm4, %v6391_v45 }
 0x643   : > { %6686 = vmatmul.bf16.gmra.mxu2 %v6383_v8  ;;  %12768 = vmatmul.msk.bf16.gmra.mxu3 %vm2265_vm4, %v6391_v45  ;;  %v13026_v8 = vor.u32 %v14589_v1, %v13023_v57 }
 0x645   : > { %7481 = vmatpush.bf16.msrb.mxu3 %v13026_v8  ;;  %v12981_v8 = vld [vmem:[%s20781_s7 + $0x420] sm:$0xf] }
 0x646   : > { %v6166_v32 = vpop.f32.mrf.mxu2  ;;  %v6207_v26 = vpop.f32.mrf.mxu3 }
 0x647   : > { %v18825_v39 = vadd.f32 %v6207_v26, %v6166_v32  ;;  %v6086_v12 = vpop.f32.mrf.mxu0  ;;  %v6127_v43 = vpop.f32.mrf.mxu1  ;;  %v6412_v32 = vshll.u32 %v21262_v0, 16  ;;  %v21263_v26 = vld [vmem:[#allocation55_spill] sm:$0xff] }
 0x648   : > { %v6420_v12 = vshll.u32 %v21263_v26, 16  ;;  %v12989_v43 = vld [vmem:[%s20781_s7 + $0x430] sm:$0xf] }
 0x649   : > { %v12990_v56 = vor.u32 %v14582_v37, %v12989_v43  ;;  %v6414_v63 = vrot.slane %v6412_v32, 1 }
 0x64b   : > { %7354 = vmatpush.bf16.msrb.mxu0 %v12990_v56 }
 0x64e   : > { %v6168_v25 = vpop.f32.mrf.mxu2  ;;  %v6209_v53 = vpop.f32.mrf.mxu3 }
 0x64f   : > { %v6088_v21 = vpop.f32.mrf.mxu0  ;;  %v6129_v60 = vpop.f32.mrf.mxu1  ;;  %v6422_v25 = vrot.slane %v6420_v12, 1  ;;  %v13022_v53 = vor.u32 %v14590_v18, %v13021_v28  ;;  %v21264_v28 = vld [vmem:[#allocation68_spill] sm:$0xff] }
 0x650   : > { %v18837_v13 = vadd.f32 %v6129_v60, %v6088_v21  ;;  %v14577_v18 = vld [vmem:[%s20781_s7 + $0x414] sm:$0xf] }
 0x651   : > { %7399 = vmatpush.bf16.msrb.mxu1 %v13022_v53 }
 0x652   : > { %6608 = vmatmul.bf16.gmra.mxu0 %v6399_v17  ;;  %12761 = vmatmul.msk.bf16.gmra.mxu1 %vm2265_vm4, %v6407_v22 }
 0x653   : > { %6690 = vmatmul.bf16.gmra.mxu2 %v6399_v17  ;;  %12769 = vmatmul.msk.bf16.gmra.mxu3 %vm2265_vm4, %v6407_v22  ;;  %v6410_v17 = vor.u32 %v6408_v19, %v6398_v3  ;;  %v6418_v22 = vor.u32 %v6416_v29, %v6406_v42  ;;  %v12983_v3 = vld [vmem:[%s20781_s7 + $0x428] sm:$0xf0]  ;;  %v21265_v19 = vld [vmem:[#allocation69_spill] sm:$0xff] }
 0x654   : > { %v12986_v42 = vor.u32 %v14579_v7, %v12983_v3  ;;  %v14588_v3 = vld [vmem:[%s20781_s7 + $0x464] sm:$0xf0] }
 0x655   : > { %v6415_v10 = vsel %vm2987_vm5, %v6410_v17, %v6414_v63  ;;  %v6423_v23 = vsel %vm2987_vm5, %v6418_v22, %v6422_v25  ;;  %v14587_v63 = vld [vmem:[%s20781_s7 + $0x464] sm:$0xf]  ;;  %v13015_v25 = vld [vmem:[%s20781_s7 + $0x468] sm:$0xf0] }
 0x656   : > { %v6170_v61 = vpop.f32.mrf.mxu2  ;;  %v6211_v50 = vpop.f32.mrf.mxu3  ;;  %7437 = vmatpush.bf16.msrb.mxu2 %v12986_v42 }
 0x657   : > { %v18855_v45 = vadd.f32 %v6211_v50, %v6170_v61  ;;  %v6090_v46 = vpop.f32.mrf.mxu0  ;;  %v6131_v20 = vpop.f32.mrf.mxu1 }
 0x658   : > { %v14580_v46 = vld [vmem:[%s20781_s7 + $0x424] sm:$0xf0] }
 0x659   : > { %v12982_v20 = vor.u32 %v14580_v46, %v12981_v8  ;;  %v21266_v46 = vld [vmem:[#allocation74_spill] sm:$0xff] }
 0x65b   : > { %7355 = vmatpush.bf16.msrb.mxu0 %v12982_v20  ;;  %v21267_v20 = vld [vmem:[#allocation75_spill] sm:$0xff] }
 0x65e   : > { %v6172_v21 = vpop.f32.mrf.mxu2  ;;  %v6213_v60 = vpop.f32.mrf.mxu3 }
 0x65f   : > { %v6092_v55 = vpop.f32.mrf.mxu0  ;;  %v6133_v38 = vpop.f32.mrf.mxu1  ;;  %v13018_v21 = vor.u32 %v14587_v63, %v13015_v25  ;;  %v14576_v63 = vld [vmem:[%s20781_s7 + $0x404] sm:$0xf0] }
 0x660   : > { %v18873_v44 = vadd.f32 %v6133_v38, %v6092_v55 }
 0x661   : > { %7482 = vmatpush.bf16.msrb.mxu3 %v13018_v21 }
 0x662   : > { %6612 = vmatmul.bf16.gmra.mxu0 %v6415_v10  ;;  %12762 = vmatmul.msk.bf16.gmra.mxu1 %vm2265_vm4, %v6423_v23 }
 0x663   : > { %6694 = vmatmul.bf16.gmra.mxu2 %v6415_v10  ;;  %12770 = vmatmul.msk.bf16.gmra.mxu3 %vm2265_vm4, %v6423_v23  ;;  %v12973_v10 = vld [vmem:[%s20781_s7 + $0x410] sm:$0xf]  ;;  %v14578_v23 = vld [vmem:[%s20781_s7 + $0x414] sm:$0xf0] }
 0x664   : > { %v12974_v7 = vor.u32 %v14578_v23, %v12973_v10  ;;  %v14585_v10 = vld [vmem:[%s20781_s7 + $0x454] sm:$0xf] }
 0x666   : > { %v6174_v1 = vpop.f32.mrf.mxu2  ;;  %v6215_v48 = vpop.f32.mrf.mxu3  ;;  %7356 = vmatpush.bf16.msrb.mxu0 %v12974_v7 }
 0x667   : > { %v18885_v57 = vadd.f32 %v6215_v48, %v6174_v1  ;;  %v6094_v61 = vpop.f32.mrf.mxu0  ;;  %v6135_v50 = vpop.f32.mrf.mxu1 }
 0x66e   : > { %v6176_v0 = vpop.f32.mrf.mxu2  ;;  %v6217_v32 = vpop.f32.mrf.mxu3 }
 0x66f   : > { %v6585_v26 = vpop.f32.mrf.mxu0  ;;  %v6626_v12 = vpop.f32.mrf.mxu1  ;;  %v14575_v32 = vld [vmem:[%s20781_s7 + $0x404] sm:$0xf] }
 0x670   : > { %v6586_v43 = vadd.f32 %v6585_v26, %v18657_v35  ;;  %v12975_v35 = vld [vmem:[%s20781_s7 + $0x418] sm:$0xf0] }
 0x671   : > { %v12978_v29 = vor.u32 %v14577_v18, %v12975_v35  ;;  %v12965_v35 = vld [vmem:[%s20781_s7 + $0x400] sm:$0xf] }
 0x672   : > { %v6627_v37 = vadd.f32 %v6626_v12, %v6586_v43  ;;  %7007 = vmatmul.bf16.vlgmr.msra.gmra.mxu0 %v21264_v28  ;;  %12915 = vmatmul.msk.bf16.vlgmr.msra.gmra.mxu1 %vm2265_vm4, %v21265_v19 }
 0x673   : > { %7089 = vmatmul.bf16.vlgmr.msra.gmra.mxu2 %v21264_v28  ;;  %12923 = vmatmul.msk.bf16.vlgmr.msra.gmra.mxu3 %vm2265_vm4, %v21265_v19 }
 0x674   : > { %v18901_v56 = vadd.f32 %v6627_v37, %v18389_v4  ;;  %7438 = vmatpush.bf16.msrb.mxu2 %v12978_v29  ;;  %v12966_v29 = vor.u32 %v14576_v63, %v12965_v35  ;;  %v14571_v35 = vld [vmem:[%s20781_s7 + $0x3e4] sm:$0xf] }
 0x676   : > { %v6667_v53 = vpop.f32.mrf.mxu2  ;;  %v6708_v4 = vpop.f32.mrf.mxu3  ;;  %7357 = vmatpush.bf16.msrb.mxu0 %v12966_v29 }
 0x677   : > { %v6668_v60 = vadd.f32 %v6667_v53, %v18675_v11  ;;  %v6587_v55 = vpop.f32.mrf.mxu0  ;;  %v6628_v38 = vpop.f32.mrf.mxu1  ;;  %v13013_v11 = vld [vmem:[%s20781_s7 + $0x460] sm:$0xf] }
 0x678   : > { %v13014_v42 = vor.u32 %v14588_v3, %v13013_v11  ;;  %v21268_v55 = vld [vmem:[#allocation80_spill] sm:$0xff]  ;;  %v13007_v11 = vld [vmem:[%s20781_s7 + $0x458] sm:$0xf0] }
 0x679   : > { %v6709_v17 = vadd.f32 %v6708_v4, %v6668_v60  ;;  %v13010_v3 = vor.u32 %v14585_v10, %v13007_v11 }
 0x67a   : > { %7400 = vmatpush.bf16.msrb.mxu1 %v13014_v42 }
 0x67b   : > { %v18917_v22 = vadd.f32 %v6709_v17, %v18407_v5  ;;  %v14573_v17 = vld [vmem:[%s20781_s7 + $0x3f4] sm:$0xf]  ;;  %7483 = vmatpush.bf16.msrb.mxu3 %v13010_v3 }
 0x67c   : > { %v14569_v3 = vld [vmem:[%s20781_s7 + $0x3d4] sm:$0xf] }
 0x67e   : > { %v6669_v5 = vpop.f32.mrf.mxu2  ;;  %v6710_v1 = vpop.f32.mrf.mxu3 }
 0x67f   : > { %v6589_v48 = vpop.f32.mrf.mxu0  ;;  %v6630_v61 = vpop.f32.mrf.mxu1 }
 0x680   : > { %v6590_v50 = vadd.f32 %v6589_v48, %v18693_v52  ;;  %v12967_v52 = vld [vmem:[%s20781_s7 + $0x408] sm:$0xf0] }
 0x681   : > { %v12970_v26 = vor.u32 %v14575_v32, %v12967_v52 }
 0x682   : > { %v6631_v8 = vadd.f32 %v6630_v61, %v6590_v50  ;;  %7011 = vmatmul.bf16.gmra.mxu0 %v21266_v46  ;;  %12916 = vmatmul.msk.bf16.gmra.mxu1 %vm2265_vm4, %v21267_v20  ;;  %v12957_v50 = vld [vmem:[%s20781_s7 + $0x3f0] sm:$0xf] }
 0x683   : > { %7093 = vmatmul.bf16.gmra.mxu2 %v21266_v46  ;;  %12924 = vmatmul.msk.bf16.gmra.mxu3 %vm2265_vm4, %v21267_v20  ;;  %v14586_v20 = vld [vmem:[%s20781_s7 + $0x454] sm:$0xf0] }
 0x684   : > { %v18939_v0 = vadd.f32 %v6631_v8, %v18429_v51  ;;  %7439 = vmatpush.bf16.msrb.mxu2 %v12970_v26  ;;  %v14574_v8 = vld [vmem:[%s20781_s7 + $0x3f4] sm:$0xf0] }
 0x685   : > { %v12958_v46 = vor.u32 %v14574_v8, %v12957_v50 }
 0x686   : > { %v6671_v12 = vpop.f32.mrf.mxu2  ;;  %v6712_v43 = vpop.f32.mrf.mxu3 }
 0x687   : > { %v6672_v37 = vadd.f32 %v6671_v12, %v18705_v15  ;;  %v6591_v28 = vpop.f32.mrf.mxu0  ;;  %v6632_v19 = vpop.f32.mrf.mxu1  ;;  %7358 = vmatpush.bf16.msrb.mxu0 %v12958_v46 }
 0x688   : > { %v21270_v28 = vld [vmem:[#allocation86_spill] sm:$0xff]  ;;  %v21271_v19 = vld [vmem:[#allocation87_spill] sm:$0xff] }
 0x689   : > { %v6713_v18 = vadd.f32 %v6712_v43, %v6672_v37 }
 0x68b   : > { %v18949_v51 = vadd.f32 %v6713_v18, %v18441_v59  ;;  %v21269_v59 = vld [vmem:[#allocation81_spill] sm:$0xff] }
 0x68e   : > { %v6673_v25 = vpop.f32.mrf.mxu2  ;;  %v6714_v53 = vpop.f32.mrf.mxu3 }
 0x68f   : > { %v6593_v15 = vpop.f32.mrf.mxu0  ;;  %v6634_v4 = vpop.f32.mrf.mxu1 }
 0x690   : > { %v6594_v21 = vadd.f32 %v6593_v15, %v18717_v49  ;;  %v12959_v49 = vld [vmem:[%s20781_s7 + $0x3f8] sm:$0xf0] }
 0x691   : > { %v12962_v23 = vor.u32 %v14573_v17, %v12959_v49 }
 0x692   : > { %v6635_v60 = vadd.f32 %v6634_v4, %v6594_v21  ;;  %7015 = vmatmul.bf16.gmra.mxu0 %v21268_v55  ;;  %12917 = vmatmul.msk.bf16.gmra.mxu1 %vm2265_vm4, %v21269_v59 }
 0x693   : > { %7097 = vmatmul.bf16.gmra.mxu2 %v21268_v55  ;;  %12925 = vmatmul.msk.bf16.gmra.mxu3 %vm2265_vm4, %v21269_v59  ;;  %v14572_v55 = vld [vmem:[%s20781_s7 + $0x3e4] sm:$0xf0] }
 0x694   : > { %v18965_v38 = vadd.f32 %v6635_v60, %v18457_v6  ;;  %7440 = vmatpush.bf16.msrb.mxu2 %v12962_v23  ;;  %v12949_v60 = vld [vmem:[%s20781_s7 + $0x3e0] sm:$0xf] }
 0x695   : > { %v12950_v59 = vor.u32 %v14572_v55, %v12949_v60 }
 0x696   : > { %v6675_v7 = vpop.f32.mrf.mxu2  ;;  %v6716_v6 = vpop.f32.mrf.mxu3 }
 0x697   : > { %v6676_v42 = vadd.f32 %v6675_v7, %v18735_v2  ;;  %v6595_v5 = vpop.f32.mrf.mxu0  ;;  %v6636_v1 = vpop.f32.mrf.mxu1  ;;  %v13005_v2 = vld [vmem:[%s20781_s7 + $0x450] sm:$0xf]  ;;  %7359 = vmatpush.bf16.msrb.mxu0 %v12950_v59 }
 0x698   : > { %v13006_v32 = vor.u32 %v14586_v20, %v13005_v2  ;;  %v21272_v7 = vld [vmem:[#allocation92_spill] sm:$0xff]  ;;  %v12999_v1 = vld [vmem:[%s20781_s7 + $0x448] sm:$0xf0] }
 0x699   : > { %v6717_v48 = vadd.f32 %v6716_v6, %v6676_v42  ;;  %v14583_v42 = vld [vmem:[%s20781_s7 + $0x444] sm:$0xf] }
 0x69a   : > { %7401 = vmatpush.bf16.msrb.mxu1 %v13006_v32  ;;  %v13002_v50 = vor.u32 %v14583_v42, %v12999_v1  ;;  %v14685_v42 = vld [vmem:[%s20782_s8 + $0x4f4] sm:$0xf] }
 0x69b   : > { %v18981_v61 = vadd.f32 %v6717_v48, %v18475_v40 }
 0x69c   : > { %7484 = vmatpush.bf16.msrb.mxu3 %v13002_v50 }
 0x69e   : > { %v6677_v40 = vpop.f32.mrf.mxu2  ;;  %v6718_v52 = vpop.f32.mrf.mxu3 }
 0x69f   : > { %v6597_v26 = vpop.f32.mrf.mxu0  ;;  %v6638_v12 = vpop.f32.mrf.mxu1  ;;  %v12941_v40 = vld [vmem:[%s20781_s7 + $0x3d0] sm:$0xf]  ;;  %v14570_v52 = vld [vmem:[%s20781_s7 + $0x3d4] sm:$0xf0] }
 0x6a0   : > { %v6598_v43 = vadd.f32 %v6597_v26, %v18753_v36  ;;  %v12951_v36 = vld [vmem:[%s20781_s7 + $0x3e8] sm:$0xf0]  ;;  %v12942_v26 = vor.u32 %v14570_v52, %v12941_v40  ;;  %v13213_v52 = vld [vmem:[%s20782_s8 + $0x4f0] sm:$0xf] }
 0x6a1   : > { %v12954_v63 = vor.u32 %v14571_v35, %v12951_v36 }
 0x6a2   : > { %v6639_v37 = vadd.f32 %v6638_v12, %v6598_v43  ;;  %7019 = vmatmul.bf16.gmra.mxu0 %v21270_v28  ;;  %12918 = vmatmul.msk.bf16.gmra.mxu1 %vm2265_vm4, %v21271_v19  ;;  %v14584_v12 = vld [vmem:[%s20781_s7 + $0x444] sm:$0xf0] }
 0x6a3   : > { %7101 = vmatmul.bf16.gmra.mxu2 %v21270_v28  ;;  %12926 = vmatmul.msk.bf16.gmra.mxu3 %vm2265_vm4, %v21271_v19 }
 0x6a4   : > { %v19003_v18 = vadd.f32 %v6639_v37, %v18497_v16  ;;  %7441 = vmatpush.bf16.msrb.mxu2 %v12954_v63  ;;  %7360 = vmatpush.bf16.msrb.mxu0 %v12942_v26  ;;  %v21274_v63 = vld [vmem:[#allocation101_spill] sm:$0xff] }
 0x6a6   : > { %v6679_v29 = vpop.f32.mrf.mxu2  ;;  %v6720_v25 = vpop.f32.mrf.mxu3 }
 0x6a7   : > { %v6680_v53 = vadd.f32 %v6679_v29, %v18765_v30  ;;  %v6599_v15 = vpop.f32.mrf.mxu0  ;;  %v6640_v4 = vpop.f32.mrf.mxu1  ;;  %v21275_v29 = vld [vmem:[#allocation102_spill] sm:$0xff] }
 0x6a9   : > { %v6721_v21 = vadd.f32 %v6720_v25, %v6680_v53  ;;  %v14567_v53 = vld [vmem:[%s20781_s7 + $0x3c4] sm:$0xf] }
 0x6ab   : > { %v19013_v16 = vadd.f32 %v6721_v21, %v18509_v47  ;;  %v21273_v47 = vld [vmem:[#allocation93_spill] sm:$0xff] }
 0x6ae   : > { %v6681_v17 = vpop.f32.mrf.mxu2  ;;  %v6722_v49 = vpop.f32.mrf.mxu3 }
 0x6af   : > { %v6601_v30 = vpop.f32.mrf.mxu0  ;;  %v6642_v10 = vpop.f32.mrf.mxu1  ;;  %v12933_v49 = vld [vmem:[%s20781_s7 + $0x3c0] sm:$0xf] }
 0x6b0   : > { %v6602_v23 = vadd.f32 %v6601_v30, %v18777_v24  ;;  %v12943_v24 = vld [vmem:[%s20781_s7 + $0x3d8] sm:$0xf0]  ;;  %v14568_v30 = vld [vmem:[%s20781_s7 + $0x3c4] sm:$0xf0] }
 0x6b1   : > { %v12946_v5 = vor.u32 %v14569_v3, %v12943_v24  ;;  %v21276_v24 = vld [vmem:[#allocation104_spill] sm:$0xff] }
 0x6b2   : > { %v6643_v11 = vadd.f32 %v6642_v10, %v6602_v23  ;;  %7023 = vmatmul.bf16.gmra.mxu0 %v21272_v7  ;;  %12919 = vmatmul.msk.bf16.gmra.mxu1 %vm2265_vm4, %v21273_v47  ;;  %v12934_v10 = vor.u32 %v14568_v30, %v12933_v49  ;;  %v14684_v49 = vld [vmem:[%s20782_s8 + $0x4e4] sm:$0xf0] }
 0x6b3   : > { %7105 = vmatmul.bf16.gmra.mxu2 %v21272_v7  ;;  %12927 = vmatmul.msk.bf16.gmra.mxu3 %vm2265_vm4, %v21273_v47 }
 0x6b4   : > { %v19029_v6 = vadd.f32 %v6643_v11, %v18525_v33  ;;  %7442 = vmatpush.bf16.msrb.mxu2 %v12946_v5  ;;  %7361 = vmatpush.bf16.msrb.mxu0 %v12934_v10  ;;  %v13215_v5 = vld [vmem:[%s20782_s8 + $0x4f8] sm:$0xf0] }
 0x6b6   : > { %v6683_v48 = vpop.f32.mrf.mxu2  ;;  %v6724_v33 = vpop.f32.mrf.mxu3 }
 0x6b7   : > { %v6684_v8 = vadd.f32 %v6683_v48, %v18795_v34  ;;  %v6603_v2 = vpop.f32.mrf.mxu0  ;;  %v6644_v46 = vpop.f32.mrf.mxu1  ;;  %v12997_v34 = vld [vmem:[%s20781_s7 + $0x440] sm:$0xf]  ;;  %v13218_v48 = vor.u32 %v14685_v42, %v13215_v5  ;;  %v13239_v5 = vld [vmem:[%s20782_s8 + $0x528] sm:$0xf0] }
 0x6b8   : > { %v12998_v43 = vor.u32 %v14584_v12, %v12997_v34  ;;  %v13245_v34 = vld [vmem:[%s20782_s8 + $0x530] sm:$0xf] }
 0x6b9   : > { %v6725_v20 = vadd.f32 %v6724_v33, %v6684_v8  ;;  %v13247_v33 = vld [vmem:[%s20782_s8 + $0x538] sm:$0xf0] }
 0x6ba   : > { %7402 = vmatpush.bf16.msrb.mxu1 %v12998_v43 }
 0x6bb   : > { %v19045_v32 = vadd.f32 %v6725_v20, %v18543_v9 }
 0x6be   : > { %v6685_v9 = vpop.f32.mrf.mxu2  ;;  %v6726_v37 = vpop.f32.mrf.mxu3 }
 0x6bf   : > { %v6605_v28 = vpop.f32.mrf.mxu0  ;;  %v6646_v19 = vpop.f32.mrf.mxu1 }
 0x6c0   : > { %v6606_v35 = vadd.f32 %v6605_v28, %v18813_v41  ;;  %v12935_v41 = vld [vmem:[%s20781_s7 + $0x3c8] sm:$0xf0] }
 0x6c1   : > { %v12938_v15 = vor.u32 %v14567_v53, %v12935_v41  ;;  %v21279_v53 = vld [vmem:[#allocation109_spill] sm:$0xff]  ;;  %v13207_v41 = vld [vmem:[%s20782_s8 + $0x4e8] sm:$0xf0] }
 0x6c2   : > { %v6647_v36 = vadd.f32 %v6646_v19, %v6606_v35  ;;  %7027 = vmatmul.bf16.gmra.mxu0 %v21274_v63  ;;  %12920 = vmatmul.msk.bf16.gmra.mxu1 %vm2265_vm4, %v21275_v29 }
 0x6c3   : > { %7109 = vmatmul.bf16.gmra.mxu2 %v21274_v63  ;;  %12928 = vmatmul.msk.bf16.gmra.mxu3 %vm2265_vm4, %v21275_v29  ;;  %v21278_v29 = vld [vmem:[#allocation108_spill] sm:$0xff] }
 0x6c4   : > { %v19067_v25 = vadd.f32 %v6647_v36, %v18565_v62  ;;  %7443 = vmatpush.bf16.msrb.mxu2 %v12938_v15 }
 0x6c6   : > { %v6687_v4 = vpop.f32.mrf.mxu2  ;;  %v6728_v21 = vpop.f32.mrf.mxu3 }
 0x6c7   : > { %v6688_v60 = vadd.f32 %v6687_v4, %v18825_v39  ;;  %v6607_v55 = vpop.f32.mrf.mxu0  ;;  %v6648_v59 = vpop.f32.mrf.mxu1 }
 0x6c8   : > { %7914 = vmatpush.bf16.msra.mxu2 %v13218_v48 }
 0x6c9   : > { %v6729_v17 = vadd.f32 %v6728_v21, %v6688_v60 }
 0x6cb   : > { %v19077_v62 = vadd.f32 %v6729_v17, %v18577_v27  ;;  %v21277_v27 = vld [vmem:[#allocation107_spill] sm:$0xff]  ;;  %v13205_v17 = vld [vmem:[%s20782_s8 + $0x4e0] sm:$0xf] }
 0x6cc   : > { %v13206_v30 = vor.u32 %v14684_v49, %v13205_v17 }
 0x6ce   : > { %v6689_v23 = vpop.f32.mrf.mxu2  ;;  %v6730_v11 = vpop.f32.mrf.mxu3 }
 0x6cf   : > { %v6609_v39 = vpop.f32.mrf.mxu0  ;;  %v6650_v7 = vpop.f32.mrf.mxu1 }
 0x6d0   : > { %v6610_v47 = vadd.f32 %v6609_v39, %v18837_v13  ;;  %v14693_v13 = vld [vmem:[%s20782_s8 + $0x534] sm:$0xf] }
 0x6d1   : > { %v13250_v50 = vor.u32 %v14693_v13, %v13247_v33 }
 0x6d2   : > { %v6651_v3 = vadd.f32 %v6650_v7, %v6610_v47  ;;  %7031 = vmatmul.bf16.gmra.mxu0 %v21276_v24  ;;  %12921 = vmatmul.msk.bf16.gmra.mxu1 %vm2265_vm4, %v21277_v27  ;;  %v21280_v47 = vld [vmem:[#allocation11_spill] sm:$0xff] }
 0x6d3   : > { %7113 = vmatmul.bf16.gmra.mxu2 %v21276_v24  ;;  %12929 = vmatmul.msk.bf16.gmra.mxu3 %vm2265_vm4, %v21277_v27  ;;  %v13199_v24 = vld [vmem:[%s20782_s8 + $0x4d8] sm:$0xf0]  ;;  %v14691_v27 = vld [vmem:[%s20782_s8 + $0x524] sm:$0xf] }
 0x6d4   : > { %v19102_v1 = vadd.f32 %v6651_v3, %v18602_v31  ;;  %7959 = vmatpush.bf16.msra.mxu3 %v13250_v50  ;;  %v14686_v31 = vld [vmem:[%s20782_s8 + $0x4f4] sm:$0xf0]  ;;  %v21281_v3 = vld [vmem:[#allocation12_spill] sm:$0xff]  ;;  %v13242_v13 = vor.u32 %v14691_v27, %v13239_v5 }
 0x6d5   : > { %v13214_v26 = vor.u32 %v14686_v31, %v13213_v52  ;;  %v14692_v31 = vld [vmem:[%s20782_s8 + $0x524] sm:$0xf0] }
 0x6d6   : > { %v6691_v8 = vpop.f32.mrf.mxu2  ;;  %v6732_v2 = vpop.f32.mrf.mxu3 }
 0x6d7   : > { %v6692_v46 = vadd.f32 %v6691_v8, %v18855_v45  ;;  %v6611_v20 = vpop.f32.mrf.mxu0  ;;  %v6652_v40 = vpop.f32.mrf.mxu1  ;;  %v14694_v45 = vld [vmem:[%s20782_s8 + $0x534] sm:$0xf0]  ;;  %7832 = vmatpush.bf16.msra.mxu0 %v13214_v26 }
 0x6d8   : > { %v13246_v43 = vor.u32 %v14694_v45, %v13245_v34  ;;  %7960 = vmatpush.bf16.msra.mxu3 %v13242_v13  ;;  %v14682_v20 = vld [vmem:[%s20782_s8 + $0x4d4] sm:$0xf0]  ;;  %v13237_v40 = vld [vmem:[%s20782_s8 + $0x520] sm:$0xf] }
 0x6d9   : > { %v6733_v12 = vadd.f32 %v6732_v2, %v6692_v46  ;;  %v13197_v46 = vld [vmem:[%s20782_s8 + $0x4d0] sm:$0xf]  ;;  %v13238_v34 = vor.u32 %v14692_v31, %v13237_v40 }
 0x6da   : > { %7877 = vmatpush.bf16.msra.mxu1 %v13246_v43  ;;  %v13198_v52 = vor.u32 %v14682_v20, %v13197_v46  ;;  %v14690_v46 = vld [vmem:[%s20782_s8 + $0x514] sm:$0xf0] }
 0x6db   : > { %v19121_v9 = vadd.f32 %v6733_v12, %v18623_v58  ;;  %v14683_v58 = vld [vmem:[%s20782_s8 + $0x4e4] sm:$0xf]  ;;  %7833 = vmatpush.bf16.msra.mxu0 %v13206_v30 }
 0x6dc   : > { %v13210_v15 = vor.u32 %v14683_v58, %v13207_v41 }
 0x6de   : > { %v6693_v37 = vpop.f32.mrf.mxu2  ;;  %v6734_v28 = vpop.f32.mrf.mxu3  ;;  %7915 = vmatpush.bf16.msra.mxu2 %v13210_v15  ;;  %7878 = vmatpush.bf16.msra.mxu1 %v13238_v34 }
 0x6df   : > { %v6613_v19 = vpop.f32.mrf.mxu0  ;;  %v6654_v35 = vpop.f32.mrf.mxu1  ;;  %7834 = vmatpush.bf16.msra.mxu0 %v13198_v52  ;;  %v21282_v28 = vld [vmem:[#allocation20_spill] sm:$0xff] }
 0x6e0   : > { %v6614_v36 = vadd.f32 %v6613_v19, %v18873_v44  ;;  %v21283_v19 = vld [vmem:[#allocation21_spill] sm:$0xff] }
 0x6e2   : > { %v6655_v63 = vadd.f32 %v6654_v35, %v6614_v36  ;;  %7035 = vmatmul.bf16.gmra.mxu0 %v21278_v29  ;;  %12922 = vmatmul.msk.bf16.gmra.mxu1 %vm2265_vm4, %v21279_v53  ;;  %v14679_v35 = vld [vmem:[%s20782_s8 + $0x4c4] sm:$0xf]  ;;  %v13191_v36 = vld [vmem:[%s20782_s8 + $0x4c8] sm:$0xf0] }
 0x6e3   : > { %7117 = vmatmul.bf16.gmra.mxu2 %v21278_v29  ;;  %12930 = vmatmul.msk.bf16.gmra.mxu3 %vm2265_vm4, %v21279_v53 }
 0x6e4   : > { %v19137_v44 = vadd.f32 %v6655_v63, %v18643_v54  ;;  %v13194_v63 = vor.u32 %v14679_v35, %v13191_v36 }
 0x6e6   : > { %v6695_v4 = vpop.f32.mrf.mxu2  ;;  %v6736_v21 = vpop.f32.mrf.mxu3 }
 0x6e7   : > { %v6696_v60 = vadd.f32 %v6695_v4, %v18885_v57  ;;  %v6615_v55 = vpop.f32.mrf.mxu0  ;;  %v6656_v59 = vpop.f32.mrf.mxu1  ;;  %v13189_v4 = vld [vmem:[%s20782_s8 + $0x4c0] sm:$0xf] }
 0x6e9   : > { %v6737_v10 = vadd.f32 %v6736_v21, %v6696_v60  ;;  %v14680_v21 = vld [vmem:[%s20782_s8 + $0x4c4] sm:$0xf0] }
 0x6ea   : > { %v13190_v60 = vor.u32 %v14680_v21, %v13189_v4 }
 0x6eb   : > { %v19147_v54 = vadd.f32 %v6737_v10, %v18655_v14  ;;  %v14681_v14 = vld [vmem:[%s20782_s8 + $0x4d4] sm:$0xf]  ;;  %v21284_v10 = vld [vmem:[#allocation22_spill] sm:$0xff] }
 0x6ec   : > { %v13202_v42 = vor.u32 %v14681_v14, %v13199_v24  ;;  %7835 = vmatpush.bf16.msra.mxu0 %v13190_v60 }
 0x6ee   : > { %v6697_v23 = vpop.f32.mrf.mxu2  ;;  %v6738_v11 = vpop.f32.mrf.mxu3  ;;  %7916 = vmatpush.bf16.msra.mxu2 %v13202_v42 }
 0x6ef   : > { %v7008_v39 = vpop.f32.mrf.mxu0  ;;  %v7049_v57 = vpop.f32.mrf.mxu1  ;;  %v21285_v23 = vld [vmem:[#allocation30_spill] sm:$0xff]  ;;  %v14677_v11 = vld [vmem:[%s20782_s8 + $0x4b4] sm:$0xf] }
 0x6f0   : > { %v19149_v7 = vadd.f32 %v7049_v57, %v7008_v39  ;;  %v13183_v39 = vld [vmem:[%s20782_s8 + $0x4b8] sm:$0xf0]  ;;  %v14689_v57 = vld [vmem:[%s20782_s8 + $0x514] sm:$0xf] }
 0x6f2   : > { %7362 = vmatmul.bf16.vlgmr.msrb.gmra.mxu0 %v21280_v47  ;;  %13027 = vmatmul.msk.bf16.vlgmr.msrb.gmra.mxu1 %vm2265_vm4, %v21281_v3 }
 0x6f3   : > { %7444 = vmatmul.bf16.vlgmr.msrb.gmra.mxu2 %v21280_v47  ;;  %13035 = vmatmul.msk.bf16.vlgmr.msrb.gmra.mxu3 %vm2265_vm4, %v21281_v3  ;;  %v13186_v47 = vor.u32 %v14677_v11, %v13183_v39  ;;  %v13231_v3 = vld [vmem:[%s20782_s8 + $0x518] sm:$0xf0]  ;;  %v14687_v39 = vld [vmem:[%s20782_s8 + $0x504] sm:$0xf] }
 0x6f4   : > { %7917 = vmatpush.bf16.msra.mxu2 %v13194_v63  ;;  %v13234_v14 = vor.u32 %v14689_v57, %v13231_v3  ;;  %v13167_v11 = vld [vmem:[%s20782_s8 + $0x498] sm:$0xf0] }
 0x6f6   : > { %v7090_v48 = vpop.f32.mrf.mxu2  ;;  %v7131_v33 = vpop.f32.mrf.mxu3  ;;  %7961 = vmatpush.bf16.msra.mxu3 %v13234_v14 }
 0x6f7   : > { %v19169_v50 = vadd.f32 %v7131_v33, %v7090_v48  ;;  %v7010_v8 = vpop.f32.mrf.mxu0  ;;  %v7051_v2 = vpop.f32.mrf.mxu1  ;;  %v13181_v48 = vld [vmem:[%s20782_s8 + $0x4b0] sm:$0xf]  ;;  %v14678_v33 = vld [vmem:[%s20782_s8 + $0x4b4] sm:$0xf0] }
 0x6f8   : > { %7918 = vmatpush.bf16.msra.mxu2 %v13186_v47  ;;  %v13229_v8 = vld [vmem:[%s20782_s8 + $0x510] sm:$0xf]  ;;  %v13182_v2 = vor.u32 %v14678_v33, %v13181_v48  ;;  %v13223_v47 = vld [vmem:[%s20782_s8 + $0x508] sm:$0xf0]  ;;  %v14674_v33 = vld [vmem:[%s20782_s8 + $0x494] sm:$0xf0] }
 0x6f9   : > { %v13230_v20 = vor.u32 %v14690_v46, %v13229_v8  ;;  %v13226_v3 = vor.u32 %v14687_v39, %v13223_v47  ;;  %v13165_v48 = vld [vmem:[%s20782_s8 + $0x490] sm:$0xf]  ;;  %v13221_v8 = vld [vmem:[%s20782_s8 + $0x500] sm:$0xf]  ;;  %v14688_v46 = vld [vmem:[%s20782_s8 + $0x504] sm:$0xf0] }
 0x6fa   : > { %7836 = vmatpush.bf16.msra.mxu0 %v13182_v2  ;;  %v13166_v2 = vor.u32 %v14674_v33, %v13165_v48  ;;  %v21293_v39 = vld [vmem:[#allocation58_spill] sm:$0xff]  ;;  %v13391_v47 = vld [vmem:[%s20781_s7 + $0x4f8] sm:$0xf0] }
 0x6fb   : > { %7879 = vmatpush.bf16.msra.mxu1 %v13230_v20  ;;  %7962 = vmatpush.bf16.msra.mxu3 %v13226_v3  ;;  %v13222_v20 = vor.u32 %v14688_v46, %v13221_v8  ;;  %v14653_v3 = vld [vmem:[%s20781_s7 + $0x534] sm:$0xf]  ;;  %v13389_v46 = vld [vmem:[%s20781_s7 + $0x4f0] sm:$0xf] }
 0x6fe   : > { %v7092_v26 = vpop.f32.mrf.mxu2  ;;  %v7133_v45 = vpop.f32.mrf.mxu3 }
 0x6ff   : > { %v7012_v12 = vpop.f32.mrf.mxu0  ;;  %v7053_v43 = vpop.f32.mrf.mxu1  ;;  %v21286_v45 = vld [vmem:[#allocation32_spill] sm:$0xff]  ;;  %7880 = vmatpush.bf16.msra.mxu1 %v13222_v20  ;;  %v14646_v20 = vld [vmem:[%s20781_s7 + $0x4f4] sm:$0xf0] }
 0x700   : > { %v19183_v37 = vadd.f32 %v7053_v43, %v7012_v12  ;;  %v21287_v12 = vld [vmem:[#allocation33_spill] sm:$0xff]  ;;  %v14675_v43 = vld [vmem:[%s20782_s8 + $0x4a4] sm:$0xf] }
 0x702   : > { %7366 = vmatmul.bf16.gmra.mxu0 %v21282_v28  ;;  %13028 = vmatmul.msk.bf16.gmra.mxu1 %vm2265_vm4, %v21283_v19 }
 0x703   : > { %7448 = vmatmul.bf16.gmra.mxu2 %v21282_v28  ;;  %13036 = vmatmul.msk.bf16.gmra.mxu3 %vm2265_vm4, %v21283_v19  ;;  %v13175_v28 = vld [vmem:[%s20782_s8 + $0x4a8] sm:$0xf0] }
 0x704   : > { %v13178_v19 = vor.u32 %v14675_v43, %v13175_v28  ;;  %v21291_v43 = vld [vmem:[#allocation56_spill] sm:$0xff]  ;;  %v14671_v28 = vld [vmem:[%s20782_s8 + $0x484] sm:$0xf] }
 0x706   : > { %v7094_v29 = vpop.f32.mrf.mxu2  ;;  %v7135_v53 = vpop.f32.mrf.mxu3  ;;  %7919 = vmatpush.bf16.msra.mxu2 %v13178_v19  ;;  %v13159_v19 = vld [vmem:[%s20782_s8 + $0x488] sm:$0xf0] }
 0x707   : > { %v19197_v58 = vadd.f32 %v7135_v53, %v7094_v29  ;;  %v7014_v41 = vpop.f32.mrf.mxu0  ;;  %v7055_v15 = vpop.f32.mrf.mxu1 }
 0x708   : > { %v13173_v41 = vld [vmem:[%s20782_s8 + $0x4a0] sm:$0xf]  ;;  %v14676_v15 = vld [vmem:[%s20782_s8 + $0x4a4] sm:$0xf0] }
 0x709   : > { %v13174_v4 = vor.u32 %v14676_v15, %v13173_v41 }
 0x70b   : > { %7837 = vmatpush.bf16.msra.mxu0 %v13174_v4  ;;  %v13157_v4 = vld [vmem:[%s20782_s8 + $0x480] sm:$0xf] }
 0x70e   : > { %v7096_v55 = vpop.f32.mrf.mxu2  ;;  %v7137_v59 = vpop.f32.mrf.mxu3 }
 0x70f   : > { %v7016_v17 = vpop.f32.mrf.mxu0  ;;  %v7057_v49 = vpop.f32.mrf.mxu1  ;;  %7838 = vmatpush.bf16.msra.mxu0 %v13166_v2 }
 0x710   : > { %v19205_v30 = vadd.f32 %v7057_v49, %v7016_v17  ;;  %v21288_v49 = vld [vmem:[#allocation39_spill] sm:$0xff] }
 0x712   : > { %7370 = vmatmul.bf16.gmra.mxu0 %v21284_v10  ;;  %13029 = vmatmul.msk.bf16.gmra.mxu1 %vm2265_vm4, %v21285_v23 }
 0x713   : > { %7452 = vmatmul.bf16.gmra.mxu2 %v21284_v10  ;;  %13037 = vmatmul.msk.bf16.gmra.mxu3 %vm2265_vm4, %v21285_v23  ;;  %v21289_v10 = vld [vmem:[#allocation40_spill] sm:$0xff] }
 0x714   : > { %v14673_v23 = vld [vmem:[%s20782_s8 + $0x494] sm:$0xf] }
 0x715   : > { %v13170_v57 = vor.u32 %v14673_v23, %v13167_v11  ;;  %v21292_v11 = vld [vmem:[#allocation57_spill] sm:$0xff] }
 0x716   : > { %v7098_v24 = vpop.f32.mrf.mxu2  ;;  %v7139_v27 = vpop.f32.mrf.mxu3 }
 0x717   : > { %v19225_v42 = vadd.f32 %v7139_v27, %v7098_v24  ;;  %v7018_v5 = vpop.f32.mrf.mxu0  ;;  %v7059_v13 = vpop.f32.mrf.mxu1  ;;  %7920 = vmatpush.bf16.msra.mxu2 %v13170_v57  ;;  %v14645_v57 = vld [vmem:[%s20781_s7 + $0x4f4] sm:$0xf] }
 0x71e   : > { %v7100_v40 = vpop.f32.mrf.mxu2  ;;  %v7141_v52 = vpop.f32.mrf.mxu3 }
 0x71f   : > { %v7020_v31 = vpop.f32.mrf.mxu0  ;;  %v7061_v34 = vpop.f32.mrf.mxu1 }
 0x720   : > { %v19239_v26 = vadd.f32 %v7061_v34, %v7020_v31 }
 0x722   : > { %7374 = vmatmul.bf16.gmra.mxu0 %v21286_v45  ;;  %13030 = vmatmul.msk.bf16.gmra.mxu1 %vm2265_vm4, %v21287_v12 }
 0x723   : > { %7456 = vmatmul.bf16.gmra.mxu2 %v21286_v45  ;;  %13038 = vmatmul.msk.bf16.gmra.mxu3 %vm2265_vm4, %v21287_v12  ;;  %v21290_v12 = vld [vmem:[#allocation53_spill] sm:$0xff] }
 0x726   : > { %v7102_v35 = vpop.f32.mrf.mxu2  ;;  %v7143_v36 = vpop.f32.mrf.mxu3 }
 0x727   : > { %v19253_v63 = vadd.f32 %v7143_v36, %v7102_v35  ;;  %v7022_v29 = vpop.f32.mrf.mxu0  ;;  %v7063_v53 = vpop.f32.mrf.mxu1  ;;  %v13162_v35 = vor.u32 %v14671_v28, %v13159_v19 }
 0x729   : > { %7921 = vmatpush.bf16.msra.mxu2 %v13162_v35 }
 0x72e   : > { %v7104_v21 = vpop.f32.mrf.mxu2  ;;  %v7145_v60 = vpop.f32.mrf.mxu3 }
 0x72f   : > { %v7024_v55 = vpop.f32.mrf.mxu0  ;;  %v7065_v59 = vpop.f32.mrf.mxu1  ;;  %v14672_v21 = vld [vmem:[%s20782_s8 + $0x484] sm:$0xf0] }
 0x730   : > { %v19261_v17 = vadd.f32 %v7065_v59, %v7024_v55  ;;  %v13158_v60 = vor.u32 %v14672_v21, %v13157_v4 }
 0x732   : > { %7378 = vmatmul.bf16.gmra.mxu0 %v21288_v49  ;;  %13031 = vmatmul.msk.bf16.gmra.mxu1 %vm2265_vm4, %v21289_v10 }
 0x733   : > { %7460 = vmatmul.bf16.gmra.mxu2 %v21288_v49  ;;  %13039 = vmatmul.msk.bf16.gmra.mxu3 %vm2265_vm4, %v21289_v10 }
 0x734   : > { %7839 = vmatpush.bf16.msra.mxu0 %v13158_v60 }
 0x736   : > { %v7106_v14 = vpop.f32.mrf.mxu2  ;;  %v7147_v24 = vpop.f32.mrf.mxu3 }
 0x737   : > { %v19281_v27 = vadd.f32 %v7147_v24, %v7106_v14  ;;  %v7026_v5 = vpop.f32.mrf.mxu0  ;;  %v7067_v13 = vpop.f32.mrf.mxu1  ;;  %v13394_v14 = vor.u32 %v14645_v57, %v13391_v47  ;;  %v13423_v24 = vld [vmem:[%s20781_s7 + $0x538] sm:$0xf0]  ;;  %v14656_v57 = vld [vmem:[#allocation3 + $0x24] sm:$0xf0]  ;;  %v13095_v47 = vld [vmem:[#allocation3 + $0x28] sm:$0xf0] }
 0x738   : > { %v13426_v48 = vor.u32 %v14653_v3, %v13423_v24 }
 0x739   : > { %8294 = vmatpush.bf16.msrb.mxu2 %v13394_v14 }
 0x73a   : > { %8339 = vmatpush.bf16.msrb.mxu3 %v13426_v48  ;;  %v14655_v48 = vld [vmem:[#allocation3 + $0x24] sm:$0xf] }
 0x73e   : > { %v7108_v40 = vpop.f32.mrf.mxu2  ;;  %v7149_v52 = vpop.f32.mrf.mxu3 }
 0x73f   : > { %v7028_v31 = vpop.f32.mrf.mxu0  ;;  %v7069_v34 = vpop.f32.mrf.mxu1  ;;  %v13421_v40 = vld [vmem:[%s20781_s7 + $0x530] sm:$0xf]  ;;  %v13390_v52 = vor.u32 %v14646_v20, %v13389_v46  ;;  %v13098_v46 = vor.u32 %v14655_v48, %v13095_v47 }
 0x740   : > { %v19295_v45 = vadd.f32 %v7069_v34, %v7028_v31  ;;  %v14654_v31 = vld [vmem:[%s20781_s7 + $0x534] sm:$0xf0] }
 0x741   : > { %v13422_v34 = vor.u32 %v14654_v31, %v13421_v40  ;;  %8212 = vmatpush.bf16.msrb.mxu0 %v13390_v52  ;;  %v14641_v52 = vld [vmem:[%s20781_s7 + $0x4d4] sm:$0xf]  ;;  %v14651_v31 = vld [vmem:[%s20781_s7 + $0x524] sm:$0xf] }
 0x742   : > { %7382 = vmatmul.bf16.gmra.mxu0 %v21290_v12  ;;  %13032 = vmatmul.msk.bf16.gmra.mxu1 %vm2265_vm4, %v21291_v43 }
 0x743   : > { %7464 = vmatmul.bf16.gmra.mxu2 %v21290_v12  ;;  %13040 = vmatmul.msk.bf16.gmra.mxu3 %vm2265_vm4, %v21291_v43 }
 0x744   : > { %8257 = vmatpush.bf16.msrb.mxu1 %v13422_v34 }
 0x746   : > { %v7110_v36 = vpop.f32.mrf.mxu2  ;;  %v7151_v29 = vpop.f32.mrf.mxu3 }
 0x747   : > { %v19309_v53 = vadd.f32 %v7151_v29, %v7110_v36  ;;  %v7030_v41 = vpop.f32.mrf.mxu0  ;;  %v7071_v15 = vpop.f32.mrf.mxu1  ;;  %v21294_v36 = vld [vmem:[#allocation59_spill] sm:$0xff]  ;;  %v21295_v29 = vld [vmem:[#allocation60_spill] sm:$0xff] }
 0x748   : > { %v14643_v41 = vld [vmem:[%s20781_s7 + $0x4e4] sm:$0xf]  ;;  %v13383_v15 = vld [vmem:[%s20781_s7 + $0x4e8] sm:$0xf0] }
 0x749   : > { %v13386_v4 = vor.u32 %v14643_v41, %v13383_v15 }
 0x74b   : > { %8295 = vmatpush.bf16.msrb.mxu2 %v13386_v4  ;;  %v13373_v4 = vld [vmem:[%s20781_s7 + $0x4d0] sm:$0xf] }
 0x74e   : > { %v7112_v55 = vpop.f32.mrf.mxu2  ;;  %v7153_v59 = vpop.f32.mrf.mxu3 }
 0x74f   : > { %v7032_v49 = vpop.f32.mrf.mxu0  ;;  %v7073_v10 = vpop.f32.mrf.mxu1 }
 0x750   : > { %v19317_v23 = vadd.f32 %v7073_v10, %v7032_v49  ;;  %v13381_v10 = vld [vmem:[%s20781_s7 + $0x4e0] sm:$0xf] }
 0x752   : > { %7386 = vmatmul.bf16.gmra.mxu0 %v21292_v11  ;;  %13033 = vmatmul.msk.bf16.gmra.mxu1 %vm2265_vm4, %v21293_v39 }
 0x753   : > { %7468 = vmatmul.bf16.gmra.mxu2 %v21292_v11  ;;  %13041 = vmatmul.msk.bf16.gmra.mxu3 %vm2265_vm4, %v21293_v39  ;;  %v14644_v11 = vld [vmem:[%s20781_s7 + $0x4e4] sm:$0xf0] }
 0x754   : > { %v13382_v39 = vor.u32 %v14644_v11, %v13381_v10 }
 0x756   : > { %v7114_v5 = vpop.f32.mrf.mxu2  ;;  %v7155_v13 = vpop.f32.mrf.mxu3  ;;  %8213 = vmatpush.bf16.msrb.mxu0 %v13382_v39 }
 0x757   : > { %v19337_v33 = vadd.f32 %v7155_v13, %v7114_v5  ;;  %v7034_v8 = vpop.f32.mrf.mxu0  ;;  %v7075_v2 = vpop.f32.mrf.mxu1  ;;  %v13093_v13 = vld [vmem:[#allocation3 + $0x20] sm:$0xf] }
 0x758   : > { %v13094_v2 = vor.u32 %v14656_v57, %v13093_v13 }
 0x75e   : > { %v7116_v12 = vpop.f32.mrf.mxu2  ;;  %v7157_v43 = vpop.f32.mrf.mxu3 }
 0x75f   : > { %v7036_v28 = vpop.f32.mrf.mxu0  ;;  %v7077_v19 = vpop.f32.mrf.mxu1  ;;  %v13415_v12 = vld [vmem:[%s20781_s7 + $0x528] sm:$0xf0] }
 0x760   : > { %v19351_v35 = vadd.f32 %v7077_v19, %v7036_v28  ;;  %v13418_v28 = vor.u32 %v14651_v31, %v13415_v12 }
 0x762   : > { %7390 = vmatmul.bf16.gmra.mxu0 %v21294_v36  ;;  %13034 = vmatmul.msk.bf16.gmra.mxu1 %vm2265_vm4, %v21295_v29 }
 0x763   : > { %7472 = vmatmul.bf16.gmra.mxu2 %v21294_v36  ;;  %13042 = vmatmul.msk.bf16.gmra.mxu3 %vm2265_vm4, %v21295_v29 }
 0x764   : > { %8340 = vmatpush.bf16.msrb.mxu3 %v13418_v28 }
 0x766   : > { %v7118_v21 = vpop.f32.mrf.mxu2  ;;  %v7159_v60 = vpop.f32.mrf.mxu3 }
 0x767   : > { %v19365_v55 = vadd.f32 %v7159_v60, %v7118_v21  ;;  %v7038_v59 = vpop.f32.mrf.mxu0  ;;  %v7079_v49 = vpop.f32.mrf.mxu1  ;;  %v14642_v21 = vld [vmem:[%s20781_s7 + $0x4d4] sm:$0xf0] }
 0x768   : > { %v13374_v60 = vor.u32 %v14642_v21, %v13373_v4  ;;  %v14652_v59 = vld [vmem:[%s20781_s7 + $0x524] sm:$0xf0]  ;;  %v14658_v49 = vld [vmem:[#allocation3 + $0x34] sm:$0xf0] }
 0x769   : > { %v13109_v21 = vld [vmem:[#allocation3 + $0x40] sm:$0xf] }
 0x76a   : > { %8214 = vmatpush.bf16.msrb.mxu0 %v13374_v60 }
 0x76e   : > { %v7120_v3 = vpop.f32.mrf.mxu2  ;;  %v7161_v14 = vpop.f32.mrf.mxu3 }
 0x76f   : > { %v7363_v24 = vpop.f32.mrf.mxu0  ;;  %v7404_v5 = vpop.f32.mrf.mxu1  ;;  %v13101_v3 = vld [vmem:[#allocation3 + $0x30] sm:$0xf]  ;;  %v14657_v14 = vld [vmem:[#allocation3 + $0x34] sm:$0xf] }
 0x770   : > { %v7364_v8 = vadd.f32 %v7363_v24, %v19149_v7  ;;  %v13375_v7 = vld [vmem:[%s20781_s7 + $0x4d8] sm:$0xf0] }
 0x771   : > { %v13378_v34 = vor.u32 %v14641_v52, %v13375_v7 }
 0x772   : > { %v7405_v20 = vadd.f32 %v7404_v5, %v7364_v8  ;;  %7840 = vmatmul.bf16.vlgmr.msra.gmra.mxu0 %v13094_v2  ;;  %13251 = vmatmul.msk.bf16.vlgmr.msra.gmra.mxu1 %vm2265_vm4, %v13098_v46  ;;  %v13102_v5 = vor.u32 %v14658_v49, %v13101_v3 }
 0x773   : > { %7922 = vmatmul.bf16.vlgmr.msra.gmra.mxu2 %v13094_v2  ;;  %13259 = vmatmul.msk.bf16.vlgmr.msra.gmra.mxu3 %vm2265_vm4, %v13098_v46  ;;  %v14639_v2 = vld [vmem:[%s20781_s7 + $0x4c4] sm:$0xf] }
 0x774   : > { %v19377_v40 = vadd.f32 %v7405_v20, %v18901_v56  ;;  %8296 = vmatpush.bf16.msrb.mxu2 %v13378_v34 }
 0x776   : > { %v7445_v43 = vpop.f32.mrf.mxu2  ;;  %v7486_v56 = vpop.f32.mrf.mxu3 }
 0x777   : > { %v7446_v19 = vadd.f32 %v7445_v43, %v19169_v50  ;;  %v7365_v36 = vpop.f32.mrf.mxu0  ;;  %v7406_v29 = vpop.f32.mrf.mxu1  ;;  %v13413_v50 = vld [vmem:[%s20781_s7 + $0x520] sm:$0xf] }
 0x778   : > { %v13414_v10 = vor.u32 %v14652_v59, %v13413_v50  ;;  %v13365_v43 = vld [vmem:[%s20781_s7 + $0x4c0] sm:$0xf]  ;;  %v13111_v36 = vld [vmem:[#allocation3 + $0x48] sm:$0xf0]  ;;  %v14659_v50 = vld [vmem:[#allocation3 + $0x44] sm:$0xf] }
 0x779   : > { %v7487_v41 = vadd.f32 %v7486_v56, %v7446_v19  ;;  %v14640_v56 = vld [vmem:[%s20781_s7 + $0x4c4] sm:$0xf0]  ;;  %v14660_v19 = vld [vmem:[#allocation3 + $0x44] sm:$0xf0]  ;;  %v13114_v59 = vor.u32 %v14659_v50, %v13111_v36 }
 0x77a   : > { %8258 = vmatpush.bf16.msrb.mxu1 %v13414_v10  ;;  %v13366_v28 = vor.u32 %v14640_v56, %v13365_v43  ;;  %v13110_v60 = vor.u32 %v14660_v19, %v13109_v21  ;;  %v14637_v10 = vld [vmem:[%s20781_s7 + $0x4b4] sm:$0xf]  ;;  %v13117_v56 = vld [vmem:[#allocation3 + $0x50] sm:$0xf] }
 0x77b   : > { %v19393_v15 = vadd.f32 %v7487_v41, %v18917_v22  ;;  %v13103_v22 = vld [vmem:[#allocation3 + $0x38] sm:$0xf0] }
 0x77c   : > { %v13106_v13 = vor.u32 %v14657_v14, %v13103_v22  ;;  %8215 = vmatpush.bf16.msrb.mxu0 %v13366_v28  ;;  %v14661_v28 = vld [vmem:[#allocation3 + $0x54] sm:$0xf] }
 0x77e   : > { %v7447_v11 = vpop.f32.mrf.mxu2  ;;  %v7488_v39 = vpop.f32.mrf.mxu3 }
 0x77f   : > { %v7367_v57 = vpop.f32.mrf.mxu0  ;;  %v7408_v47 = vpop.f32.mrf.mxu1  ;;  %v14649_v11 = vld [vmem:[%s20781_s7 + $0x514] sm:$0xf] }
 0x780   : > { %v7368_v24 = vadd.f32 %v7367_v57, %v19183_v37  ;;  %v13367_v37 = vld [vmem:[%s20781_s7 + $0x4c8] sm:$0xf0]  ;;  %v13407_v57 = vld [vmem:[%s20781_s7 + $0x518] sm:$0xf0] }
 0x781   : > { %v13370_v46 = vor.u32 %v14639_v2, %v13367_v37  ;;  %v13410_v3 = vor.u32 %v14649_v11, %v13407_v57  ;;  %v13357_v2 = vld [vmem:[%s20781_s7 + $0x4b0] sm:$0xf]  ;;  %v14638_v37 = vld [vmem:[%s20781_s7 + $0x4b4] sm:$0xf0]  ;;  %v14636_v11 = vld [vmem:[%s20781_s7 + $0x4a4] sm:$0xf0] }
 0x782   : > { %v7409_v48 = vadd.f32 %v7408_v47, %v7368_v24  ;;  %7844 = vmatmul.bf16.gmra.mxu0 %v13102_v5  ;;  %13252 = vmatmul.msk.bf16.gmra.mxu1 %vm2265_vm4, %v13106_v13  ;;  %v14664_v57 = vld [vmem:[#allocation3 + $0x64] sm:$0xf0] }
 0x783   : > { %7926 = vmatmul.bf16.gmra.mxu2 %v13102_v5  ;;  %13260 = vmatmul.msk.bf16.gmra.mxu3 %vm2265_vm4, %v13106_v13 }
 0x784   : > { %v19411_v8 = vadd.f32 %v7409_v48, %v18939_v0  ;;  %8297 = vmatpush.bf16.msrb.mxu2 %v13370_v46  ;;  %8341 = vmatpush.bf16.msrb.mxu3 %v13410_v3  ;;  %v13358_v46 = vor.u32 %v14638_v37, %v13357_v2 }
 0x786   : > { %v7449_v20 = vpop.f32.mrf.mxu2  ;;  %v7490_v52 = vpop.f32.mrf.mxu3  ;;  %8216 = vmatpush.bf16.msrb.mxu0 %v13358_v46  ;;  %v14633_v46 = vld [vmem:[%s20781_s7 + $0x494] sm:$0xf] }
 0x787   : > { %v7450_v7 = vadd.f32 %v7449_v20, %v19197_v58  ;;  %v7369_v31 = vpop.f32.mrf.mxu0  ;;  %v7410_v34 = vpop.f32.mrf.mxu1  ;;  %v14650_v20 = vld [vmem:[%s20781_s7 + $0x514] sm:$0xf0] }
 0x789   : > { %v7491_v12 = vadd.f32 %v7490_v52, %v7450_v7  ;;  %v14662_v52 = vld [vmem:[#allocation3 + $0x54] sm:$0xf0] }
 0x78a   : > { %v13118_v36 = vor.u32 %v14662_v52, %v13117_v56 }
 0x78b   : > { %v19421_v0 = vadd.f32 %v7491_v12, %v18949_v51 }
 0x78e   : > { %v7451_v29 = vpop.f32.mrf.mxu2  ;;  %v7492_v58 = vpop.f32.mrf.mxu3 }
 0x78f   : > { %v7371_v41 = vpop.f32.mrf.mxu0  ;;  %v7412_v4 = vpop.f32.mrf.mxu1 }
 0x790   : > { %v7372_v51 = vadd.f32 %v7371_v41, %v19205_v30  ;;  %v13359_v30 = vld [vmem:[%s20781_s7 + $0x4b8] sm:$0xf0] }
 0x791   : > { %v13362_v39 = vor.u32 %v14637_v10, %v13359_v30  ;;  %v13349_v30 = vld [vmem:[%s20781_s7 + $0x4a0] sm:$0xf] }
 0x792   : > { %v7413_v49 = vadd.f32 %v7412_v4, %v7372_v51  ;;  %7848 = vmatmul.bf16.gmra.mxu0 %v13110_v60  ;;  %13253 = vmatmul.msk.bf16.gmra.mxu1 %vm2265_vm4, %v13114_v59  ;;  %v14635_v4 = vld [vmem:[%s20781_s7 + $0x4a4] sm:$0xf] }
 0x793   : > { %7930 = vmatmul.bf16.gmra.mxu2 %v13110_v60  ;;  %13261 = vmatmul.msk.bf16.gmra.mxu3 %vm2265_vm4, %v13114_v59 }
 0x794   : > { %v19433_v22 = vadd.f32 %v7413_v49, %v18965_v38  ;;  %8298 = vmatpush.bf16.msrb.mxu2 %v13362_v39  ;;  %v13350_v39 = vor.u32 %v14636_v11, %v13349_v30 }
 0x796   : > { %v7453_v47 = vpop.f32.mrf.mxu2  ;;  %v7494_v38 = vpop.f32.mrf.mxu3  ;;  %8217 = vmatpush.bf16.msrb.mxu0 %v13350_v39 }
 0x797   : > { %v7454_v14 = vadd.f32 %v7453_v47, %v19225_v42  ;;  %v7373_v24 = vpop.f32.mrf.mxu0  ;;  %v7414_v5 = vpop.f32.mrf.mxu1  ;;  %v13405_v42 = vld [vmem:[%s20781_s7 + $0x510] sm:$0xf]  ;;  %v13127_v47 = vld [vmem:[#allocation3 + $0x68] sm:$0xf0] }
 0x798   : > { %v13406_v7 = vor.u32 %v14650_v20, %v13405_v42  ;;  %v13125_v24 = vld [vmem:[#allocation3 + $0x60] sm:$0xf]  ;;  %v14663_v5 = vld [vmem:[#allocation3 + $0x64] sm:$0xf]  ;;  %v14647_v20 = vld [vmem:[%s20781_s7 + $0x504] sm:$0xf] }
 0x799   : > { %v7495_v13 = vadd.f32 %v7494_v38, %v7454_v14  ;;  %v13130_v2 = vor.u32 %v14663_v5, %v13127_v47  ;;  %v14631_v47 = vld [vmem:[%s20781_s7 + $0x484] sm:$0xf] }
 0x79a   : > { %8259 = vmatpush.bf16.msrb.mxu1 %v13406_v7 }
 0x79b   : > { %v19449_v48 = vadd.f32 %v7495_v13, %v18981_v61  ;;  %v13119_v61 = vld [vmem:[#allocation3 + $0x58] sm:$0xf0]  ;;  %v13126_v13 = vor.u32 %v14664_v57, %v13125_v24 }
 0x79c   : > { %v13122_v29 = vor.u32 %v14661_v28, %v13119_v61  ;;  %v13399_v61 = vld [vmem:[%s20781_s7 + $0x508] sm:$0xf0] }
 0x79e   : > { %v7455_v31 = vpop.f32.mrf.mxu2  ;;  %v7496_v34 = vpop.f32.mrf.mxu3 }
 0x79f   : > { %v7375_v12 = vpop.f32.mrf.mxu0  ;;  %v7416_v43 = vpop.f32.mrf.mxu1  ;;  %v13402_v31 = vor.u32 %v14647_v20, %v13399_v61 }
 0x7a0   : > { %v7376_v19 = vadd.f32 %v7375_v12, %v19239_v26  ;;  %v13351_v26 = vld [vmem:[%s20781_s7 + $0x4a8] sm:$0xf0] }
 0x7a1   : > { %v13354_v21 = vor.u32 %v14635_v4, %v13351_v26  ;;  %8342 = vmatpush.bf16.msrb.mxu3 %v13402_v31  ;;  %v14666_v4 = vld [vmem:[#allocation3 + $0x74] sm:$0xf0] }
 0x7a2   : > { %v7417_v58 = vadd.f32 %v7416_v43, %v7376_v19  ;;  %7852 = vmatmul.bf16.gmra.mxu0 %v13118_v36  ;;  %13254 = vmatmul.msk.bf16.gmra.mxu1 %vm2265_vm4, %v13122_v29  ;;  %v13341_v19 = vld [vmem:[%s20781_s7 + $0x490] sm:$0xf] }
 0x7a3   : > { %7934 = vmatmul.bf16.gmra.mxu2 %v13118_v36  ;;  %13262 = vmatmul.msk.bf16.gmra.mxu3 %vm2265_vm4, %v13122_v29  ;;  %v14634_v36 = vld [vmem:[%s20781_s7 + $0x494] sm:$0xf0] }
 0x7a4   : > { %v19467_v41 = vadd.f32 %v7417_v58, %v19003_v18  ;;  %8299 = vmatpush.bf16.msrb.mxu2 %v13354_v21  ;;  %v13342_v29 = vor.u32 %v14634_v36, %v13341_v19  ;;  %v14648_v58 = vld [vmem:[%s20781_s7 + $0x504] sm:$0xf0] }
 0x7a6   : > { %v7457_v50 = vpop.f32.mrf.mxu2  ;;  %v7498_v51 = vpop.f32.mrf.mxu3  ;;  %8218 = vmatpush.bf16.msrb.mxu0 %v13342_v29 }
 0x7a7   : > { %v7458_v60 = vadd.f32 %v7457_v50, %v19253_v63  ;;  %v7377_v59 = vpop.f32.mrf.mxu0  ;;  %v7418_v49 = vpop.f32.mrf.mxu1 }
 0x7a8   : > { %v13133_v59 = vld [vmem:[#allocation3 + $0x70] sm:$0xf]  ;;  %v14665_v49 = vld [vmem:[#allocation3 + $0x74] sm:$0xf] }
 0x7a9   : > { %v7499_v10 = vadd.f32 %v7498_v51, %v7458_v60  ;;  %v13134_v30 = vor.u32 %v14666_v4, %v13133_v59 }
 0x7ab   : > { %v19477_v18 = vadd.f32 %v7499_v10, %v19013_v16 }
 0x7ae   : > { %v7459_v38 = vpop.f32.mrf.mxu2  ;;  %v7500_v63 = vpop.f32.mrf.mxu3 }
 0x7af   : > { %v7379_v3 = vpop.f32.mrf.mxu0  ;;  %v7420_v14 = vpop.f32.mrf.mxu1 }
 0x7b0   : > { %v7380_v16 = vadd.f32 %v7379_v3, %v19261_v17  ;;  %v13343_v17 = vld [vmem:[%s20781_s7 + $0x498] sm:$0xf0] }
 0x7b1   : > { %v13346_v52 = vor.u32 %v14633_v46, %v13343_v17  ;;  %v14668_v46 = vld [vmem:[#allocation3 + $0x84] sm:$0xf0]  ;;  %v13143_v17 = vld [vmem:[#allocation3 + $0x88] sm:$0xf0] }
 0x7b2   : > { %v7421_v37 = vadd.f32 %v7420_v14, %v7380_v16  ;;  %7856 = vmatmul.bf16.gmra.mxu0 %v13126_v13  ;;  %13255 = vmatmul.msk.bf16.gmra.mxu1 %vm2265_vm4, %v13130_v2 }
 0x7b3   : > { %7938 = vmatmul.bf16.gmra.mxu2 %v13126_v13  ;;  %13263 = vmatmul.msk.bf16.gmra.mxu3 %vm2265_vm4, %v13130_v2  ;;  %v13333_v13 = vld [vmem:[%s20781_s7 + $0x480] sm:$0xf]  ;;  %v14632_v2 = vld [vmem:[%s20781_s7 + $0x484] sm:$0xf0] }
 0x7b4   : > { %v19489_v42 = vadd.f32 %v7421_v37, %v19029_v6  ;;  %8300 = vmatpush.bf16.msrb.mxu2 %v13346_v52  ;;  %v13334_v37 = vor.u32 %v14632_v2, %v13333_v13  ;;  %v13599_v13 = vld [vmem:[%s20782_s8 + $0x5a8] sm:$0xf0] }
 0x7b6   : > { %v7461_v7 = vpop.f32.mrf.mxu2  ;;  %v7502_v6 = vpop.f32.mrf.mxu3  ;;  %8219 = vmatpush.bf16.msrb.mxu0 %v13334_v37 }
 0x7b7   : > { %v7462_v34 = vadd.f32 %v7461_v7, %v19281_v27  ;;  %v7381_v12 = vpop.f32.mrf.mxu0  ;;  %v7422_v43 = vpop.f32.mrf.mxu1  ;;  %v13397_v27 = vld [vmem:[%s20781_s7 + $0x500] sm:$0xf]  ;;  %v13141_v7 = vld [vmem:[#allocation3 + $0x80] sm:$0xf] }
 0x7b8   : > { %v13398_v26 = vor.u32 %v14648_v58, %v13397_v27  ;;  %v13142_v31 = vor.u32 %v14668_v46, %v13141_v7  ;;  %v14761_v43 = vld [vmem:[%s20782_s8 + $0x5b4] sm:$0xf]  ;;  %v13639_v27 = vld [vmem:[%s20782_s8 + $0x5f8] sm:$0xf0] }
 0x7b9   : > { %v7503_v56 = vadd.f32 %v7502_v6, %v7462_v34  ;;  %v14667_v6 = vld [vmem:[#allocation3 + $0x84] sm:$0xf] }
 0x7ba   : > { %8260 = vmatpush.bf16.msrb.mxu1 %v13398_v26  ;;  %v13146_v34 = vor.u32 %v14667_v6, %v13143_v17 }
 0x7bb   : > { %v19505_v28 = vadd.f32 %v7503_v56, %v19045_v32  ;;  %v13135_v32 = vld [vmem:[#allocation3 + $0x78] sm:$0xf0]  ;;  %v13607_v56 = vld [vmem:[%s20782_s8 + $0x5b8] sm:$0xf0] }
 0x7bc   : > { %v13138_v11 = vor.u32 %v14665_v49, %v13135_v32  ;;  %v13610_v36 = vor.u32 %v14761_v43, %v13607_v56  ;;  %v13269_v56 = vld [vmem:[#allocation2 + $0x20] sm:$0xf] }
 0x7be   : > { %v7463_v21 = vpop.f32.mrf.mxu2  ;;  %v7504_v50 = vpop.f32.mrf.mxu3 }
 0x7bf   : > { %v7383_v51 = vpop.f32.mrf.mxu0  ;;  %v7424_v60 = vpop.f32.mrf.mxu1  ;;  %v13605_v50 = vld [vmem:[%s20782_s8 + $0x5b0] sm:$0xf] }
 0x7c0   : > { %v7384_v10 = vadd.f32 %v7383_v51, %v19295_v45  ;;  %v13335_v45 = vld [vmem:[%s20781_s7 + $0x488] sm:$0xf0]  ;;  %v13637_v51 = vld [vmem:[%s20782_s8 + $0x5f0] sm:$0xf] }
 0x7c1   : > { %v13338_v38 = vor.u32 %v14631_v47, %v13335_v45 }
 0x7c2   : > { %v7425_v39 = vadd.f32 %v7424_v60, %v7384_v10  ;;  %7860 = vmatmul.bf16.gmra.mxu0 %v13134_v30  ;;  %13256 = vmatmul.msk.bf16.gmra.mxu1 %vm2265_vm4, %v13138_v11 }
 0x7c3   : > { %7942 = vmatmul.bf16.gmra.mxu2 %v13134_v30  ;;  %13264 = vmatmul.msk.bf16.gmra.mxu3 %vm2265_vm4, %v13138_v11  ;;  %v14670_v30 = vld [vmem:[#allocation3 + $0x94] sm:$0xf0]  ;;  %v13151_v11 = vld [vmem:[#allocation3 + $0x98] sm:$0xf0] }
 0x7c4   : > { %v19523_v57 = vadd.f32 %v7425_v39, %v19067_v25  ;;  %8301 = vmatpush.bf16.msrb.mxu2 %v13338_v38 }
 0x7c6   : > { %v7465_v63 = vpop.f32.mrf.mxu2  ;;  %v7506_v3 = vpop.f32.mrf.mxu3 }
 0x7c7   : > { %v7466_v14 = vadd.f32 %v7465_v63, %v19309_v53  ;;  %v7385_v24 = vpop.f32.mrf.mxu0  ;;  %v7426_v5 = vpop.f32.mrf.mxu1  ;;  %v13149_v63 = vld [vmem:[#allocation3 + $0x90] sm:$0xf] }
 0x7c8   : > { %8915 = vmatpush.bf16.msra.mxu2 %v13610_v36  ;;  %v13150_v24 = vor.u32 %v14670_v30, %v13149_v63  ;;  %v13629_v30 = vld [vmem:[%s20782_s8 + $0x5e0] sm:$0xf] }
 0x7c9   : > { %v7507_v16 = vadd.f32 %v7506_v3, %v7466_v14  ;;  %v14669_v3 = vld [vmem:[#allocation3 + $0x94] sm:$0xf] }
 0x7ca   : > { %v13154_v5 = vor.u32 %v14669_v3, %v13151_v11 }
 0x7cb   : > { %v19533_v25 = vadd.f32 %v7507_v16, %v19077_v62 }
 0x7ce   : > { %v7467_v20 = vpop.f32.mrf.mxu2  ;;  %v7508_v53 = vpop.f32.mrf.mxu3 }
 0x7cf   : > { %v7387_v52 = vpop.f32.mrf.mxu0  ;;  %v7428_v61 = vpop.f32.mrf.mxu1 }
 0x7d0   : > { %v7388_v62 = vadd.f32 %v7387_v52, %v19317_v23  ;;  %v14769_v23 = vld [vmem:[%s20782_s8 + $0x5f4] sm:$0xf]  ;;  %v13597_v52 = vld [vmem:[%s20782_s8 + $0x5a0] sm:$0xf] }
 0x7d1   : > { %v13642_v29 = vor.u32 %v14769_v23, %v13639_v27  ;;  %v14615_v23 = vld [vmem:[#allocation2 + $0x24] sm:$0xf] }
 0x7d2   : > { %v7429_v12 = vadd.f32 %v7428_v61, %v7388_v62  ;;  %7864 = vmatmul.bf16.gmra.mxu0 %v13142_v31  ;;  %13257 = vmatmul.msk.bf16.gmra.mxu1 %vm2265_vm4, %v13146_v34  ;;  %v14760_v61 = vld [vmem:[%s20782_s8 + $0x5a4] sm:$0xf0] }
 0x7d3   : > { %7946 = vmatmul.bf16.gmra.mxu2 %v13142_v31  ;;  %13265 = vmatmul.msk.bf16.gmra.mxu3 %vm2265_vm4, %v13146_v34  ;;  %v13598_v7 = vor.u32 %v14760_v61, %v13597_v52  ;;  %v14616_v62 = vld [vmem:[#allocation2 + $0x24] sm:$0xf0]  ;;  %v13271_v31 = vld [vmem:[#allocation2 + $0x28] sm:$0xf0] }
 0x7d4   : > { %v19554_v19 = vadd.f32 %v7429_v12, %v19102_v1  ;;  %8960 = vmatpush.bf16.msra.mxu3 %v13642_v29  ;;  %v14762_v1 = vld [vmem:[%s20782_s8 + $0x5b4] sm:$0xf0]  ;;  %v13270_v27 = vor.u32 %v14616_v62, %v13269_v56  ;;  %v13274_v29 = vor.u32 %v14615_v23, %v13271_v31  ;;  %v14756_v62 = vld [vmem:[%s20782_s8 + $0x584] sm:$0xf0] }
 0x7d5   : > { %v13606_v60 = vor.u32 %v14762_v1, %v13605_v50 }
 0x7d6   : > { %v7469_v58 = vpop.f32.mrf.mxu2  ;;  %v7510_v4 = vpop.f32.mrf.mxu3 }
 0x7d7   : > { %v7470_v32 = vadd.f32 %v7469_v58, %v19337_v33  ;;  %v7389_v26 = vpop.f32.mrf.mxu0  ;;  %v7430_v21 = vpop.f32.mrf.mxu1  ;;  %v14770_v33 = vld [vmem:[%s20782_s8 + $0x5f4] sm:$0xf0]  ;;  %8833 = vmatpush.bf16.msra.mxu0 %v13606_v60  ;;  %v13591_v58 = vld [vmem:[%s20782_s8 + $0x598] sm:$0xf0] }
 0x7d8   : > { %v13638_v49 = vor.u32 %v14770_v33, %v13637_v51  ;;  %v13631_v26 = vld [vmem:[%s20782_s8 + $0x5e8] sm:$0xf0] }
 0x7d9   : > { %v7511_v59 = vadd.f32 %v7510_v4, %v7470_v32  ;;  %v14767_v4 = vld [vmem:[%s20782_s8 + $0x5e4] sm:$0xf] }
 0x7da   : > { %8878 = vmatpush.bf16.msra.mxu1 %v13638_v49  ;;  %v13634_v21 = vor.u32 %v14767_v4, %v13631_v26  ;;  %v14758_v49 = vld [vmem:[%s20782_s8 + $0x594] sm:$0xf0]  ;;  %v13575_v26 = vld [vmem:[%s20782_s8 + $0x578] sm:$0xf0] }
 0x7db   : > { %v19573_v10 = vadd.f32 %v7511_v59, %v19121_v9  ;;  %v14759_v9 = vld [vmem:[%s20782_s8 + $0x5a4] sm:$0xf]  ;;  %8834 = vmatpush.bf16.msra.mxu0 %v13598_v7  ;;  %v13589_v59 = vld [vmem:[%s20782_s8 + $0x590] sm:$0xf] }
 0x7dc   : > { %8961 = vmatpush.bf16.msra.mxu3 %v13634_v21  ;;  %v13590_v11 = vor.u32 %v14758_v49, %v13589_v59  ;;  %v14765_v21 = vld [vmem:[%s20782_s8 + $0x5d4] sm:$0xf] }
 0x7de   : > { %v7471_v39 = vpop.f32.mrf.mxu2  ;;  %v7512_v47 = vpop.f32.mrf.mxu3 }
 0x7df   : > { %v7391_v45 = vpop.f32.mrf.mxu0  ;;  %v7432_v38 = vpop.f32.mrf.mxu1  ;;  %v14768_v39 = vld [vmem:[%s20782_s8 + $0x5e4] sm:$0xf0]  ;;  %8835 = vmatpush.bf16.msra.mxu0 %v13590_v11 }
 0x7e0   : > { %v7392_v14 = vadd.f32 %v7391_v45, %v19351_v35  ;;  %v13602_v35 = vor.u32 %v14759_v9, %v13599_v13  ;;  %v13630_v47 = vor.u32 %v14768_v39, %v13629_v30  ;;  %v14618_v45 = vld [vmem:[#allocation2 + $0x34] sm:$0xf0]  ;;  %v13573_v39 = vld [vmem:[%s20782_s8 + $0x570] sm:$0xf] }
 0x7e2   : > { %v7433_v16 = vadd.f32 %v7432_v38, %v7392_v14  ;;  %7868 = vmatmul.bf16.gmra.mxu0 %v13150_v24  ;;  %13258 = vmatmul.msk.bf16.gmra.mxu1 %vm2265_vm4, %v13154_v5  ;;  %v13279_v38 = vld [vmem:[#allocation2 + $0x38] sm:$0xf0] }
 0x7e3   : > { %7950 = vmatmul.bf16.gmra.mxu2 %v13150_v24  ;;  %13266 = vmatmul.msk.bf16.gmra.mxu3 %vm2265_vm4, %v13154_v5  ;;  %v13277_v5 = vld [vmem:[#allocation2 + $0x30] sm:$0xf] }
 0x7e4   : > { %v19585_v2 = vadd.f32 %v7433_v16, %v19137_v44  ;;  %8916 = vmatpush.bf16.msra.mxu2 %v13602_v35  ;;  %8879 = vmatpush.bf16.msra.mxu1 %v13630_v47  ;;  %v14617_v16 = vld [vmem:[#allocation2 + $0x34] sm:$0xf]  ;;  %v13278_v13 = vor.u32 %v14618_v45, %v13277_v5  ;;  %v14754_v47 = vld [vmem:[%s20782_s8 + $0x574] sm:$0xf0]  ;;  %v13621_v45 = vld [vmem:[%s20782_s8 + $0x5d0] sm:$0xf] }
 0x7e5   : > { %v13282_v35 = vor.u32 %v14617_v16, %v13279_v38  ;;  %v13574_v38 = vor.u32 %v14754_v47, %v13573_v39  ;;  %v13615_v47 = vld [vmem:[%s20782_s8 + $0x5c8] sm:$0xf0] }
 0x7e6   : > { %v7473_v37 = vpop.f32.mrf.mxu2  ;;  %v7514_v46 = vpop.f32.mrf.mxu3 }
 0x7e7   : > { %v7474_v17 = vadd.f32 %v7473_v37, %v19365_v55  ;;  %v7393_v20 = vpop.f32.mrf.mxu0  ;;  %v7434_v53 = vpop.f32.mrf.mxu1  ;;  %v14755_v37 = vld [vmem:[%s20782_s8 + $0x584] sm:$0xf] }
 0x7e9   : > { %v7515_v6 = vadd.f32 %v7514_v46, %v7474_v17  ;;  %v13583_v46 = vld [vmem:[%s20782_s8 + $0x588] sm:$0xf0] }
 0x7ea   : > { %v13586_v17 = vor.u32 %v14755_v37, %v13583_v46  ;;  %v13293_v37 = vld [vmem:[#allocation2 + $0x50] sm:$0xf]  ;;  %v14621_v46 = vld [vmem:[#allocation2 + $0x54] sm:$0xf] }
 0x7eb   : > { %v19595_v44 = vadd.f32 %v7515_v6, %v19147_v54  ;;  %v14757_v54 = vld [vmem:[%s20782_s8 + $0x594] sm:$0xf]  ;;  %v13581_v6 = vld [vmem:[%s20782_s8 + $0x580] sm:$0xf] }
 0x7ec   : > { %v13594_v32 = vor.u32 %v14757_v54, %v13591_v58  ;;  %v13582_v31 = vor.u32 %v14756_v62, %v13581_v6 }
 0x7ee   : > { %v7475_v34 = vpop.f32.mrf.mxu2  ;;  %v7516_v55 = vpop.f32.mrf.mxu3  ;;  %8917 = vmatpush.bf16.msra.mxu2 %v13594_v32  ;;  %8836 = vmatpush.bf16.msra.mxu0 %v13582_v31  ;;  %v14753_v32 = vld [vmem:[%s20782_s8 + $0x574] sm:$0xf] }
 0x7ef   : > { %v7841_v12 = vpop.f32.mrf.mxu0  ;;  %v7882_v43 = vpop.f32.mrf.mxu1  ;;  %v14620_v34 = vld [vmem:[#allocation2 + $0x44] sm:$0xf0]  ;;  %v13287_v55 = vld [vmem:[#allocation2 + $0x48] sm:$0xf0] }
 0x7f0   : > { %v19597_v36 = vadd.f32 %v7882_v43, %v7841_v12 }
 0x7f2   : > { %8220 = vmatmul.bf16.vlgmr.msrb.gmra.mxu0 %v13270_v27  ;;  %13427 = vmatmul.msk.bf16.vlgmr.msrb.gmra.mxu1 %vm2265_vm4, %v13274_v29 }
 0x7f3   : > { %8302 = vmatmul.bf16.vlgmr.msrb.gmra.mxu2 %v13270_v27  ;;  %13435 = vmatmul.msk.bf16.vlgmr.msrb.gmra.mxu3 %vm2265_vm4, %v13274_v29  ;;  %v13285_v27 = vld [vmem:[#allocation2 + $0x40] sm:$0xf]  ;;  %v14619_v29 = vld [vmem:[#allocation2 + $0x44] sm:$0xf] }
 0x7f4   : > { %8918 = vmatpush.bf16.msra.mxu2 %v13586_v17  ;;  %v13286_v58 = vor.u32 %v14620_v34, %v13285_v27  ;;  %v13290_v4 = vor.u32 %v14619_v29, %v13287_v55  ;;  %8837 = vmatpush.bf16.msra.mxu0 %v13574_v38  ;;  %v14624_v27 = vld [vmem:[#allocation2 + $0x64] sm:$0xf0]  ;;  %v13303_v29 = vld [vmem:[#allocation2 + $0x68] sm:$0xf0] }
 0x7f6   : > { %v7923_v50 = vpop.f32.mrf.mxu2  ;;  %v7964_v1 = vpop.f32.mrf.mxu3 }
 0x7f7   : > { %v19613_v51 = vadd.f32 %v7964_v1, %v7923_v50  ;;  %v7843_v60 = vpop.f32.mrf.mxu0  ;;  %v7884_v33 = vpop.f32.mrf.mxu1  ;;  %v13578_v50 = vor.u32 %v14753_v32, %v13575_v26  ;;  %v13623_v1 = vld [vmem:[%s20782_s8 + $0x5d8] sm:$0xf0] }
 0x7f8   : > { %v13626_v60 = vor.u32 %v14765_v21, %v13623_v1  ;;  %v13301_v21 = vld [vmem:[#allocation2 + $0x60] sm:$0xf] }
 0x7f9   : > { %8919 = vmatpush.bf16.msra.mxu2 %v13578_v50  ;;  %v14623_v50 = vld [vmem:[#allocation2 + $0x64] sm:$0xf] }
 0x7fa   : > { %8962 = vmatpush.bf16.msra.mxu3 %v13626_v60  ;;  %v13302_v60 = vor.u32 %v14624_v27, %v13301_v21  ;;  %v13551_v27 = vld [vmem:[%s20782_s8 + $0x548] sm:$0xf0] }
 0x7fe   : > { %v7925_v63 = vpop.f32.mrf.mxu2  ;;  %v7966_v3 = vpop.f32.mrf.mxu3 }
 0x7ff   : > { %v7845_v14 = vpop.f32.mrf.mxu0  ;;  %v7886_v24 = vpop.f32.mrf.mxu1  ;;  %v14766_v63 = vld [vmem:[%s20782_s8 + $0x5d4] sm:$0xf0] }
 0x800   : > { %v19627_v9 = vadd.f32 %v7886_v24, %v7845_v14  ;;  %v13622_v3 = vor.u32 %v14766_v63, %v13621_v45  ;;  %v14622_v14 = vld [vmem:[#allocation2 + $0x54] sm:$0xf0]  ;;  %v13295_v24 = vld [vmem:[#allocation2 + $0x58] sm:$0xf0] }
 0x802   : > { %8224 = vmatmul.bf16.gmra.mxu0 %v13278_v13  ;;  %13428 = vmatmul.msk.bf16.gmra.mxu1 %vm2265_vm4, %v13282_v35 }
 0x803   : > { %8306 = vmatmul.bf16.gmra.mxu2 %v13278_v13  ;;  %13436 = vmatmul.msk.bf16.gmra.mxu3 %vm2265_vm4, %v13282_v35 }
 0x804   : > { %8880 = vmatpush.bf16.msra.mxu1 %v13622_v3 }
 0x806   : > { %v7927_v20 = vpop.f32.mrf.mxu2  ;;  %v7968_v53 = vpop.f32.mrf.mxu3 }
 0x807   : > { %v19637_v52 = vadd.f32 %v7968_v53, %v7927_v20  ;;  %v7847_v61 = vpop.f32.mrf.mxu0  ;;  %v7888_v7 = vpop.f32.mrf.mxu1  ;;  %v13294_v20 = vor.u32 %v14622_v14, %v13293_v37  ;;  %v13298_v53 = vor.u32 %v14621_v46, %v13295_v24  ;;  %v14764_v37 = vld [vmem:[%s20782_s8 + $0x5c4] sm:$0xf0] }
 0x808   : > { %v14751_v61 = vld [vmem:[%s20782_s8 + $0x564] sm:$0xf]  ;;  %v13567_v7 = vld [vmem:[%s20782_s8 + $0x568] sm:$0xf0] }
 0x809   : > { %v13570_v6 = vor.u32 %v14751_v61, %v13567_v7 }
 0x80b   : > { %8920 = vmatpush.bf16.msra.mxu2 %v13570_v6 }
 0x80e   : > { %v7929_v12 = vpop.f32.mrf.mxu2  ;;  %v7970_v43 = vpop.f32.mrf.mxu3 }
 0x80f   : > { %v7849_v56 = vpop.f32.mrf.mxu0  ;;  %v7890_v23 = vpop.f32.mrf.mxu1  ;;  %v13565_v43 = vld [vmem:[%s20782_s8 + $0x560] sm:$0xf] }
 0x810   : > { %v19645_v54 = vadd.f32 %v7890_v23, %v7849_v56  ;;  %v14752_v56 = vld [vmem:[%s20782_s8 + $0x564] sm:$0xf0] }
 0x811   : > { %v13566_v23 = vor.u32 %v14752_v56, %v13565_v43 }
 0x812   : > { %8228 = vmatmul.bf16.gmra.mxu0 %v13286_v58  ;;  %13429 = vmatmul.msk.bf16.gmra.mxu1 %vm2265_vm4, %v13290_v4 }
 0x813   : > { %8310 = vmatmul.bf16.gmra.mxu2 %v13286_v58  ;;  %13437 = vmatmul.msk.bf16.gmra.mxu3 %vm2265_vm4, %v13290_v4 }
 0x814   : > { %8838 = vmatpush.bf16.msra.mxu0 %v13566_v23  ;;  %v14747_v23 = vld [vmem:[%s20782_s8 + $0x544] sm:$0xf] }
 0x816   : > { %v7931_v33 = vpop.f32.mrf.mxu2  ;;  %v7972_v59 = vpop.f32.mrf.mxu3 }
 0x817   : > { %v19661_v49 = vadd.f32 %v7972_v59, %v7931_v33  ;;  %v7851_v30 = vpop.f32.mrf.mxu0  ;;  %v7892_v11 = vpop.f32.mrf.mxu1  ;;  %v13306_v33 = vor.u32 %v14623_v50, %v13303_v29  ;;  %v14749_v59 = vld [vmem:[%s20782_s8 + $0x554] sm:$0xf]  ;;  %v13554_v29 = vor.u32 %v14747_v23, %v13551_v27  ;;  %v13549_v50 = vld [vmem:[%s20782_s8 + $0x540] sm:$0xf]  ;;  %v14732_v27 = vld [vmem:[%s20781_s7 + $0x5f4] sm:$0xf0] }
 0x818   : > { %v13559_v30 = vld [vmem:[%s20782_s8 + $0x558] sm:$0xf0]  ;;  %v14763_v11 = vld [vmem:[%s20782_s8 + $0x5c4] sm:$0xf] }
 0x819   : > { %v13562_v39 = vor.u32 %v14749_v59, %v13559_v30  ;;  %v13618_v45 = vor.u32 %v14763_v11, %v13615_v47  ;;  %v14628_v59 = vld [vmem:[#allocation2 + $0x84] sm:$0xf0]  ;;  %v13319_v30 = vld [vmem:[#allocation2 + $0x88] sm:$0xf0] }
 0x81b   : > { %8921 = vmatpush.bf16.msra.mxu2 %v13562_v39  ;;  %8963 = vmatpush.bf16.msra.mxu3 %v13618_v45 }
 0x81e   : > { %v7933_v5 = vpop.f32.mrf.mxu2  ;;  %v7974_v16 = vpop.f32.mrf.mxu3 }
 0x81f   : > { %v7853_v13 = vpop.f32.mrf.mxu0  ;;  %v7894_v35 = vpop.f32.mrf.mxu1  ;;  %v13557_v5 = vld [vmem:[%s20782_s8 + $0x550] sm:$0xf]  ;;  %v14750_v16 = vld [vmem:[%s20782_s8 + $0x554] sm:$0xf0]  ;;  %8922 = vmatpush.bf16.msra.mxu2 %v13554_v29 }
 0x820   : > { %v19675_v17 = vadd.f32 %v7894_v35, %v7853_v13  ;;  %v13613_v13 = vld [vmem:[%s20782_s8 + $0x5c0] sm:$0xf]  ;;  %v13558_v35 = vor.u32 %v14750_v16, %v13557_v5  ;;  %v14723_v16 = vld [vmem:[%s20781_s7 + $0x5b4] sm:$0xf]  ;;  %v14630_v29 = vld [vmem:[#allocation2 + $0x94] sm:$0xf0] }
 0x821   : > { %v13614_v46 = vor.u32 %v14764_v37, %v13613_v13  ;;  %v13775_v13 = vld [vmem:[%s20781_s7 + $0x5b8] sm:$0xf0] }
 0x822   : > { %8232 = vmatmul.bf16.gmra.mxu0 %v13294_v20  ;;  %13430 = vmatmul.msk.bf16.gmra.mxu1 %vm2265_vm4, %v13298_v53  ;;  %v13778_v37 = vor.u32 %v14723_v16, %v13775_v13  ;;  %v13495_v16 = vld [vmem:[#allocation3 + $0x38] sm:$0xf0]  ;;  %v13493_v13 = vld [vmem:[#allocation3 + $0x30] sm:$0xf] }
 0x823   : > { %8314 = vmatmul.bf16.gmra.mxu2 %v13294_v20  ;;  %13438 = vmatmul.msk.bf16.gmra.mxu3 %vm2265_vm4, %v13298_v53  ;;  %v14626_v20 = vld [vmem:[#allocation2 + $0x74] sm:$0xf0]  ;;  %v13311_v53 = vld [vmem:[#allocation2 + $0x78] sm:$0xf0] }
 0x824   : > { %8839 = vmatpush.bf16.msra.mxu0 %v13558_v35  ;;  %8881 = vmatpush.bf16.msra.mxu1 %v13614_v46  ;;  %v14731_v35 = vld [vmem:[%s20781_s7 + $0x5f4] sm:$0xf]  ;;  %v13807_v46 = vld [vmem:[%s20781_s7 + $0x5f8] sm:$0xf0] }
 0x825   : > { %9436 = vmatpush.bf16.msrb.mxu2 %v13778_v37 }
 0x826   : > { %v7935_v62 = vpop.f32.mrf.mxu2  ;;  %v7976_v31 = vpop.f32.mrf.mxu3 }
 0x827   : > { %v19685_v34 = vadd.f32 %v7976_v31, %v7935_v62  ;;  %v7855_v55 = vpop.f32.mrf.mxu0  ;;  %v7896_v12 = vpop.f32.mrf.mxu1  ;;  %v13309_v31 = vld [vmem:[#allocation2 + $0x70] sm:$0xf] }
 0x828   : > { %v14625_v55 = vld [vmem:[#allocation2 + $0x74] sm:$0xf]  ;;  %v13310_v43 = vor.u32 %v14626_v20, %v13309_v31  ;;  %v13773_v31 = vld [vmem:[%s20781_s7 + $0x5b0] sm:$0xf] }
 0x829   : > { %v13314_v56 = vor.u32 %v14625_v55, %v13311_v53  ;;  %v14724_v55 = vld [vmem:[%s20781_s7 + $0x5b4] sm:$0xf0] }
 0x82a   : > { %v13774_v23 = vor.u32 %v14724_v55, %v13773_v31 }
 0x82e   : > { %v7937_v58 = vpop.f32.mrf.mxu2  ;;  %v7978_v4 = vpop.f32.mrf.mxu3 }
 0x82f   : > { %v7857_v32 = vpop.f32.mrf.mxu0  ;;  %v7898_v26 = vpop.f32.mrf.mxu1 }
 0x830   : > { %v19693_v1 = vadd.f32 %v7898_v26, %v7857_v32 }
 0x832   : > { %8236 = vmatmul.bf16.gmra.mxu0 %v13302_v60  ;;  %13431 = vmatmul.msk.bf16.gmra.mxu1 %vm2265_vm4, %v13306_v33 }
 0x833   : > { %8318 = vmatmul.bf16.gmra.mxu2 %v13302_v60  ;;  %13439 = vmatmul.msk.bf16.gmra.mxu3 %vm2265_vm4, %v13306_v33  ;;  %v14748_v60 = vld [vmem:[%s20782_s8 + $0x544] sm:$0xf0] }
 0x834   : > { %v13550_v33 = vor.u32 %v14748_v60, %v13549_v50  ;;  %v8434_v50 = vld [vmem:[#allocation3 + $0x20] sm:$0xff] }
 0x836   : > { %v7939_v38 = vpop.f32.mrf.mxu2  ;;  %v7980_v63 = vpop.f32.mrf.mxu3  ;;  %8840 = vmatpush.bf16.msra.mxu0 %v13550_v33 }
 0x837   : > { %v19709_v3 = vadd.f32 %v7980_v63, %v7939_v38  ;;  %v7859_v14 = vpop.f32.mrf.mxu0  ;;  %v7900_v24 = vpop.f32.mrf.mxu1  ;;  %v13317_v38 = vld [vmem:[#allocation2 + $0x80] sm:$0xf]  ;;  %v14627_v63 = vld [vmem:[#allocation2 + $0x84] sm:$0xf] }
 0x838   : > { %v13318_v24 = vor.u32 %v14628_v59, %v13317_v38  ;;  %v13322_v5 = vor.u32 %v14627_v63, %v13319_v30  ;;  %v13325_v59 = vld [vmem:[#allocation2 + $0x90] sm:$0xf]  ;;  %v14629_v30 = vld [vmem:[#allocation2 + $0x94] sm:$0xf]  ;;  %v8493_v63 = vunpack.c.l.b16 %v8434_v50 }
 0x83a   : > { %9354 = vmatpush.bf16.msrb.mxu0 %v13774_v23 }
 0x83e   : > { %v7941_v61 = vpop.f32.mrf.mxu2  ;;  %v7982_v7 = vpop.f32.mrf.mxu3 }
 0x83f   : > { %v7861_v6 = vpop.f32.mrf.mxu0  ;;  %v7902_v62 = vpop.f32.mrf.mxu1  ;;  %v13810_v61 = vor.u32 %v14731_v35, %v13807_v46  ;;  %v14733_v46 = vld [vmem:[#allocation3 + $0x34] sm:$0xf] }
 0x840   : > { %v19723_v12 = vadd.f32 %v7902_v62, %v7861_v6 }
 0x841   : > { %9481 = vmatpush.bf16.msrb.mxu3 %v13810_v61 }
 0x842   : > { %8240 = vmatmul.bf16.gmra.mxu0 %v13310_v43  ;;  %13432 = vmatmul.msk.bf16.gmra.mxu1 %vm2265_vm4, %v13314_v56 }
 0x843   : > { %8322 = vmatmul.bf16.gmra.mxu2 %v13310_v43  ;;  %13440 = vmatmul.msk.bf16.gmra.mxu3 %vm2265_vm4, %v13314_v56  ;;  %v13805_v43 = vld [vmem:[%s20781_s7 + $0x5f0] sm:$0xf] }
 0x844   : > { %v19768_v56 = vld [vmem:[#allocation3 + $0x28] sm:$0xff] }
 0x846   : > { %v7943_v58 = vpop.f32.mrf.mxu2  ;;  %v7984_v4 = vpop.f32.mrf.mxu3 }
 0x847   : > { %v19733_v32 = vadd.f32 %v7984_v4, %v7943_v58  ;;  %v7863_v26 = vpop.f32.mrf.mxu0  ;;  %v7904_v21 = vpop.f32.mrf.mxu1  ;;  %v13327_v58 = vld [vmem:[#allocation2 + $0x98] sm:$0xf0]  ;;  %v13806_v4 = vor.u32 %v14732_v27, %v13805_v43 }
 0x848   : > { %v13330_v38 = vor.u32 %v14629_v30, %v13327_v58 }
 0x849   : > { %9399 = vmatpush.bf16.msrb.mxu1 %v13806_v4 }
 0x84e   : > { %v7945_v11 = vpop.f32.mrf.mxu2  ;;  %v7986_v39 = vpop.f32.mrf.mxu3 }
 0x84f   : > { %v7865_v47 = vpop.f32.mrf.mxu0  ;;  %v7906_v45 = vpop.f32.mrf.mxu1  ;;  %v21001_v11 = vunpack.c.l.b16 %v19768_v56  ;;  %v21000_v39 = vunpack.c.h.b16 %v19768_v56 }
 0x850   : > { %v19741_v14 = vadd.f32 %v7906_v45, %v7865_v47  ;;  %v13326_v45 = vor.u32 %v14630_v29, %v13325_v59 }
 0x851   : > { %v8527_v35 = vpack.c.b16 %v21001_v11, %v8493_v63 }
 0x852   : > { %8244 = vmatmul.bf16.gmra.mxu0 %v13318_v24  ;;  %13433 = vmatmul.msk.bf16.gmra.mxu1 %vm2265_vm4, %v13322_v5 }
 0x853   : > { %8326 = vmatmul.bf16.gmra.mxu2 %v13318_v24  ;;  %13441 = vmatmul.msk.bf16.gmra.mxu3 %vm2265_vm4, %v13322_v5  ;;  %v8494_v24 = vunpack.c.h.b16 %v8434_v50  ;;  %v14734_v5 = vld [vmem:[#allocation3 + $0x34] sm:$0xf0]  ;;  %v8548_v29 = vshll.u32 %v8527_v35, 16  ;;  %v8546_v30 = vshrl.u32 %v8527_v35, 16  ;;  %v14736_v35 = vld [vmem:[#allocation3 + $0x44] sm:$0xf0] }
 0x854   : > { %v19789_v61 = vor.u32 %v14734_v5, %v13493_v13 }
 0x855   : > { %v8528_v37 = vpack.c.b16 %v21000_v39, %v8494_v24 }
 0x856   : > { %v7947_v20 = vpop.f32.mrf.mxu2  ;;  %v7988_v53 = vpop.f32.mrf.mxu3  ;;  %v8553_v4 = vshll.u32 %v19789_v61, 16 }
 0x857   : > { %v19757_v7 = vadd.f32 %v7988_v53, %v7947_v20  ;;  %v7867_v6 = vpop.f32.mrf.mxu0  ;;  %v7908_v62 = vpop.f32.mrf.mxu1  ;;  %v14721_v20 = vld [vmem:[%s20781_s7 + $0x5a4] sm:$0xf]  ;;  %v13767_v53 = vld [vmem:[%s20781_s7 + $0x5a8] sm:$0xf0]  ;;  %v8560_v58 = vshll.u32 %v8528_v37, 16 }
 0x858   : > { %v19791_v6 = vor.u32 %v14733_v46, %v13495_v16  ;;  %v13770_v62 = vor.u32 %v14721_v20, %v13767_v53 }
 0x859   : > { %v8562_v50 = vrot.slane %v8560_v58, 1  ;;  %v13759_v58 = vld [vmem:[%s20781_s7 + $0x598] sm:$0xf0] }
 0x85a   : > { %9437 = vmatpush.bf16.msrb.mxu2 %v13770_v62 }
 0x85e   : > { %v7949_v26 = vpop.f32.mrf.mxu2  ;;  %v7990_v21 = vpop.f32.mrf.mxu3 }
 0x85f   : > { %v7869_v60 = vpop.f32.mrf.mxu0  ;;  %v7910_v33 = vpop.f32.mrf.mxu1  ;;  %v8565_v26 = vshll.u32 %v19791_v6, 16  ;;  %v8550_v21 = vrot.slane %v8548_v29, 1 }
 0x860   : > { %v19775_v47 = vadd.f32 %v7910_v33, %v7869_v60  ;;  %v13765_v60 = vld [vmem:[%s20781_s7 + $0x5a0] sm:$0xf]  ;;  %v14722_v33 = vld [vmem:[%s20781_s7 + $0x5a4] sm:$0xf0] }
 0x861   : > { %v13766_v59 = vor.u32 %v14722_v33, %v13765_v60  ;;  %v8567_v63 = vrot.slane %v8565_v26, 1  ;;  %v8551_v46 = vor.u32 %v8550_v21, %v8546_v30 }
 0x862   : > { %8248 = vmatmul.bf16.gmra.mxu0 %v13326_v45  ;;  %13434 = vmatmul.msk.bf16.gmra.mxu1 %vm2265_vm4, %v13330_v38 }
 0x863   : > { %8330 = vmatmul.bf16.gmra.mxu2 %v13326_v45  ;;  %13442 = vmatmul.msk.bf16.gmra.mxu3 %vm2265_vm4, %v13330_v38  ;;  %v8555_v45 = vrot.slane %v8553_v4, 1  ;;  %v8558_v38 = vshrl.u32 %v8528_v37, 16  ;;  %v13503_v37 = vld [vmem:[#allocation3 + $0x48] sm:$0xf0]  ;;  %v14729_v4 = vld [vmem:[%s20781_s7 + $0x5e4] sm:$0xf] }
 0x864   : > { %9355 = vmatpush.bf16.msrb.mxu0 %v13766_v59 }
 0x865   : > { %v8563_v20 = vor.u32 %v8562_v50, %v8558_v38  ;;  %v8556_v62 = vsel %vm2987_vm5, %v8551_v46, %v8555_v45 }
 0x866   : > { %v7951_v31 = vpop.f32.mrf.mxu2  ;;  %v7992_v55 = vpop.f32.mrf.mxu3 }
 0x867   : > { %v19793_v43 = vadd.f32 %v7992_v55, %v7951_v31  ;;  %v7871_v23 = vpop.f32.mrf.mxu0  ;;  %v7912_v27 = vpop.f32.mrf.mxu1  ;;  %v8568_v31 = vsel %vm2987_vm5, %v8563_v20, %v8567_v63  ;;  %v13757_v20 = vld [vmem:[%s20781_s7 + $0x590] sm:$0xf] }
 0x868   : > { %v13501_v23 = vld [vmem:[#allocation3 + $0x40] sm:$0xf]  ;;  %v14735_v27 = vld [vmem:[#allocation3 + $0x44] sm:$0xf] }
 0x869   : > { %v19820_v26 = vor.u32 %v14736_v35, %v13501_v23  ;;  %v19822_v21 = vor.u32 %v14735_v27, %v13503_v37  ;;  %v8577_v35 = vshrl.u32 %v19791_v6, 16 }
 0x86e   : > { %v7953_v24 = vpop.f32.mrf.mxu2  ;;  %v7994_v5 = vpop.f32.mrf.mxu3 }
 0x86f   : > { %v8221_v16 = vpop.f32.mrf.mxu0  ;;  %v8262_v13 = vpop.f32.mrf.mxu1 }
 0x870   : > { %v8222_v53 = vadd.f32 %v8221_v16, %v19597_v36  ;;  %v14719_v36 = vld [vmem:[%s20781_s7 + $0x594] sm:$0xf]  ;;  %v8573_v16 = vshll.u32 %v19820_v26, 16 }
 0x871   : > { %v13762_v50 = vor.u32 %v14719_v36, %v13759_v58 }
 0x872   : > { %v8263_v55 = vadd.f32 %v8262_v13, %v8222_v53  ;;  %8841 = vmatmul.bf16.vlgmr.msra.gmra.mxu0 %v8556_v62  ;;  %13643 = vmatmul.msk.bf16.vlgmr.msra.gmra.mxu1 %vm2265_vm4, %v8568_v31  ;;  %v8581_v13 = vshll.u32 %v19822_v21, 16  ;;  %v13797_v53 = vld [vmem:[%s20781_s7 + $0x5e0] sm:$0xf] }
 0x873   : > { %8923 = vmatmul.bf16.vlgmr.msra.gmra.mxu2 %v8556_v62  ;;  %13651 = vmatmul.msk.bf16.vlgmr.msra.gmra.mxu3 %vm2265_vm4, %v8568_v31  ;;  %v8569_v62 = vshrl.u32 %v19789_v61, 16 }
 0x874   : > { %v19809_v29 = vadd.f32 %v8263_v55, %v19377_v40  ;;  %v13799_v40 = vld [vmem:[%s20781_s7 + $0x5e8] sm:$0xf0]  ;;  %9438 = vmatpush.bf16.msrb.mxu2 %v13762_v50  ;;  %v8575_v55 = vrot.slane %v8573_v16, 1  ;;  %v8583_v37 = vrot.slane %v8581_v13, 1 }
 0x875   : > { %v13802_v59 = vor.u32 %v14729_v4, %v13799_v40  ;;  %v8571_v50 = vor.u32 %v8569_v62, %v8555_v45  ;;  %v8579_v40 = vor.u32 %v8577_v35, %v8567_v63  ;;  %v14737_v63 = vld [vmem:[#allocation3 + $0x54] sm:$0xf]  ;;  %v13751_v16 = vld [vmem:[%s20781_s7 + $0x588] sm:$0xf0] }
 0x876   : > { %v8303_v60 = vpop.f32.mrf.mxu2  ;;  %v8344_v33 = vpop.f32.mrf.mxu3 }
 0x877   : > { %v8304_v30 = vadd.f32 %v8303_v60, %v19613_v51  ;;  %v8223_v38 = vpop.f32.mrf.mxu0  ;;  %v8264_v24 = vpop.f32.mrf.mxu1  ;;  %9482 = vmatpush.bf16.msrb.mxu3 %v13802_v59  ;;  %v14720_v51 = vld [vmem:[%s20781_s7 + $0x594] sm:$0xf0]  ;;  %v8584_v59 = vsel %vm2987_vm5, %v8579_v40, %v8583_v37 }
 0x878   : > { %v13758_v31 = vor.u32 %v14720_v51, %v13757_v20  ;;  %v14738_v38 = vld [vmem:[#allocation3 + $0x54] sm:$0xf0]  ;;  %v13511_v24 = vld [vmem:[#allocation3 + $0x58] sm:$0xf0] }
 0x879   : > { %v8345_v5 = vadd.f32 %v8344_v33, %v8304_v30  ;;  %v8576_v33 = vsel %vm2987_vm5, %v8571_v50, %v8575_v55  ;;  %v19863_v20 = vor.u32 %v14737_v63, %v13511_v24  ;;  %v8585_v50 = vshrl.u32 %v19820_v26, 16 }
 0x87a   : > { %9356 = vmatpush.bf16.msrb.mxu0 %v13758_v31 }
 0x87b   : > { %v19831_v46 = vadd.f32 %v8345_v5, %v19393_v15  ;;  %v14730_v15 = vld [vmem:[%s20781_s7 + $0x5e4] sm:$0xf0]  ;;  %v13509_v5 = vld [vmem:[#allocation3 + $0x50] sm:$0xf]  ;;  %v8587_v24 = vor.u32 %v8585_v50, %v8575_v55 }
 0x87c   : > { %v13798_v23 = vor.u32 %v14730_v15, %v13797_v53  ;;  %v19861_v13 = vor.u32 %v14738_v38, %v13509_v5 }
 0x87e   : > { %v8305_v27 = vpop.f32.mrf.mxu2  ;;  %v8346_v36 = vpop.f32.mrf.mxu3  ;;  %9400 = vmatpush.bf16.msrb.mxu1 %v13798_v23  ;;  %v8589_v23 = vshll.u32 %v19861_v13, 16 }
 0x87f   : > { %v8225_v58 = vpop.f32.mrf.mxu0  ;;  %v8266_v4 = vpop.f32.mrf.mxu1  ;;  %v8597_v27 = vshll.u32 %v19863_v20, 16 }
 0x880   : > { %v8226_v60 = vadd.f32 %v8225_v58, %v19627_v9  ;;  %v14717_v9 = vld [vmem:[%s20781_s7 + $0x584] sm:$0xf]  ;;  %v13749_v58 = vld [vmem:[%s20781_s7 + $0x580] sm:$0xf]  ;;  %v8591_v40 = vrot.slane %v8589_v23, 1 }
 0x881   : > { %v13754_v51 = vor.u32 %v14717_v9, %v13751_v16 }
 0x882   : > { %v8267_v30 = vadd.f32 %v8266_v4, %v8226_v60  ;;  %8845 = vmatmul.bf16.gmra.mxu0 %v8576_v33  ;;  %13644 = vmatmul.msk.bf16.gmra.mxu1 %vm2265_vm4, %v8584_v59  ;;  %v14718_v4 = vld [vmem:[%s20781_s7 + $0x584] sm:$0xf0]  ;;  %v8593_v60 = vshrl.u32 %v19822_v21, 16  ;;  %v8592_v9 = vsel %vm2987_vm5, %v8587_v24, %v8591_v40 }
 0x883   : > { %8927 = vmatmul.bf16.gmra.mxu2 %v8576_v33  ;;  %13652 = vmatmul.msk.bf16.gmra.mxu3 %vm2265_vm4, %v8584_v59  ;;  %v8599_v33 = vrot.slane %v8597_v27, 1 }
 0x884   : > { %v19853_v45 = vadd.f32 %v8267_v30, %v19411_v8  ;;  %9439 = vmatpush.bf16.msrb.mxu2 %v13754_v51  ;;  %v8595_v5 = vor.u32 %v8593_v60, %v8583_v37  ;;  %v13743_v37 = vld [vmem:[%s20781_s7 + $0x578] sm:$0xf0] }
 0x886   : > { %v8307_v53 = vpop.f32.mrf.mxu2  ;;  %v8348_v62 = vpop.f32.mrf.mxu3  ;;  %v8600_v16 = vsel %vm2987_vm5, %v8595_v5, %v8599_v33  ;;  %v13741_v5 = vld [vmem:[%s20781_s7 + $0x570] sm:$0xf] }
 0x887   : > { %v8308_v31 = vadd.f32 %v8307_v53, %v19637_v52  ;;  %v8227_v8 = vpop.f32.mrf.mxu0  ;;  %v8268_v15 = vpop.f32.mrf.mxu1  ;;  %v13750_v52 = vor.u32 %v14718_v4, %v13749_v58  ;;  %v14740_v53 = vld [vmem:[#allocation3 + $0x64] sm:$0xf0] }
 0x888   : > { %v14739_v8 = vld [vmem:[#allocation3 + $0x64] sm:$0xf]  ;;  %v14727_v15 = vld [vmem:[%s20781_s7 + $0x5d4] sm:$0xf] }
 0x889   : > { %v8349_v35 = vadd.f32 %v8348_v62, %v8308_v31  ;;  %9357 = vmatpush.bf16.msrb.mxu0 %v13750_v52  ;;  %v13519_v62 = vld [vmem:[#allocation3 + $0x68] sm:$0xf0]  ;;  %v13517_v31 = vld [vmem:[#allocation3 + $0x60] sm:$0xf] }
 0x88a   : > { %v19898_v23 = vor.u32 %v14739_v8, %v13519_v62 }
 0x88b   : > { %v19869_v36 = vadd.f32 %v8349_v35, %v19421_v0  ;;  %v19896_v35 = vor.u32 %v14740_v53, %v13517_v31  ;;  %v8609_v53 = vshrl.u32 %v19863_v20, 16 }
 0x88e   : > { %v8309_v59 = vpop.f32.mrf.mxu2  ;;  %v8350_v30 = vpop.f32.mrf.mxu3 }
 0x88f   : > { %v8229_v0 = vpop.f32.mrf.mxu0  ;;  %v8270_v38 = vpop.f32.mrf.mxu1 }
 0x890   : > { %v8230_v63 = vadd.f32 %v8229_v0, %v19645_v54  ;;  %v14715_v54 = vld [vmem:[%s20781_s7 + $0x574] sm:$0xf]  ;;  %v8605_v0 = vshll.u32 %v19896_v35, 16 }
 0x891   : > { %v13746_v27 = vor.u32 %v14715_v54, %v13743_v37 }
 0x892   : > { %v8271_v51 = vadd.f32 %v8270_v38, %v8230_v63  ;;  %8849 = vmatmul.bf16.gmra.mxu0 %v8592_v9  ;;  %13645 = vmatmul.msk.bf16.gmra.mxu1 %vm2265_vm4, %v8600_v16  ;;  %v8613_v38 = vshll.u32 %v19898_v23, 16  ;;  %v13789_v63 = vld [vmem:[%s20781_s7 + $0x5d0] sm:$0xf] }
 0x893   : > { %8931 = vmatmul.bf16.gmra.mxu2 %v8592_v9  ;;  %13653 = vmatmul.msk.bf16.gmra.mxu3 %vm2265_vm4, %v8600_v16  ;;  %v8601_v9 = vshrl.u32 %v19861_v13, 16 }
 0x894   : > { %v19885_v55 = vadd.f32 %v8271_v51, %v19433_v22  ;;  %v13791_v22 = vld [vmem:[%s20781_s7 + $0x5d8] sm:$0xf0]  ;;  %9440 = vmatpush.bf16.msrb.mxu2 %v13746_v27  ;;  %v8607_v51 = vrot.slane %v8605_v0, 1  ;;  %v8615_v62 = vrot.slane %v8613_v38, 1  ;;  %v13735_v0 = vld [vmem:[%s20781_s7 + $0x568] sm:$0xf0] }
 0x895   : > { %v13794_v52 = vor.u32 %v14727_v15, %v13791_v22  ;;  %v8603_v27 = vor.u32 %v8601_v9, %v8591_v40  ;;  %v8611_v22 = vor.u32 %v8609_v53, %v8599_v33  ;;  %v14741_v33 = vld [vmem:[#allocation3 + $0x74] sm:$0xf] }
 0x896   : > { %v8311_v58 = vpop.f32.mrf.mxu2  ;;  %v8352_v4 = vpop.f32.mrf.mxu3 }
 0x897   : > { %v8312_v50 = vadd.f32 %v8311_v58, %v19661_v49  ;;  %v8231_v60 = vpop.f32.mrf.mxu0  ;;  %v8272_v59 = vpop.f32.mrf.mxu1  ;;  %9483 = vmatpush.bf16.msrb.mxu3 %v13794_v52  ;;  %v14716_v49 = vld [vmem:[%s20781_s7 + $0x574] sm:$0xf0]  ;;  %v8616_v52 = vsel %vm2987_vm5, %v8611_v22, %v8615_v62 }
 0x898   : > { %v13742_v16 = vor.u32 %v14716_v49, %v13741_v5  ;;  %v14742_v60 = vld [vmem:[#allocation3 + $0x74] sm:$0xf0]  ;;  %v13527_v59 = vld [vmem:[#allocation3 + $0x78] sm:$0xf0] }
 0x899   : > { %v8353_v30 = vadd.f32 %v8352_v4, %v8312_v50  ;;  %v8608_v4 = vsel %vm2987_vm5, %v8603_v27, %v8607_v51  ;;  %v19939_v5 = vor.u32 %v14741_v33, %v13527_v59  ;;  %v8617_v27 = vshrl.u32 %v19896_v35, 16 }
 0x89a   : > { %9358 = vmatpush.bf16.msrb.mxu0 %v13742_v16 }
 0x89b   : > { %v19907_v24 = vadd.f32 %v8353_v30, %v19449_v48  ;;  %v14728_v48 = vld [vmem:[%s20781_s7 + $0x5d4] sm:$0xf0]  ;;  %v8619_v59 = vor.u32 %v8617_v27, %v8607_v51 }
 0x89c   : > { %v13790_v31 = vor.u32 %v14728_v48, %v13789_v63  ;;  %v13525_v30 = vld [vmem:[#allocation3 + $0x70] sm:$0xf] }
 0x89d   : > { %v19937_v38 = vor.u32 %v14742_v60, %v13525_v30 }
 0x89e   : > { %v8313_v8 = vpop.f32.mrf.mxu2  ;;  %v8354_v54 = vpop.f32.mrf.mxu3  ;;  %9401 = vmatpush.bf16.msrb.mxu1 %v13790_v31 }
 0x89f   : > { %v8233_v37 = vpop.f32.mrf.mxu0  ;;  %v8274_v15 = vpop.f32.mrf.mxu1  ;;  %v8621_v31 = vshll.u32 %v19937_v38, 16  ;;  %v8629_v8 = vshll.u32 %v19939_v5, 16 }
 0x8a0   : > { %v8234_v58 = vadd.f32 %v8233_v37, %v19675_v17  ;;  %v14713_v17 = vld [vmem:[%s20781_s7 + $0x564] sm:$0xf]  ;;  %v13733_v37 = vld [vmem:[%s20781_s7 + $0x560] sm:$0xf] }
 0x8a1   : > { %v13738_v49 = vor.u32 %v14713_v17, %v13735_v0  ;;  %v8623_v22 = vrot.slane %v8621_v31, 1 }
 0x8a2   : > { %v8275_v50 = vadd.f32 %v8274_v15, %v8234_v58  ;;  %8853 = vmatmul.bf16.gmra.mxu0 %v8608_v4  ;;  %13646 = vmatmul.msk.bf16.gmra.mxu1 %vm2265_vm4, %v8616_v52  ;;  %v14714_v15 = vld [vmem:[%s20781_s7 + $0x564] sm:$0xf0]  ;;  %v8625_v58 = vshrl.u32 %v19898_v23, 16 }
 0x8a3   : > { %8935 = vmatmul.bf16.gmra.mxu2 %v8608_v4  ;;  %13654 = vmatmul.msk.bf16.gmra.mxu3 %vm2265_vm4, %v8616_v52  ;;  %v8631_v4 = vrot.slane %v8629_v8, 1  ;;  %v8624_v17 = vsel %vm2987_vm5, %v8619_v59, %v8623_v22 }
 0x8a4   : > { %v19929_v40 = vadd.f32 %v8275_v50, %v19467_v41  ;;  %9441 = vmatpush.bf16.msrb.mxu2 %v13738_v49  ;;  %v8627_v30 = vor.u32 %v8625_v58, %v8615_v62  ;;  %v13727_v62 = vld [vmem:[%s20781_s7 + $0x558] sm:$0xf0] }
 0x8a6   : > { %v8315_v63 = vpop.f32.mrf.mxu2  ;;  %v8356_v9 = vpop.f32.mrf.mxu3  ;;  %v8632_v0 = vsel %vm2987_vm5, %v8627_v30, %v8631_v4  ;;  %v13725_v30 = vld [vmem:[%s20781_s7 + $0x550] sm:$0xf] }
 0x8a7   : > { %v8316_v16 = vadd.f32 %v8315_v63, %v19685_v34  ;;  %v8235_v41 = vpop.f32.mrf.mxu0  ;;  %v8276_v48 = vpop.f32.mrf.mxu1  ;;  %v13734_v34 = vor.u32 %v14714_v15, %v13733_v37  ;;  %v14744_v63 = vld [vmem:[#allocation3 + $0x84] sm:$0xf0] }
 0x8a8   : > { %v14743_v41 = vld [vmem:[#allocation3 + $0x84] sm:$0xf]  ;;  %v14725_v48 = vld [vmem:[%s20781_s7 + $0x5c4] sm:$0xf] }
 0x8a9   : > { %v8357_v53 = vadd.f32 %v8356_v9, %v8316_v16  ;;  %9359 = vmatpush.bf16.msrb.mxu0 %v13734_v34  ;;  %v13535_v9 = vld [vmem:[#allocation3 + $0x88] sm:$0xf0]  ;;  %v13533_v16 = vld [vmem:[#allocation3 + $0x80] sm:$0xf] }
 0x8aa   : > { %v19974_v31 = vor.u32 %v14743_v41, %v13535_v9 }
 0x8ab   : > { %v19945_v54 = vadd.f32 %v8357_v53, %v19477_v18  ;;  %v19972_v53 = vor.u32 %v14744_v63, %v13533_v16  ;;  %v8641_v63 = vshrl.u32 %v19939_v5, 16 }
 0x8ae   : > { %v8317_v52 = vpop.f32.mrf.mxu2  ;;  %v8358_v50 = vpop.f32.mrf.mxu3 }
 0x8af   : > { %v8237_v18 = vpop.f32.mrf.mxu0  ;;  %v8278_v60 = vpop.f32.mrf.mxu1 }
 0x8b0   : > { %v8238_v33 = vadd.f32 %v8237_v18, %v19693_v1  ;;  %v14711_v1 = vld [vmem:[%s20781_s7 + $0x554] sm:$0xf]  ;;  %v8637_v18 = vshll.u32 %v19972_v53, 16 }
 0x8b1   : > { %v13730_v8 = vor.u32 %v14711_v1, %v13727_v62 }
 0x8b2   : > { %v8279_v49 = vadd.f32 %v8278_v60, %v8238_v33  ;;  %8857 = vmatmul.bf16.gmra.mxu0 %v8624_v17  ;;  %13647 = vmatmul.msk.bf16.gmra.mxu1 %vm2265_vm4, %v8632_v0  ;;  %v8645_v60 = vshll.u32 %v19974_v31, 16  ;;  %v13781_v33 = vld [vmem:[%s20781_s7 + $0x5c0] sm:$0xf] }
 0x8b3   : > { %8939 = vmatmul.bf16.gmra.mxu2 %v8624_v17  ;;  %13655 = vmatmul.msk.bf16.gmra.mxu3 %vm2265_vm4, %v8632_v0  ;;  %v8633_v17 = vshrl.u32 %v19937_v38, 16 }
 0x8b4   : > { %v19961_v51 = vadd.f32 %v8279_v49, %v19489_v42  ;;  %v13783_v42 = vld [vmem:[%s20781_s7 + $0x5c8] sm:$0xf0]  ;;  %9442 = vmatpush.bf16.msrb.mxu2 %v13730_v8  ;;  %v8639_v49 = vrot.slane %v8637_v18, 1  ;;  %v8647_v9 = vrot.slane %v8645_v60, 1 }
 0x8b5   : > { %v13786_v34 = vor.u32 %v14725_v48, %v13783_v42  ;;  %v8635_v8 = vor.u32 %v8633_v17, %v8623_v22  ;;  %v8643_v42 = vor.u32 %v8641_v63, %v8631_v4  ;;  %v14745_v4 = vld [vmem:[#allocation3 + $0x94] sm:$0xf]  ;;  %v13719_v18 = vld [vmem:[%s20781_s7 + $0x548] sm:$0xf0] }
 0x8b6   : > { %v8319_v37 = vpop.f32.mrf.mxu2  ;;  %v8360_v15 = vpop.f32.mrf.mxu3 }
 0x8b7   : > { %v8320_v27 = vadd.f32 %v8319_v37, %v19709_v3  ;;  %v8239_v58 = vpop.f32.mrf.mxu0  ;;  %v8280_v52 = vpop.f32.mrf.mxu1  ;;  %9484 = vmatpush.bf16.msrb.mxu3 %v13786_v34  ;;  %v14712_v3 = vld [vmem:[%s20781_s7 + $0x554] sm:$0xf0]  ;;  %v8648_v34 = vsel %vm2987_vm5, %v8643_v42, %v8647_v9 }
 0x8b8   : > { %v13726_v0 = vor.u32 %v14712_v3, %v13725_v30  ;;  %v14746_v58 = vld [vmem:[#allocation3 + $0x94] sm:$0xf0]  ;;  %v13543_v52 = vld [vmem:[#allocation3 + $0x98] sm:$0xf0] }
 0x8b9   : > { %v8361_v50 = vadd.f32 %v8360_v15, %v8320_v27  ;;  %v8640_v15 = vsel %vm2987_vm5, %v8635_v8, %v8639_v49  ;;  %v20015_v30 = vor.u32 %v14745_v4, %v13543_v52  ;;  %v8649_v8 = vshrl.u32 %v19972_v53, 16 }
 0x8ba   : > { %9360 = vmatpush.bf16.msrb.mxu0 %v13726_v0 }
 0x8bb   : > { %v19983_v59 = vadd.f32 %v8361_v50, %v19505_v28  ;;  %v14726_v28 = vld [vmem:[%s20781_s7 + $0x5c4] sm:$0xf0]  ;;  %v13541_v50 = vld [vmem:[#allocation3 + $0x90] sm:$0xf]  ;;  %v8651_v52 = vor.u32 %v8649_v8, %v8639_v49  ;;  %v14809_v49 = vld [vmem:[%s20782_s8 + $0x674] sm:$0xf] }
 0x8bc   : > { %v13782_v16 = vor.u32 %v14726_v28, %v13781_v33  ;;  %v20013_v60 = vor.u32 %v14746_v58, %v13541_v50 }
 0x8be   : > { %v8321_v41 = vpop.f32.mrf.mxu2  ;;  %v8362_v1 = vpop.f32.mrf.mxu3  ;;  %9402 = vmatpush.bf16.msrb.mxu1 %v13782_v16  ;;  %v8653_v16 = vshll.u32 %v20013_v60, 16 }
 0x8bf   : > { %v8241_v62 = vpop.f32.mrf.mxu0  ;;  %v8282_v48 = vpop.f32.mrf.mxu1  ;;  %v8661_v41 = vshll.u32 %v20015_v30, 16 }
 0x8c0   : > { %v8242_v37 = vadd.f32 %v8241_v62, %v19723_v12  ;;  %v14709_v12 = vld [vmem:[%s20781_s7 + $0x544] sm:$0xf]  ;;  %v13717_v62 = vld [vmem:[%s20781_s7 + $0x540] sm:$0xf]  ;;  %v8655_v42 = vrot.slane %v8653_v16, 1 }
 0x8c1   : > { %v13722_v3 = vor.u32 %v14709_v12, %v13719_v18  ;;  %v8450_v12 = vld [vmem:[#allocation3 + $0xa0] sm:$0x11] }
 0x8c2   : > { %v8283_v27 = vadd.f32 %v8282_v48, %v8242_v37  ;;  %8861 = vmatmul.bf16.gmra.mxu0 %v8640_v15  ;;  %13648 = vmatmul.msk.bf16.gmra.mxu1 %vm2265_vm4, %v8648_v34  ;;  %v14710_v48 = vld [vmem:[%s20781_s7 + $0x544] sm:$0xf0]  ;;  %v8657_v37 = vshrl.u32 %v19974_v31, 16  ;;  %v8656_v18 = vsel %vm2987_vm5, %v8651_v52, %v8655_v42 }
 0x8c3   : > { %8943 = vmatmul.bf16.gmra.mxu2 %v8640_v15  ;;  %13656 = vmatmul.msk.bf16.gmra.mxu3 %vm2265_vm4, %v8648_v34  ;;  %v8663_v15 = vrot.slane %v8661_v41, 1 }
 0x8c4   : > { %v20005_v22 = vadd.f32 %v8283_v27, %v19523_v57  ;;  %9443 = vmatpush.bf16.msrb.mxu2 %v13722_v3  ;;  %v8659_v50 = vor.u32 %v8657_v37, %v8647_v9  ;;  %v14817_v9 = vld [vmem:[%s20782_s8 + $0x6b4] sm:$0xf] }
 0x8c6   : > { %v8323_v33 = vpop.f32.mrf.mxu2  ;;  %v8364_v17 = vpop.f32.mrf.mxu3  ;;  %v8664_v3 = vsel %vm2987_vm5, %v8659_v50, %v8663_v15 }
 0x8c7   : > { %v8324_v0 = vadd.f32 %v8323_v33, %v19733_v32  ;;  %v8243_v57 = vpop.f32.mrf.mxu0  ;;  %v8284_v28 = vpop.f32.mrf.mxu1  ;;  %v13718_v32 = vor.u32 %v14710_v48, %v13717_v62 }
 0x8c9   : > { %v8365_v63 = vadd.f32 %v8364_v17, %v8324_v0  ;;  %9361 = vmatpush.bf16.msrb.mxu0 %v13718_v32  ;;  %v8525_v17 = vunpack.c.l.b16 %v8450_v12  ;;  %v8526_v0 = vunpack.c.h.b16 %v8450_v12 }
 0x8cb   : > { %v20021_v1 = vadd.f32 %v8365_v63, %v19533_v25  ;;  %v13967_v63 = vld [vmem:[%s20782_s8 + $0x6b8] sm:$0xf0]  ;;  %v20052_v37 = vpack.c.b16 %v8525_v17, %v8525_v17  ;;  %v20075_v17 = vld [vmem:[#allocation2 + $0x28] sm:$0xff] }
 0x8cc   : > { %v13970_v16 = vor.u32 %v14817_v9, %v13967_v63  ;;  %21299 = vst [vmem:[#allocation34_spill] sm:$0xff] %v20075_v17 }
 0x8cd   : > { %21296 = vst [vmem:[#allocation23_spill] sm:$0xff] %v20052_v37  ;;  %v8669_v50 = vshll.u32 %v20052_v37, 16 }
 0x8ce   : > { %v8325_v34 = vpop.f32.mrf.mxu2  ;;  %v8366_v27 = vpop.f32.mrf.mxu3  ;;  %9904 = vmatpush.bf16.msra.mxu3 %v13970_v16  ;;  %v8392_v16 = vld [vmem:[#allocation2 + $0x20] sm:$0xff] }
 0x8cf   : > { %v8245_v25 = vpop.f32.mrf.mxu0  ;;  %v8286_v58 = vpop.f32.mrf.mxu1  ;;  %v20054_v34 = vpack.c.b16 %v8526_v0, %v8526_v0  ;;  %v14810_v27 = vld [vmem:[%s20782_s8 + $0x674] sm:$0xf0] }
 0x8d0   : > { %v8246_v4 = vadd.f32 %v8245_v25, %v19741_v14  ;;  %v13935_v14 = vld [vmem:[%s20782_s8 + $0x678] sm:$0xf0]  ;;  %v13965_v25 = vld [vmem:[%s20782_s8 + $0x6b0] sm:$0xf] }
 0x8d1   : > { %v13938_v28 = vor.u32 %v14809_v49, %v13935_v14  ;;  %21297 = vst [vmem:[#allocation24_spill] sm:$0xff] %v20054_v34  ;;  %v8671_v49 = vrot.slane %v8669_v50, 1  ;;  %v13927_v50 = vld [vmem:[%s20782_s8 + $0x668] sm:$0xf0] }
 0x8d2   : > { %v8287_v33 = vadd.f32 %v8286_v58, %v8246_v4  ;;  %8865 = vmatmul.bf16.gmra.mxu0 %v8656_v18  ;;  %13649 = vmatmul.msk.bf16.gmra.mxu1 %vm2265_vm4, %v8664_v3  ;;  %v14818_v58 = vld [vmem:[%s20782_s8 + $0x6b4] sm:$0xf0]  ;;  %v8677_v4 = vshll.u32 %v20054_v34, 16 }
 0x8d3   : > { %8947 = vmatmul.bf16.gmra.mxu2 %v8656_v18  ;;  %13657 = vmatmul.msk.bf16.gmra.mxu3 %vm2265_vm4, %v8664_v3  ;;  %v13966_v12 = vor.u32 %v14818_v58, %v13965_v25  ;;  %v8665_v3 = vshrl.u32 %v20013_v60, 16 }
 0x8d4   : > { %v20046_v57 = vadd.f32 %v8287_v33, %v19554_v19  ;;  %9859 = vmatpush.bf16.msra.mxu2 %v13938_v28  ;;  %v13933_v19 = vld [vmem:[%s20782_s8 + $0x670] sm:$0xf]  ;;  %v8673_v33 = vshrl.u32 %v20015_v30, 16  ;;  %v8679_v9 = vrot.slane %v8677_v4, 1 }
 0x8d5   : > { %9822 = vmatpush.bf16.msra.mxu1 %v13966_v12  ;;  %v8667_v0 = vor.u32 %v8665_v3, %v8655_v42  ;;  %v9015_v42 = vunpack.c.h.b16 %v8392_v16  ;;  %v13661_v12 = vld [vmem:[#allocation2 + $0x30] sm:$0xf]  ;;  %v14695_v3 = vld [vmem:[#allocation2 + $0x34] sm:$0xf] }
 0x8d6   : > { %v8327_v41 = vpop.f32.mrf.mxu2  ;;  %v8368_v62 = vpop.f32.mrf.mxu3  ;;  %v8675_v14 = vor.u32 %v8673_v33, %v8663_v15  ;;  %v14696_v15 = vld [vmem:[#allocation2 + $0x34] sm:$0xf0] }
 0x8d7   : > { %v8328_v48 = vadd.f32 %v8327_v41, %v19757_v7  ;;  %v8247_v32 = vpop.f32.mrf.mxu0  ;;  %v8288_v8 = vpop.f32.mrf.mxu1  ;;  %v13934_v7 = vor.u32 %v14810_v27, %v13933_v19  ;;  %v9014_v27 = vunpack.c.l.b16 %v8392_v16 }
 0x8d8   : > { %v8672_v8 = vsel %vm2987_vm5, %v8667_v0, %v8671_v49  ;;  %v8680_v19 = vsel %vm2987_vm5, %v8675_v14, %v8679_v9  ;;  %v20097_v0 = vor.u32 %v14696_v15, %v13661_v12 }
 0x8d9   : > { %v8369_v52 = vadd.f32 %v8368_v62, %v8328_v48  ;;  %9777 = vmatpush.bf16.msra.mxu0 %v13934_v7  ;;  %v20999_v48 = vunpack.c.l.b16 %v20075_v17  ;;  %v13663_v7 = vld [vmem:[#allocation2 + $0x38] sm:$0xf0] }
 0x8da   : > { %21301 = vst [vmem:[#allocation42_spill] sm:$0xff] %v20097_v0  ;;  %v20099_v49 = vor.u32 %v14695_v3, %v13663_v7 }
 0x8db   : > { %v20071_v18 = vadd.f32 %v8369_v52, %v19573_v10  ;;  %v20998_v10 = vunpack.c.h.b16 %v20075_v17  ;;  %v9048_v58 = vpack.c.b16 %v20999_v48, %v9014_v27  ;;  %v14807_v52 = vld [vmem:[%s20782_s8 + $0x664] sm:$0xf]  ;;  %v9074_v27 = vshll.u32 %v20097_v0, 16 }
 0x8dc   : > { %v13930_v33 = vor.u32 %v14807_v52, %v13927_v50  ;;  %21302 = vst [vmem:[#allocation45_spill] sm:$0xff] %v20099_v49 }
 0x8dd   : > { %21298 = vst [vmem:[#allocation31_spill] sm:$0xff] %v20071_v18  ;;  %v9067_v7 = vshrl.u32 %v9048_v58, 16  ;;  %v9076_v52 = vrot.slane %v9074_v27, 1 }
 0x8de   : > { %v8329_v28 = vpop.f32.mrf.mxu2  ;;  %v8370_v63 = vpop.f32.mrf.mxu3  ;;  %9860 = vmatpush.bf16.msra.mxu2 %v13930_v33 }
 0x8df   : > { %v8249_v41 = vpop.f32.mrf.mxu0  ;;  %v8290_v62 = vpop.f32.mrf.mxu1 }
 0x8e0   : > { %v8250_v32 = vadd.f32 %v8249_v41, %v19775_v47  ;;  %v9049_v47 = vpack.c.b16 %v20998_v10, %v9015_v42  ;;  %v9069_v41 = vshll.u32 %v9048_v58, 16  ;;  %v9086_v42 = vshll.u32 %v20099_v49, 16  ;;  %v13671_v58 = vld [vmem:[#allocation2 + $0x48] sm:$0xf0] }
 0x8e2   : > { %v8291_v25 = vadd.f32 %v8290_v62, %v8250_v32  ;;  %8869 = vmatmul.bf16.gmra.mxu0 %v8672_v8  ;;  %13650 = vmatmul.msk.bf16.gmra.mxu1 %vm2265_vm4, %v8680_v19  ;;  %v9081_v62 = vshll.u32 %v9049_v47, 16  ;;  %v14808_v32 = vld [vmem:[%s20782_s8 + $0x664] sm:$0xf0]  ;;  %v9079_v50 = vshrl.u32 %v9049_v47, 16  ;;  %v9088_v12 = vrot.slane %v9086_v42, 1 }
 0x8e3   : > { %8951 = vmatmul.bf16.gmra.mxu2 %v8672_v8  ;;  %13658 = vmatmul.msk.bf16.gmra.mxu3 %vm2265_vm4, %v8680_v19  ;;  %v14805_v47 = vld [vmem:[%s20782_s8 + $0x654] sm:$0xf]  ;;  %v13959_v42 = vld [vmem:[%s20782_s8 + $0x6a8] sm:$0xf0] }
 0x8e4   : > { %v20095_v4 = vadd.f32 %v8291_v25, %v19585_v2  ;;  %v13925_v2 = vld [vmem:[%s20782_s8 + $0x660] sm:$0xf]  ;;  %v9071_v25 = vrot.slane %v9069_v41, 1  ;;  %v9083_v15 = vrot.slane %v9081_v62, 1  ;;  %v13919_v41 = vld [vmem:[%s20782_s8 + $0x658] sm:$0xf0] }
 0x8e5   : > { %v13926_v8 = vor.u32 %v14808_v32, %v13925_v2  ;;  %v14815_v62 = vld [vmem:[%s20782_s8 + $0x6a4] sm:$0xf]  ;;  %v13922_v27 = vor.u32 %v14805_v47, %v13919_v41 }
 0x8e6   : > { %21300 = vst [vmem:[#allocation41_spill] sm:$0xff] %v20095_v4  ;;  %v8331_v14 = vpop.f32.mrf.mxu2  ;;  %v8372_v9 = vpop.f32.mrf.mxu3 }
 0x8e7   : > { %v8332_v28 = vadd.f32 %v8331_v14, %v19793_v43  ;;  %v8251_v63 = vpop.f32.mrf.mxu0  ;;  %v8292_v16 = vpop.f32.mrf.mxu1  ;;  %9778 = vmatpush.bf16.msra.mxu0 %v13926_v8  ;;  %v13669_v8 = vld [vmem:[#allocation2 + $0x40] sm:$0xf]  ;;  %9861 = vmatpush.bf16.msra.mxu2 %v13922_v27 }
 0x8e8   : > { %v9072_v16 = vor.u32 %v9071_v25, %v9067_v7  ;;  %v13962_v7 = vor.u32 %v14815_v62, %v13959_v42  ;;  %v9090_v62 = vshrl.u32 %v20097_v0, 16 }
 0x8e9   : > { %v8373_v19 = vadd.f32 %v8372_v9, %v8332_v28  ;;  %v9084_v9 = vor.u32 %v9083_v15, %v9079_v50 }
 0x8ea   : > { %v9077_v2 = vsel %vm2987_vm5, %v9072_v16, %v9076_v52  ;;  %9905 = vmatpush.bf16.msra.mxu3 %v13962_v7  ;;  %v13917_v16 = vld [vmem:[%s20782_s8 + $0x650] sm:$0xf] }
 0x8eb   : > { %v20111_v43 = vadd.f32 %v8373_v19, %v19595_v44  ;;  %v9089_v32 = vsel %vm2987_vm5, %v9084_v9, %v9088_v12  ;;  %v14698_v44 = vld [vmem:[#allocation2 + $0x44] sm:$0xf0]  ;;  %v14697_v19 = vld [vmem:[#allocation2 + $0x44] sm:$0xf]  ;;  %v14806_v9 = vld [vmem:[%s20782_s8 + $0x654] sm:$0xf0] }
 0x8ec   : > { %v20131_v25 = vor.u32 %v14698_v44, %v13669_v8  ;;  %v20133_v15 = vor.u32 %v14697_v19, %v13671_v58  ;;  %v14816_v44 = vld [vmem:[%s20782_s8 + $0x6a4] sm:$0xf0]  ;;  %v9098_v19 = vshrl.u32 %v20099_v49, 16 }
 0x8ed   : > { %21303 = vst [vmem:[#allocation46_spill] sm:$0xff] %v20111_v43 }
 0x8ee   : > { %v8333_v3 = vpop.f32.mrf.mxu2  ;;  %v8374_v33 = vpop.f32.mrf.mxu3  ;;  %21304 = vst [vmem:[#allocation61_spill] sm:$0xff] %v20131_v25  ;;  %v9094_v58 = vshll.u32 %v20131_v25, 16  ;;  %v9102_v47 = vshll.u32 %v20133_v15, 16 }
 0x8ef   : > { %v8842_v14 = vpop.f32.mrf.mxu0  ;;  %v8883_v63 = vpop.f32.mrf.mxu1  ;;  %21305 = vst [vmem:[#allocation62_spill] sm:$0xff] %v20133_v15 }
 0x8f0   : > { %v20113_v28 = vadd.f32 %v8883_v63, %v8842_v14  ;;  %v9096_v8 = vrot.slane %v9094_v58, 1  ;;  %v9104_v27 = vrot.slane %v9102_v47, 1  ;;  %v14803_v58 = vld [vmem:[%s20782_s8 + $0x644] sm:$0xf]  ;;  %v14699_v47 = vld [vmem:[#allocation2 + $0x54] sm:$0xf] }
 0x8f2   : > { %9362 = vmatmul.bf16.vlgmr.msrb.gmra.mxu0 %v9077_v2  ;;  %13811 = vmatmul.msk.bf16.vlgmr.msrb.gmra.mxu1 %vm2265_vm4, %v9089_v32 }
 0x8f3   : > { %9444 = vmatmul.bf16.vlgmr.msrb.gmra.mxu2 %v9077_v2  ;;  %13819 = vmatmul.msk.bf16.vlgmr.msrb.gmra.mxu3 %vm2265_vm4, %v9089_v32  ;;  %v13957_v2 = vld [vmem:[%s20782_s8 + $0x6a0] sm:$0xf]  ;;  %v13918_v32 = vor.u32 %v14806_v9, %v13917_v16 }
 0x8f4   : > { %v13958_v41 = vor.u32 %v14816_v44, %v13957_v2  ;;  %v13679_v44 = vld [vmem:[#allocation2 + $0x58] sm:$0xf0] }
 0x8f5   : > { %9779 = vmatpush.bf16.msra.mxu0 %v13918_v32  ;;  %v14700_v32 = vld [vmem:[#allocation2 + $0x54] sm:$0xf0] }
 0x8f6   : > { %v8924_v50 = vpop.f32.mrf.mxu2  ;;  %v8965_v3 = vpop.f32.mrf.mxu3  ;;  %9823 = vmatpush.bf16.msra.mxu1 %v13958_v41 }
 0x8f7   : > { %v20135_v33 = vadd.f32 %v8965_v3, %v8924_v50  ;;  %v8844_v14 = vpop.f32.mrf.mxu0  ;;  %v8885_v63 = vpop.f32.mrf.mxu1 }
 0x8f8   : > { %v9092_v14 = vor.u32 %v9090_v62, %v9076_v52  ;;  %v9100_v63 = vor.u32 %v9098_v19, %v9088_v12  ;;  %v13911_v52 = vld [vmem:[%s20782_s8 + $0x648] sm:$0xf0]  ;;  %v13677_v12 = vld [vmem:[#allocation2 + $0x50] sm:$0xf]  ;;  %v20167_v19 = vor.u32 %v14699_v47, %v13679_v44 }
 0x8f9   : > { %v13914_v41 = vor.u32 %v14803_v58, %v13911_v52  ;;  %v20165_v62 = vor.u32 %v14700_v32, %v13677_v12  ;;  %v9106_v58 = vshrl.u32 %v20131_v25, 16  ;;  %v9114_v12 = vshrl.u32 %v20133_v15, 16 }
 0x8fa   : > { %v9097_v9 = vsel %vm2987_vm5, %v9092_v14, %v9096_v8  ;;  %v9105_v2 = vsel %vm2987_vm5, %v9100_v63, %v9104_v27  ;;  %21307 = vst [vmem:[#allocation65_spill] sm:$0xff] %v20167_v19  ;;  %v13909_v63 = vld [vmem:[%s20782_s8 + $0x640] sm:$0xf]  ;;  %v9118_v44 = vshll.u32 %v20167_v19, 16 }
 0x8fb   : > { %21306 = vst [vmem:[#allocation64_spill] sm:$0xff] %v20165_v62  ;;  %9862 = vmatpush.bf16.msra.mxu2 %v13914_v41  ;;  %v9110_v32 = vshll.u32 %v20165_v62, 16  ;;  %v9116_v10 = vor.u32 %v9114_v12, %v9104_v27  ;;  %v14813_v27 = vld [vmem:[%s20782_s8 + $0x694] sm:$0xf] }
 0x8fc   : > { %v9120_v47 = vrot.slane %v9118_v44, 1 }
 0x8fd   : > { %v9112_v52 = vrot.slane %v9110_v32, 1 }
 0x8fe   : > { %v8926_v42 = vpop.f32.mrf.mxu2  ;;  %v8967_v7 = vpop.f32.mrf.mxu3 }
 0x8ff   : > { %v8846_v50 = vpop.f32.mrf.mxu0  ;;  %v8887_v3 = vpop.f32.mrf.mxu1 }
 0x900   : > { %v20153_v16 = vadd.f32 %v8887_v3, %v8846_v50 }
 0x902   : > { %9366 = vmatmul.bf16.gmra.mxu0 %v9097_v9  ;;  %13812 = vmatmul.msk.bf16.gmra.mxu1 %vm2265_vm4, %v9105_v2 }
 0x903   : > { %9448 = vmatmul.bf16.gmra.mxu2 %v9097_v9  ;;  %13820 = vmatmul.msk.bf16.gmra.mxu3 %vm2265_vm4, %v9105_v2  ;;  %v14804_v9 = vld [vmem:[%s20782_s8 + $0x644] sm:$0xf0] }
 0x904   : > { %v13910_v2 = vor.u32 %v14804_v9, %v13909_v63  ;;  %v9121_v9 = vsel %vm2987_vm5, %v9116_v10, %v9120_v47  ;;  %v13951_v10 = vld [vmem:[%s20782_s8 + $0x698] sm:$0xf0] }
 0x905   : > { %v13954_v44 = vor.u32 %v14813_v27, %v13951_v10 }
 0x906   : > { %v8928_v42 = vpop.f32.mrf.mxu2  ;;  %v8969_v7 = vpop.f32.mrf.mxu3  ;;  %9780 = vmatpush.bf16.msra.mxu0 %v13910_v2  ;;  %v14801_v2 = vld [vmem:[%s20782_s8 + $0x634] sm:$0xf] }
 0x907   : > { %v20169_v50 = vadd.f32 %v8969_v7, %v8928_v42  ;;  %v8848_v3 = vpop.f32.mrf.mxu0  ;;  %v8889_v14 = vpop.f32.mrf.mxu1  ;;  %9906 = vmatpush.bf16.msra.mxu3 %v13954_v44 }
 0x908   : > { %v9108_v14 = vor.u32 %v9106_v58, %v9096_v8  ;;  %v13903_v8 = vld [vmem:[%s20782_s8 + $0x638] sm:$0xf0] }
 0x909   : > { %v13906_v32 = vor.u32 %v14801_v2, %v13903_v8  ;;  %v14814_v2 = vld [vmem:[%s20782_s8 + $0x694] sm:$0xf0]  ;;  %v21308_v8 = vld [vmem:[#allocation110_spill] sm:$0xff] }
 0x90a   : > { %v9113_v63 = vsel %vm2987_vm5, %v9108_v14, %v9112_v52  ;;  %v14802_v14 = vld [vmem:[%s20782_s8 + $0x634] sm:$0xf0]  ;;  %v9126_v27 = vshll.u32 %v21308_v8, 16 }
 0x90b   : > { %9863 = vmatpush.bf16.msra.mxu2 %v13906_v32  ;;  %v21309_v32 = vld [vmem:[#allocation111_spill] sm:$0xff] }
 0x90c   : > { %v9134_v10 = vshll.u32 %v21309_v32, 16 }
 0x90e   : > { %v8930_v41 = vpop.f32.mrf.mxu2  ;;  %v8971_v42 = vpop.f32.mrf.mxu3 }
 0x90f   : > { %v8850_v7 = vpop.f32.mrf.mxu0  ;;  %v8891_v3 = vpop.f32.mrf.mxu1 }
 0x910   : > { %v20181_v48 = vadd.f32 %v8891_v3, %v8850_v7  ;;  %v13901_v3 = vld [vmem:[%s20782_s8 + $0x630] sm:$0xf] }
 0x912   : > { %9370 = vmatmul.bf16.gmra.mxu0 %v9113_v63  ;;  %13813 = vmatmul.msk.bf16.gmra.mxu1 %vm2265_vm4, %v9121_v9 }
 0x913   : > { %9452 = vmatmul.bf16.gmra.mxu2 %v9113_v63  ;;  %13821 = vmatmul.msk.bf16.gmra.mxu3 %vm2265_vm4, %v9121_v9  ;;  %v13949_v63 = vld [vmem:[%s20782_s8 + $0x690] sm:$0xf]  ;;  %v13902_v9 = vor.u32 %v14802_v14, %v13901_v3 }
 0x914   : > { %v13950_v44 = vor.u32 %v14814_v2, %v13949_v63 }
 0x915   : > { %9781 = vmatpush.bf16.msra.mxu0 %v13902_v9 }
 0x916   : > { %v8932_v58 = vpop.f32.mrf.mxu2  ;;  %v8973_v12 = vpop.f32.mrf.mxu3  ;;  %9824 = vmatpush.bf16.msra.mxu1 %v13950_v44  ;;  %v21310_v44 = vld [vmem:[#allocation112_spill] sm:$0xff] }
 0x917   : > { %v20199_v41 = vadd.f32 %v8973_v12, %v8932_v58  ;;  %v8852_v42 = vpop.f32.mrf.mxu0  ;;  %v8893_v7 = vpop.f32.mrf.mxu1  ;;  %v9122_v58 = vshrl.u32 %v20165_v62, 16  ;;  %v9128_v12 = vrot.slane %v9126_v27, 1  ;;  %v14800_v27 = vld [vmem:[%s20782_s8 + $0x624] sm:$0xf0] }
 0x918   : > { %v9130_v42 = vshrl.u32 %v20167_v19, 16  ;;  %v9136_v7 = vrot.slane %v9134_v10, 1 }
 0x919   : > { %v9124_v15 = vor.u32 %v9122_v58, %v9112_v52  ;;  %v9142_v58 = vshll.u32 %v21310_v44, 16 }
 0x91a   : > { %v9132_v25 = vor.u32 %v9130_v42, %v9120_v47  ;;  %v21311_v42 = vld [vmem:[#allocation113_spill] sm:$0xff] }
 0x91b   : > { %v9129_v0 = vsel %vm2987_vm5, %v9124_v15, %v9128_v12 }
 0x91c   : > { %v9137_v63 = vsel %vm2987_vm5, %v9132_v25, %v9136_v7 }
 0x91e   : > { %v8934_v39 = vpop.f32.mrf.mxu2  ;;  %v8975_v11 = vpop.f32.mrf.mxu3 }
 0x91f   : > { %v8854_v3 = vpop.f32.mrf.mxu0  ;;  %v8895_v14 = vpop.f32.mrf.mxu1  ;;  %v14799_v11 = vld [vmem:[%s20782_s8 + $0x624] sm:$0xf]  ;;  %v13895_v39 = vld [vmem:[%s20782_s8 + $0x628] sm:$0xf0] }
 0x920   : > { %v20217_v49 = vadd.f32 %v8895_v14, %v8854_v3  ;;  %v13898_v52 = vor.u32 %v14799_v11, %v13895_v39  ;;  %v9150_v3 = vshll.u32 %v21311_v42, 16  ;;  %v9138_v14 = vshrl.u32 %v21308_v8, 16 }
 0x921   : > { %v9146_v11 = vshrl.u32 %v21309_v32, 16 }
 0x922   : > { %9374 = vmatmul.bf16.gmra.mxu0 %v9129_v0  ;;  %13814 = vmatmul.msk.bf16.gmra.mxu1 %vm2265_vm4, %v9137_v63  ;;  %v9152_v39 = vrot.slane %v9150_v3, 1 }
 0x923   : > { %9456 = vmatmul.bf16.gmra.mxu2 %v9129_v0  ;;  %13822 = vmatmul.msk.bf16.gmra.mxu3 %vm2265_vm4, %v9137_v63  ;;  %v13893_v0 = vld [vmem:[%s20782_s8 + $0x620] sm:$0xf]  ;;  %v9144_v63 = vrot.slane %v9142_v58, 1  ;;  %v9148_v19 = vor.u32 %v9146_v11, %v9136_v7  ;;  %v14811_v7 = vld [vmem:[%s20782_s8 + $0x684] sm:$0xf] }
 0x924   : > { %9864 = vmatpush.bf16.msra.mxu2 %v13898_v52  ;;  %v13894_v10 = vor.u32 %v14800_v27, %v13893_v0 }
 0x925   : > { %v9153_v27 = vsel %vm2987_vm5, %v9148_v19, %v9152_v39  ;;  %v13943_v19 = vld [vmem:[%s20782_s8 + $0x688] sm:$0xf0] }
 0x926   : > { %v8936_v47 = vpop.f32.mrf.mxu2  ;;  %v8977_v9 = vpop.f32.mrf.mxu3  ;;  %9782 = vmatpush.bf16.msra.mxu0 %v13894_v10  ;;  %v14797_v10 = vld [vmem:[%s20782_s8 + $0x614] sm:$0xf]  ;;  %v13946_v3 = vor.u32 %v14811_v7, %v13943_v19 }
 0x927   : > { %v20229_v15 = vadd.f32 %v8977_v9, %v8936_v47  ;;  %v8856_v25 = vpop.f32.mrf.mxu0  ;;  %v8897_v2 = vpop.f32.mrf.mxu1 }
 0x928   : > { %v9140_v2 = vor.u32 %v9138_v14, %v9128_v12  ;;  %v13887_v12 = vld [vmem:[%s20782_s8 + $0x618] sm:$0xf0]  ;;  %9907 = vmatpush.bf16.msra.mxu3 %v13946_v3 }
 0x929   : > { %v13890_v58 = vor.u32 %v14797_v10, %v13887_v12  ;;  %v14812_v10 = vld [vmem:[%s20782_s8 + $0x684] sm:$0xf0]  ;;  %v21312_v12 = vld [vmem:[#allocation116_spill] sm:$0xff] }
 0x92a   : > { %v9145_v0 = vsel %vm2987_vm5, %v9140_v2, %v9144_v63  ;;  %v14798_v2 = vld [vmem:[%s20782_s8 + $0x614] sm:$0xf0]  ;;  %v9158_v7 = vshll.u32 %v21312_v12, 16 }
 0x92b   : > { %9865 = vmatpush.bf16.msra.mxu2 %v13890_v58  ;;  %v21313_v58 = vld [vmem:[#allocation117_spill] sm:$0xff] }
 0x92c   : > { %v9166_v19 = vshll.u32 %v21313_v58, 16 }
 0x92e   : > { %v8938_v52 = vpop.f32.mrf.mxu2  ;;  %v8979_v47 = vpop.f32.mrf.mxu3 }
 0x92f   : > { %v8858_v9 = vpop.f32.mrf.mxu0  ;;  %v8899_v25 = vpop.f32.mrf.mxu1 }
 0x930   : > { %v20241_v62 = vadd.f32 %v8899_v25, %v8858_v9  ;;  %v13885_v25 = vld [vmem:[%s20782_s8 + $0x610] sm:$0xf] }
 0x932   : > { %9378 = vmatmul.bf16.gmra.mxu0 %v9145_v0  ;;  %13815 = vmatmul.msk.bf16.gmra.mxu1 %vm2265_vm4, %v9153_v27 }
 0x933   : > { %9460 = vmatmul.bf16.gmra.mxu2 %v9145_v0  ;;  %13823 = vmatmul.msk.bf16.gmra.mxu3 %vm2265_vm4, %v9153_v27  ;;  %v13941_v0 = vld [vmem:[%s20782_s8 + $0x680] sm:$0xf]  ;;  %v13886_v27 = vor.u32 %v14798_v2, %v13885_v25 }
 0x934   : > { %v13942_v3 = vor.u32 %v14812_v10, %v13941_v0 }
 0x935   : > { %9783 = vmatpush.bf16.msra.mxu0 %v13886_v27  ;;  %v14796_v27 = vld [vmem:[%s20782_s8 + $0x604] sm:$0xf0] }
 0x936   : > { %v8940_v14 = vpop.f32.mrf.mxu2  ;;  %v8981_v11 = vpop.f32.mrf.mxu3  ;;  %9825 = vmatpush.bf16.msra.mxu1 %v13942_v3  ;;  %v21315_v3 = vld [vmem:[#allocation121_spill] sm:$0xff] }
 0x937   : > { %v20259_v52 = vadd.f32 %v8981_v11, %v8940_v14  ;;  %v8860_v47 = vpop.f32.mrf.mxu0  ;;  %v8901_v9 = vpop.f32.mrf.mxu1  ;;  %v9154_v14 = vshrl.u32 %v21310_v44, 16  ;;  %v9160_v11 = vrot.slane %v9158_v7, 1  ;;  %v21314_v7 = vld [vmem:[#allocation120_spill] sm:$0xff] }
 0x938   : > { %v9162_v47 = vshrl.u32 %v21311_v42, 16  ;;  %v9168_v9 = vrot.slane %v9166_v19, 1  ;;  %v9174_v19 = vshll.u32 %v21314_v7, 16 }
 0x939   : > { %v9156_v17 = vor.u32 %v9154_v14, %v9144_v63  ;;  %v9182_v14 = vshll.u32 %v21315_v3, 16 }
 0x93a   : > { %v9164_v43 = vor.u32 %v9162_v47, %v9152_v39  ;;  %v9170_v47 = vshrl.u32 %v21312_v12, 16  ;;  %v14785_v12 = vld [vmem:[%s20781_s7 + $0x674] sm:$0xf] }
 0x93b   : > { %v9161_v34 = vsel %vm2987_vm5, %v9156_v17, %v9160_v11 }
 0x93c   : > { %v9169_v0 = vsel %vm2987_vm5, %v9164_v43, %v9168_v9 }
 0x93e   : > { %v8942_v32 = vpop.f32.mrf.mxu2  ;;  %v8983_v8 = vpop.f32.mrf.mxu3 }
 0x93f   : > { %v8862_v25 = vpop.f32.mrf.mxu0  ;;  %v8903_v2 = vpop.f32.mrf.mxu1  ;;  %v14795_v8 = vld [vmem:[%s20782_s8 + $0x604] sm:$0xf]  ;;  %v13879_v32 = vld [vmem:[%s20782_s8 + $0x608] sm:$0xf0] }
 0x940   : > { %v20277_v4 = vadd.f32 %v8903_v2, %v8862_v25  ;;  %v13882_v44 = vor.u32 %v14795_v8, %v13879_v32  ;;  %v9176_v25 = vrot.slane %v9174_v19, 1  ;;  %v9178_v2 = vshrl.u32 %v21313_v58, 16  ;;  %v14047_v58 = vld [vmem:[%s20781_s7 + $0x678] sm:$0xf0] }
 0x942   : > { %9382 = vmatmul.bf16.gmra.mxu0 %v9161_v34  ;;  %13816 = vmatmul.msk.bf16.gmra.mxu1 %vm2265_vm4, %v9169_v0 }
 0x943   : > { %9464 = vmatmul.bf16.gmra.mxu2 %v9161_v34  ;;  %13824 = vmatmul.msk.bf16.gmra.mxu3 %vm2265_vm4, %v9169_v0  ;;  %v13877_v34 = vld [vmem:[%s20782_s8 + $0x600] sm:$0xf]  ;;  %v9184_v0 = vrot.slane %v9182_v14, 1 }
 0x944   : > { %9866 = vmatpush.bf16.msra.mxu2 %v13882_v44  ;;  %v13878_v10 = vor.u32 %v14796_v27, %v13877_v34 }
 0x946   : > { %v8944_v42 = vpop.f32.mrf.mxu2  ;;  %v8985_v63 = vpop.f32.mrf.mxu3  ;;  %9784 = vmatpush.bf16.msra.mxu0 %v13878_v10  ;;  %v14079_v10 = vld [vmem:[%s20781_s7 + $0x6b8] sm:$0xf0] }
 0x947   : > { %v20289_v17 = vadd.f32 %v8985_v63, %v8944_v42  ;;  %v8864_v43 = vpop.f32.mrf.mxu0  ;;  %v8905_v39 = vpop.f32.mrf.mxu1  ;;  %v9172_v63 = vor.u32 %v9170_v47, %v9160_v11  ;;  %v14793_v11 = vld [vmem:[%s20781_s7 + $0x6b4] sm:$0xf] }
 0x948   : > { %v9180_v43 = vor.u32 %v9178_v2, %v9168_v9  ;;  %v14050_v9 = vor.u32 %v14785_v12, %v14047_v58  ;;  %v14082_v47 = vor.u32 %v14793_v11, %v14079_v10  ;;  %v14045_v12 = vld [vmem:[%s20781_s7 + $0x670] sm:$0xf]  ;;  %v14786_v58 = vld [vmem:[%s20781_s7 + $0x674] sm:$0xf0] }
 0x949   : > { %v9177_v34 = vsel %vm2987_vm5, %v9172_v63, %v9176_v25  ;;  %v21317_v63 = vld [vmem:[#allocation123_spill] sm:$0xff]  ;;  %v14077_v11 = vld [vmem:[%s20781_s7 + $0x6b0] sm:$0xf]  ;;  %v14046_v10 = vor.u32 %v14786_v58, %v14045_v12 }
 0x94a   : > { %v9185_v27 = vsel %vm2987_vm5, %v9180_v43, %v9184_v0  ;;  %10214 = vmatpush.bf16.msrb.mxu2 %v14050_v9  ;;  %10259 = vmatpush.bf16.msrb.mxu3 %v14082_v47  ;;  %v9198_v43 = vshll.u32 %v21317_v63, 16  ;;  %v9560_v12 = vld [vmem:[#allocation3 + $0x20] sm:$0xee] }
 0x94b   : > { %10132 = vmatpush.bf16.msrb.mxu0 %v14046_v10  ;;  %v9588_v10 = vunpack.c.h.b16 %v9560_v12 }
 0x94e   : > { %v8946_v8 = vpop.f32.mrf.mxu2  ;;  %v8987_v32 = vpop.f32.mrf.mxu3 }
 0x94f   : > { %v8866_v44 = vpop.f32.mrf.mxu0  ;;  %v8907_v42 = vpop.f32.mrf.mxu1 }
 0x950   : > { %v20301_v39 = vadd.f32 %v8907_v42, %v8866_v44  ;;  %v21316_v44 = vld [vmem:[#allocation122_spill] sm:$0xff] }
 0x951   : > { %v9190_v42 = vshll.u32 %v21316_v44, 16 }
 0x952   : > { %9386 = vmatmul.bf16.gmra.mxu0 %v9177_v34  ;;  %13817 = vmatmul.msk.bf16.gmra.mxu1 %vm2265_vm4, %v9185_v27 }
 0x953   : > { %9468 = vmatmul.bf16.gmra.mxu2 %v9177_v34  ;;  %13825 = vmatmul.msk.bf16.gmra.mxu3 %vm2265_vm4, %v9185_v27  ;;  %v9186_v34 = vshrl.u32 %v21314_v7, 16  ;;  %v9194_v27 = vshrl.u32 %v21315_v3, 16  ;;  %v14794_v7 = vld [vmem:[%s20781_s7 + $0x6b4] sm:$0xf0] }
 0x954   : > { %v14078_v47 = vor.u32 %v14794_v7, %v14077_v11  ;;  %v21318_v7 = vunpack.c.l.b16 %v19768_v56 }
 0x955   : > { %v9188_v9 = vor.u32 %v9186_v34, %v9176_v25  ;;  %v9196_v3 = vor.u32 %v9194_v27, %v9184_v0  ;;  %v14783_v0 = vld [vmem:[%s20781_s7 + $0x664] sm:$0xf] }
 0x956   : > { %v8948_v19 = vpop.f32.mrf.mxu2  ;;  %v8989_v14 = vpop.f32.mrf.mxu3  ;;  %10177 = vmatpush.bf16.msrb.mxu1 %v14078_v47  ;;  %v14037_v47 = vld [vmem:[%s20781_s7 + $0x660] sm:$0xf] }
 0x957   : > { %v20319_v2 = vadd.f32 %v8989_v14, %v8948_v19  ;;  %v8868_v8 = vpop.f32.mrf.mxu0  ;;  %v8909_v32 = vpop.f32.mrf.mxu1  ;;  %v9192_v19 = vrot.slane %v9190_v42, 1  ;;  %v9200_v14 = vrot.slane %v9198_v43, 1  ;;  %v14039_v42 = vld [vmem:[%s20781_s7 + $0x668] sm:$0xf0] }
 0x958   : > { %v14042_v43 = vor.u32 %v14783_v0, %v14039_v42 }
 0x959   : > { %v9193_v18 = vsel %vm2987_vm5, %v9188_v9, %v9192_v19  ;;  %v9201_v25 = vsel %vm2987_vm5, %v9196_v3, %v9200_v14  ;;  %v21319_v3 = vunpack.c.h.b16 %v19768_v56 }
 0x95a   : > { %10215 = vmatpush.bf16.msrb.mxu2 %v14042_v43 }
 0x95b   : > { %v9590_v14 = vpack.c.b16 %v21319_v3, %v9588_v10 }
 0x95e   : > { %v8950_v8 = vpop.f32.mrf.mxu2  ;;  %v8991_v32 = vpop.f32.mrf.mxu3 }
 0x95f   : > { %v8870_v44 = vpop.f32.mrf.mxu0  ;;  %v8911_v63 = vpop.f32.mrf.mxu1  ;;  %v14784_v8 = vld [vmem:[%s20781_s7 + $0x664] sm:$0xf0] }
 0x960   : > { %v20337_v37 = vadd.f32 %v8911_v63, %v8870_v44  ;;  %v14038_v32 = vor.u32 %v14784_v8, %v14037_v47  ;;  %v9592_v44 = vrot.slane %v19789_v61, 1  ;;  %v9595_v63 = vrot.slane %v19791_v6, 1  ;;  %v14781_v6 = vld [vmem:[%s20781_s7 + $0x654] sm:$0xf] }
 0x962   : > { %9390 = vmatmul.bf16.gmra.mxu0 %v9193_v18  ;;  %13818 = vmatmul.msk.bf16.gmra.mxu1 %vm2265_vm4, %v9201_v25 }
 0x963   : > { %9472 = vmatmul.bf16.gmra.mxu2 %v9193_v18  ;;  %13826 = vmatmul.msk.bf16.gmra.mxu3 %vm2265_vm4, %v9201_v25  ;;  %v9587_v18 = vunpack.c.l.b16 %v9560_v12 }
 0x964   : > { %10133 = vmatpush.bf16.msrb.mxu0 %v14038_v32 }
 0x965   : > { %v9589_v19 = vpack.c.b16 %v21318_v7, %v9587_v18  ;;  %v14791_v18 = vld [vmem:[%s20781_s7 + $0x6a4] sm:$0xf]  ;;  %v14071_v7 = vld [vmem:[%s20781_s7 + $0x6a8] sm:$0xf0] }
 0x966   : > { %v8952_v34 = vpop.f32.mrf.mxu2  ;;  %v8993_v27 = vpop.f32.mrf.mxu3  ;;  %v14074_v3 = vor.u32 %v14791_v18, %v14071_v7 }
 0x967   : > { %v20349_v58 = vadd.f32 %v8993_v27, %v8952_v34  ;;  %v8872_v11 = vpop.f32.mrf.mxu0  ;;  %v8913_v9 = vpop.f32.mrf.mxu1  ;;  %v9591_v56 = vrot.slane %v9589_v19, 1  ;;  %v9594_v34 = vrot.slane %v9590_v14, 1 }
 0x968   : > { %10260 = vmatpush.bf16.msrb.mxu3 %v14074_v3 }
 0x969   : > { %v9593_v12 = vsel %vm4034_vm3, %v9591_v56, %v9592_v44  ;;  %v9596_v11 = vsel %vm4034_vm3, %v9594_v34, %v9595_v63  ;;  %v14792_v56 = vld [vmem:[%s20781_s7 + $0x6a4] sm:$0xf0]  ;;  %v9599_v34 = vrot.slane %v19822_v21, 1  ;;  %v14779_v21 = vld [vmem:[%s20781_s7 + $0x644] sm:$0xf] }
 0x96e   : > { %v8954_v25 = vpop.f32.mrf.mxu2  ;;  %v8995_v0 = vpop.f32.mrf.mxu3 }
 0x96f   : > { %v9363_v42 = vpop.f32.mrf.mxu0  ;;  %v9404_v43 = vpop.f32.mrf.mxu1  ;;  %v14029_v0 = vld [vmem:[%s20781_s7 + $0x650] sm:$0xf] }
 0x970   : > { %v9364_v27 = vadd.f32 %v9363_v42, %v20113_v28  ;;  %v14031_v28 = vld [vmem:[%s20781_s7 + $0x658] sm:$0xf0]  ;;  %v14782_v42 = vld [vmem:[%s20781_s7 + $0x654] sm:$0xf0] }
 0x971   : > { %v14034_v10 = vor.u32 %v14781_v6, %v14031_v28 }
 0x972   : > { %v9405_v9 = vadd.f32 %v9404_v43, %v9364_v27  ;;  %9785 = vmatmul.bf16.vlgmr.msra.gmra.mxu0 %v9593_v12  ;;  %13971 = vmatmul.msk.bf16.vlgmr.msra.gmra.mxu1 %vm2265_vm4, %v9596_v11  ;;  %v14030_v43 = vor.u32 %v14782_v42, %v14029_v0  ;;  %v9601_v42 = vrot.slane %v19861_v13, 1 }
 0x973   : > { %9867 = vmatmul.bf16.vlgmr.msra.gmra.mxu2 %v9593_v12  ;;  %13979 = vmatmul.msk.bf16.vlgmr.msra.gmra.mxu3 %vm2265_vm4, %v9596_v11 }
 0x974   : > { %v20369_v61 = vadd.f32 %v9405_v9, %v19809_v29  ;;  %10216 = vmatpush.bf16.msrb.mxu2 %v14034_v10  ;;  %10134 = vmatpush.bf16.msrb.mxu0 %v14030_v43  ;;  %v9600_v10 = vsel %vm4034_vm3, %v9595_v63, %v9599_v34 }
 0x976   : > { %v9445_v19 = vpop.f32.mrf.mxu2  ;;  %v9486_v29 = vpop.f32.mrf.mxu3 }
 0x977   : > { %v9446_v14 = vadd.f32 %v9445_v19, %v20135_v33  ;;  %v9365_v47 = vpop.f32.mrf.mxu0  ;;  %v9406_v8 = vpop.f32.mrf.mxu1  ;;  %v14069_v33 = vld [vmem:[%s20781_s7 + $0x6a0] sm:$0xf] }
 0x978   : > { %v14070_v27 = vor.u32 %v14792_v56, %v14069_v33  ;;  %v14021_v8 = vld [vmem:[%s20781_s7 + $0x640] sm:$0xf] }
 0x979   : > { %v9487_v32 = vadd.f32 %v9486_v29, %v9446_v14 }
 0x97a   : > { %10178 = vmatpush.bf16.msrb.mxu1 %v14070_v27 }
 0x97b   : > { %v20385_v25 = vadd.f32 %v9487_v32, %v19831_v46  ;;  %v9597_v46 = vrot.slane %v19820_v26, 1  ;;  %v14780_v32 = vld [vmem:[%s20781_s7 + $0x644] sm:$0xf0] }
 0x97c   : > { %v14022_v0 = vor.u32 %v14780_v32, %v14021_v8 }
 0x97d   : > { %v9598_v18 = vsel %vm4034_vm3, %v9592_v44, %v9597_v46 }
 0x97e   : > { %v9447_v12 = vpop.f32.mrf.mxu2  ;;  %v9488_v11 = vpop.f32.mrf.mxu3  ;;  %10135 = vmatpush.bf16.msrb.mxu0 %v14022_v0 }
 0x97f   : > { %v9367_v9 = vpop.f32.mrf.mxu0  ;;  %v9408_v6 = vpop.f32.mrf.mxu1  ;;  %v9602_v12 = vsel %vm4034_vm3, %v9597_v46, %v9601_v42  ;;  %v14789_v46 = vld [vmem:[%s20781_s7 + $0x694] sm:$0xf] }
 0x980   : > { %v9368_v28 = vadd.f32 %v9367_v9, %v20153_v16  ;;  %v14023_v16 = vld [vmem:[%s20781_s7 + $0x648] sm:$0xf0] }
 0x981   : > { %v14026_v44 = vor.u32 %v14779_v21, %v14023_v16 }
 0x982   : > { %v9409_v7 = vadd.f32 %v9408_v6, %v9368_v28  ;;  %9789 = vmatmul.bf16.gmra.mxu0 %v9598_v18  ;;  %13972 = vmatmul.msk.bf16.gmra.mxu1 %vm2265_vm4, %v9600_v10  ;;  %v14063_v6 = vld [vmem:[%s20781_s7 + $0x698] sm:$0xf0] }
 0x983   : > { %9871 = vmatmul.bf16.gmra.mxu2 %v9598_v18  ;;  %13980 = vmatmul.msk.bf16.gmra.mxu3 %vm2265_vm4, %v9600_v10  ;;  %v14066_v18 = vor.u32 %v14789_v46, %v14063_v6  ;;  %v14005_v46 = vld [vmem:[%s20781_s7 + $0x620] sm:$0xf] }
 0x984   : > { %v20407_v26 = vadd.f32 %v9409_v7, %v19853_v45  ;;  %10217 = vmatpush.bf16.msrb.mxu2 %v14026_v44 }
 0x985   : > { %10261 = vmatpush.bf16.msrb.mxu3 %v14066_v18 }
 0x986   : > { %v9449_v63 = vpop.f32.mrf.mxu2  ;;  %v9490_v19 = vpop.f32.mrf.mxu3 }
 0x987   : > { %v9450_v29 = vadd.f32 %v9449_v63, %v20169_v50  ;;  %v9369_v3 = vpop.f32.mrf.mxu0  ;;  %v9410_v14 = vpop.f32.mrf.mxu1  ;;  %v9603_v50 = vrot.slane %v19863_v20, 1  ;;  %v14777_v20 = vld [vmem:[%s20781_s7 + $0x634] sm:$0xf]  ;;  %v14013_v63 = vld [vmem:[%s20781_s7 + $0x630] sm:$0xf] }
 0x988   : > { %v14790_v3 = vld [vmem:[%s20781_s7 + $0x694] sm:$0xf0]  ;;  %v9607_v14 = vrot.slane %v19898_v23, 1  ;;  %v14775_v23 = vld [vmem:[%s20781_s7 + $0x624] sm:$0xf] }
 0x989   : > { %v9491_v47 = vadd.f32 %v9490_v19, %v9450_v29  ;;  %v9604_v11 = vsel %vm4034_vm3, %v9599_v34, %v9603_v50  ;;  %v14778_v19 = vld [vmem:[%s20781_s7 + $0x634] sm:$0xf0] }
 0x98a   : > { %v14014_v29 = vor.u32 %v14778_v19, %v14013_v63  ;;  %v14787_v19 = vld [vmem:[%s20781_s7 + $0x684] sm:$0xf] }
 0x98b   : > { %v20417_v45 = vadd.f32 %v9491_v47, %v19869_v36 }
 0x98c   : > { %10136 = vmatpush.bf16.msrb.mxu0 %v14014_v29  ;;  %v14055_v29 = vld [vmem:[%s20781_s7 + $0x688] sm:$0xf0] }
 0x98e   : > { %v9451_v33 = vpop.f32.mrf.mxu2  ;;  %v9492_v43 = vpop.f32.mrf.mxu3 }
 0x98f   : > { %v9371_v56 = vpop.f32.mrf.mxu0  ;;  %v9412_v27 = vpop.f32.mrf.mxu1 }
 0x990   : > { %v9372_v36 = vadd.f32 %v9371_v56, %v20181_v48  ;;  %v14015_v48 = vld [vmem:[%s20781_s7 + $0x638] sm:$0xf0] }
 0x991   : > { %v14018_v34 = vor.u32 %v14777_v20, %v14015_v48 }
 0x992   : > { %v9413_v9 = vadd.f32 %v9412_v27, %v9372_v36  ;;  %9793 = vmatmul.bf16.gmra.mxu0 %v9602_v12  ;;  %13973 = vmatmul.msk.bf16.gmra.mxu1 %vm2265_vm4, %v9604_v11  ;;  %v9608_v27 = vsel %vm4034_vm3, %v9603_v50, %v9607_v14 }
 0x993   : > { %9875 = vmatmul.bf16.gmra.mxu2 %v9602_v12  ;;  %13981 = vmatmul.msk.bf16.gmra.mxu3 %vm2265_vm4, %v9604_v11 }
 0x994   : > { %v20433_v13 = vadd.f32 %v9413_v9, %v19885_v55  ;;  %10218 = vmatpush.bf16.msrb.mxu2 %v14018_v34  ;;  %v14776_v34 = vld [vmem:[%s20781_s7 + $0x624] sm:$0xf0] }
 0x995   : > { %v14006_v6 = vor.u32 %v14776_v34, %v14005_v46 }
 0x996   : > { %v9453_v28 = vpop.f32.mrf.mxu2  ;;  %v9494_v55 = vpop.f32.mrf.mxu3 }
 0x997   : > { %v9454_v10 = vadd.f32 %v9453_v28, %v20199_v41  ;;  %v9373_v7 = vpop.f32.mrf.mxu0  ;;  %v9414_v21 = vpop.f32.mrf.mxu1  ;;  %v14061_v41 = vld [vmem:[%s20781_s7 + $0x690] sm:$0xf]  ;;  %v9609_v28 = vrot.slane %v19937_v38, 1  ;;  %10137 = vmatpush.bf16.msrb.mxu0 %v14006_v6 }
 0x998   : > { %v14062_v47 = vor.u32 %v14790_v3, %v14061_v41 }
 0x999   : > { %v9495_v16 = vadd.f32 %v9494_v55, %v9454_v10 }
 0x99a   : > { %10179 = vmatpush.bf16.msrb.mxu1 %v14062_v47 }
 0x99b   : > { %v20449_v44 = vadd.f32 %v9495_v16, %v19907_v24  ;;  %v9605_v24 = vrot.slane %v19896_v35, 1 }
 0x99d   : > { %v9606_v56 = vsel %vm4034_vm3, %v9601_v42, %v9605_v24  ;;  %v9610_v21 = vsel %vm4034_vm3, %v9605_v24, %v9609_v28  ;;  %v14058_v24 = vor.u32 %v14787_v19, %v14055_v29 }
 0x99e   : > { %v9455_v8 = vpop.f32.mrf.mxu2  ;;  %v9496_v32 = vpop.f32.mrf.mxu3 }
 0x99f   : > { %v9375_v0 = vpop.f32.mrf.mxu0  ;;  %v9416_v33 = vpop.f32.mrf.mxu1  ;;  %10262 = vmatpush.bf16.msrb.mxu3 %v14058_v24 }
 0x9a0   : > { %v9376_v43 = vadd.f32 %v9375_v0, %v20217_v49  ;;  %v14007_v49 = vld [vmem:[%s20781_s7 + $0x628] sm:$0xf0] }
 0x9a1   : > { %v14010_v42 = vor.u32 %v14775_v23, %v14007_v49 }
 0x9a2   : > { %v9417_v36 = vadd.f32 %v9416_v33, %v9376_v43  ;;  %9797 = vmatmul.bf16.gmra.mxu0 %v9606_v56  ;;  %13974 = vmatmul.msk.bf16.gmra.mxu1 %vm2265_vm4, %v9608_v27  ;;  %v13997_v33 = vld [vmem:[%s20781_s7 + $0x610] sm:$0xf]  ;;  %v14774_v43 = vld [vmem:[%s20781_s7 + $0x614] sm:$0xf0] }
 0x9a3   : > { %9879 = vmatmul.bf16.gmra.mxu2 %v9606_v56  ;;  %13982 = vmatmul.msk.bf16.gmra.mxu3 %vm2265_vm4, %v9608_v27  ;;  %v13998_v56 = vor.u32 %v14774_v43, %v13997_v33  ;;  %v14788_v27 = vld [vmem:[%s20781_s7 + $0x684] sm:$0xf0]  ;;  %v21322_v43 = vld [vmem:[#allocation24_spill] sm:$0xff] }
 0x9a4   : > { %v20471_v35 = vadd.f32 %v9417_v36, %v19929_v40  ;;  %10219 = vmatpush.bf16.msrb.mxu2 %v14010_v42  ;;  %v9615_v36 = vrot.slane %v19974_v31, 1  ;;  %v14771_v31 = vld [vmem:[%s20781_s7 + $0x604] sm:$0xf] }
 0x9a5   : > { %10138 = vmatpush.bf16.msrb.mxu0 %v13998_v56 }
 0x9a6   : > { %v9457_v50 = vpop.f32.mrf.mxu2  ;;  %v9498_v12 = vpop.f32.mrf.mxu3 }
 0x9a7   : > { %v9458_v11 = vadd.f32 %v9457_v50, %v20229_v15  ;;  %v9377_v9 = vpop.f32.mrf.mxu0  ;;  %v9418_v20 = vpop.f32.mrf.mxu1  ;;  %v9611_v15 = vrot.slane %v19939_v5, 1  ;;  %v14773_v5 = vld [vmem:[%s20781_s7 + $0x614] sm:$0xf] }
 0x9a9   : > { %v9499_v48 = vadd.f32 %v9498_v12, %v9458_v11  ;;  %v9612_v16 = vsel %vm4034_vm3, %v9607_v14, %v9611_v15  ;;  %v9616_v20 = vsel %vm4034_vm3, %v9611_v15, %v9615_v36 }
 0x9ab   : > { %v20481_v40 = vadd.f32 %v9499_v48, %v19945_v54 }
 0x9ae   : > { %v9459_v55 = vpop.f32.mrf.mxu2  ;;  %v9500_v18 = vpop.f32.mrf.mxu3 }
 0x9af   : > { %v9379_v10 = vpop.f32.mrf.mxu0  ;;  %v9420_v7 = vpop.f32.mrf.mxu1 }
 0x9b0   : > { %v9380_v54 = vadd.f32 %v9379_v10, %v20241_v62  ;;  %v13999_v62 = vld [vmem:[%s20781_s7 + $0x618] sm:$0xf0]  ;;  %v13989_v10 = vld [vmem:[%s20781_s7 + $0x600] sm:$0xf] }
 0x9b1   : > { %v14002_v41 = vor.u32 %v14773_v5, %v13999_v62 }
 0x9b2   : > { %v9421_v63 = vadd.f32 %v9420_v7, %v9380_v54  ;;  %9801 = vmatmul.bf16.gmra.mxu0 %v9610_v21  ;;  %13975 = vmatmul.msk.bf16.gmra.mxu1 %vm2265_vm4, %v9612_v16  ;;  %v14772_v7 = vld [vmem:[%s20781_s7 + $0x604] sm:$0xf0] }
 0x9b3   : > { %9883 = vmatmul.bf16.gmra.mxu2 %v9610_v21  ;;  %13983 = vmatmul.msk.bf16.gmra.mxu3 %vm2265_vm4, %v9612_v16  ;;  %v13990_v54 = vor.u32 %v14772_v7, %v13989_v10  ;;  %v9617_v21 = vrot.slane %v20013_v60, 1  ;;  %v21328_v7 = vld [vmem:[#allocation42_spill] sm:$0xff] }
 0x9b4   : > { %v20497_v38 = vadd.f32 %v9421_v63, %v19961_v51  ;;  %10220 = vmatpush.bf16.msrb.mxu2 %v14002_v41 }
 0x9b5   : > { %10139 = vmatpush.bf16.msrb.mxu0 %v13990_v54  ;;  %v9947_v54 = vrot.slane %v21328_v7, 1 }
 0x9b6   : > { %v9461_v3 = vpop.f32.mrf.mxu2  ;;  %v9502_v51 = vpop.f32.mrf.mxu3 }
 0x9b7   : > { %v9462_v14 = vadd.f32 %v9461_v3, %v20259_v52  ;;  %v9381_v47 = vpop.f32.mrf.mxu0  ;;  %v9422_v8 = vpop.f32.mrf.mxu1  ;;  %v14053_v52 = vld [vmem:[%s20781_s7 + $0x680] sm:$0xf] }
 0x9b8   : > { %v14054_v23 = vor.u32 %v14788_v27, %v14053_v52  ;;  %v21320_v47 = vld [vmem:[#allocation31_spill] sm:$0xff]  ;;  %v9623_v52 = vrot.slane %v21322_v43, 1 }
 0x9b9   : > { %v9503_v32 = vadd.f32 %v9502_v51, %v9462_v14 }
 0x9ba   : > { %10180 = vmatpush.bf16.msrb.mxu1 %v14054_v23 }
 0x9bb   : > { %v20513_v0 = vadd.f32 %v9503_v32, %v19983_v59  ;;  %v9613_v59 = vrot.slane %v19972_v53, 1  ;;  %v21321_v32 = vld [vmem:[#allocation23_spill] sm:$0xff] }
 0x9bc   : > { %v9621_v33 = vrot.slane %v21321_v32, 1  ;;  %v21331_v32 = vld [vmem:[#allocation62_spill] sm:$0xff] }
 0x9bd   : > { %v9614_v9 = vsel %vm4034_vm3, %v9609_v28, %v9613_v59  ;;  %v9618_v19 = vsel %vm4034_vm3, %v9613_v59, %v9617_v21 }
 0x9be   : > { %v9463_v49 = vpop.f32.mrf.mxu2  ;;  %v9504_v42 = vpop.f32.mrf.mxu3  ;;  %v9622_v23 = vsel %vm4034_vm3, %v9617_v21, %v9621_v33  ;;  %v21329_v21 = vld [vmem:[#allocation45_spill] sm:$0xff]  ;;  %v9954_v33 = vrot.slane %v21331_v32, 1 }
 0x9bf   : > { %v9383_v50 = vpop.f32.mrf.mxu0  ;;  %v9424_v12 = vpop.f32.mrf.mxu1  ;;  %v21323_v42 = vld [vmem:[#allocation41_spill] sm:$0xff] }
 0x9c0   : > { %v9384_v11 = vadd.f32 %v9383_v50, %v20277_v4  ;;  %v13991_v4 = vld [vmem:[%s20781_s7 + $0x608] sm:$0xf0] }
 0x9c1   : > { %v13994_v46 = vor.u32 %v14771_v31, %v13991_v4 }
 0x9c2   : > { %v9425_v48 = vadd.f32 %v9424_v12, %v9384_v11  ;;  %9805 = vmatmul.bf16.gmra.mxu0 %v9614_v9  ;;  %13976 = vmatmul.msk.bf16.gmra.mxu1 %vm2265_vm4, %v9616_v20 }
 0x9c3   : > { %9887 = vmatmul.bf16.gmra.mxu2 %v9614_v9  ;;  %13984 = vmatmul.msk.bf16.gmra.mxu3 %vm2265_vm4, %v9616_v20  ;;  %v9534_v9 = vld [vmem:[#allocation2 + $0x20] sm:$0xee] }
 0x9c4   : > { %v20535_v53 = vadd.f32 %v9425_v48, %v20005_v22  ;;  %10221 = vmatpush.bf16.msrb.mxu2 %v13994_v46  ;;  %v9942_v4 = vunpack.c.l.b16 %v9534_v9  ;;  %v9943_v46 = vunpack.c.h.b16 %v9534_v9 }
 0x9c6   : > { %v9465_v34 = vpop.f32.mrf.mxu2  ;;  %v9506_v6 = vpop.f32.mrf.mxu3 }
 0x9c7   : > { %v9466_v28 = vadd.f32 %v9465_v34, %v20289_v17  ;;  %v9385_v15 = vpop.f32.mrf.mxu0  ;;  %v9426_v55 = vpop.f32.mrf.mxu1  ;;  %v9619_v17 = vrot.slane %v20015_v30, 1  ;;  %v21324_v34 = vld [vmem:[#allocation46_spill] sm:$0xff] }
 0x9c9   : > { %v9507_v18 = vadd.f32 %v9506_v6, %v9466_v28  ;;  %v9620_v41 = vsel %vm4034_vm3, %v9615_v36, %v9619_v17  ;;  %v21325_v28 = vld [vmem:[#allocation34_spill] sm:$0xff] }
 0x9ca   : > { %v21326_v15 = vunpack.c.l.b16 %v21325_v28 }
 0x9cb   : > { %v20545_v22 = vadd.f32 %v9507_v18, %v20021_v1  ;;  %v21327_v18 = vunpack.c.h.b16 %v21325_v28 }
 0x9cc   : > { %v9944_v55 = vpack.c.b16 %v21326_v15, %v9942_v4 }
 0x9cd   : > { %v9945_v10 = vpack.c.b16 %v21327_v18, %v9943_v46 }
 0x9ce   : > { %v9467_v16 = vpop.f32.mrf.mxu2  ;;  %v9508_v63 = vpop.f32.mrf.mxu3 }
 0x9cf   : > { %v9387_v5 = vpop.f32.mrf.mxu0  ;;  %v9428_v62 = vpop.f32.mrf.mxu1 }
 0x9d0   : > { %v9388_v1 = vadd.f32 %v9387_v5, %v20301_v39 }
 0x9d2   : > { %v9429_v29 = vadd.f32 %v9428_v62, %v9388_v1  ;;  %9809 = vmatmul.bf16.gmra.mxu0 %v9618_v19  ;;  %13977 = vmatmul.msk.bf16.gmra.mxu1 %vm2265_vm4, %v9620_v41  ;;  %v9946_v62 = vrot.slane %v9944_v55, 1  ;;  %v9949_v1 = vrot.slane %v9945_v10, 1 }
 0x9d3   : > { %9891 = vmatmul.bf16.gmra.mxu2 %v9618_v19  ;;  %13985 = vmatmul.msk.bf16.gmra.mxu3 %vm2265_vm4, %v9620_v41 }
 0x9d4   : > { %v20561_v60 = vadd.f32 %v9429_v29, %v20046_v57  ;;  %v9948_v41 = vsel %vm4034_vm3, %v9946_v62, %v9947_v54 }
 0x9d6   : > { %v9469_v30 = vpop.f32.mrf.mxu2  ;;  %v9510_v3 = vpop.f32.mrf.mxu3 }
 0x9d7   : > { %v9470_v51 = vadd.f32 %v9469_v30, %v20319_v2  ;;  %v9389_v24 = vpop.f32.mrf.mxu0  ;;  %v9430_v39 = vpop.f32.mrf.mxu1  ;;  %v9624_v2 = vsel %vm4034_vm3, %v9619_v17, %v9623_v52  ;;  %v9950_v17 = vrot.slane %v21329_v21, 1 }
 0x9d9   : > { %v9511_v14 = vadd.f32 %v9510_v3, %v9470_v51  ;;  %v9951_v29 = vsel %vm4034_vm3, %v9949_v1, %v9950_v17 }
 0x9db   : > { %v20565_v8 = vadd.f32 %v9511_v14, %v21320_v47  ;;  %v21330_v14 = vld [vmem:[#allocation61_spill] sm:$0xff] }
 0x9dc   : > { %v9952_v47 = vrot.slane %v21330_v14, 1 }
 0x9de   : > { %v9471_v56 = vpop.f32.mrf.mxu2  ;;  %v9512_v27 = vpop.f32.mrf.mxu3 }
 0x9df   : > { %v9391_v59 = vpop.f32.mrf.mxu0  ;;  %v9432_v36 = vpop.f32.mrf.mxu1 }
 0x9e0   : > { %v9392_v57 = vadd.f32 %v9391_v59, %v20337_v37 }
 0x9e2   : > { %v9433_v49 = vadd.f32 %v9432_v36, %v9392_v57  ;;  %9813 = vmatmul.bf16.gmra.mxu0 %v9622_v23  ;;  %13978 = vmatmul.msk.bf16.gmra.mxu1 %vm2265_vm4, %v9624_v2  ;;  %v9953_v36 = vsel %vm4034_vm3, %v9947_v54, %v9952_v47  ;;  %v9955_v57 = vsel %vm4034_vm3, %v9950_v17, %v9954_v33 }
 0x9e3   : > { %9895 = vmatmul.bf16.gmra.mxu2 %v9622_v23  ;;  %13986 = vmatmul.msk.bf16.gmra.mxu3 %vm2265_vm4, %v9624_v2 }
 0x9e4   : > { %v20575_v50 = vadd.f32 %v9433_v49, %v21323_v42 }
 0x9e6   : > { %v9473_v12 = vpop.f32.mrf.mxu2  ;;  %v9514_v11 = vpop.f32.mrf.mxu3 }
 0x9e7   : > { %v9474_v20 = vadd.f32 %v9473_v12, %v20349_v58  ;;  %v9393_v37 = vpop.f32.mrf.mxu0  ;;  %v9434_v48 = vpop.f32.mrf.mxu1 }
 0x9e9   : > { %v9515_v31 = vadd.f32 %v9514_v11, %v9474_v20  ;;  %v21332_v11 = vld [vmem:[#allocation64_spill] sm:$0xff]  ;;  %v21333_v20 = vld [vmem:[#allocation65_spill] sm:$0xff] }
 0x9ea   : > { %v9956_v9 = vrot.slane %v21332_v11, 1  ;;  %v9958_v37 = vrot.slane %v21333_v20, 1 }
 0x9eb   : > { %v20579_v6 = vadd.f32 %v9515_v31, %v21324_v34 }
 0x9ec   : > { %v9957_v28 = vsel %vm4034_vm3, %v9952_v47, %v9956_v9  ;;  %v9959_v15 = vsel %vm4034_vm3, %v9954_v33, %v9958_v37 }
 0x9ee   : > { %v9475_v16 = vpop.f32.mrf.mxu2  ;;  %v9516_v58 = vpop.f32.mrf.mxu3 }
 0x9ef   : > { %v9786_v63 = vpop.f32.mrf.mxu0  ;;  %v9827_v5 = vpop.f32.mrf.mxu1 }
 0x9f0   : > { %v20587_v19 = vadd.f32 %v9827_v5, %v9786_v63  ;;  %v21334_v5 = vld [vmem:[#allocation110_spill] sm:$0xff] }
 0x9f1   : > { %v21335_v62 = vrot.slane %v21334_v5, 1  ;;  %v21343_v5 = vld [vmem:[#allocation125_spill] sm:$0xff] }
 0x9f2   : > { %10140 = vmatmul.bf16.vlgmr.msrb.gmra.mxu0 %v9948_v41  ;;  %14083 = vmatmul.msk.bf16.vlgmr.msrb.gmra.mxu1 %vm2265_vm4, %v9951_v29 }
 0x9f3   : > { %10222 = vmatmul.bf16.vlgmr.msrb.gmra.mxu2 %v9948_v41  ;;  %14091 = vmatmul.msk.bf16.vlgmr.msrb.gmra.mxu3 %vm2265_vm4, %v9951_v29  ;;  %v9961_v1 = vsel %vm4034_vm3, %v9956_v9, %v21335_v62  ;;  %v21336_v41 = vld [vmem:[#allocation111_spill] sm:$0xff] }
 0x9f4   : > { %v21337_v29 = vrot.slane %v21336_v41, 1 }
 0x9f6   : > { %v9868_v30 = vpop.f32.mrf.mxu2  ;;  %v9909_v3 = vpop.f32.mrf.mxu3 }
 0x9f7   : > { %v20593_v51 = vadd.f32 %v9909_v3, %v9868_v30  ;;  %v9788_v24 = vpop.f32.mrf.mxu0  ;;  %v9829_v39 = vpop.f32.mrf.mxu1  ;;  %v9963_v30 = vsel %vm4034_vm3, %v9958_v37, %v21337_v29 }
 0x9fe   : > { %v9870_v43 = vpop.f32.mrf.mxu2  ;;  %v9911_v52 = vpop.f32.mrf.mxu3 }
 0x9ff   : > { %v9790_v56 = vpop.f32.mrf.mxu0  ;;  %v9831_v27 = vpop.f32.mrf.mxu1 }
 0xa00   : > { %v20597_v59 = vadd.f32 %v9831_v27, %v9790_v56  ;;  %v21338_v27 = vld [vmem:[#allocation114_spill] sm:$0xff] }
 0xa02   : > { %10144 = vmatmul.bf16.gmra.mxu0 %v9953_v36  ;;  %14084 = vmatmul.msk.bf16.gmra.mxu1 %vm2265_vm4, %v9955_v57 }
 0xa03   : > { %10226 = vmatmul.bf16.gmra.mxu2 %v9953_v36  ;;  %14092 = vmatmul.msk.bf16.gmra.mxu3 %vm2265_vm4, %v9955_v57  ;;  %v21339_v36 = vld [vmem:[#allocation115_spill] sm:$0xff] }
 0xa06   : > { %v9872_v23 = vpop.f32.mrf.mxu2  ;;  %v9913_v2 = vpop.f32.mrf.mxu3 }
 0xa07   : > { %v20603_v49 = vadd.f32 %v9913_v2, %v9872_v23  ;;  %v9792_v42 = vpop.f32.mrf.mxu0  ;;  %v9833_v12 = vpop.f32.mrf.mxu1 }
 0xa0e   : > { %v9874_v48 = vpop.f32.mrf.mxu2  ;;  %v9915_v31 = vpop.f32.mrf.mxu3 }
 0xa0f   : > { %v9794_v4 = vpop.f32.mrf.mxu0  ;;  %v9835_v46 = vpop.f32.mrf.mxu1  ;;  %v21340_v31 = vld [vmem:[#allocation118_spill] sm:$0xff] }
 0xa10   : > { %v20607_v34 = vadd.f32 %v9835_v46, %v9794_v4  ;;  %v21341_v4 = vld [vmem:[#allocation119_spill] sm:$0xff] }
 0xa12   : > { %10148 = vmatmul.bf16.gmra.mxu0 %v9957_v28  ;;  %14085 = vmatmul.msk.bf16.gmra.mxu1 %vm2265_vm4, %v9959_v15 }
 0xa13   : > { %10230 = vmatmul.bf16.gmra.mxu2 %v9957_v28  ;;  %14093 = vmatmul.msk.bf16.gmra.mxu3 %vm2265_vm4, %v9959_v15 }
 0xa16   : > { %v9876_v55 = vpop.f32.mrf.mxu2  ;;  %v9917_v18 = vpop.f32.mrf.mxu3 }
 0xa17   : > { %v20613_v10 = vadd.f32 %v9917_v18, %v9876_v55  ;;  %v9796_v7 = vpop.f32.mrf.mxu0  ;;  %v9837_v54 = vpop.f32.mrf.mxu1 }
 0xa1e   : > { %v9878_v21 = vpop.f32.mrf.mxu2  ;;  %v9919_v17 = vpop.f32.mrf.mxu3 }
 0xa1f   : > { %v9798_v16 = vpop.f32.mrf.mxu0  ;;  %v9839_v58 = vpop.f32.mrf.mxu1 }
 0xa20   : > { %v20615_v63 = vadd.f32 %v9839_v58, %v9798_v16  ;;  %v21342_v58 = vld [vmem:[#allocation124_spill] sm:$0xff] }
 0xa22   : > { %10152 = vmatmul.bf16.gmra.mxu0 %v9961_v1  ;;  %14086 = vmatmul.msk.bf16.gmra.mxu1 %vm2265_vm4, %v9963_v30 }
 0xa23   : > { %10234 = vmatmul.bf16.gmra.mxu2 %v9961_v1  ;;  %14094 = vmatmul.msk.bf16.gmra.mxu3 %vm2265_vm4, %v9963_v30 }
 0xa26   : > { %v9880_v3 = vpop.f32.mrf.mxu2  ;;  %v9921_v24 = vpop.f32.mrf.mxu3 }
 0xa27   : > { %v20625_v39 = vadd.f32 %v9921_v24, %v9880_v3  ;;  %v9800_v14 = vpop.f32.mrf.mxu0  ;;  %v9841_v47 = vpop.f32.mrf.mxu1 }
 0xa2e   : > { %v9882_v32 = vpop.f32.mrf.mxu2  ;;  %v9923_v33 = vpop.f32.mrf.mxu3 }
 0xa2f   : > { %v9802_v43 = vpop.f32.mrf.mxu0  ;;  %v9843_v52 = vpop.f32.mrf.mxu1  ;;  %v21344_v33 = vld [vmem:[#allocation126_spill] sm:$0xff] }
 0xa30   : > { %v20627_v56 = vadd.f32 %v9843_v52, %v9802_v43  ;;  %v21345_v43 = vld [vmem:[#allocation127_spill] sm:$0xff] }
 0xa32   : > { %10156 = vmatmul.bf16.gmra.mxu0 %v21338_v27  ;;  %14087 = vmatmul.msk.bf16.gmra.mxu1 %vm2265_vm4, %v21339_v36 }
 0xa33   : > { %10238 = vmatmul.bf16.gmra.mxu2 %v21338_v27  ;;  %14095 = vmatmul.msk.bf16.gmra.mxu3 %vm2265_vm4, %v21339_v36 }
 0xa36   : > { %v9884_v57 = vpop.f32.mrf.mxu2  ;;  %v9925_v23 = vpop.f32.mrf.mxu3 }
 0xa37   : > { %v20635_v2 = vadd.f32 %v9925_v23, %v9884_v57  ;;  %v9804_v42 = vpop.f32.mrf.mxu0  ;;  %v9845_v12 = vpop.f32.mrf.mxu1 }
 0xa3e   : > { %v9886_v11 = vpop.f32.mrf.mxu2  ;;  %v9927_v9 = vpop.f32.mrf.mxu3 }
 0xa3f   : > { %v9806_v20 = vpop.f32.mrf.mxu0  ;;  %v9847_v37 = vpop.f32.mrf.mxu1 }
 0xa40   : > { %v20637_v48 = vadd.f32 %v9847_v37, %v9806_v20  ;;  %v10312_v20 = vld [vmem:[%s20783_s9] sm:$0x3] }
 0xa42   : > { %10160 = vmatmul.bf16.gmra.mxu0 %v21340_v31  ;;  %14088 = vmatmul.msk.bf16.gmra.mxu1 %vm2265_vm4, %v21341_v4 }
 0xa43   : > { %10242 = vmatmul.bf16.gmra.mxu2 %v21340_v31  ;;  %14096 = vmatmul.msk.bf16.gmra.mxu3 %vm2265_vm4, %v21341_v4  ;;  %v20672_v4 = vperm.slane %v10312_v20, 0 }
 0xa46   : > { %v9888_v46 = vpop.f32.mrf.mxu2  ;;  %v9929_v28 = vpop.f32.mrf.mxu3 }
 0xa47   : > { %v20645_v15 = vadd.f32 %v9929_v28, %v9888_v46  ;;  %v9808_v55 = vpop.f32.mrf.mxu0  ;;  %v9849_v18 = vpop.f32.mrf.mxu1 }
 0xa4e   : > { %v9890_v7 = vpop.f32.mrf.mxu2  ;;  %v9931_v54 = vpop.f32.mrf.mxu3 }
 0xa4f   : > { %v9810_v21 = vpop.f32.mrf.mxu0  ;;  %v9851_v17 = vpop.f32.mrf.mxu1  ;;  %v10350_v7 = vld [vmem:[%s20677_s12] sm:$0xff] }
 0xa50   : > { %v20647_v16 = vadd.f32 %v9851_v17, %v9810_v21 }
 0xa52   : > { %10164 = vmatmul.bf16.gmra.mxu0 %v21342_v58  ;;  %14089 = vmatmul.msk.bf16.gmra.mxu1 %vm2265_vm4, %v21343_v5 }
 0xa53   : > { %10246 = vmatmul.bf16.gmra.mxu2 %v21342_v58  ;;  %14097 = vmatmul.msk.bf16.gmra.mxu3 %vm2265_vm4, %v21343_v5 }
 0xa56   : > { %v9892_v62 = vpop.f32.mrf.mxu2  ;;  %v9933_v1 = vpop.f32.mrf.mxu3 }
 0xa57   : > { %v20655_v41 = vadd.f32 %v9933_v1, %v9892_v62  ;;  %v9812_v29 = vpop.f32.mrf.mxu0  ;;  %v9853_v30 = vpop.f32.mrf.mxu1  ;;  %v10351_v1 = vld [vmem:[%s20677_s12 + $0x8] sm:$0xff] }
 0xa5e   : > { %v9894_v3 = vpop.f32.mrf.mxu2  ;;  %v9935_v24 = vpop.f32.mrf.mxu3 }
 0xa5f   : > { %v9814_v14 = vpop.f32.mrf.mxu0  ;;  %v9855_v47 = vpop.f32.mrf.mxu1 }
 0xa60   : > { %v20657_v32 = vadd.f32 %v9855_v47, %v9814_v14 }
 0xa62   : > { %10168 = vmatmul.bf16.gmra.mxu0 %v21344_v33  ;;  %14090 = vmatmul.msk.bf16.gmra.mxu1 %vm2265_vm4, %v21345_v43 }
 0xa63   : > { %10250 = vmatmul.bf16.gmra.mxu2 %v21344_v33  ;;  %14098 = vmatmul.msk.bf16.gmra.mxu3 %vm2265_vm4, %v21345_v43 }
 0xa66   : > { %v9896_v52 = vpop.f32.mrf.mxu2  ;;  %v9937_v27 = vpop.f32.mrf.mxu3 }
 0xa67   : > { %v20665_v36 = vadd.f32 %v9937_v27, %v9896_v52  ;;  %v9816_v57 = vpop.f32.mrf.mxu0  ;;  %v9857_v23 = vpop.f32.mrf.mxu1 }
 0xa68   : > { %v10352_v23 = vld [vmem:[%s20677_s12 + $0x10] sm:$0xff] }
 0xa6e   : > { %v9898_v42 = vpop.f32.mrf.mxu2  ;;  %v9939_v12 = vpop.f32.mrf.mxu3 }
 0xa6f   : > { %v10141_v11 = vpop.f32.mrf.mxu0  ;;  %v10182_v9 = vpop.f32.mrf.mxu1 }
 0xa70   : > { %v10142_v37 = vadd.f32 %v10141_v11, %v20587_v19 }
 0xa72   : > { %v10183_v31 = vadd.f32 %v10182_v9, %v10142_v37 }
 0xa74   : > { %v10296_v46 = vadd.f32 %v10183_v31, %v20369_v61  ;;  %v20688_v61 = vperm.slane %v10312_v20, 1 }
 0xa76   : > { %v10318_v28 = vadd.f32 %v20672_v4, %v10296_v46  ;;  %v10223_v55 = vpop.f32.mrf.mxu2  ;;  %v10264_v18 = vpop.f32.mrf.mxu3 }
 0xa77   : > { %v10224_v19 = vadd.f32 %v10223_v55, %v20593_v51  ;;  %v10143_v54 = vpop.f32.mrf.mxu0  ;;  %v10184_v21 = vpop.f32.mrf.mxu1 }
 0xa78   : > { %v10334_v17 = vmax.f32 %v10318_v28, 0.0 }
 0xa79   : > { %v10265_v58 = vadd.f32 %v10264_v18, %v10224_v19 }
 0xa7a   : > { %v10366_v5 = vadd.f32 %v10350_v7, %v10334_v17 }
 0xa7b   : > { %v10297_v62 = vadd.f32 %v10265_v58, %v20385_v25 }
 0xa7c   : > { %10382 = vst [vmem:[%s20686_s25] sm:$0xff] %v10366_v5  ;;  %v10354_v5 = vld [vmem:[%s20677_s12 + $0x20] sm:$0xff] }
 0xa7d   : > { %v10319_v51 = vadd.f32 %v20688_v61, %v10297_v62 }
 0xa7e   : > { %v10225_v29 = vpop.f32.mrf.mxu2  ;;  %v10266_v30 = vpop.f32.mrf.mxu3 }
 0xa7f   : > { %v10335_v3 = vmax.f32 %v10319_v51, 0.0  ;;  %v10145_v24 = vpop.f32.mrf.mxu0  ;;  %v10186_v14 = vpop.f32.mrf.mxu1 }
 0xa80   : > { %v10146_v47 = vadd.f32 %v10145_v24, %v20597_v59 }
 0xa81   : > { %v10367_v33 = vadd.f32 %v10351_v1, %v10335_v3 }
 0xa82   : > { %v10187_v43 = vadd.f32 %v10186_v14, %v10146_v47 }
 0xa83   : > { %10383 = vst [vmem:[%s20686_s25 + $0x8] sm:$0xff] %v10367_v33 }
 0xa84   : > { %v10298_v52 = vadd.f32 %v10187_v43, %v20407_v26  ;;  %v10353_v26 = vld [vmem:[%s20677_s12 + $0x18] sm:$0xff] }
 0xa86   : > { %v10320_v25 = vadd.f32 %v20672_v4, %v10298_v52  ;;  %v10227_v27 = vpop.f32.mrf.mxu2  ;;  %v10268_v57 = vpop.f32.mrf.mxu3 }
 0xa87   : > { %v10228_v42 = vadd.f32 %v10227_v27, %v20603_v49  ;;  %v10147_v12 = vpop.f32.mrf.mxu0  ;;  %v10188_v11 = vpop.f32.mrf.mxu1 }
 0xa88   : > { %v10336_v9 = vmax.f32 %v10320_v25, 0.0  ;;  %v10356_v12 = vld [vmem:[%s20677_s12 + $0x30] sm:$0xff] }
 0xa89   : > { %v10269_v20 = vadd.f32 %v10268_v57, %v10228_v42 }
 0xa8a   : > { %v10368_v59 = vadd.f32 %v10352_v23, %v10336_v9 }
 0xa8b   : > { %v10299_v37 = vadd.f32 %v10269_v20, %v20417_v45 }
 0xa8c   : > { %10384 = vst [vmem:[%s20686_s25 + $0x10] sm:$0xff] %v10368_v59 }
 0xa8d   : > { %v10321_v31 = vadd.f32 %v20688_v61, %v10299_v37 }
 0xa8e   : > { %v10229_v46 = vpop.f32.mrf.mxu2  ;;  %v10270_v28 = vpop.f32.mrf.mxu3 }
 0xa8f   : > { %v10337_v55 = vmax.f32 %v10321_v31, 0.0  ;;  %v10149_v18 = vpop.f32.mrf.mxu0  ;;  %v10190_v7 = vpop.f32.mrf.mxu1 }
 0xa90   : > { %v10150_v49 = vadd.f32 %v10149_v18, %v20607_v34 }
 0xa91   : > { %v10369_v19 = vadd.f32 %v10353_v26, %v10337_v55 }
 0xa92   : > { %v10191_v54 = vadd.f32 %v10190_v7, %v10150_v49 }
 0xa93   : > { %10385 = vst [vmem:[%s20686_s25 + $0x18] sm:$0xff] %v10369_v19 }
 0xa94   : > { %v10300_v21 = vadd.f32 %v10191_v54, %v20433_v13  ;;  %v10355_v13 = vld [vmem:[%s20677_s12 + $0x28] sm:$0xff] }
 0xa96   : > { %v10322_v45 = vadd.f32 %v20672_v4, %v10300_v21  ;;  %v10231_v17 = vpop.f32.mrf.mxu2  ;;  %v10272_v58 = vpop.f32.mrf.mxu3 }
 0xa97   : > { %v10232_v62 = vadd.f32 %v10231_v17, %v20613_v10  ;;  %v10151_v51 = vpop.f32.mrf.mxu0  ;;  %v10192_v1 = vpop.f32.mrf.mxu1  ;;  %v10358_v17 = vld [vmem:[%s20677_s12 + $0x40] sm:$0xff] }
 0xa98   : > { %v10338_v29 = vmax.f32 %v10322_v45, 0.0 }
 0xa99   : > { %v10273_v30 = vadd.f32 %v10272_v58, %v10232_v62 }
 0xa9a   : > { %v10370_v34 = vadd.f32 %v10354_v5, %v10338_v29 }
 0xa9b   : > { %v10301_v3 = vadd.f32 %v10273_v30, %v20449_v44 }
 0xa9c   : > { %10386 = vst [vmem:[%s20686_s25 + $0x20] sm:$0xff] %v10370_v34 }
 0xa9d   : > { %v10323_v24 = vadd.f32 %v20688_v61, %v10301_v3 }
 0xa9e   : > { %v10233_v14 = vpop.f32.mrf.mxu2  ;;  %v10274_v47 = vpop.f32.mrf.mxu3 }
 0xa9f   : > { %v10339_v33 = vmax.f32 %v10323_v24, 0.0  ;;  %v10153_v43 = vpop.f32.mrf.mxu0  ;;  %v10194_v52 = vpop.f32.mrf.mxu1 }
 0xaa0   : > { %v10154_v10 = vadd.f32 %v10153_v43, %v20615_v63 }
 0xaa1   : > { %v10371_v25 = vadd.f32 %v10355_v13, %v10339_v33 }
 0xaa2   : > { %v10195_v27 = vadd.f32 %v10194_v52, %v10154_v10 }
 0xaa3   : > { %10387 = vst [vmem:[%s20686_s25 + $0x28] sm:$0xff] %v10371_v25  ;;  %v10360_v25 = vld [vmem:[%s20677_s12 + $0x50] sm:$0xff] }
 0xaa4   : > { %v10302_v57 = vadd.f32 %v10195_v27, %v20471_v35  ;;  %v10357_v35 = vld [vmem:[%s20677_s12 + $0x38] sm:$0xff] }
 0xaa6   : > { %v10324_v44 = vadd.f32 %v20672_v4, %v10302_v57  ;;  %v10235_v23 = vpop.f32.mrf.mxu2  ;;  %v10276_v42 = vpop.f32.mrf.mxu3 }
 0xaa7   : > { %v10236_v11 = vadd.f32 %v10235_v23, %v20625_v39  ;;  %v10155_v9 = vpop.f32.mrf.mxu0  ;;  %v10196_v20 = vpop.f32.mrf.mxu1 }
 0xaa8   : > { %v10340_v59 = vmax.f32 %v10324_v44, 0.0 }
 0xaa9   : > { %v10277_v37 = vadd.f32 %v10276_v42, %v10236_v11 }
 0xaaa   : > { %v10372_v63 = vadd.f32 %v10356_v12, %v10340_v59 }
 0xaab   : > { %v10303_v31 = vadd.f32 %v10277_v37, %v20481_v40 }
 0xaac   : > { %10388 = vst [vmem:[%s20686_s25 + $0x30] sm:$0xff] %v10372_v63 }
 0xaad   : > { %v10325_v26 = vadd.f32 %v20688_v61, %v10303_v31 }
 0xaae   : > { %v10237_v46 = vpop.f32.mrf.mxu2  ;;  %v10278_v28 = vpop.f32.mrf.mxu3 }
 0xaaf   : > { %v10341_v55 = vmax.f32 %v10325_v26, 0.0  ;;  %v10157_v18 = vpop.f32.mrf.mxu0  ;;  %v10198_v7 = vpop.f32.mrf.mxu1 }
 0xab0   : > { %v10158_v39 = vadd.f32 %v10157_v18, %v20627_v56 }
 0xab1   : > { %v10373_v49 = vadd.f32 %v10357_v35, %v10341_v55  ;;  %v10362_v55 = vld [vmem:[%s20677_s12 + $0x60] sm:$0xff] }
 0xab2   : > { %v10199_v19 = vadd.f32 %v10198_v7, %v10158_v39 }
 0xab3   : > { %10389 = vst [vmem:[%s20686_s25 + $0x38] sm:$0xff] %v10373_v49 }
 0xab4   : > { %v10304_v54 = vadd.f32 %v10199_v19, %v20497_v38  ;;  %v10359_v38 = vld [vmem:[%s20677_s12 + $0x48] sm:$0xff] }
 0xab6   : > { %v10326_v40 = vadd.f32 %v20672_v4, %v10304_v54  ;;  %v10239_v21 = vpop.f32.mrf.mxu2  ;;  %v10280_v45 = vpop.f32.mrf.mxu3 }
 0xab7   : > { %v10240_v58 = vadd.f32 %v10239_v21, %v20635_v2  ;;  %v10159_v5 = vpop.f32.mrf.mxu0  ;;  %v10200_v62 = vpop.f32.mrf.mxu1 }
 0xab8   : > { %v10342_v51 = vmax.f32 %v10326_v40, 0.0 }
 0xab9   : > { %v10281_v1 = vadd.f32 %v10280_v45, %v10240_v58 }
 0xaba   : > { %v10374_v56 = vadd.f32 %v10358_v17, %v10342_v51 }
 0xabb   : > { %v10305_v29 = vadd.f32 %v10281_v1, %v20513_v0 }
 0xabc   : > { %10390 = vst [vmem:[%s20686_s25 + $0x40] sm:$0xff] %v10374_v56 }
 0xabd   : > { %v10327_v30 = vadd.f32 %v20688_v61, %v10305_v29 }
 0xabe   : > { %v10241_v34 = vpop.f32.mrf.mxu2  ;;  %v10282_v3 = vpop.f32.mrf.mxu3 }
 0xabf   : > { %v10343_v24 = vmax.f32 %v10327_v30, 0.0  ;;  %v10161_v13 = vpop.f32.mrf.mxu0  ;;  %v10202_v14 = vpop.f32.mrf.mxu1  ;;  %v10364_v30 = vld [vmem:[%s20677_s12 + $0x70] sm:$0xff] }
 0xac0   : > { %v10162_v2 = vadd.f32 %v10161_v13, %v20637_v48 }
 0xac1   : > { %v10375_v47 = vadd.f32 %v10359_v38, %v10343_v24 }
 0xac2   : > { %v10203_v33 = vadd.f32 %v10202_v14, %v10162_v2 }
 0xac3   : > { %10391 = vst [vmem:[%s20686_s25 + $0x48] sm:$0xff] %v10375_v47  ;;  %v10365_v47 = vld [vmem:[%s20677_s12 + $0x78] sm:$0xff] }
 0xac4   : > { %v10306_v43 = vadd.f32 %v10203_v33, %v20535_v53  ;;  %v10361_v53 = vld [vmem:[%s20677_s12 + $0x58] sm:$0xff] }
 0xac6   : > { %v10328_v0 = vadd.f32 %v20672_v4, %v10306_v43  ;;  %v10243_v52 = vpop.f32.mrf.mxu2  ;;  %v10284_v10 = vpop.f32.mrf.mxu3 }
 0xac7   : > { %v10244_v27 = vadd.f32 %v10243_v52, %v20645_v15  ;;  %v10163_v57 = vpop.f32.mrf.mxu0  ;;  %v10204_v44 = vpop.f32.mrf.mxu1 }
 0xac8   : > { %v10344_v23 = vmax.f32 %v10328_v0, 0.0 }
 0xac9   : > { %v10285_v42 = vadd.f32 %v10284_v10, %v10244_v27 }
 0xaca   : > { %v10376_v48 = vadd.f32 %v10360_v25, %v10344_v23 }
 0xacb   : > { %v10307_v12 = vadd.f32 %v10285_v42, %v20545_v22 }
 0xacc   : > { %10392 = vst [vmem:[%s20686_s25 + $0x50] sm:$0xff] %v10376_v48 }
 0xacd   : > { %v10329_v11 = vadd.f32 %v20688_v61, %v10307_v12 }
 0xace   : > { %v10245_v9 = vpop.f32.mrf.mxu2  ;;  %v10286_v20 = vpop.f32.mrf.mxu3 }
 0xacf   : > { %v10345_v59 = vmax.f32 %v10329_v11, 0.0  ;;  %v10165_v37 = vpop.f32.mrf.mxu0  ;;  %v10206_v63 = vpop.f32.mrf.mxu1 }
 0xad0   : > { %v10166_v15 = vadd.f32 %v10165_v37, %v20647_v16 }
 0xad1   : > { %v10377_v31 = vadd.f32 %v10361_v53, %v10345_v59 }
 0xad2   : > { %v10207_v26 = vadd.f32 %v10206_v63, %v10166_v15 }
 0xad3   : > { %10393 = vst [vmem:[%s20686_s25 + $0x58] sm:$0xff] %v10377_v31 }
 0xad4   : > { %v10308_v35 = vadd.f32 %v10207_v26, %v20561_v60  ;;  %v10363_v60 = vld [vmem:[%s20677_s12 + $0x68] sm:$0xff] }
 0xad6   : > { %v10330_v22 = vadd.f32 %v20672_v4, %v10308_v35  ;;  %v10247_v46 = vpop.f32.mrf.mxu2  ;;  %v10288_v28 = vpop.f32.mrf.mxu3 }
 0xad7   : > { %v10248_v18 = vadd.f32 %v10247_v46, %v20655_v41  ;;  %v10167_v7 = vpop.f32.mrf.mxu0  ;;  %v10208_v39 = vpop.f32.mrf.mxu1 }
 0xad8   : > { %v10346_v49 = vmax.f32 %v10330_v22, 0.0 }
 0xad9   : > { %v10289_v19 = vadd.f32 %v10288_v28, %v10248_v18 }
 0xada   : > { %v10378_v16 = vadd.f32 %v10362_v55, %v10346_v49 }
 0xadb   : > { %v10309_v54 = vadd.f32 %v10289_v19, %v20565_v8 }
 0xadc   : > { %10394 = vst [vmem:[%s20686_s25 + $0x60] sm:$0xff] %v10378_v16 }
 0xadd   : > { %v10331_v40 = vadd.f32 %v20688_v61, %v10309_v54 }
 0xade   : > { %v10249_v21 = vpop.f32.mrf.mxu2  ;;  %v10290_v45 = vpop.f32.mrf.mxu3 }
 0xadf   : > { %v10347_v17 = vmax.f32 %v10331_v40, 0.0  ;;  %v10169_v58 = vpop.f32.mrf.mxu0  ;;  %v10210_v5 = vpop.f32.mrf.mxu1 }
 0xae0   : > { %v10170_v41 = vadd.f32 %v10169_v58, %v20657_v32 }
 0xae1   : > { %v10379_v62 = vadd.f32 %v10363_v60, %v10347_v17 }
 0xae2   : > { %v10211_v51 = vadd.f32 %v10210_v5, %v10170_v41 }
 0xae3   : > { %10395 = vst [vmem:[%s20686_s25 + $0x68] sm:$0xff] %v10379_v62 }
 0xae4   : > { %v10310_v1 = vadd.f32 %v10211_v51, %v20575_v50 }
 0xae6   : > { %v10332_v8 = vadd.f32 %v20672_v4, %v10310_v1  ;;  %v10251_v56 = vpop.f32.mrf.mxu2  ;;  %v10292_v29 = vpop.f32.mrf.mxu3 }
 0xae7   : > { %v10252_v38 = vadd.f32 %v10251_v56, %v20665_v36  ;;  %v10171_v34 = vpop.f32.mrf.mxu0  ;;  %v10212_v3 = vpop.f32.mrf.mxu1 }
 0xae8   : > { %v10348_v24 = vmax.f32 %v10332_v8, 0.0 }
 0xae9   : > { %v10293_v13 = vadd.f32 %v10292_v29, %v10252_v38 }
 0xaea   : > { %v10380_v32 = vadd.f32 %v10364_v30, %v10348_v24 }
 0xaeb   : > { %v10311_v14 = vadd.f32 %v10293_v13, %v20579_v6 }
 0xaec   : > { %10396 = vst [vmem:[%s20686_s25 + $0x70] sm:$0xff] %v10380_v32 }
 0xaed   : > { %v10333_v2 = vadd.f32 %v20688_v61, %v10311_v14 }
 0xaee   : > { %v10253_v50 = vpop.f32.mrf.mxu2  ;;  %v10294_v33 = vpop.f32.mrf.mxu3 }
 0xaef   : > { %v10349_v4 = vmax.f32 %v10333_v2, 0.0 }
 0xaf1   : > { %v10381_v43 = vadd.f32 %v10365_v47, %v10349_v4 }
 0xaf3   : > { %10397 = vst [vmem:[%s20686_s25 + $0x78] sm:$0xff] %v10381_v43 }
 0xaf4 PF: > { %s21_s19 = sadd.s32 1, %s14870_s19   ;;  %s21346_s17 = smov %s14866_s18 }
 0xaf5   : > { %p18_p5 = scmp.ge.s32.totalorder %s21_s19, 4   ;;  %s21347_s18 = smov %s21349_s20 }
 0xaf7   :  { %20 = sbr.rel (!%p18_p5) target bundleno = 2 (0x2), region = 119 }

</bundles_post_ra>
